<compile_context>
chip_gen: v6e
topology: v6e:2x2x1
jax: 0.10.0
libtpu: 0.0.40
codegen_flags: <defaults>
</compile_context>

<pallas_src>
import math
from functools import partial

import jax
import jax.numpy as jnp
from jax import lax
from jax.experimental import pallas as pl
from jax.experimental.pallas import tpu as pltpu

_LN_EPS = 1e-5
_GELU_C = 0.7978845608028654  # sqrt(2/pi)


# --------------------------------------------------------------------------------------
# helpers
# --------------------------------------------------------------------------------------
def _seq_tile(beff, t, max_rows=512):
    """Number of whole sequences per grid step (divides beff, ~max_rows rows per step)."""
    limit = max(1, max_rows // max(t, 1))
    if beff <= limit:
        return beff
    for cand in range(limit, 0, -1):
        if beff % cand == 0:
            return cand
    return 1


def _const_spec(shape):
    nd = len(shape)
    return pl.BlockSpec(shape, lambda i: (0,) * nd)


def _layernorm(x, g, b):
    mu = jnp.mean(x, axis=-1, keepdims=True)
    xc = x - mu
    var = jnp.mean(xc * xc, axis=-1, keepdims=True)
    return xc * lax.rsqrt(var + _LN_EPS) * g + b


# --------------------------------------------------------------------------------------
# fused TransformerBlock kernel
# --------------------------------------------------------------------------------------
def _block_kernel(x_ref, ln1g_ref, ln1b_ref, wq_ref, bq_ref, wk_ref, bk_ref,
                  wv_ref, bv_ref, wo_ref, bo_ref, ln2g_ref, ln2b_ref,
                  w1_ref, b1_ref, w2_ref, b2_ref, o_ref, *, num_heads, static_kv_first):
    bt, t, h = x_ref.shape
    hd = h // num_heads
    tq = t - 1 if static_kv_first else t
    scale = 1.0 / math.sqrt(hd)

    x = x_ref[...]                                      # (bt, t, H)
    xr = x.reshape(bt * t, h)                           # lane-dense rows

    # ---- pre-attention LayerNorm + Q/K/V projections (full-width MXU matmuls) ----
    hn = _layernorm(xr, ln1g_ref[...], ln1b_ref[...])
    q = jnp.dot(hn, wq_ref[...], preferred_element_type=jnp.float32) + bq_ref[...]
    k = jnp.dot(hn, wk_ref[...], preferred_element_type=jnp.float32) + bk_ref[...]
    v = jnp.dot(hn, wv_ref[...], preferred_element_type=jnp.float32) + bv_ref[...]

    # bottom-right aligned causal mask: query i may attend key j iff j <= i + (t - tq)
    qi = lax.broadcasted_iota(jnp.int32, (tq, t), 0)
    kj = lax.broadcasted_iota(jnp.int32, (tq, t), 1)
    allowed = kj <= (qi + (t - tq))                     # (tq, t)

    # ---- per-head causal SDPA, entirely in VMEM (static unrolled loop over heads) ----
    head_outs = []
    for hh in range(num_heads):
        sl = slice(hh * hd, (hh + 1) * hd)
        qh = q[:, sl].reshape(bt, t, hd)
        kh = k[:, sl].reshape(bt, t, hd)
        vh = v[:, sl].reshape(bt, t, hd)
        if static_kv_first:                             # history element is KV-only
            qh = qh[:, 1:, :]
        s = jnp.einsum("bqd,bkd->bqk", qh, kh,
                       preferred_element_type=jnp.float32) * scale   # (bt, tq, t)
        s = jnp.where(allowed[None, :, :], s, jnp.float32(-1e30))
        m = jnp.max(s, axis=-1, keepdims=True)
        e = jnp.exp(s - m)
        p = e / jnp.sum(e, axis=-1, keepdims=True)
        # TODO(synk): attention_dropout is identity here (eval mode).
        oh = jnp.einsum("bqk,bkd->bqd", p, vh, preferred_element_type=jnp.float32)
        head_outs.append(oh.reshape(bt * tq, hd))
    attn = jnp.concatenate(head_outs, axis=-1)          # (bt*tq, H) head merge in VMEM

    # ---- output projection + residual ----
    res = (x[:, 1:, :] if static_kv_first else x).reshape(bt * tq, h)
    h1 = jnp.dot(attn, wo_ref[...], preferred_element_type=jnp.float32) + bo_ref[...] + res

    # ---- pre-MLP LayerNorm + MLP (GELU, tanh approx) + residual ----
    h2 = _layernorm(h1, ln2g_ref[...], ln2b_ref[...])
    u = jnp.dot(h2, w1_ref[...], preferred_element_type=jnp.float32) + b1_ref[...]
    a = 0.5 * u * (1.0 + jnp.tanh(_GELU_C * (u + 0.044715 * u * u * u)))
    # TODO(synk): resid_dropout is identity here (eval mode).
    out = h1 + jnp.dot(a, w2_ref[...], preferred_element_type=jnp.float32) + b2_ref[...]

    o_ref[...] = out.reshape(bt, tq, h).astype(o_ref.dtype)


# --------------------------------------------------------------------------------------
# pallas_call wrapper: one fused kernel per TransformerBlock invocation
# --------------------------------------------------------------------------------------
def _transformer_block(x, p, num_heads, static_kv_first):
    """TransformerBlock.forward (eval): x (Beff, T, H) -> (Beff, Tq, H)."""
    beff, t, h = x.shape
    inner = p["w1"].shape[1]
    tq = t - 1 if static_kv_first else t
    bt = _seq_tile(beff, t)

    kernel = partial(_block_kernel, num_heads=num_heads, static_kv_first=static_kv_first)
    return pl.pallas_call(
        kernel,
        out_shape=jax.ShapeDtypeStruct((beff, tq, h), jnp.float32),
        grid_spec=pltpu.PrefetchScalarGridSpec(
            num_scalar_prefetch=0,
            grid=(beff // bt,),
            in_specs=[pl.BlockSpec((bt, t, h), lambda i: (i, 0, 0)),
                      _const_spec((1, h)), _const_spec((1, h)),       # ln1 gamma/beta
                      _const_spec((h, h)), _const_spec((1, h)),       # wq, bq
                      _const_spec((h, h)), _const_spec((1, h)),       # wk, bk
                      _const_spec((h, h)), _const_spec((1, h)),       # wv, bv
                      _const_spec((h, h)), _const_spec((1, h)),       # wo, bo
                      _const_spec((1, h)), _const_spec((1, h)),       # ln2 gamma/beta
                      _const_spec((h, inner)), _const_spec((1, inner)),   # w1, b1
                      _const_spec((inner, h)), _const_spec((1, h))],      # w2, b2
            out_specs=pl.BlockSpec((bt, tq, h), lambda i: (i, 0, 0))),
        compiler_params=pltpu.CompilerParams(dimension_semantics=("parallel",)),
    )(x, p["ln1_g"], p["ln1_b"], p["wq"], p["bq"], p["wk"], p["bk"],
      p["wv"], p["bv"], p["wo"], p["bo"], p["ln2_g"], p["ln2_b"],
      p["w1"], p["b1"], p["w2"], p["b2"])


# --------------------------------------------------------------------------------------
# module forward (Pallas path)
# --------------------------------------------------------------------------------------
def structured_transformer_block_forward(hidden_states, seq_params, dep_params, num_heads):
    """hidden_states: (B, S, dep_graph_len, H) -> (B, S, dep_graph_len, H).

    TODO(synk): StructuredAttention's source is not provided; its composition is modelled
    as: causal seq-attention over per-event summary embeddings (last dep-graph element),
    then per-event dep-graph attention with the shifted, contextualized history prepended
    as a static (KV-only) first element — matching the constructor usage in the spec.
    """
    b, s, d, h = hidden_states.shape
    event_embeds = hidden_states[:, :, -1, :]                                   # (B, S, H)
    seq_out = _transformer_block(event_embeds, seq_params, num_heads, False)    # (B, S, H)
    history = jnp.concatenate([jnp.zeros_like(seq_out[:, :1]), seq_out[:, :-1]], axis=1)
    dep_in = jnp.concatenate([history[:, :, None, :], hidden_states[:, :, :-1, :]], axis=2)
    dep_out = _transformer_block(dep_in.reshape(b * s, d, h), dep_params, num_heads, True)
    dep_out = dep_out.reshape(b, s, d - 1, h)
    return jnp.concatenate([dep_out, seq_out[:, :, None, :]], axis=2)


# --------------------------------------------------------------------------------------
# plain-JAX reference (same math, no Pallas)
# --------------------------------------------------------------------------------------
def _ref_block(x, p, num_heads, static_kv_first):
    beff, t, h = x.shape
    hd = h // num_heads
    residual = x[:, 1:, :] if static_kv_first else x
    mu = x.mean(-1, keepdims=True)
    xc = x - mu
    var = (xc * xc).mean(-1, keepdims=True)
    hn = xc * lax.rsqrt(var + _LN_EPS) * p["ln1_g"][0] + p["ln1_b"][0]
    q = hn @ p["wq"] + p["bq"][0]
    k = hn @ p["wk"] + p["bk"][0]
    v = hn @ p["wv"] + p["bv"][0]
    split = lambda a: a.reshape(beff, t, num_heads, hd).transpose(0, 2, 1, 3)
    qh, kh, vh = split(q), split(k), split(v)
    if static_kv_first:
        qh = qh[:, :, 1:, :]
    tq, tk = qh.shape[2], t
    s = jnp.einsum("bhqd,bhkd->bhqk", qh, kh) / math.sqrt(hd)
    mask = jnp.arange(tk)[None, :] <= (jnp.arange(tq)[:, None] + (tk - tq))
    s = jnp.where(mask[None, None], s, -1e30)
    pa = jax.nn.softmax(s, axis=-1)
    o = jnp.einsum("bhqk,bhkd->bhqd", pa, vh).transpose(0, 2, 1, 3).reshape(beff, tq, h)
    h1 = o @ p["wo"] + p["bo"][0] + residual
    mu2 = h1.mean(-1, keepdims=True)
    xc2 = h1 - mu2
    var2 = (xc2 * xc2).mean(-1, keepdims=True)
    h2 = xc2 * lax.rsqrt(var2 + _LN_EPS) * p["ln2_g"][0] + p["ln2_b"][0]
    u = h2 @ p["w1"] + p["b1"][0]
    a = 0.5 * u * (1.0 + jnp.tanh(_GELU_C * (u + 0.044715 * u * u * u)))
    return h1 + a @ p["w2"] + p["b2"][0]


def _ref_structured(hidden_states, seq_params, dep_params, num_heads):
    b, s, d, h = hidden_states.shape
    event_embeds = hidden_states[:, :, -1, :]
    seq_out = _ref_block(event_embeds, seq_params, num_heads, False)
    history = jnp.concatenate([jnp.zeros_like(seq_out[:, :1]), seq_out[:, :-1]], axis=1)
    dep_in = jnp.concatenate([history[:, :, None, :], hidden_states[:, :, :-1, :]], axis=2)
    dep_out = _ref_block(dep_in.reshape(b * s, d, h), dep_params, num_heads, True)
    return jnp.concatenate([dep_out.reshape(b, s, d - 1, h), seq_out[:, :, None, :]], axis=2)


# --------------------------------------------------------------------------------------
# params
# --------------------------------------------------------------------------------------
def _init_block_params(key, h, inner):
    ks = jax.random.split(key, 16)
    w = lambda k, fi, fo: jax.random.normal(k, (fi, fo), jnp.float32) / math.sqrt(fi)
    bias = lambda k, n: 0.02 * jax.random.normal(k, (1, n), jnp.float32)
    return {
        "ln1_g": 1.0 + 0.1 * jax.random.normal(ks[0], (1, h), jnp.float32),
        "ln1_b": 0.1 * jax.random.normal(ks[1], (1, h), jnp.float32),
        "wq": w(ks[2], h, h), "bq": bias(ks[3], h),
        "wk": w(ks[4], h, h), "bk": bias(ks[5], h),
        "wv": w(ks[6], h, h), "bv": bias(ks[7], h),
        "wo": w(ks[8], h, h), "bo": bias(ks[9], h),
        "ln2_g": 1.0 + 0.1 * jax.random.normal(ks[10], (1, h), jnp.float32),
        "ln2_b": 0.1 * jax.random.normal(ks[11], (1, h), jnp.float32),
        "w1": w(ks[12], h, inner), "b1": bias(ks[13], inner),
        "w2": w(ks[14], inner, h), "b2": bias(ks[15], h),
    }


if __name__ == "__main__":
    # Small deterministic shapes implied by the module: batch=2, seq=8, dep_graph_len=4,
    # hidden=128 (lane-dense), heads=4 (head_dim=32), intermediate=4*hidden=512.
    B, S, D, H, NH = 2, 8, 4, 128, 4
    INNER = 4 * H

    key = jax.random.PRNGKey(0)
    k_x, k_seq, k_dep = jax.random.split(key, 3)
    hidden_states = jax.random.normal(k_x, (B, S, D, H), jnp.float32)
    seq_params = _init_block_params(k_seq, H, INNER)
    dep_params = _init_block_params(k_dep, H, INNER)

    fwd = jax.jit(partial(structured_transformer_block_forward,
                          seq_params=seq_params, dep_params=dep_params, num_heads=NH))
    out = jax.block_until_ready(fwd(hidden_states))

    with jax.default_matmul_precision("highest"):
        ref = _ref_structured(hidden_states, seq_params, dep_params, NH)

    assert out.shape == (B, S, D, H)
    max_err = float(jnp.max(jnp.abs(out - ref)))
    assert jnp.allclose(out, ref, atol=1e-2, rtol=1e-2), f"mismatch vs reference: {max_err}"
    print("KERNEL_OK")
</pallas_src>

<mosaic_0001>
module attributes {stable_mosaic.version = 11 : i64} {
  func.func @_block_kernel(%arg0: i32, %arg1: memref<2x8x128xf32, #tpu.memory_space<vmem>>, %arg2: memref<1x128xf32, #tpu.memory_space<vmem>>, %arg3: memref<1x128xf32, #tpu.memory_space<vmem>>, %arg4: memref<128x128xf32, #tpu.memory_space<vmem>>, %arg5: memref<1x128xf32, #tpu.memory_space<vmem>>, %arg6: memref<128x128xf32, #tpu.memory_space<vmem>>, %arg7: memref<1x128xf32, #tpu.memory_space<vmem>>, %arg8: memref<128x128xf32, #tpu.memory_space<vmem>>, %arg9: memref<1x128xf32, #tpu.memory_space<vmem>>, %arg10: memref<128x128xf32, #tpu.memory_space<vmem>>, %arg11: memref<1x128xf32, #tpu.memory_space<vmem>>, %arg12: memref<1x128xf32, #tpu.memory_space<vmem>>, %arg13: memref<1x128xf32, #tpu.memory_space<vmem>>, %arg14: memref<128x512xf32, #tpu.memory_space<vmem>>, %arg15: memref<1x512xf32, #tpu.memory_space<vmem>>, %arg16: memref<512x128xf32, #tpu.memory_space<vmem>>, %arg17: memref<1x128xf32, #tpu.memory_space<vmem>>, %arg18: memref<2x8x128xf32, #tpu.memory_space<vmem>>) attributes {dimension_semantics = [#tpu.dimension_semantics<parallel>], iteration_bounds = array<i64: 1>, scalar_prefetch = 0 : i64, scratch_operands = 0 : i64, tpu.core_type = #tpu.core_type<tc>, window_params = [{transform_indices = @transform_0, window_bounds = array<i64: 2, 8, 128>}, {pipeline_mode = #tpu.pipeline_mode<synchronous>, transform_indices = @transform_1, window_bounds = array<i64: 1, 128>}, {pipeline_mode = #tpu.pipeline_mode<synchronous>, transform_indices = @transform_2, window_bounds = array<i64: 1, 128>}, {pipeline_mode = #tpu.pipeline_mode<synchronous>, transform_indices = @transform_3, window_bounds = array<i64: 128, 128>}, {pipeline_mode = #tpu.pipeline_mode<synchronous>, transform_indices = @transform_4, window_bounds = array<i64: 1, 128>}, {pipeline_mode = #tpu.pipeline_mode<synchronous>, transform_indices = @transform_5, window_bounds = array<i64: 128, 128>}, {pipeline_mode = #tpu.pipeline_mode<synchronous>, transform_indices = @transform_6, window_bounds = array<i64: 1, 128>}, {pipeline_mode = #tpu.pipeline_mode<synchronous>, transform_indices = @transform_7, window_bounds = array<i64: 128, 128>}, {pipeline_mode = #tpu.pipeline_mode<synchronous>, transform_indices = @transform_8, window_bounds = array<i64: 1, 128>}, {pipeline_mode = #tpu.pipeline_mode<synchronous>, transform_indices = @transform_9, window_bounds = array<i64: 128, 128>}, {pipeline_mode = #tpu.pipeline_mode<synchronous>, transform_indices = @transform_10, window_bounds = array<i64: 1, 128>}, {pipeline_mode = #tpu.pipeline_mode<synchronous>, transform_indices = @transform_11, window_bounds = array<i64: 1, 128>}, {pipeline_mode = #tpu.pipeline_mode<synchronous>, transform_indices = @transform_12, window_bounds = array<i64: 1, 128>}, {pipeline_mode = #tpu.pipeline_mode<synchronous>, transform_indices = @transform_13, window_bounds = array<i64: 128, 512>}, {pipeline_mode = #tpu.pipeline_mode<synchronous>, transform_indices = @transform_14, window_bounds = array<i64: 1, 512>}, {pipeline_mode = #tpu.pipeline_mode<synchronous>, transform_indices = @transform_15, window_bounds = array<i64: 512, 128>}, {pipeline_mode = #tpu.pipeline_mode<synchronous>, transform_indices = @transform_16, window_bounds = array<i64: 1, 128>}, {transform_indices = @transform_17, window_bounds = array<i64: 2, 8, 128>}]} {
    %c0 = arith.constant 0 : index
    %c0_0 = arith.constant 0 : index
    %c0_1 = arith.constant 0 : index
    %0 = vector.load %arg1[%c0, %c0_0, %c0_1] : memref<2x8x128xf32, #tpu.memory_space<vmem>>, vector<2x8x128xf32>
    %1 = vector.shape_cast %0 : vector<2x8x128xf32> to vector<16x128xf32>
    %c0_2 = arith.constant 0 : index
    %c0_3 = arith.constant 0 : index
    %2 = vector.load %arg2[%c0_2, %c0_3] : memref<1x128xf32, #tpu.memory_space<vmem>>, vector<1x128xf32>
    %c0_4 = arith.constant 0 : index
    %c0_5 = arith.constant 0 : index
    %3 = vector.load %arg3[%c0_4, %c0_5] : memref<1x128xf32, #tpu.memory_space<vmem>>, vector<1x128xf32>
    %cst = arith.constant dense<0.000000e+00> : vector<16xf32>
    %4 = vector.multi_reduction <add>, %1, %cst [1] : vector<16x128xf32> to vector<16xf32>
    %5 = vector.shape_cast %4 : vector<16xf32> to vector<16x1xf32>
    %cst_6 = arith.constant 1.280000e+02 : f32
    %6 = vector.broadcast %cst_6 : f32 to vector<16x1xf32>
    %7 = arith.divf %5, %6 : vector<16x1xf32>
    %8 = vector.broadcast %7 : vector<16x1xf32> to vector<16x128xf32>
    %9 = arith.subf %1, %8 : vector<16x128xf32>
    %10 = arith.mulf %9, %9 : vector<16x128xf32>
    %cst_7 = arith.constant dense<0.000000e+00> : vector<16xf32>
    %11 = vector.multi_reduction <add>, %10, %cst_7 [1] : vector<16x128xf32> to vector<16xf32>
    %12 = vector.shape_cast %11 : vector<16xf32> to vector<16x1xf32>
    %cst_8 = arith.constant 1.280000e+02 : f32
    %13 = vector.broadcast %cst_8 : f32 to vector<16x1xf32>
    %14 = arith.divf %12, %13 : vector<16x1xf32>
    %cst_9 = arith.constant 9.99999974E-6 : f32
    %15 = vector.broadcast %cst_9 : f32 to vector<16x1xf32>
    %16 = arith.addf %14, %15 : vector<16x1xf32>
    %17 = math.rsqrt %16 : vector<16x1xf32>
    %18 = vector.broadcast %17 : vector<16x1xf32> to vector<16x128xf32>
    %19 = arith.mulf %9, %18 : vector<16x128xf32>
    %20 = vector.broadcast %2 : vector<1x128xf32> to vector<16x128xf32>
    %21 = arith.mulf %19, %20 : vector<16x128xf32>
    %22 = vector.broadcast %3 : vector<1x128xf32> to vector<16x128xf32>
    %23 = arith.addf %21, %22 : vector<16x128xf32>
    %c0_10 = arith.constant 0 : index
    %c0_11 = arith.constant 0 : index
    %24 = vector.load %arg4[%c0_10, %c0_11] : memref<128x128xf32, #tpu.memory_space<vmem>>, vector<128x128xf32>
    %cst_12 = arith.constant dense<0.000000e+00> : vector<16x128xf32>
    %25 = tpu.matmul %23, %24, %cst_12 {dimension_numbers = #tpu.dot_dimension_numbers<[1], [0], [0], [1], [0, 0, 1, 1], [], []>} : vector<16x128xf32>, vector<128x128xf32>, vector<16x128xf32> -> vector<16x128xf32>
    %c0_13 = arith.constant 0 : index
    %c0_14 = arith.constant 0 : index
    %26 = vector.load %arg5[%c0_13, %c0_14] : memref<1x128xf32, #tpu.memory_space<vmem>>, vector<1x128xf32>
    %27 = vector.broadcast %26 : vector<1x128xf32> to vector<16x128xf32>
    %28 = arith.addf %25, %27 : vector<16x128xf32>
    %c0_15 = arith.constant 0 : index
    %c0_16 = arith.constant 0 : index
    %29 = vector.load %arg6[%c0_15, %c0_16] : memref<128x128xf32, #tpu.memory_space<vmem>>, vector<128x128xf32>
    %cst_17 = arith.constant dense<0.000000e+00> : vector<16x128xf32>
    %30 = tpu.matmul %23, %29, %cst_17 {dimension_numbers = #tpu.dot_dimension_numbers<[1], [0], [0], [1], [0, 0, 1, 1], [], []>} : vector<16x128xf32>, vector<128x128xf32>, vector<16x128xf32> -> vector<16x128xf32>
    %c0_18 = arith.constant 0 : index
    %c0_19 = arith.constant 0 : index
    %31 = vector.load %arg7[%c0_18, %c0_19] : memref<1x128xf32, #tpu.memory_space<vmem>>, vector<1x128xf32>
    %32 = vector.broadcast %31 : vector<1x128xf32> to vector<16x128xf32>
    %33 = arith.addf %30, %32 : vector<16x128xf32>
    %c0_20 = arith.constant 0 : index
    %c0_21 = arith.constant 0 : index
    %34 = vector.load %arg8[%c0_20, %c0_21] : memref<128x128xf32, #tpu.memory_space<vmem>>, vector<128x128xf32>
    %cst_22 = arith.constant dense<0.000000e+00> : vector<16x128xf32>
    %35 = tpu.matmul %23, %34, %cst_22 {dimension_numbers = #tpu.dot_dimension_numbers<[1], [0], [0], [1], [0, 0, 1, 1], [], []>} : vector<16x128xf32>, vector<128x128xf32>, vector<16x128xf32> -> vector<16x128xf32>
    %c0_23 = arith.constant 0 : index
    %c0_24 = arith.constant 0 : index
    %36 = vector.load %arg9[%c0_23, %c0_24] : memref<1x128xf32, #tpu.memory_space<vmem>>, vector<1x128xf32>
    %37 = vector.broadcast %36 : vector<1x128xf32> to vector<16x128xf32>
    %38 = arith.addf %35, %37 : vector<16x128xf32>
    %39 = tpu.iota {dimensions = array<i32: 0>} : vector<8x8xi32>
    %40 = tpu.iota {dimensions = array<i32: 1>} : vector<8x8xi32>
    %c0_i32 = arith.constant 0 : i32
    %41 = vector.broadcast %c0_i32 : i32 to vector<8x8xi32>
    %42 = arith.addi %39, %41 : vector<8x8xi32>
    %43 = arith.cmpi sle, %40, %42 : vector<8x8xi32>
    %44 = vector.extract_strided_slice %28 {offsets = [0, 0], sizes = [16, 32], strides = [1, 1]} : vector<16x128xf32> to vector<16x32xf32>
    %45 = vector.shape_cast %44 : vector<16x32xf32> to vector<2x8x32xf32>
    %46 = vector.extract_strided_slice %33 {offsets = [0, 0], sizes = [16, 32], strides = [1, 1]} : vector<16x128xf32> to vector<16x32xf32>
    %47 = vector.shape_cast %46 : vector<16x32xf32> to vector<2x8x32xf32>
    %48 = vector.extract_strided_slice %38 {offsets = [0, 0], sizes = [16, 32], strides = [1, 1]} : vector<16x128xf32> to vector<16x32xf32>
    %49 = vector.shape_cast %48 : vector<16x32xf32> to vector<2x8x32xf32>
    "tpu.trace_start"() <{level = 10 : i32, message = "bqd,bkd->bqk"}> : () -> ()
    %cst_25 = arith.constant dense<0.000000e+00> : vector<2x8x8xf32>
    %50 = tpu.matmul %45, %47, %cst_25 {dimension_numbers = #tpu.dot_dimension_numbers<[2], [2], [1], [1], [0, 0, 0, 1, 1, 1], [0], [0]>} : vector<2x8x32xf32>, vector<2x8x32xf32>, vector<2x8x8xf32> -> vector<2x8x8xf32>
    "tpu.trace_stop"() : () -> ()
    %cst_26 = arith.constant 0.176776692 : f32
    %51 = vector.broadcast %cst_26 : f32 to vector<2x8x8xf32>
    %52 = arith.mulf %50, %51 : vector<2x8x8xf32>
    %53 = vector.shape_cast %43 : vector<8x8xi1> to vector<1x8x8xi1>
    %cst_27 = arith.constant -1.000000e+30 : f32
    %54 = vector.shape_cast %53 : vector<1x8x8xi1> to vector<1x8x8xi1>
    %55 = vector.broadcast %54 : vector<1x8x8xi1> to vector<2x8x8xi1>
    %56 = vector.broadcast %cst_27 : f32 to vector<2x8x8xf32>
    %57 = arith.select %55, %52, %56 : vector<2x8x8xi1>, vector<2x8x8xf32>
    %cst_28 = arith.constant dense<0xFF800000> : vector<2x8xf32>
    %58 = vector.multi_reduction <maximumf>, %57, %cst_28 [2] : vector<2x8x8xf32> to vector<2x8xf32>
    %59 = vector.shape_cast %58 : vector<2x8xf32> to vector<2x8x1xf32>
    %60 = vector.broadcast %59 : vector<2x8x1xf32> to vector<2x8x8xf32>
    %61 = arith.subf %57, %60 : vector<2x8x8xf32>
    %62 = math.exp %61 : vector<2x8x8xf32>
    %cst_29 = arith.constant dense<0.000000e+00> : vector<2x8xf32>
    %63 = vector.multi_reduction <add>, %62, %cst_29 [2] : vector<2x8x8xf32> to vector<2x8xf32>
    %64 = vector.shape_cast %63 : vector<2x8xf32> to vector<2x8x1xf32>
    %65 = vector.broadcast %64 : vector<2x8x1xf32> to vector<2x8x8xf32>
    %66 = arith.divf %62, %65 : vector<2x8x8xf32>
    "tpu.trace_start"() <{level = 10 : i32, message = "bqk,bkd->bqd"}> : () -> ()
    %cst_30 = arith.constant dense<0.000000e+00> : vector<2x8x32xf32>
    %67 = tpu.matmul %66, %49, %cst_30 {dimension_numbers = #tpu.dot_dimension_numbers<[2], [1], [1], [2], [0, 0, 0, 1, 1, 2], [0], [0]>} : vector<2x8x8xf32>, vector<2x8x32xf32>, vector<2x8x32xf32> -> vector<2x8x32xf32>
    "tpu.trace_stop"() : () -> ()
    %68 = vector.shape_cast %67 : vector<2x8x32xf32> to vector<16x32xf32>
    %69 = vector.extract_strided_slice %28 {offsets = [0, 32], sizes = [16, 32], strides = [1, 1]} : vector<16x128xf32> to vector<16x32xf32>
    %70 = vector.shape_cast %69 : vector<16x32xf32> to vector<2x8x32xf32>
    %71 = vector.extract_strided_slice %33 {offsets = [0, 32], sizes = [16, 32], strides = [1, 1]} : vector<16x128xf32> to vector<16x32xf32>
    %72 = vector.shape_cast %71 : vector<16x32xf32> to vector<2x8x32xf32>
    %73 = vector.extract_strided_slice %38 {offsets = [0, 32], sizes = [16, 32], strides = [1, 1]} : vector<16x128xf32> to vector<16x32xf32>
    %74 = vector.shape_cast %73 : vector<16x32xf32> to vector<2x8x32xf32>
    "tpu.trace_start"() <{level = 10 : i32, message = "bqd,bkd->bqk"}> : () -> ()
    %cst_31 = arith.constant dense<0.000000e+00> : vector<2x8x8xf32>
    %75 = tpu.matmul %70, %72, %cst_31 {dimension_numbers = #tpu.dot_dimension_numbers<[2], [2], [1], [1], [0, 0, 0, 1, 1, 1], [0], [0]>} : vector<2x8x32xf32>, vector<2x8x32xf32>, vector<2x8x8xf32> -> vector<2x8x8xf32>
    "tpu.trace_stop"() : () -> ()
    %cst_32 = arith.constant 0.176776692 : f32
    %76 = vector.broadcast %cst_32 : f32 to vector<2x8x8xf32>
    %77 = arith.mulf %75, %76 : vector<2x8x8xf32>
    %78 = vector.shape_cast %43 : vector<8x8xi1> to vector<1x8x8xi1>
    %cst_33 = arith.constant -1.000000e+30 : f32
    %79 = vector.shape_cast %78 : vector<1x8x8xi1> to vector<1x8x8xi1>
    %80 = vector.broadcast %79 : vector<1x8x8xi1> to vector<2x8x8xi1>
    %81 = vector.broadcast %cst_33 : f32 to vector<2x8x8xf32>
    %82 = arith.select %80, %77, %81 : vector<2x8x8xi1>, vector<2x8x8xf32>
    %cst_34 = arith.constant dense<0xFF800000> : vector<2x8xf32>
    %83 = vector.multi_reduction <maximumf>, %82, %cst_34 [2] : vector<2x8x8xf32> to vector<2x8xf32>
    %84 = vector.shape_cast %83 : vector<2x8xf32> to vector<2x8x1xf32>
    %85 = vector.broadcast %84 : vector<2x8x1xf32> to vector<2x8x8xf32>
    %86 = arith.subf %82, %85 : vector<2x8x8xf32>
    %87 = math.exp %86 : vector<2x8x8xf32>
    %cst_35 = arith.constant dense<0.000000e+00> : vector<2x8xf32>
    %88 = vector.multi_reduction <add>, %87, %cst_35 [2] : vector<2x8x8xf32> to vector<2x8xf32>
    %89 = vector.shape_cast %88 : vector<2x8xf32> to vector<2x8x1xf32>
    %90 = vector.broadcast %89 : vector<2x8x1xf32> to vector<2x8x8xf32>
    %91 = arith.divf %87, %90 : vector<2x8x8xf32>
    "tpu.trace_start"() <{level = 10 : i32, message = "bqk,bkd->bqd"}> : () -> ()
    %cst_36 = arith.constant dense<0.000000e+00> : vector<2x8x32xf32>
    %92 = tpu.matmul %91, %74, %cst_36 {dimension_numbers = #tpu.dot_dimension_numbers<[2], [1], [1], [2], [0, 0, 0, 1, 1, 2], [0], [0]>} : vector<2x8x8xf32>, vector<2x8x32xf32>, vector<2x8x32xf32> -> vector<2x8x32xf32>
    "tpu.trace_stop"() : () -> ()
    %93 = vector.shape_cast %92 : vector<2x8x32xf32> to vector<16x32xf32>
    %94 = vector.extract_strided_slice %28 {offsets = [0, 64], sizes = [16, 32], strides = [1, 1]} : vector<16x128xf32> to vector<16x32xf32>
    %95 = vector.shape_cast %94 : vector<16x32xf32> to vector<2x8x32xf32>
    %96 = vector.extract_strided_slice %33 {offsets = [0, 64], sizes = [16, 32], strides = [1, 1]} : vector<16x128xf32> to vector<16x32xf32>
    %97 = vector.shape_cast %96 : vector<16x32xf32> to vector<2x8x32xf32>
    %98 = vector.extract_strided_slice %38 {offsets = [0, 64], sizes = [16, 32], strides = [1, 1]} : vector<16x128xf32> to vector<16x32xf32>
    %99 = vector.shape_cast %98 : vector<16x32xf32> to vector<2x8x32xf32>
    "tpu.trace_start"() <{level = 10 : i32, message = "bqd,bkd->bqk"}> : () -> ()
    %cst_37 = arith.constant dense<0.000000e+00> : vector<2x8x8xf32>
    %100 = tpu.matmul %95, %97, %cst_37 {dimension_numbers = #tpu.dot_dimension_numbers<[2], [2], [1], [1], [0, 0, 0, 1, 1, 1], [0], [0]>} : vector<2x8x32xf32>, vector<2x8x32xf32>, vector<2x8x8xf32> -> vector<2x8x8xf32>
    "tpu.trace_stop"() : () -> ()
    %cst_38 = arith.constant 0.176776692 : f32
    %101 = vector.broadcast %cst_38 : f32 to vector<2x8x8xf32>
    %102 = arith.mulf %100, %101 : vector<2x8x8xf32>
    %103 = vector.shape_cast %43 : vector<8x8xi1> to vector<1x8x8xi1>
    %cst_39 = arith.constant -1.000000e+30 : f32
    %104 = vector.shape_cast %103 : vector<1x8x8xi1> to vector<1x8x8xi1>
    %105 = vector.broadcast %104 : vector<1x8x8xi1> to vector<2x8x8xi1>
    %106 = vector.broadcast %cst_39 : f32 to vector<2x8x8xf32>
    %107 = arith.select %105, %102, %106 : vector<2x8x8xi1>, vector<2x8x8xf32>
    %cst_40 = arith.constant dense<0xFF800000> : vector<2x8xf32>
    %108 = vector.multi_reduction <maximumf>, %107, %cst_40 [2] : vector<2x8x8xf32> to vector<2x8xf32>
    %109 = vector.shape_cast %108 : vector<2x8xf32> to vector<2x8x1xf32>
    %110 = vector.broadcast %109 : vector<2x8x1xf32> to vector<2x8x8xf32>
    %111 = arith.subf %107, %110 : vector<2x8x8xf32>
    %112 = math.exp %111 : vector<2x8x8xf32>
    %cst_41 = arith.constant dense<0.000000e+00> : vector<2x8xf32>
    %113 = vector.multi_reduction <add>, %112, %cst_41 [2] : vector<2x8x8xf32> to vector<2x8xf32>
    %114 = vector.shape_cast %113 : vector<2x8xf32> to vector<2x8x1xf32>
    %115 = vector.broadcast %114 : vector<2x8x1xf32> to vector<2x8x8xf32>
    %116 = arith.divf %112, %115 : vector<2x8x8xf32>
    "tpu.trace_start"() <{level = 10 : i32, message = "bqk,bkd->bqd"}> : () -> ()
    %cst_42 = arith.constant dense<0.000000e+00> : vector<2x8x32xf32>
    %117 = tpu.matmul %116, %99, %cst_42 {dimension_numbers = #tpu.dot_dimension_numbers<[2], [1], [1], [2], [0, 0, 0, 1, 1, 2], [0], [0]>} : vector<2x8x8xf32>, vector<2x8x32xf32>, vector<2x8x32xf32> -> vector<2x8x32xf32>
    "tpu.trace_stop"() : () -> ()
    %118 = vector.shape_cast %117 : vector<2x8x32xf32> to vector<16x32xf32>
    %119 = vector.extract_strided_slice %28 {offsets = [0, 96], sizes = [16, 32], strides = [1, 1]} : vector<16x128xf32> to vector<16x32xf32>
    %120 = vector.shape_cast %119 : vector<16x32xf32> to vector<2x8x32xf32>
    %121 = vector.extract_strided_slice %33 {offsets = [0, 96], sizes = [16, 32], strides = [1, 1]} : vector<16x128xf32> to vector<16x32xf32>
    %122 = vector.shape_cast %121 : vector<16x32xf32> to vector<2x8x32xf32>
    %123 = vector.extract_strided_slice %38 {offsets = [0, 96], sizes = [16, 32], strides = [1, 1]} : vector<16x128xf32> to vector<16x32xf32>
    %124 = vector.shape_cast %123 : vector<16x32xf32> to vector<2x8x32xf32>
    "tpu.trace_start"() <{level = 10 : i32, message = "bqd,bkd->bqk"}> : () -> ()
    %cst_43 = arith.constant dense<0.000000e+00> : vector<2x8x8xf32>
    %125 = tpu.matmul %120, %122, %cst_43 {dimension_numbers = #tpu.dot_dimension_numbers<[2], [2], [1], [1], [0, 0, 0, 1, 1, 1], [0], [0]>} : vector<2x8x32xf32>, vector<2x8x32xf32>, vector<2x8x8xf32> -> vector<2x8x8xf32>
    "tpu.trace_stop"() : () -> ()
    %cst_44 = arith.constant 0.176776692 : f32
    %126 = vector.broadcast %cst_44 : f32 to vector<2x8x8xf32>
    %127 = arith.mulf %125, %126 : vector<2x8x8xf32>
    %128 = vector.shape_cast %43 : vector<8x8xi1> to vector<1x8x8xi1>
    %cst_45 = arith.constant -1.000000e+30 : f32
    %129 = vector.shape_cast %128 : vector<1x8x8xi1> to vector<1x8x8xi1>
    %130 = vector.broadcast %129 : vector<1x8x8xi1> to vector<2x8x8xi1>
    %131 = vector.broadcast %cst_45 : f32 to vector<2x8x8xf32>
    %132 = arith.select %130, %127, %131 : vector<2x8x8xi1>, vector<2x8x8xf32>
    %cst_46 = arith.constant dense<0xFF800000> : vector<2x8xf32>
    %133 = vector.multi_reduction <maximumf>, %132, %cst_46 [2] : vector<2x8x8xf32> to vector<2x8xf32>
    %134 = vector.shape_cast %133 : vector<2x8xf32> to vector<2x8x1xf32>
    %135 = vector.broadcast %134 : vector<2x8x1xf32> to vector<2x8x8xf32>
    %136 = arith.subf %132, %135 : vector<2x8x8xf32>
    %137 = math.exp %136 : vector<2x8x8xf32>
    %cst_47 = arith.constant dense<0.000000e+00> : vector<2x8xf32>
    %138 = vector.multi_reduction <add>, %137, %cst_47 [2] : vector<2x8x8xf32> to vector<2x8xf32>
    %139 = vector.shape_cast %138 : vector<2x8xf32> to vector<2x8x1xf32>
    %140 = vector.broadcast %139 : vector<2x8x1xf32> to vector<2x8x8xf32>
    %141 = arith.divf %137, %140 : vector<2x8x8xf32>
    "tpu.trace_start"() <{level = 10 : i32, message = "bqk,bkd->bqd"}> : () -> ()
    %cst_48 = arith.constant dense<0.000000e+00> : vector<2x8x32xf32>
    %142 = tpu.matmul %141, %124, %cst_48 {dimension_numbers = #tpu.dot_dimension_numbers<[2], [1], [1], [2], [0, 0, 0, 1, 1, 2], [0], [0]>} : vector<2x8x8xf32>, vector<2x8x32xf32>, vector<2x8x32xf32> -> vector<2x8x32xf32>
    "tpu.trace_stop"() : () -> ()
    %143 = vector.shape_cast %142 : vector<2x8x32xf32> to vector<16x32xf32>
    %144 = tpu.concatenate %68, %93, %118, %143 in 1 : vector<16x32xf32>, vector<16x32xf32>, vector<16x32xf32>, vector<16x32xf32> -> vector<16x128xf32>
    %145 = vector.shape_cast %0 : vector<2x8x128xf32> to vector<16x128xf32>
    %c0_49 = arith.constant 0 : index
    %c0_50 = arith.constant 0 : index
    %146 = vector.load %arg10[%c0_49, %c0_50] : memref<128x128xf32, #tpu.memory_space<vmem>>, vector<128x128xf32>
    %cst_51 = arith.constant dense<0.000000e+00> : vector<16x128xf32>
    %147 = tpu.matmul %144, %146, %cst_51 {dimension_numbers = #tpu.dot_dimension_numbers<[1], [0], [0], [1], [0, 0, 1, 1], [], []>} : vector<16x128xf32>, vector<128x128xf32>, vector<16x128xf32> -> vector<16x128xf32>
    %c0_52 = arith.constant 0 : index
    %c0_53 = arith.constant 0 : index
    %148 = vector.load %arg11[%c0_52, %c0_53] : memref<1x128xf32, #tpu.memory_space<vmem>>, vector<1x128xf32>
    %149 = vector.broadcast %148 : vector<1x128xf32> to vector<16x128xf32>
    %150 = arith.addf %147, %149 : vector<16x128xf32>
    %151 = arith.addf %150, %145 : vector<16x128xf32>
    %c0_54 = arith.constant 0 : index
    %c0_55 = arith.constant 0 : index
    %152 = vector.load %arg12[%c0_54, %c0_55] : memref<1x128xf32, #tpu.memory_space<vmem>>, vector<1x128xf32>
    %c0_56 = arith.constant 0 : index
    %c0_57 = arith.constant 0 : index
    %153 = vector.load %arg13[%c0_56, %c0_57] : memref<1x128xf32, #tpu.memory_space<vmem>>, vector<1x128xf32>
    %cst_58 = arith.constant dense<0.000000e+00> : vector<16xf32>
    %154 = vector.multi_reduction <add>, %151, %cst_58 [1] : vector<16x128xf32> to vector<16xf32>
    %155 = vector.shape_cast %154 : vector<16xf32> to vector<16x1xf32>
    %cst_59 = arith.constant 1.280000e+02 : f32
    %156 = vector.broadcast %cst_59 : f32 to vector<16x1xf32>
    %157 = arith.divf %155, %156 : vector<16x1xf32>
    %158 = vector.broadcast %157 : vector<16x1xf32> to vector<16x128xf32>
    %159 = arith.subf %151, %158 : vector<16x128xf32>
    %160 = arith.mulf %159, %159 : vector<16x128xf32>
    %cst_60 = arith.constant dense<0.000000e+00> : vector<16xf32>
    %161 = vector.multi_reduction <add>, %160, %cst_60 [1] : vector<16x128xf32> to vector<16xf32>
    %162 = vector.shape_cast %161 : vector<16xf32> to vector<16x1xf32>
    %cst_61 = arith.constant 1.280000e+02 : f32
    %163 = vector.broadcast %cst_61 : f32 to vector<16x1xf32>
    %164 = arith.divf %162, %163 : vector<16x1xf32>
    %cst_62 = arith.constant 9.99999974E-6 : f32
    %165 = vector.broadcast %cst_62 : f32 to vector<16x1xf32>
    %166 = arith.addf %164, %165 : vector<16x1xf32>
    %167 = math.rsqrt %166 : vector<16x1xf32>
    %168 = vector.broadcast %167 : vector<16x1xf32> to vector<16x128xf32>
    %169 = arith.mulf %159, %168 : vector<16x128xf32>
    %170 = vector.broadcast %152 : vector<1x128xf32> to vector<16x128xf32>
    %171 = arith.mulf %169, %170 : vector<16x128xf32>
    %172 = vector.broadcast %153 : vector<1x128xf32> to vector<16x128xf32>
    %173 = arith.addf %171, %172 : vector<16x128xf32>
    %c0_63 = arith.constant 0 : index
    %c0_64 = arith.constant 0 : index
    %174 = vector.load %arg14[%c0_63, %c0_64] : memref<128x512xf32, #tpu.memory_space<vmem>>, vector<128x512xf32>
    %cst_65 = arith.constant dense<0.000000e+00> : vector<16x512xf32>
    %175 = tpu.matmul %173, %174, %cst_65 {dimension_numbers = #tpu.dot_dimension_numbers<[1], [0], [0], [1], [0, 0, 1, 1], [], []>} : vector<16x128xf32>, vector<128x512xf32>, vector<16x512xf32> -> vector<16x512xf32>
    %c0_66 = arith.constant 0 : index
    %c0_67 = arith.constant 0 : index
    %176 = vector.load %arg15[%c0_66, %c0_67] : memref<1x512xf32, #tpu.memory_space<vmem>>, vector<1x512xf32>
    %177 = vector.broadcast %176 : vector<1x512xf32> to vector<16x512xf32>
    %178 = arith.addf %175, %177 : vector<16x512xf32>
    %cst_68 = arith.constant 5.000000e-01 : f32
    %179 = vector.broadcast %cst_68 : f32 to vector<16x512xf32>
    %180 = arith.mulf %179, %178 : vector<16x512xf32>
    %cst_69 = arith.constant 4.471500e-02 : f32
    %181 = vector.broadcast %cst_69 : f32 to vector<16x512xf32>
    %182 = arith.mulf %181, %178 : vector<16x512xf32>
    %183 = arith.mulf %182, %178 : vector<16x512xf32>
    %184 = arith.mulf %183, %178 : vector<16x512xf32>
    %185 = arith.addf %178, %184 : vector<16x512xf32>
    %cst_70 = arith.constant 0.797884583 : f32
    %186 = vector.broadcast %cst_70 : f32 to vector<16x512xf32>
    %187 = arith.mulf %186, %185 : vector<16x512xf32>
    %188 = math.tanh %187 : vector<16x512xf32>
    %cst_71 = arith.constant 1.000000e+00 : f32
    %189 = vector.broadcast %cst_71 : f32 to vector<16x512xf32>
    %190 = arith.addf %189, %188 : vector<16x512xf32>
    %191 = arith.mulf %180, %190 : vector<16x512xf32>
    %c0_72 = arith.constant 0 : index
    %c0_73 = arith.constant 0 : index
    %192 = vector.load %arg16[%c0_72, %c0_73] : memref<512x128xf32, #tpu.memory_space<vmem>>, vector<512x128xf32>
    %cst_74 = arith.constant dense<0.000000e+00> : vector<16x128xf32>
    %193 = tpu.matmul %191, %192, %cst_74 {dimension_numbers = #tpu.dot_dimension_numbers<[1], [0], [0], [1], [0, 0, 1, 1], [], []>} : vector<16x512xf32>, vector<512x128xf32>, vector<16x128xf32> -> vector<16x128xf32>
    %194 = arith.addf %151, %193 : vector<16x128xf32>
    %c0_75 = arith.constant 0 : index
    %c0_76 = arith.constant 0 : index
    %195 = vector.load %arg17[%c0_75, %c0_76] : memref<1x128xf32, #tpu.memory_space<vmem>>, vector<1x128xf32>
    %196 = vector.broadcast %195 : vector<1x128xf32> to vector<16x128xf32>
    %197 = arith.addf %194, %196 : vector<16x128xf32>
    %198 = vector.shape_cast %197 : vector<16x128xf32> to vector<2x8x128xf32>
    %c0_77 = arith.constant 0 : index
    %c0_78 = arith.constant 0 : index
    %c0_79 = arith.constant 0 : index
    %199 = vector.load %arg18[%c0_77, %c0_78, %c0_79] : memref<2x8x128xf32, #tpu.memory_space<vmem>>, vector<2x8x128xf32>
    tpu.vector_store %arg18[%c0_77, %c0_78, %c0_79], %198 {strides = array<i32>} : memref<2x8x128xf32, #tpu.memory_space<vmem>>, vector<2x8x128xf32>,
    return
  }
  func.func @transform_0(%arg0: i32) -> (i32, i32, i32) {
    %c0_i32 = arith.constant 0 : i32
    %c0_i32_0 = arith.constant 0 : i32
    %c0_i32_1 = arith.constant 0 : i32
    return %arg0, %c0_i32, %c0_i32_0 : i32, i32, i32
  }
  func.func @transform_1(%arg0: i32) -> (i32, i32) {
    %c0_i32 = arith.constant 0 : i32
    %c0_i32_0 = arith.constant 0 : i32
    %c0_i32_1 = arith.constant 0 : i32
    return %c0_i32, %c0_i32_0 : i32, i32
  }
  func.func @transform_2(%arg0: i32) -> (i32, i32) {
    %c0_i32 = arith.constant 0 : i32
    %c0_i32_0 = arith.constant 0 : i32
    %c0_i32_1 = arith.constant 0 : i32
    return %c0_i32, %c0_i32_0 : i32, i32
  }
  func.func @transform_3(%arg0: i32) -> (i32, i32) {
    %c0_i32 = arith.constant 0 : i32
    %c0_i32_0 = arith.constant 0 : i32
    %c0_i32_1 = arith.constant 0 : i32
    return %c0_i32, %c0_i32_0 : i32, i32
  }
  func.func @transform_4(%arg0: i32) -> (i32, i32) {
    %c0_i32 = arith.constant 0 : i32
    %c0_i32_0 = arith.constant 0 : i32
    %c0_i32_1 = arith.constant 0 : i32
    return %c0_i32, %c0_i32_0 : i32, i32
  }
  func.func @transform_5(%arg0: i32) -> (i32, i32) {
    %c0_i32 = arith.constant 0 : i32
    %c0_i32_0 = arith.constant 0 : i32
    %c0_i32_1 = arith.constant 0 : i32
    return %c0_i32, %c0_i32_0 : i32, i32
  }
  func.func @transform_6(%arg0: i32) -> (i32, i32) {
    %c0_i32 = arith.constant 0 : i32
    %c0_i32_0 = arith.constant 0 : i32
    %c0_i32_1 = arith.constant 0 : i32
    return %c0_i32, %c0_i32_0 : i32, i32
  }
  func.func @transform_7(%arg0: i32) -> (i32, i32) {
    %c0_i32 = arith.constant 0 : i32
    %c0_i32_0 = arith.constant 0 : i32
    %c0_i32_1 = arith.constant 0 : i32
    return %c0_i32, %c0_i32_0 : i32, i32
  }
  func.func @transform_8(%arg0: i32) -> (i32, i32) {
    %c0_i32 = arith.constant 0 : i32
    %c0_i32_0 = arith.constant 0 : i32
    %c0_i32_1 = arith.constant 0 : i32
    return %c0_i32, %c0_i32_0 : i32, i32
  }
  func.func @transform_9(%arg0: i32) -> (i32, i32) {
    %c0_i32 = arith.constant 0 : i32
    %c0_i32_0 = arith.constant 0 : i32
    %c0_i32_1 = arith.constant 0 : i32
    return %c0_i32, %c0_i32_0 : i32, i32
  }
  func.func @transform_10(%arg0: i32) -> (i32, i32) {
    %c0_i32 = arith.constant 0 : i32
    %c0_i32_0 = arith.constant 0 : i32
    %c0_i32_1 = arith.constant 0 : i32
    return %c0_i32, %c0_i32_0 : i32, i32
  }
  func.func @transform_11(%arg0: i32) -> (i32, i32) {
    %c0_i32 = arith.constant 0 : i32
    %c0_i32_0 = arith.constant 0 : i32
    %c0_i32_1 = arith.constant 0 : i32
    return %c0_i32, %c0_i32_0 : i32, i32
  }
  func.func @transform_12(%arg0: i32) -> (i32, i32) {
    %c0_i32 = arith.constant 0 : i32
    %c0_i32_0 = arith.constant 0 : i32
    %c0_i32_1 = arith.constant 0 : i32
    return %c0_i32, %c0_i32_0 : i32, i32
  }
  func.func @transform_13(%arg0: i32) -> (i32, i32) {
    %c0_i32 = arith.constant 0 : i32
    %c0_i32_0 = arith.constant 0 : i32
    %c0_i32_1 = arith.constant 0 : i32
    return %c0_i32, %c0_i32_0 : i32, i32
  }
  func.func @transform_14(%arg0: i32) -> (i32, i32) {
    %c0_i32 = arith.constant 0 : i32
    %c0_i32_0 = arith.constant 0 : i32
    %c0_i32_1 = arith.constant 0 : i32
    return %c0_i32, %c0_i32_0 : i32, i32
  }
  func.func @transform_15(%arg0: i32) -> (i32, i32) {
    %c0_i32 = arith.constant 0 : i32
    %c0_i32_0 = arith.constant 0 : i32
    %c0_i32_1 = arith.constant 0 : i32
    return %c0_i32, %c0_i32_0 : i32, i32
  }
  func.func @transform_16(%arg0: i32) -> (i32, i32) {
    %c0_i32 = arith.constant 0 : i32
    %c0_i32_0 = arith.constant 0 : i32
    %c0_i32_1 = arith.constant 0 : i32
    return %c0_i32, %c0_i32_0 : i32, i32
  }
  func.func @transform_17(%arg0: i32) -> (i32, i32, i32) {
    %c0_i32 = arith.constant 0 : i32
    %c0_i32_0 = arith.constant 0 : i32
    %c0_i32_1 = arith.constant 0 : i32
    return %arg0, %c0_i32, %c0_i32_0 : i32, i32, i32
  }
}

module attributes {stable_mosaic.version = 11 : i64} {
  func.func @_block_kernel(%arg0: i32, %arg1: memref<16x4x128xf32, #tpu.memory_space<vmem>>, %arg2: memref<1x128xf32, #tpu.memory_space<vmem>>, %arg3: memref<1x128xf32, #tpu.memory_space<vmem>>, %arg4: memref<128x128xf32, #tpu.memory_space<vmem>>, %arg5: memref<1x128xf32, #tpu.memory_space<vmem>>, %arg6: memref<128x128xf32, #tpu.memory_space<vmem>>, %arg7: memref<1x128xf32, #tpu.memory_space<vmem>>, %arg8: memref<128x128xf32, #tpu.memory_space<vmem>>, %arg9: memref<1x128xf32, #tpu.memory_space<vmem>>, %arg10: memref<128x128xf32, #tpu.memory_space<vmem>>, %arg11: memref<1x128xf32, #tpu.memory_space<vmem>>, %arg12: memref<1x128xf32, #tpu.memory_space<vmem>>, %arg13: memref<1x128xf32, #tpu.memory_space<vmem>>, %arg14: memref<128x512xf32, #tpu.memory_space<vmem>>, %arg15: memref<1x512xf32, #tpu.memory_space<vmem>>, %arg16: memref<512x128xf32, #tpu.memory_space<vmem>>, %arg17: memref<1x128xf32, #tpu.memory_space<vmem>>, %arg18: memref<16x3x128xf32, #tpu.memory_space<vmem>>) attributes {dimension_semantics = [#tpu.dimension_semantics<parallel>], iteration_bounds = array<i64: 1>, scalar_prefetch = 0 : i64, scratch_operands = 0 : i64, tpu.core_type = #tpu.core_type<tc>, window_params = [{transform_indices = @transform_0, window_bounds = array<i64: 16, 4, 128>}, {pipeline_mode = #tpu.pipeline_mode<synchronous>, transform_indices = @transform_1, window_bounds = array<i64: 1, 128>}, {pipeline_mode = #tpu.pipeline_mode<synchronous>, transform_indices = @transform_2, window_bounds = array<i64: 1, 128>}, {pipeline_mode = #tpu.pipeline_mode<synchronous>, transform_indices = @transform_3, window_bounds = array<i64: 128, 128>}, {pipeline_mode = #tpu.pipeline_mode<synchronous>, transform_indices = @transform_4, window_bounds = array<i64: 1, 128>}, {pipeline_mode = #tpu.pipeline_mode<synchronous>, transform_indices = @transform_5, window_bounds = array<i64: 128, 128>}, {pipeline_mode = #tpu.pipeline_mode<synchronous>, transform_indices = @transform_6, window_bounds = array<i64: 1, 128>}, {pipeline_mode = #tpu.pipeline_mode<synchronous>, transform_indices = @transform_7, window_bounds = array<i64: 128, 128>}, {pipeline_mode = #tpu.pipeline_mode<synchronous>, transform_indices = @transform_8, window_bounds = array<i64: 1, 128>}, {pipeline_mode = #tpu.pipeline_mode<synchronous>, transform_indices = @transform_9, window_bounds = array<i64: 128, 128>}, {pipeline_mode = #tpu.pipeline_mode<synchronous>, transform_indices = @transform_10, window_bounds = array<i64: 1, 128>}, {pipeline_mode = #tpu.pipeline_mode<synchronous>, transform_indices = @transform_11, window_bounds = array<i64: 1, 128>}, {pipeline_mode = #tpu.pipeline_mode<synchronous>, transform_indices = @transform_12, window_bounds = array<i64: 1, 128>}, {pipeline_mode = #tpu.pipeline_mode<synchronous>, transform_indices = @transform_13, window_bounds = array<i64: 128, 512>}, {pipeline_mode = #tpu.pipeline_mode<synchronous>, transform_indices = @transform_14, window_bounds = array<i64: 1, 512>}, {pipeline_mode = #tpu.pipeline_mode<synchronous>, transform_indices = @transform_15, window_bounds = array<i64: 512, 128>}, {pipeline_mode = #tpu.pipeline_mode<synchronous>, transform_indices = @transform_16, window_bounds = array<i64: 1, 128>}, {transform_indices = @transform_17, window_bounds = array<i64: 16, 3, 128>}]} {
    %c0 = arith.constant 0 : index
    %c0_0 = arith.constant 0 : index
    %c0_1 = arith.constant 0 : index
    %0 = vector.load %arg1[%c0, %c0_0, %c0_1] : memref<16x4x128xf32, #tpu.memory_space<vmem>>, vector<16x4x128xf32>
    %1 = vector.shape_cast %0 : vector<16x4x128xf32> to vector<64x128xf32>
    %c0_2 = arith.constant 0 : index
    %c0_3 = arith.constant 0 : index
    %2 = vector.load %arg2[%c0_2, %c0_3] : memref<1x128xf32, #tpu.memory_space<vmem>>, vector<1x128xf32>
    %c0_4 = arith.constant 0 : index
    %c0_5 = arith.constant 0 : index
    %3 = vector.load %arg3[%c0_4, %c0_5] : memref<1x128xf32, #tpu.memory_space<vmem>>, vector<1x128xf32>
    %cst = arith.constant dense<0.000000e+00> : vector<64xf32>
    %4 = vector.multi_reduction <add>, %1, %cst [1] : vector<64x128xf32> to vector<64xf32>
    %5 = vector.shape_cast %4 : vector<64xf32> to vector<64x1xf32>
    %cst_6 = arith.constant 1.280000e+02 : f32
    %6 = vector.broadcast %cst_6 : f32 to vector<64x1xf32>
    %7 = arith.divf %5, %6 : vector<64x1xf32>
    %8 = vector.broadcast %7 : vector<64x1xf32> to vector<64x128xf32>
    %9 = arith.subf %1, %8 : vector<64x128xf32>
    %10 = arith.mulf %9, %9 : vector<64x128xf32>
    %cst_7 = arith.constant dense<0.000000e+00> : vector<64xf32>
    %11 = vector.multi_reduction <add>, %10, %cst_7 [1] : vector<64x128xf32> to vector<64xf32>
    %12 = vector.shape_cast %11 : vector<64xf32> to vector<64x1xf32>
    %cst_8 = arith.constant 1.280000e+02 : f32
    %13 = vector.broadcast %cst_8 : f32 to vector<64x1xf32>
    %14 = arith.divf %12, %13 : vector<64x1xf32>
    %cst_9 = arith.constant 9.99999974E-6 : f32
    %15 = vector.broadcast %cst_9 : f32 to vector<64x1xf32>
    %16 = arith.addf %14, %15 : vector<64x1xf32>
    %17 = math.rsqrt %16 : vector<64x1xf32>
    %18 = vector.broadcast %17 : vector<64x1xf32> to vector<64x128xf32>
    %19 = arith.mulf %9, %18 : vector<64x128xf32>
    %20 = vector.broadcast %2 : vector<1x128xf32> to vector<64x128xf32>
    %21 = arith.mulf %19, %20 : vector<64x128xf32>
    %22 = vector.broadcast %3 : vector<1x128xf32> to vector<64x128xf32>
    %23 = arith.addf %21, %22 : vector<64x128xf32>
    %c0_10 = arith.constant 0 : index
    %c0_11 = arith.constant 0 : index
    %24 = vector.load %arg4[%c0_10, %c0_11] : memref<128x128xf32, #tpu.memory_space<vmem>>, vector<128x128xf32>
    %cst_12 = arith.constant dense<0.000000e+00> : vector<64x128xf32>
    %25 = tpu.matmul %23, %24, %cst_12 {dimension_numbers = #tpu.dot_dimension_numbers<[1], [0], [0], [1], [0, 0, 1, 1], [], []>} : vector<64x128xf32>, vector<128x128xf32>, vector<64x128xf32> -> vector<64x128xf32>
    %c0_13 = arith.constant 0 : index
    %c0_14 = arith.constant 0 : index
    %26 = vector.load %arg5[%c0_13, %c0_14] : memref<1x128xf32, #tpu.memory_space<vmem>>, vector<1x128xf32>
    %27 = vector.broadcast %26 : vector<1x128xf32> to vector<64x128xf32>
    %28 = arith.addf %25, %27 : vector<64x128xf32>
    %c0_15 = arith.constant 0 : index
    %c0_16 = arith.constant 0 : index
    %29 = vector.load %arg6[%c0_15, %c0_16] : memref<128x128xf32, #tpu.memory_space<vmem>>, vector<128x128xf32>
    %cst_17 = arith.constant dense<0.000000e+00> : vector<64x128xf32>
    %30 = tpu.matmul %23, %29, %cst_17 {dimension_numbers = #tpu.dot_dimension_numbers<[1], [0], [0], [1], [0, 0, 1, 1], [], []>} : vector<64x128xf32>, vector<128x128xf32>, vector<64x128xf32> -> vector<64x128xf32>
    %c0_18 = arith.constant 0 : index
    %c0_19 = arith.constant 0 : index
    %31 = vector.load %arg7[%c0_18, %c0_19] : memref<1x128xf32, #tpu.memory_space<vmem>>, vector<1x128xf32>
    %32 = vector.broadcast %31 : vector<1x128xf32> to vector<64x128xf32>
    %33 = arith.addf %30, %32 : vector<64x128xf32>
    %c0_20 = arith.constant 0 : index
    %c0_21 = arith.constant 0 : index
    %34 = vector.load %arg8[%c0_20, %c0_21] : memref<128x128xf32, #tpu.memory_space<vmem>>, vector<128x128xf32>
    %cst_22 = arith.constant dense<0.000000e+00> : vector<64x128xf32>
    %35 = tpu.matmul %23, %34, %cst_22 {dimension_numbers = #tpu.dot_dimension_numbers<[1], [0], [0], [1], [0, 0, 1, 1], [], []>} : vector<64x128xf32>, vector<128x128xf32>, vector<64x128xf32> -> vector<64x128xf32>
    %c0_23 = arith.constant 0 : index
    %c0_24 = arith.constant 0 : index
    %36 = vector.load %arg9[%c0_23, %c0_24] : memref<1x128xf32, #tpu.memory_space<vmem>>, vector<1x128xf32>
    %37 = vector.broadcast %36 : vector<1x128xf32> to vector<64x128xf32>
    %38 = arith.addf %35, %37 : vector<64x128xf32>
    %39 = tpu.iota {dimensions = array<i32: 0>} : vector<3x4xi32>
    %40 = tpu.iota {dimensions = array<i32: 1>} : vector<3x4xi32>
    %c1_i32 = arith.constant 1 : i32
    %41 = vector.broadcast %c1_i32 : i32 to vector<3x4xi32>
    %42 = arith.addi %39, %41 : vector<3x4xi32>
    %43 = arith.cmpi sle, %40, %42 : vector<3x4xi32>
    %44 = vector.extract_strided_slice %28 {offsets = [0, 0], sizes = [64, 32], strides = [1, 1]} : vector<64x128xf32> to vector<64x32xf32>
    %45 = vector.shape_cast %44 : vector<64x32xf32> to vector<16x4x32xf32>
    %46 = vector.extract_strided_slice %33 {offsets = [0, 0], sizes = [64, 32], strides = [1, 1]} : vector<64x128xf32> to vector<64x32xf32>
    %47 = vector.shape_cast %46 : vector<64x32xf32> to vector<16x4x32xf32>
    %48 = vector.extract_strided_slice %38 {offsets = [0, 0], sizes = [64, 32], strides = [1, 1]} : vector<64x128xf32> to vector<64x32xf32>
    %49 = vector.shape_cast %48 : vector<64x32xf32> to vector<16x4x32xf32>
    %50 = vector.extract_strided_slice %45 {offsets = [0, 1, 0], sizes = [16, 3, 32], strides = [1, 1, 1]} : vector<16x4x32xf32> to vector<16x3x32xf32>
    "tpu.trace_start"() <{level = 10 : i32, message = "bqd,bkd->bqk"}> : () -> ()
    %cst_25 = arith.constant dense<0.000000e+00> : vector<16x3x4xf32>
    %51 = tpu.matmul %50, %47, %cst_25 {dimension_numbers = #tpu.dot_dimension_numbers<[2], [2], [1], [1], [0, 0, 0, 1, 1, 1], [0], [0]>} : vector<16x3x32xf32>, vector<16x4x32xf32>, vector<16x3x4xf32> -> vector<16x3x4xf32>
    "tpu.trace_stop"() : () -> ()
    %cst_26 = arith.constant 0.176776692 : f32
    %52 = vector.broadcast %cst_26 : f32 to vector<16x3x4xf32>
    %53 = arith.mulf %51, %52 : vector<16x3x4xf32>
    %54 = vector.shape_cast %43 : vector<3x4xi1> to vector<1x3x4xi1>
    %cst_27 = arith.constant -1.000000e+30 : f32
    %55 = vector.shape_cast %54 : vector<1x3x4xi1> to vector<1x3x4xi1>
    %56 = vector.broadcast %55 : vector<1x3x4xi1> to vector<16x3x4xi1>
    %57 = vector.broadcast %cst_27 : f32 to vector<16x3x4xf32>
    %58 = arith.select %56, %53, %57 : vector<16x3x4xi1>, vector<16x3x4xf32>
    %cst_28 = arith.constant dense<0xFF800000> : vector<16x3xf32>
    %59 = vector.multi_reduction <maximumf>, %58, %cst_28 [2] : vector<16x3x4xf32> to vector<16x3xf32>
    %60 = vector.shape_cast %59 : vector<16x3xf32> to vector<16x3x1xf32>
    %61 = vector.broadcast %60 : vector<16x3x1xf32> to vector<16x3x4xf32>
    %62 = arith.subf %58, %61 : vector<16x3x4xf32>
    %63 = math.exp %62 : vector<16x3x4xf32>
    %cst_29 = arith.constant dense<0.000000e+00> : vector<16x3xf32>
    %64 = vector.multi_reduction <add>, %63, %cst_29 [2] : vector<16x3x4xf32> to vector<16x3xf32>
    %65 = vector.shape_cast %64 : vector<16x3xf32> to vector<16x3x1xf32>
    %66 = vector.broadcast %65 : vector<16x3x1xf32> to vector<16x3x4xf32>
    %67 = arith.divf %63, %66 : vector<16x3x4xf32>
    "tpu.trace_start"() <{level = 10 : i32, message = "bqk,bkd->bqd"}> : () -> ()
    %cst_30 = arith.constant dense<0.000000e+00> : vector<16x3x32xf32>
    %68 = tpu.matmul %67, %49, %cst_30 {dimension_numbers = #tpu.dot_dimension_numbers<[2], [1], [1], [2], [0, 0, 0, 1, 1, 2], [0], [0]>} : vector<16x3x4xf32>, vector<16x4x32xf32>, vector<16x3x32xf32> -> vector<16x3x32xf32>
    "tpu.trace_stop"() : () -> ()
    %69 = vector.shape_cast %68 : vector<16x3x32xf32> to vector<48x32xf32>
    %70 = vector.extract_strided_slice %28 {offsets = [0, 32], sizes = [64, 32], strides = [1, 1]} : vector<64x128xf32> to vector<64x32xf32>
    %71 = vector.shape_cast %70 : vector<64x32xf32> to vector<16x4x32xf32>
    %72 = vector.extract_strided_slice %33 {offsets = [0, 32], sizes = [64, 32], strides = [1, 1]} : vector<64x128xf32> to vector<64x32xf32>
    %73 = vector.shape_cast %72 : vector<64x32xf32> to vector<16x4x32xf32>
    %74 = vector.extract_strided_slice %38 {offsets = [0, 32], sizes = [64, 32], strides = [1, 1]} : vector<64x128xf32> to vector<64x32xf32>
    %75 = vector.shape_cast %74 : vector<64x32xf32> to vector<16x4x32xf32>
    %76 = vector.extract_strided_slice %71 {offsets = [0, 1, 0], sizes = [16, 3, 32], strides = [1, 1, 1]} : vector<16x4x32xf32> to vector<16x3x32xf32>
    "tpu.trace_start"() <{level = 10 : i32, message = "bqd,bkd->bqk"}> : () -> ()
    %cst_31 = arith.constant dense<0.000000e+00> : vector<16x3x4xf32>
    %77 = tpu.matmul %76, %73, %cst_31 {dimension_numbers = #tpu.dot_dimension_numbers<[2], [2], [1], [1], [0, 0, 0, 1, 1, 1], [0], [0]>} : vector<16x3x32xf32>, vector<16x4x32xf32>, vector<16x3x4xf32> -> vector<16x3x4xf32>
    "tpu.trace_stop"() : () -> ()
    %cst_32 = arith.constant 0.176776692 : f32
    %78 = vector.broadcast %cst_32 : f32 to vector<16x3x4xf32>
    %79 = arith.mulf %77, %78 : vector<16x3x4xf32>
    %80 = vector.shape_cast %43 : vector<3x4xi1> to vector<1x3x4xi1>
    %cst_33 = arith.constant -1.000000e+30 : f32
    %81 = vector.shape_cast %80 : vector<1x3x4xi1> to vector<1x3x4xi1>
    %82 = vector.broadcast %81 : vector<1x3x4xi1> to vector<16x3x4xi1>
    %83 = vector.broadcast %cst_33 : f32 to vector<16x3x4xf32>
    %84 = arith.select %82, %79, %83 : vector<16x3x4xi1>, vector<16x3x4xf32>
    %cst_34 = arith.constant dense<0xFF800000> : vector<16x3xf32>
    %85 = vector.multi_reduction <maximumf>, %84, %cst_34 [2] : vector<16x3x4xf32> to vector<16x3xf32>
    %86 = vector.shape_cast %85 : vector<16x3xf32> to vector<16x3x1xf32>
    %87 = vector.broadcast %86 : vector<16x3x1xf32> to vector<16x3x4xf32>
    %88 = arith.subf %84, %87 : vector<16x3x4xf32>
    %89 = math.exp %88 : vector<16x3x4xf32>
    %cst_35 = arith.constant dense<0.000000e+00> : vector<16x3xf32>
    %90 = vector.multi_reduction <add>, %89, %cst_35 [2] : vector<16x3x4xf32> to vector<16x3xf32>
    %91 = vector.shape_cast %90 : vector<16x3xf32> to vector<16x3x1xf32>
    %92 = vector.broadcast %91 : vector<16x3x1xf32> to vector<16x3x4xf32>
    %93 = arith.divf %89, %92 : vector<16x3x4xf32>
    "tpu.trace_start"() <{level = 10 : i32, message = "bqk,bkd->bqd"}> : () -> ()
    %cst_36 = arith.constant dense<0.000000e+00> : vector<16x3x32xf32>
    %94 = tpu.matmul %93, %75, %cst_36 {dimension_numbers = #tpu.dot_dimension_numbers<[2], [1], [1], [2], [0, 0, 0, 1, 1, 2], [0], [0]>} : vector<16x3x4xf32>, vector<16x4x32xf32>, vector<16x3x32xf32> -> vector<16x3x32xf32>
    "tpu.trace_stop"() : () -> ()
    %95 = vector.shape_cast %94 : vector<16x3x32xf32> to vector<48x32xf32>
    %96 = vector.extract_strided_slice %28 {offsets = [0, 64], sizes = [64, 32], strides = [1, 1]} : vector<64x128xf32> to vector<64x32xf32>
    %97 = vector.shape_cast %96 : vector<64x32xf32> to vector<16x4x32xf32>
    %98 = vector.extract_strided_slice %33 {offsets = [0, 64], sizes = [64, 32], strides = [1, 1]} : vector<64x128xf32> to vector<64x32xf32>
    %99 = vector.shape_cast %98 : vector<64x32xf32> to vector<16x4x32xf32>
    %100 = vector.extract_strided_slice %38 {offsets = [0, 64], sizes = [64, 32], strides = [1, 1]} : vector<64x128xf32> to vector<64x32xf32>
    %101 = vector.shape_cast %100 : vector<64x32xf32> to vector<16x4x32xf32>
    %102 = vector.extract_strided_slice %97 {offsets = [0, 1, 0], sizes = [16, 3, 32], strides = [1, 1, 1]} : vector<16x4x32xf32> to vector<16x3x32xf32>
    "tpu.trace_start"() <{level = 10 : i32, message = "bqd,bkd->bqk"}> : () -> ()
    %cst_37 = arith.constant dense<0.000000e+00> : vector<16x3x4xf32>
    %103 = tpu.matmul %102, %99, %cst_37 {dimension_numbers = #tpu.dot_dimension_numbers<[2], [2], [1], [1], [0, 0, 0, 1, 1, 1], [0], [0]>} : vector<16x3x32xf32>, vector<16x4x32xf32>, vector<16x3x4xf32> -> vector<16x3x4xf32>
    "tpu.trace_stop"() : () -> ()
    %cst_38 = arith.constant 0.176776692 : f32
    %104 = vector.broadcast %cst_38 : f32 to vector<16x3x4xf32>
    %105 = arith.mulf %103, %104 : vector<16x3x4xf32>
    %106 = vector.shape_cast %43 : vector<3x4xi1> to vector<1x3x4xi1>
    %cst_39 = arith.constant -1.000000e+30 : f32
    %107 = vector.shape_cast %106 : vector<1x3x4xi1> to vector<1x3x4xi1>
    %108 = vector.broadcast %107 : vector<1x3x4xi1> to vector<16x3x4xi1>
    %109 = vector.broadcast %cst_39 : f32 to vector<16x3x4xf32>
    %110 = arith.select %108, %105, %109 : vector<16x3x4xi1>, vector<16x3x4xf32>
    %cst_40 = arith.constant dense<0xFF800000> : vector<16x3xf32>
    %111 = vector.multi_reduction <maximumf>, %110, %cst_40 [2] : vector<16x3x4xf32> to vector<16x3xf32>
    %112 = vector.shape_cast %111 : vector<16x3xf32> to vector<16x3x1xf32>
    %113 = vector.broadcast %112 : vector<16x3x1xf32> to vector<16x3x4xf32>
    %114 = arith.subf %110, %113 : vector<16x3x4xf32>
    %115 = math.exp %114 : vector<16x3x4xf32>
    %cst_41 = arith.constant dense<0.000000e+00> : vector<16x3xf32>
    %116 = vector.multi_reduction <add>, %115, %cst_41 [2] : vector<16x3x4xf32> to vector<16x3xf32>
    %117 = vector.shape_cast %116 : vector<16x3xf32> to vector<16x3x1xf32>
    %118 = vector.broadcast %117 : vector<16x3x1xf32> to vector<16x3x4xf32>
    %119 = arith.divf %115, %118 : vector<16x3x4xf32>
    "tpu.trace_start"() <{level = 10 : i32, message = "bqk,bkd->bqd"}> : () -> ()
    %cst_42 = arith.constant dense<0.000000e+00> : vector<16x3x32xf32>
    %120 = tpu.matmul %119, %101, %cst_42 {dimension_numbers = #tpu.dot_dimension_numbers<[2], [1], [1], [2], [0, 0, 0, 1, 1, 2], [0], [0]>} : vector<16x3x4xf32>, vector<16x4x32xf32>, vector<16x3x32xf32> -> vector<16x3x32xf32>
    "tpu.trace_stop"() : () -> ()
    %121 = vector.shape_cast %120 : vector<16x3x32xf32> to vector<48x32xf32>
    %122 = vector.extract_strided_slice %28 {offsets = [0, 96], sizes = [64, 32], strides = [1, 1]} : vector<64x128xf32> to vector<64x32xf32>
    %123 = vector.shape_cast %122 : vector<64x32xf32> to vector<16x4x32xf32>
    %124 = vector.extract_strided_slice %33 {offsets = [0, 96], sizes = [64, 32], strides = [1, 1]} : vector<64x128xf32> to vector<64x32xf32>
    %125 = vector.shape_cast %124 : vector<64x32xf32> to vector<16x4x32xf32>
    %126 = vector.extract_strided_slice %38 {offsets = [0, 96], sizes = [64, 32], strides = [1, 1]} : vector<64x128xf32> to vector<64x32xf32>
    %127 = vector.shape_cast %126 : vector<64x32xf32> to vector<16x4x32xf32>
    %128 = vector.extract_strided_slice %123 {offsets = [0, 1, 0], sizes = [16, 3, 32], strides = [1, 1, 1]} : vector<16x4x32xf32> to vector<16x3x32xf32>
    "tpu.trace_start"() <{level = 10 : i32, message = "bqd,bkd->bqk"}> : () -> ()
    %cst_43 = arith.constant dense<0.000000e+00> : vector<16x3x4xf32>
    %129 = tpu.matmul %128, %125, %cst_43 {dimension_numbers = #tpu.dot_dimension_numbers<[2], [2], [1], [1], [0, 0, 0, 1, 1, 1], [0], [0]>} : vector<16x3x32xf32>, vector<16x4x32xf32>, vector<16x3x4xf32> -> vector<16x3x4xf32>
    "tpu.trace_stop"() : () -> ()
    %cst_44 = arith.constant 0.176776692 : f32
    %130 = vector.broadcast %cst_44 : f32 to vector<16x3x4xf32>
    %131 = arith.mulf %129, %130 : vector<16x3x4xf32>
    %132 = vector.shape_cast %43 : vector<3x4xi1> to vector<1x3x4xi1>
    %cst_45 = arith.constant -1.000000e+30 : f32
    %133 = vector.shape_cast %132 : vector<1x3x4xi1> to vector<1x3x4xi1>
    %134 = vector.broadcast %133 : vector<1x3x4xi1> to vector<16x3x4xi1>
    %135 = vector.broadcast %cst_45 : f32 to vector<16x3x4xf32>
    %136 = arith.select %134, %131, %135 : vector<16x3x4xi1>, vector<16x3x4xf32>
    %cst_46 = arith.constant dense<0xFF800000> : vector<16x3xf32>
    %137 = vector.multi_reduction <maximumf>, %136, %cst_46 [2] : vector<16x3x4xf32> to vector<16x3xf32>
    %138 = vector.shape_cast %137 : vector<16x3xf32> to vector<16x3x1xf32>
    %139 = vector.broadcast %138 : vector<16x3x1xf32> to vector<16x3x4xf32>
    %140 = arith.subf %136, %139 : vector<16x3x4xf32>
    %141 = math.exp %140 : vector<16x3x4xf32>
    %cst_47 = arith.constant dense<0.000000e+00> : vector<16x3xf32>
    %142 = vector.multi_reduction <add>, %141, %cst_47 [2] : vector<16x3x4xf32> to vector<16x3xf32>
    %143 = vector.shape_cast %142 : vector<16x3xf32> to vector<16x3x1xf32>
    %144 = vector.broadcast %143 : vector<16x3x1xf32> to vector<16x3x4xf32>
    %145 = arith.divf %141, %144 : vector<16x3x4xf32>
    "tpu.trace_start"() <{level = 10 : i32, message = "bqk,bkd->bqd"}> : () -> ()
    %cst_48 = arith.constant dense<0.000000e+00> : vector<16x3x32xf32>
    %146 = tpu.matmul %145, %127, %cst_48 {dimension_numbers = #tpu.dot_dimension_numbers<[2], [1], [1], [2], [0, 0, 0, 1, 1, 2], [0], [0]>} : vector<16x3x4xf32>, vector<16x4x32xf32>, vector<16x3x32xf32> -> vector<16x3x32xf32>
    "tpu.trace_stop"() : () -> ()
    %147 = vector.shape_cast %146 : vector<16x3x32xf32> to vector<48x32xf32>
    %148 = tpu.concatenate %69, %95, %121, %147 in 1 : vector<48x32xf32>, vector<48x32xf32>, vector<48x32xf32>, vector<48x32xf32> -> vector<48x128xf32>
    %149 = vector.extract_strided_slice %0 {offsets = [0, 1, 0], sizes = [16, 3, 128], strides = [1, 1, 1]} : vector<16x4x128xf32> to vector<16x3x128xf32>
    %150 = vector.shape_cast %149 : vector<16x3x128xf32> to vector<48x128xf32>
    %c0_49 = arith.constant 0 : index
    %c0_50 = arith.constant 0 : index
    %151 = vector.load %arg10[%c0_49, %c0_50] : memref<128x128xf32, #tpu.memory_space<vmem>>, vector<128x128xf32>
    %cst_51 = arith.constant dense<0.000000e+00> : vector<48x128xf32>
    %152 = tpu.matmul %148, %151, %cst_51 {dimension_numbers = #tpu.dot_dimension_numbers<[1], [0], [0], [1], [0, 0, 1, 1], [], []>} : vector<48x128xf32>, vector<128x128xf32>, vector<48x128xf32> -> vector<48x128xf32>
    %c0_52 = arith.constant 0 : index
    %c0_53 = arith.constant 0 : index
    %153 = vector.load %arg11[%c0_52, %c0_53] : memref<1x128xf32, #tpu.memory_space<vmem>>, vector<1x128xf32>
    %154 = vector.broadcast %153 : vector<1x128xf32> to vector<48x128xf32>
    %155 = arith.addf %152, %154 : vector<48x128xf32>
    %156 = arith.addf %155, %150 : vector<48x128xf32>
    %c0_54 = arith.constant 0 : index
    %c0_55 = arith.constant 0 : index
    %157 = vector.load %arg12[%c0_54, %c0_55] : memref<1x128xf32, #tpu.memory_space<vmem>>, vector<1x128xf32>
    %c0_56 = arith.constant 0 : index
    %c0_57 = arith.constant 0 : index
    %158 = vector.load %arg13[%c0_56, %c0_57] : memref<1x128xf32, #tpu.memory_space<vmem>>, vector<1x128xf32>
    %cst_58 = arith.constant dense<0.000000e+00> : vector<48xf32>
    %159 = vector.multi_reduction <add>, %156, %cst_58 [1] : vector<48x128xf32> to vector<48xf32>
    %160 = vector.shape_cast %159 : vector<48xf32> to vector<48x1xf32>
    %cst_59 = arith.constant 1.280000e+02 : f32
    %161 = vector.broadcast %cst_59 : f32 to vector<48x1xf32>
    %162 = arith.divf %160, %161 : vector<48x1xf32>
    %163 = vector.broadcast %162 : vector<48x1xf32> to vector<48x128xf32>
    %164 = arith.subf %156, %163 : vector<48x128xf32>
    %165 = arith.mulf %164, %164 : vector<48x128xf32>
    %cst_60 = arith.constant dense<0.000000e+00> : vector<48xf32>
    %166 = vector.multi_reduction <add>, %165, %cst_60 [1] : vector<48x128xf32> to vector<48xf32>
    %167 = vector.shape_cast %166 : vector<48xf32> to vector<48x1xf32>
    %cst_61 = arith.constant 1.280000e+02 : f32
    %168 = vector.broadcast %cst_61 : f32 to vector<48x1xf32>
    %169 = arith.divf %167, %168 : vector<48x1xf32>
    %cst_62 = arith.constant 9.99999974E-6 : f32
    %170 = vector.broadcast %cst_62 : f32 to vector<48x1xf32>
    %171 = arith.addf %169, %170 : vector<48x1xf32>
    %172 = math.rsqrt %171 : vector<48x1xf32>
    %173 = vector.broadcast %172 : vector<48x1xf32> to vector<48x128xf32>
    %174 = arith.mulf %164, %173 : vector<48x128xf32>
    %175 = vector.broadcast %157 : vector<1x128xf32> to vector<48x128xf32>
    %176 = arith.mulf %174, %175 : vector<48x128xf32>
    %177 = vector.broadcast %158 : vector<1x128xf32> to vector<48x128xf32>
    %178 = arith.addf %176, %177 : vector<48x128xf32>
    %c0_63 = arith.constant 0 : index
    %c0_64 = arith.constant 0 : index
    %179 = vector.load %arg14[%c0_63, %c0_64] : memref<128x512xf32, #tpu.memory_space<vmem>>, vector<128x512xf32>
    %cst_65 = arith.constant dense<0.000000e+00> : vector<48x512xf32>
    %180 = tpu.matmul %178, %179, %cst_65 {dimension_numbers = #tpu.dot_dimension_numbers<[1], [0], [0], [1], [0, 0, 1, 1], [], []>} : vector<48x128xf32>, vector<128x512xf32>, vector<48x512xf32> -> vector<48x512xf32>
    %c0_66 = arith.constant 0 : index
    %c0_67 = arith.constant 0 : index
    %181 = vector.load %arg15[%c0_66, %c0_67] : memref<1x512xf32, #tpu.memory_space<vmem>>, vector<1x512xf32>
    %182 = vector.broadcast %181 : vector<1x512xf32> to vector<48x512xf32>
    %183 = arith.addf %180, %182 : vector<48x512xf32>
    %cst_68 = arith.constant 5.000000e-01 : f32
    %184 = vector.broadcast %cst_68 : f32 to vector<48x512xf32>
    %185 = arith.mulf %184, %183 : vector<48x512xf32>
    %cst_69 = arith.constant 4.471500e-02 : f32
    %186 = vector.broadcast %cst_69 : f32 to vector<48x512xf32>
    %187 = arith.mulf %186, %183 : vector<48x512xf32>
    %188 = arith.mulf %187, %183 : vector<48x512xf32>
    %189 = arith.mulf %188, %183 : vector<48x512xf32>
    %190 = arith.addf %183, %189 : vector<48x512xf32>
    %cst_70 = arith.constant 0.797884583 : f32
    %191 = vector.broadcast %cst_70 : f32 to vector<48x512xf32>
    %192 = arith.mulf %191, %190 : vector<48x512xf32>
    %193 = math.tanh %192 : vector<48x512xf32>
    %cst_71 = arith.constant 1.000000e+00 : f32
    %194 = vector.broadcast %cst_71 : f32 to vector<48x512xf32>
    %195 = arith.addf %194, %193 : vector<48x512xf32>
    %196 = arith.mulf %185, %195 : vector<48x512xf32>
    %c0_72 = arith.constant 0 : index
    %c0_73 = arith.constant 0 : index
    %197 = vector.load %arg16[%c0_72, %c0_73] : memref<512x128xf32, #tpu.memory_space<vmem>>, vector<512x128xf32>
    %cst_74 = arith.constant dense<0.000000e+00> : vector<48x128xf32>
    %198 = tpu.matmul %196, %197, %cst_74 {dimension_numbers = #tpu.dot_dimension_numbers<[1], [0], [0], [1], [0, 0, 1, 1], [], []>} : vector<48x512xf32>, vector<512x128xf32>, vector<48x128xf32> -> vector<48x128xf32>
    %199 = arith.addf %156, %198 : vector<48x128xf32>
    %c0_75 = arith.constant 0 : index
    %c0_76 = arith.constant 0 : index
    %200 = vector.load %arg17[%c0_75, %c0_76] : memref<1x128xf32, #tpu.memory_space<vmem>>, vector<1x128xf32>
    %201 = vector.broadcast %200 : vector<1x128xf32> to vector<48x128xf32>
    %202 = arith.addf %199, %201 : vector<48x128xf32>
    %203 = vector.shape_cast %202 : vector<48x128xf32> to vector<16x3x128xf32>
    %c0_77 = arith.constant 0 : index
    %c0_78 = arith.constant 0 : index
    %c0_79 = arith.constant 0 : index
    %204 = vector.load %arg18[%c0_77, %c0_78, %c0_79] : memref<16x3x128xf32, #tpu.memory_space<vmem>>, vector<16x3x128xf32>
    tpu.vector_store %arg18[%c0_77, %c0_78, %c0_79], %203 {strides = array<i32>} : memref<16x3x128xf32, #tpu.memory_space<vmem>>, vector<16x3x128xf32>,
    return
  }
  func.func @transform_0(%arg0: i32) -> (i32, i32, i32) {
    %c0_i32 = arith.constant 0 : i32
    %c0_i32_0 = arith.constant 0 : i32
    %c0_i32_1 = arith.constant 0 : i32
    return %arg0, %c0_i32, %c0_i32_0 : i32, i32, i32
  }
  func.func @transform_1(%arg0: i32) -> (i32, i32) {
    %c0_i32 = arith.constant 0 : i32
    %c0_i32_0 = arith.constant 0 : i32
    %c0_i32_1 = arith.constant 0 : i32
    return %c0_i32, %c0_i32_0 : i32, i32
  }
  func.func @transform_2(%arg0: i32) -> (i32, i32) {
    %c0_i32 = arith.constant 0 : i32
    %c0_i32_0 = arith.constant 0 : i32
    %c0_i32_1 = arith.constant 0 : i32
    return %c0_i32, %c0_i32_0 : i32, i32
  }
  func.func @transform_3(%arg0: i32) -> (i32, i32) {
    %c0_i32 = arith.constant 0 : i32
    %c0_i32_0 = arith.constant 0 : i32
    %c0_i32_1 = arith.constant 0 : i32
    return %c0_i32, %c0_i32_0 : i32, i32
  }
  func.func @transform_4(%arg0: i32) -> (i32, i32) {
    %c0_i32 = arith.constant 0 : i32
    %c0_i32_0 = arith.constant 0 : i32
    %c0_i32_1 = arith.constant 0 : i32
    return %c0_i32, %c0_i32_0 : i32, i32
  }
  func.func @transform_5(%arg0: i32) -> (i32, i32) {
    %c0_i32 = arith.constant 0 : i32
    %c0_i32_0 = arith.constant 0 : i32
    %c0_i32_1 = arith.constant 0 : i32
    return %c0_i32, %c0_i32_0 : i32, i32
  }
  func.func @transform_6(%arg0: i32) -> (i32, i32) {
    %c0_i32 = arith.constant 0 : i32
    %c0_i32_0 = arith.constant 0 : i32
    %c0_i32_1 = arith.constant 0 : i32
    return %c0_i32, %c0_i32_0 : i32, i32
  }
  func.func @transform_7(%arg0: i32) -> (i32, i32) {
    %c0_i32 = arith.constant 0 : i32
    %c0_i32_0 = arith.constant 0 : i32
    %c0_i32_1 = arith.constant 0 : i32
    return %c0_i32, %c0_i32_0 : i32, i32
  }
  func.func @transform_8(%arg0: i32) -> (i32, i32) {
    %c0_i32 = arith.constant 0 : i32
    %c0_i32_0 = arith.constant 0 : i32
    %c0_i32_1 = arith.constant 0 : i32
    return %c0_i32, %c0_i32_0 : i32, i32
  }
  func.func @transform_9(%arg0: i32) -> (i32, i32) {
    %c0_i32 = arith.constant 0 : i32
    %c0_i32_0 = arith.constant 0 : i32
    %c0_i32_1 = arith.constant 0 : i32
    return %c0_i32, %c0_i32_0 : i32, i32
  }
  func.func @transform_10(%arg0: i32) -> (i32, i32) {
    %c0_i32 = arith.constant 0 : i32
    %c0_i32_0 = arith.constant 0 : i32
    %c0_i32_1 = arith.constant 0 : i32
    return %c0_i32, %c0_i32_0 : i32, i32
  }
  func.func @transform_11(%arg0: i32) -> (i32, i32) {
    %c0_i32 = arith.constant 0 : i32
    %c0_i32_0 = arith.constant 0 : i32
    %c0_i32_1 = arith.constant 0 : i32
    return %c0_i32, %c0_i32_0 : i32, i32
  }
  func.func @transform_12(%arg0: i32) -> (i32, i32) {
    %c0_i32 = arith.constant 0 : i32
    %c0_i32_0 = arith.constant 0 : i32
    %c0_i32_1 = arith.constant 0 : i32
    return %c0_i32, %c0_i32_0 : i32, i32
  }
  func.func @transform_13(%arg0: i32) -> (i32, i32) {
    %c0_i32 = arith.constant 0 : i32
    %c0_i32_0 = arith.constant 0 : i32
    %c0_i32_1 = arith.constant 0 : i32
    return %c0_i32, %c0_i32_0 : i32, i32
  }
  func.func @transform_14(%arg0: i32) -> (i32, i32) {
    %c0_i32 = arith.constant 0 : i32
    %c0_i32_0 = arith.constant 0 : i32
    %c0_i32_1 = arith.constant 0 : i32
    return %c0_i32, %c0_i32_0 : i32, i32
  }
  func.func @transform_15(%arg0: i32) -> (i32, i32) {
    %c0_i32 = arith.constant 0 : i32
    %c0_i32_0 = arith.constant 0 : i32
    %c0_i32_1 = arith.constant 0 : i32
    return %c0_i32, %c0_i32_0 : i32, i32
  }
  func.func @transform_16(%arg0: i32) -> (i32, i32) {
    %c0_i32 = arith.constant 0 : i32
    %c0_i32_0 = arith.constant 0 : i32
    %c0_i32_1 = arith.constant 0 : i32
    return %c0_i32, %c0_i32_0 : i32, i32
  }
  func.func @transform_17(%arg0: i32) -> (i32, i32, i32) {
    %c0_i32 = arith.constant 0 : i32
    %c0_i32_0 = arith.constant 0 : i32
    %c0_i32_1 = arith.constant 0 : i32
    return %arg0, %c0_i32, %c0_i32_0 : i32, i32, i32
  }
}

</mosaic_0001>

<bundles_post_ra>
// kernel: structured_transformer_block_forward.2
= control target key start
LH: loop header
LB: loop body
LE: loop exit
PB: predicated region body
PF: predicated region fallthrough
CT: control target
= control target key end

     0   :  { %s3623_s0 = inlined_call_operand.vmem [shape: f32[2,8,128], index: 0, kind: input, shape index: {}]   ;;  %s3624_s1 = inlined_call_operand.vmem [shape: f32[1,128], index: 1, kind: input, shape index: {}]   ;;  %s3625_s2 = inlined_call_operand.vmem [shape: f32[1,128], index: 2, kind: input, shape index: {}]   ;;  %s3626_s3 = inlined_call_operand.hbm [shape: f32[128,128], index: 3, kind: input, shape index: {}]   ;;  %s3627_s4 = inlined_call_operand.vmem [shape: f32[1,128], index: 4, kind: input, shape index: {}]   ;;  %s3628_s5 = inlined_call_operand.hbm [shape: f32[128,128], index: 5, kind: input, shape index: {}]   ;;  %s3629_s6 = inlined_call_operand.vmem [shape: f32[1,128], index: 6, kind: input, shape index: {}]   ;;  %s3630_s7 = inlined_call_operand.hbm [shape: f32[128,128], index: 7, kind: input, shape index: {}]   ;;  %s3631_s8 = inlined_call_operand.vmem [shape: f32[1,128], index: 8, kind: input, shape index: {}]   ;;  %s3632_s9 = inlined_call_operand.hbm [shape: f32[128,128], index: 9, kind: input, shape index: {}]   ;;  %s3633_s10 = inlined_call_operand.vmem [shape: f32[1,128], index: 10, kind: input, shape index: {}]   ;;  %s3634_s11 = inlined_call_operand.vmem [shape: f32[1,128], index: 11, kind: input, shape index: {}]   ;;  %s3635_s12 = inlined_call_operand.vmem [shape: f32[1,128], index: 12, kind: input, shape index: {}]   ;;  %s3636_s13 = inlined_call_operand.hbm [shape: f32[128,512], index: 13, kind: input, shape index: {}]   ;;  %s3637_s14 = inlined_call_operand.vmem [shape: f32[1,512], index: 14, kind: input, shape index: {}]   ;;  %s3638_s15 = inlined_call_operand.hbm [shape: f32[512,128], index: 15, kind: input, shape index: {}]   ;;  %s3639_s16 = inlined_call_operand.vmem [shape: f32[1,128], index: 16, kind: input, shape index: {}]   ;;  %s3640_s17 = inlined_call_operand.vmem [shape: f32[2,8,128], index: 17, kind: output, shape index: {}]  }
   0x1   :  { %3642 = sst [smem:[#allocation16_spill]] %s3623_s0 }
   0x2   :  { %3643 = sst [smem:[#allocation17_spill]] %s3624_s1 }
   0x3   :  { %22 = vsyncpa [#allocation3], 0 }
   0x4   :  { %23 = vsyncpa [#allocation5], 0 }
   0x5   :  { %24 = vsyncpa [#allocation8], 0 }
   0x6   :  { %25 = vsyncpa [#allocation11], 0  ;;  %s3179_s24 = smov [#allocation4]   ;;  %s3180_s26 = smov [#allocation7]  }
   0x7   :  { %s51_s25 = sshll.u32 %s3179_s24, 4  ;;  %s79_s27 = sshll.u32 %s3180_s26, 4  ;;  %s52_s25 = int_to_ptr.vmem [resolvable:$true] %s51_s25  ;;  %s80_s27 = int_to_ptr.vmem [resolvable:$true] %s79_s27 }
   0x8   :  { %s3059_s28 = scalar_lea.vmem %s52_s25, 2048  ;;  %p3064_p1 = scmp.lt.s32.totalorder %s52_s25, %s52_s25 }
   0x9   :  { %p3060_p0 = scmp.ne.s32.totalorder %s52_s25, %s3059_s28  ;;  %p3065_p2 = scmp.lt.s32.totalorder %s3059_s28, %s3059_s28 }
   0xb   :  { %p3066_p3 = por %p3065_p2, %p3064_p1 }
   0xd   :  { %p3067_p4 = pnand %p3066_p3, %p3060_p0 }
   0xf   :  { %3070 = shalt.err (!%p3067_p4)
}
  0x10   :  { %s3181_s29 = smov 128   ;;  %s3182_s0 = smov 8  }
  0x11   :  { %57 = dma.hbm_to_vmem [thread:$0]  %s3628_s5, 2048, %s52_s25, [#allocation5], %s3181_s29, %s3181_s29, %s3182_s0  }
  0x12   :  { %s3079_s19 = scalar_lea.vmem %s80_s27, 2048  ;;  %p3084_p6 = scmp.lt.s32.totalorder %s80_s27, %s80_s27 }
  0x13   :  { %p3080_p5 = scmp.ne.s32.totalorder %s80_s27, %s3079_s19  ;;  %p3085_p7 = scmp.lt.s32.totalorder %s3079_s19, %s3079_s19 }
  0x15   :  { %p3086_p8 = por %p3085_p7, %p3084_p6 }
  0x17   :  { %p3087_p9 = pnand %p3086_p8, %p3080_p5 }
  0x19   :  { %3090 = shalt.err (!%p3087_p9)
}
  0x1a   :  { %85 = dma.hbm_to_vmem [thread:$0]  %s3632_s9, 2048, %s80_s27, [#allocation8], %s3181_s29, %s3181_s29, %s3182_s0  }
  0x1b   :  { %s3183_s21 = smov [#allocation2]   ;;  %s3184_s23 = smov [#allocation6]  }
  0x1c   :  { %s37_s22 = sshll.u32 %s3183_s21, 4  ;;  %s65_s24 = sshll.u32 %s3184_s23, 4  ;;  %s38_s22 = int_to_ptr.vmem [resolvable:$true] %s37_s22  ;;  %s66_s24 = int_to_ptr.vmem [resolvable:$true] %s65_s24 }
  0x1d   :  { %s3099_s5 = scalar_lea.vmem %s38_s22, 2048  ;;  %p3104_p11 = scmp.lt.s32.totalorder %s38_s22, %s38_s22 }
  0x1e   :  { %p3100_p10 = scmp.ne.s32.totalorder %s38_s22, %s3099_s5  ;;  %p3105_p12 = scmp.lt.s32.totalorder %s3099_s5, %s3099_s5 }
  0x20   :  { %p3106_p13 = por %p3105_p12, %p3104_p11 }
  0x22   :  { %p3107_p0 = pnand %p3106_p13, %p3100_p10 }
  0x24   :  { %3110 = shalt.err (!%p3107_p0)
}
  0x25   :  { %43 = dma.hbm_to_vmem [thread:$0]  %s3626_s3, 2048, %s38_s22, [#allocation3], %s3181_s29, %s3181_s29, %s3182_s0  }
  0x26   :  { %s3119_s9 = scalar_lea.vmem %s66_s24, 2048  ;;  %p3124_p2 = scmp.lt.s32.totalorder %s66_s24, %s66_s24 }
  0x27   :  { %p3120_p1 = scmp.ne.s32.totalorder %s66_s24, %s3119_s9  ;;  %p3125_p3 = scmp.lt.s32.totalorder %s3119_s9, %s3119_s9 }
  0x29   :  { %p3126_p4 = por %p3125_p3, %p3124_p2 }
  0x2b   :  { %p3127_p5 = pnand %p3126_p4, %p3120_p1 }
  0x2d   :  { %3130 = shalt.err (!%p3127_p5)
}
  0x2e   :  { %71 = dma.hbm_to_vmem [thread:$0]  %s3630_s7, 2048, %s66_s24, [#allocation5], %s3181_s29, %s3181_s29, %s3182_s0  }
  0x2f   :  { %s3185_s30 = smov [#allocation9]  }
  0x30   :  { %s97_s18 = sshll.u32 %s3185_s30, 4  ;;  %s98_s18 = int_to_ptr.vmem [resolvable:$true] %s97_s18 }
  0x31   :  { %s3139_s19 = scalar_lea.vmem %s98_s18, 8192  ;;  %p3144_p7 = scmp.lt.s32.totalorder %s98_s18, %s98_s18 }
  0x32   :  { %p3140_p6 = scmp.ne.s32.totalorder %s98_s18, %s3139_s19  ;;  %p3145_p8 = scmp.lt.s32.totalorder %s3139_s19, %s3139_s19 }
  0x34   :  { %p3146_p9 = por %p3145_p8, %p3144_p7 }
  0x36   :  { %p3147_p10 = pnand %p3146_p9, %p3140_p6 }
  0x38   :  { %3150 = shalt.err (!%p3147_p10)
}
  0x39   :  { %s3186_s3 = smov 512   ;;  %s3187_s1 = smov 32  }
  0x3a   :  { %103 = dma.hbm_to_vmem [thread:$0]  %s3636_s13, 8192, %s98_s18, [#allocation8], %s3186_s3, %s3186_s3, %s3187_s1  }
  0x3b   :  { %s3188_s22 = smov [#allocation10]  }
  0x3c   :  { %s111_s23 = sshll.u32 %s3188_s22, 4  ;;  %s112_s23 = int_to_ptr.vmem [resolvable:$true] %s111_s23 }
  0x3d   :  { %s3159_s7 = scalar_lea.vmem %s112_s23, 8192  ;;  %p3164_p12 = scmp.lt.s32.totalorder %s112_s23, %s112_s23 }
  0x3e   :  { %p3160_p11 = scmp.ne.s32.totalorder %s112_s23, %s3159_s7  ;;  %p3165_p13 = scmp.lt.s32.totalorder %s3159_s7, %s3159_s7 }
  0x40   :  { %p3166_p0 = por %p3165_p13, %p3164_p12 }
  0x42   :  { %p3167_p1 = pnand %p3166_p0, %p3160_p11 }
  0x44   :  { %3170 = shalt.err (!%p3167_p1)
}
  0x45   :  { %117 = dma.hbm_to_vmem [thread:$0]  %s3638_s15, 8192, %s112_s23, [#allocation11], %s3181_s29, %s3181_s29, %s3182_s0  }
  0x46   :  { %3171 = dma.done.wait [#allocation3], 2048  }
  0x47   :  { %3172 = vsyncadd [#allocation3], 4294965248 }
  0x48   :  { %3173 = dma.done.wait [#allocation5], 4096  }
  0x49   :  { %3174 = vsyncadd [#allocation5], 4294963200 }
  0x4a   :  { %3175 = dma.done.wait [#allocation8], 10240  }
  0x4b   :  { %3176 = vsyncadd [#allocation8], 4294957056 }
  0x4c   :  { %3177 = dma.done.wait [#allocation11], 8192  }
  0x4d   :  { %3178 = vsyncadd [#allocation11], 4294959104  ;;  %s3644_s26 = sld [smem:[#allocation16_spill]]  ;;  %v196_v2 = vld [vmem:[#allocation2 + $0x78] sm:$0xff]  ;;  %v195_v4 = vld [vmem:[#allocation2 + $0x70] sm:$0xff]  ;;  %vm3190_vm0 = vmmov 0  }
  0x4e   :  { %v294_v3 = vld [vmem:[#allocation4 + $0x78] sm:$0xff]  ;;  %2744 = vmatprep.subr.mxu0 %v196_v2  ;;  %v293_v5 = vld [vmem:[#allocation4 + $0x70] sm:$0xff]  ;;  %v194_v6 = vld [vmem:[#allocation2 + $0x68] sm:$0xff]  ;;  %s3645_s0 = sld [smem:[#allocation17_spill]]  ;;  %vm480_vm1 = vcmask 261120   ;;  %vm639_vm3 = vcmask 64512  }
  0x4f   :  { %2779 = vmatprep.subr.mxu1 %v294_v3  ;;  %2745 = vmatpush3.msra.mxu0 %v196_v2  ;;  %v292_v15 = vld [vmem:[#allocation4 + $0x68] sm:$0xff]  ;;  %v193_v16 = vld [vmem:[#allocation2 + $0x60] sm:$0xff]  ;;  %v192_v18 = vld [vmem:[#allocation2 + $0x58] sm:$0xff]  ;;  %s3192_s20 = smov 64   ;;  %vm1838_vm4 = vcmask 523264   ;;  %vm1841_vm5 = vcmask 785408  }
  0x50   :  { %2780 = vmatpush3.msra.mxu1 %v294_v3  ;;  %2746 = vmatprep.subr.mxu0 %v195_v4  ;;  %v291_v17 = vld [vmem:[#allocation4 + $0x60] sm:$0xff]  ;;  %v290_v19 = vld [vmem:[#allocation4 + $0x58] sm:$0xff]  ;;  %v191_v20 = vld [vmem:[#allocation2 + $0x50] sm:$0xff] }
  0x51   :  { %2781 = vmatprep.subr.mxu1 %v293_v5  ;;  %2747 = vmatpush3.msra.mxu0 %v195_v4  ;;  %v289_v21 = vld [vmem:[#allocation4 + $0x50] sm:$0xff]  ;;  %v190_v22 = vld [vmem:[#allocation2 + $0x48] sm:$0xff]  ;;  %v189_v24 = vld [vmem:[#allocation2 + $0x40] sm:$0xff] }
  0x52   :  { %2782 = vmatpush3.msra.mxu1 %v293_v5  ;;  %2748 = vmatprep.subr.mxu0 %v194_v6  ;;  %v288_v23 = vld [vmem:[#allocation4 + $0x48] sm:$0xff]  ;;  %v287_v25 = vld [vmem:[#allocation4 + $0x40] sm:$0xff]  ;;  %v188_v26 = vld [vmem:[#allocation2 + $0x38] sm:$0xff] }
  0x53   :  { %v138_v0 = vld [vmem:[%s3644_s26] sm:$0xff]  ;;  %v139_v1 = vld [vmem:[%s3644_s26 + $0x8] sm:$0xff]  ;;  %2749 = vmatpush3.msra.mxu0 %v194_v6  ;;  %2783 = vmatprep.subr.mxu1 %v292_v15  ;;  %v286_v27 = vld [vmem:[#allocation4 + $0x38] sm:$0xff] }
  0x54   :  { %142 = vadd.xlane.f32.xlu0 %v138_v0  ;;  %2750 = vmatprep.subr.mxu0 %v193_v16  ;;  %v187_v28 = vld [vmem:[#allocation2 + $0x30] sm:$0xff]  ;;  %v186_v30 = vld [vmem:[#allocation2 + $0x28] sm:$0xff]  ;;  %v185_v32 = vld [vmem:[#allocation2 + $0x20] sm:$0xff] }
  0x55   :  { %2784 = vmatpush3.msra.mxu1 %v292_v15  ;;  %2751 = vmatpush3.msra.mxu0 %v193_v16  ;;  %v285_v29 = vld [vmem:[#allocation4 + $0x30] sm:$0xff]  ;;  %v284_v31 = vld [vmem:[#allocation4 + $0x28] sm:$0xff]  ;;  %v283_v33 = vld [vmem:[#allocation4 + $0x20] sm:$0xff] }
  0x56   :  { %2785 = vmatprep.subr.mxu1 %v291_v17  ;;  %2752 = vmatprep.subr.mxu0 %v192_v18  ;;  %v184_v34 = vld [vmem:[#allocation2 + $0x18] sm:$0xff]  ;;  %v183_v36 = vld [vmem:[#allocation2 + $0x10] sm:$0xff]  ;;  %v182_v38 = vld [vmem:[#allocation2 + $0x8] sm:$0xff] }
  0x57   :  { %2786 = vmatpush3.msra.mxu1 %v291_v17  ;;  %2753 = vmatpush3.msra.mxu0 %v192_v18  ;;  %v282_v35 = vld [vmem:[#allocation4 + $0x18] sm:$0xff]  ;;  %v281_v37 = vld [vmem:[#allocation4 + $0x10] sm:$0xff]  ;;  %v280_v39 = vld [vmem:[#allocation4 + $0x8] sm:$0xff] }
  0x58   :  { %144 = vadd.xlane.f32.xlu0 %v139_v1  ;;  %2787 = vmatprep.subr.mxu1 %v290_v19  ;;  %v181_v40 = vld [vmem:[#allocation2] sm:$0xff]  ;;  %v392_v42 = vld [vmem:[#allocation6 + $0x78] sm:$0xff]  ;;  %v391_v59 = vld [vmem:[#allocation6 + $0x70] sm:$0xff] }
  0x59   :  { %2754 = vmatprep.subr.mxu0 %v191_v20  ;;  %2788 = vmatpush3.msra.mxu1 %v290_v19  ;;  %v279_v41 = vld [vmem:[#allocation4] sm:$0xff]  ;;  %v390_v60 = vld [vmem:[#allocation6 + $0x68] sm:$0xff]  ;;  %v388_v62 = vld [vmem:[#allocation6 + $0x58] sm:$0xff] }
  0x5a   :  { %2755 = vmatpush3.msra.mxu0 %v191_v20  ;;  %2789 = vmatprep.subr.mxu1 %v289_v21  ;;  %v2531_v50 = vld [vmem:[%s3645_s0] ss:$0 sm:$0xff]  ;;  %v387_v63 = vld [vmem:[#allocation6 + $0x50] sm:$0xff]  ;;  %v384_v2 = vld [vmem:[#allocation6 + $0x38] sm:$0xff] }
  0x5b   :  { %2756 = vmatprep.subr.mxu0 %v190_v22  ;;  %2790 = vmatpush3.msra.mxu1 %v289_v21  ;;  %v2532_v52 = vld [vmem:[%s3625_s2] ss:$0 sm:$0xff]  ;;  %v383_v3 = vld [vmem:[#allocation6 + $0x30] sm:$0xff]  ;;  %v382_v4 = vld [vmem:[#allocation6 + $0x28] sm:$0xff] }
  0x5c   :  { %2757 = vmatpush3.msra.mxu0 %v190_v22  ;;  %2791 = vmatprep.subr.mxu1 %v288_v23  ;;  %v389_v61 = vld [vmem:[#allocation6 + $0x60] sm:$0xff]  ;;  %v380_v6 = vld [vmem:[#allocation6 + $0x18] sm:$0xff] }
  0x5d   :  { %2758 = vmatprep.subr.mxu0 %v189_v24  ;;  %2792 = vmatpush3.msra.mxu1 %v288_v23  ;;  %v381_v5 = vld [vmem:[#allocation6 + $0x20] sm:$0xff] }
  0x5e   :  { %2759 = vmatpush3.msra.mxu0 %v189_v24  ;;  %2793 = vmatprep.subr.mxu1 %v287_v25  ;;  %v2533_v17 = vld [vmem:[%s3627_s4] ss:$0 sm:$0xff] }
  0x5f   :  { %2760 = vmatprep.subr.mxu0 %v188_v26  ;;  %2794 = vmatpush3.msra.mxu1 %v287_v25  ;;  %v2535_v21 = vld [vmem:[%s3631_s8] ss:$0 sm:$0xff]  ;;  %s3191_s8 = smov 96  }
  0x60   :  { %2761 = vmatpush3.msra.mxu0 %v188_v26  ;;  %2795 = vmatprep.subr.mxu1 %v286_v27  ;;  %v475_v26 = vlaneseq }
  0x61   :  { %2762 = vmatprep.subr.mxu0 %v187_v28  ;;  %2796 = vmatpush3.msra.mxu1 %v286_v27 }
  0x62   :  { %2763 = vmatpush3.msra.mxu0 %v187_v28  ;;  %2797 = vmatprep.subr.mxu1 %v285_v29  ;;  %v3379_v27 = vshrl.u32 %v475_v26, 7  ;;  %v478_v28 = vand.u32 127, %v475_v26 }
  0x63   :  { %2764 = vmatprep.subr.mxu0 %v186_v30  ;;  %2798 = vmatpush3.msra.mxu1 %v285_v29 }
  0x64   :  { %2765 = vmatpush3.msra.mxu0 %v186_v30  ;;  %2799 = vmatprep.subr.mxu1 %v284_v31  ;;  %vm3382_vm2 = vcmp.le.s32.totalorder %v478_v28, %v3379_v27 }
  0x65   :  { %2766 = vmatprep.subr.mxu0 %v185_v32  ;;  %2800 = vmatpush3.msra.mxu1 %v284_v31 }
  0x66   :  { %2767 = vmatpush3.msra.mxu0 %v185_v32  ;;  %2801 = vmatprep.subr.mxu1 %v283_v33 }
  0x67   :  { %2768 = vmatprep.subr.mxu0 %v184_v34  ;;  %2802 = vmatpush3.msra.mxu1 %v283_v33 }
  0x68   :  { %2769 = vmatpush3.msra.mxu0 %v184_v34  ;;  %2803 = vmatprep.subr.mxu1 %v282_v35 }
  0x69   :  { %2770 = vmatprep.subr.mxu0 %v183_v36  ;;  %2804 = vmatpush3.msra.mxu1 %v282_v35 }
  0x6a   :  { %2771 = vmatpush3.msra.mxu0 %v183_v36  ;;  %2805 = vmatprep.subr.mxu1 %v281_v37 }
  0x6b   :  { %2772 = vmatprep.subr.mxu0 %v182_v38  ;;  %2806 = vmatpush3.msra.mxu1 %v281_v37 }
  0x6c   :  { %2773 = vmatpush3.msra.mxu0 %v182_v38  ;;  %2807 = vmatprep.subr.mxu1 %v280_v39 }
  0x6d   :  { %2774 = vmatprep.subr.mxu0 %v181_v40  ;;  %2808 = vmatpush3.msra.mxu1 %v280_v39 }
  0x6e   :  { %2775 = vmatpush3.msra.mxu0 %v181_v40  ;;  %2809 = vmatprep.subr.mxu1 %v279_v41 }
  0x6f   :  { %2810 = vmatpush3.msra.mxu1 %v279_v41  ;;  %2814 = vmatprep.subr.mxu0 %v392_v42 }
  0xdd   :  { %v143_v7 = vpop.xlane.xlu0 %142 }
  0xde   :  { %v147_v8 = vmul.f32 0.0078125, %v143_v7  ;;  %v379_v7 = vld [vmem:[#allocation6 + $0x10] sm:$0xff] }
  0xe0   :  { %v3323_v9 = vsub.f32 %v138_v0, %v147_v8  ;;  %v386_v0 = vld [vmem:[#allocation6 + $0x48] sm:$0xff] }
  0xe1   :  { %v145_v10 = vpop.xlane.xlu0 %144  ;;  %v378_v8 = vld [vmem:[#allocation6 + $0x8] sm:$0xff] }
  0xe2   :  { %v148_v11 = vmul.f32 0.0078125, %v145_v10  ;;  %v151_v12 = vmul.f32 %v3323_v9, %v3323_v9  ;;  %v3189_v10 = vmov 0.0  }
  0xe3   :  { %2849 = vmatprep.subr.mxu1 %v3189_v10 }
  0xe4   :  { %v3327_v13 = vsub.f32 %v139_v1, %v148_v11  ;;  %153 = vadd.xlane.f32.xlu1 %v151_v12  ;;  %v385_v1 = vld [vmem:[#allocation6 + $0x40] sm:$0xff] }
  0xe6   :  { %v152_v14 = vmul.f32 %v3327_v13, %v3327_v13 }
  0xe8   :  { %155 = vadd.xlane.f32.xlu1 %v152_v14 }
 0x16d   :  { %v154_v43 = vpop.xlane.xlu1 %153 }
 0x16e   :  { %v157_v44 = vmul.f32 0.0078125, %v154_v43 }
 0x170   :  { %v159_v45 = vadd.f32 1e-05, %v157_v44 }
 0x171   :  { %v156_v46 = vpop.xlane.xlu1 %155 }
 0x172   :  { %2993 = vrsqrt.f32 %v159_v45  ;;  %v158_v47 = vmul.f32 0.0078125, %v156_v46 }
 0x174   :  { %v160_v48 = vadd.f32 1e-05, %v158_v47 }
 0x176   :  { %2995 = vrsqrt.f32 %v160_v48 }
 0x17f   :  { %v2994_v49 = vpop.eup %2993 }
 0x180   :  { %v163_v51 = vmul.f32 %v2994_v49, %v3323_v9  ;;  %v377_v9 = vld [vmem:[#allocation6] sm:$0xff] }
 0x182   :  { %v171_v53 = vmul.f32 %v2531_v50, %v163_v51 }
 0x183   :  { %v2996_v54 = vpop.eup %2995 }
 0x184   :  { %v179_v55 = vadd.f32 %v2532_v52, %v171_v53  ;;  %v164_v56 = vmul.f32 %v2996_v54, %v3327_v13  ;;  %v2534_v13 = vld [vmem:[%s3629_s6] ss:$0 sm:$0xff] }
 0x186   :  { %2776 = vmatprep.mubr.f32.mxu0 %v179_v55  ;;  %2811 = vmatprep.mubr.f32.mxu1 %v179_v55  ;;  %v172_v57 = vmul.f32 %v2531_v50, %v164_v56 }
 0x188   :  { %v180_v58 = vadd.f32 %v2532_v52, %v172_v57 }
 0x18a   :  { %2777 = vmatmul.mubr.f32.vlgmr.msra.gmra.mxu0 %v180_v58  ;;  %2812 = vmatmul.mubr.f32.vlgmr.msra.gmra.mxu1 %v180_v58 }
 0x18b   :  { %2815 = vmatpush3.msra.mxu0 %v392_v42  ;;  %2846 = vmatprep.mubr.f32.mxu0 %v179_v55 }
 0x18c   :  { %2816 = vmatprep.subr.mxu0 %v391_v59  ;;  %2851 = vmatprep.mubr.msk.f32.mxu1 %vm3190_vm0, %v3189_v10 }
 0x18d   :  { %2817 = vmatpush3.msra.mxu0 %v391_v59 }
 0x18e   :  { %2818 = vmatprep.subr.mxu0 %v390_v60 }
 0x18f   :  { %2819 = vmatpush3.msra.mxu0 %v390_v60 }
 0x190   :  { %2820 = vmatprep.subr.mxu0 %v389_v61 }
 0x191   :  { %2821 = vmatpush3.msra.mxu0 %v389_v61 }
 0x192   :  { %2822 = vmatprep.subr.mxu0 %v388_v62 }
 0x193   :  { %2823 = vmatpush3.msra.mxu0 %v388_v62 }
 0x194   :  { %2824 = vmatprep.subr.mxu0 %v387_v63 }
 0x195   :  { %2825 = vmatpush3.msra.mxu0 %v387_v63 }
 0x196   :  { %2826 = vmatprep.subr.mxu0 %v386_v0 }
 0x197   :  { %2827 = vmatpush3.msra.mxu0 %v386_v0 }
 0x198   :  { %2828 = vmatprep.subr.mxu0 %v385_v1 }
 0x199   :  { %2829 = vmatpush3.msra.mxu0 %v385_v1 }
 0x19a   :  { %2830 = vmatprep.subr.mxu0 %v384_v2 }
 0x19b   :  { %2831 = vmatpush3.msra.mxu0 %v384_v2 }
 0x19c   :  { %2832 = vmatprep.subr.mxu0 %v383_v3 }
 0x19d   :  { %2833 = vmatpush3.msra.mxu0 %v383_v3 }
 0x19e   :  { %2834 = vmatprep.subr.mxu0 %v382_v4 }
 0x19f   :  { %2835 = vmatpush3.msra.mxu0 %v382_v4 }
 0x1a0   :  { %2836 = vmatprep.subr.mxu0 %v381_v5 }
 0x1a1   :  { %2837 = vmatpush3.msra.mxu0 %v381_v5 }
 0x1a2   :  { %2838 = vmatprep.subr.mxu0 %v380_v6 }
 0x1a3   :  { %2839 = vmatpush3.msra.mxu0 %v380_v6 }
 0x1a4   :  { %2840 = vmatprep.subr.mxu0 %v379_v7 }
 0x1a5   :  { %2841 = vmatpush3.msra.mxu0 %v379_v7 }
 0x1a6   :  { %2842 = vmatprep.subr.mxu0 %v378_v8 }
 0x1a7   :  { %2843 = vmatpush3.msra.mxu0 %v378_v8 }
 0x1a8   :  { %2844 = vmatprep.subr.mxu0 %v377_v9 }
 0x1a9   :  { %2845 = vmatpush3.msra.mxu0 %v377_v9 }
 0x1aa   :  { %2847 = vmatmul.mubr.f32.vlgmr.msra.gmra.mxu0 %v180_v58 }
 0x24a   :  { %v2778_v11 = vpop.f32.mrf.mxu0  ;;  %v2813_v12 = vpop.f32.mrf.mxu1 }
 0x24b   :  { %v3355_v19 = vadd.f32 %v2813_v12, %v2534_v13  ;;  %v3363_v20 = vadd.f32 %v2778_v11, %v2533_v17 }
 0x24c   :  { %v368_v14 = vpop.f32.mrf.mxu1  ;;  %v270_v15 = vpop.f32.mrf.mxu0 }
 0x24d   :  { %v3345_v16 = vadd.f32 %v2534_v13, %v368_v14  ;;  %v3352_v18 = vadd.f32 %v2533_v17, %v270_v15 }
 0x24f   :  { %2850 = vmatpush3.xpose.msk.msra.mxu1 %vm480_vm1, %v3345_v16 }
 0x250   :  { %2854 = vmatprep.subr.mxu1 %v3189_v10 }
 0x252   :  { %2852 = vmatmul.mubr.msk.f32.vlgmr.msra.gmra.mxu1 %vm480_vm1, %v3352_v18 }
 0x253   :  { %2855 = vmatpush3.xpose.msk.msra.mxu1 %vm480_vm1, %v3355_v19  ;;  %2856 = vmatprep.mubr.msk.f32.mxu1 %vm3190_vm0, %v3189_v10 }
 0x254   :  { %2859 = vmatprep.subr.mxu1 %v3189_v10 }
 0x256   :  { %2857 = vmatmul.mubr.msk.f32.vlgmr.msra.gmra.mxu1 %vm480_vm1, %v3363_v20 }
 0x257   :  { %2861 = vmatprep.mubr.msk.f32.mxu1 %vm3190_vm0, %v3189_v10 }
 0x26a   :  { %v2848_v22 = vpop.f32.mrf.mxu0 }
 0x26b   :  { %v3373_v23 = vadd.f32 %v2848_v22, %v2535_v21 }
 0x26c   :  { %v466_v24 = vpop.f32.mrf.mxu0 }
 0x26d   :  { %v3375_v25 = vadd.f32 %v2535_v21, %v466_v24 }
 0x26f   :  { %2860 = vmatpush3.msra.mxu1 %v3375_v25 }
 0x270   :  { %2864 = vmatprep.subr.mxu1 %v3189_v10 }
 0x312   :  { %v553_v29 = vpop.f32.mrf.mxu1 }
 0x313   :  { %v633_v31 = vmul.f32 0.17677669, %v553_v29 }
 0x314   :  { %v2853_v32 = vpop.f32.mrf.mxu1 }
 0x315   :  { %v637_v33 = vsel %vm3382_vm2, %v633_v31, -1e+30 }
 0x316   :  { %v629_v34 = vpop.f32.mrf.mxu1  ;;  %v640_v35 = vsel %vm639_vm3, %v637_v33, -inf }
 0x317   :  { %v634_v36 = vmul.f32 0.17677669, %v629_v34  ;;  %641 = vmax.xlane.f32.xlu0 %v640_v35 }
 0x318   :  { %v2858_v37 = vpop.f32.mrf.mxu1 }
 0x319   :  { %v638_v38 = vsel %vm3382_vm2, %v634_v36, -1e+30 }
 0x31a   :  { %v643_v39 = vsel %vm639_vm3, %v638_v38, -inf }
 0x31b   :  { %644 = vmax.xlane.f32.xlu1 %v643_v39 }
 0x32c   :  { %808 = vrot.lane.b32.xlu1 %v3352_v18, %s3191_s8 }
 0x330   :  { %888 = vrot.lane.b32.xlu1 %v3355_v19, %s3191_s8 }
 0x3a0   :  { %v642_v40 = vpop.xlane.xlu0 %641 }
 0x3a1   :  { %v646_v41 = vsub.f32 %v637_v33, %v642_v40 }
 0x3a3   :  { %v648_v42 = vmul.f32 1.442695, %v646_v41 }
 0x3a4   :  { %v645_v43 = vpop.xlane.xlu1 %644 }
 0x3a5   :  { %2997 = vpow2.f32 %v648_v42  ;;  %v647_v44 = vsub.f32 %v638_v38, %v645_v43 }
 0x3a7   :  { %v650_v45 = vmul.f32 1.442695, %v647_v44 }
 0x3a8   :  { %v809_v50 = vpop.permute.xlu1 %808 }
 0x3a9   :  { %2999 = vpow2.f32 %v650_v45 }
 0x3ac   :  { %v889_v51 = vpop.permute.xlu1 %888 }
 0x3b2   :  { %v2998_v46 = vpop.eup %2997 }
 0x3b3   :  { %v652_v47 = vsel %vm639_vm3, %v2998_v46, 0.0 }
 0x3b4   :  { %653 = vadd.xlane.f32.xlu0 %v652_v47 }
 0x3b6   :  { %v3000_v48 = vpop.eup %2999 }
 0x3b7   :  { %v655_v49 = vsel %vm639_vm3, %v3000_v48, 0.0 }
 0x3b8   :  { %656 = vadd.xlane.f32.xlu1 %v655_v49 }
 0x3c9   :  { %886 = vrot.lane.b32.xlu1 %v3363_v20, %s3191_s8 }
 0x3ca   :  { %810 = vrot.lane.b32.xlu0 %v3345_v16, %s3191_s8 }
 0x43d   :  { %v654_v52 = vpop.xlane.xlu0 %653 }
 0x43e   :  { %3001 = vrcp.f32 %v654_v52 }
 0x441   :  { %v657_v53 = vpop.xlane.xlu1 %656  ;;  %v811_v58 = vpop.permute.xlu0 %810 }
 0x442   :  { %3003 = vrcp.f32 %v657_v53 }
 0x445   :  { %v887_v59 = vpop.permute.xlu1 %886 }
 0x44b   :  { %v3002_v54 = vpop.eup %3001 }
 0x44c   :  { %v659_v55 = vmul.f32 %v3002_v54, %v2998_v46 }
 0x44e   :  { %2862 = vmatmul.mubr.msk.f32.vlgmr.msra.gmra.mxu1 %vm639_vm3, %v659_v55 }
 0x44f   :  { %v3004_v56 = vpop.eup %3003  ;;  %2865 = vmatpush3.msra.mxu1 %v3373_v23  ;;  %2866 = vmatprep.mubr.msk.f32.mxu1 %vm3190_vm0, %v3189_v10 }
 0x450   :  { %2869 = vmatprep.subr.mxu1 %v3189_v10  ;;  %v661_v57 = vmul.f32 %v3004_v56, %v3000_v48 }
 0x452   :  { %2867 = vmatmul.mubr.msk.f32.vlgmr.msra.gmra.mxu1 %vm639_vm3, %v661_v57 }
 0x453   :  { %2870 = vmatpush3.xpose.msk.msra.mxu1 %vm480_vm1, %v811_v58  ;;  %2871 = vmatprep.mubr.msk.f32.mxu1 %vm3190_vm0, %v3189_v10 }
 0x454   :  { %2874 = vmatprep.subr.mxu1 %v3189_v10 }
 0x456   :  { %2872 = vmatmul.mubr.msk.f32.vlgmr.msra.gmra.mxu1 %vm480_vm1, %v809_v50 }
 0x457   :  { %2875 = vmatpush3.xpose.msk.msra.mxu1 %vm480_vm1, %v889_v51  ;;  %2876 = vmatprep.mubr.msk.f32.mxu1 %vm3190_vm0, %v3189_v10 }
 0x458   :  { %2879 = vmatprep.subr.mxu1 %v3189_v10 }
 0x45a   :  { %2877 = vmatmul.mubr.msk.f32.vlgmr.msra.gmra.mxu1 %vm480_vm1, %v887_v59 }
 0x45b   :  { %2881 = vmatprep.mubr.msk.f32.mxu1 %vm3190_vm0, %v3189_v10 }
 0x50e   :  { %v3420_v60 = vpop.f32.mrf.mxu1 }
 0x510   :  { %v2863_v61 = vpop.f32.mrf.mxu1 }
 0x512   :  { %v3422_v62 = vpop.f32.mrf.mxu1 }
 0x514   :  { %v2868_v63 = vpop.f32.mrf.mxu1 }
 0x516   :  { %v882_v0 = vpop.f32.mrf.mxu1 }
 0x517   :  { %v964_v1 = vmul.f32 0.17677669, %v882_v0 }
 0x518   :  { %v2873_v2 = vpop.f32.mrf.mxu1 }
 0x519   :  { %v966_v3 = vsel %vm3382_vm2, %v964_v1, -1e+30 }
 0x51a   :  { %v960_v4 = vpop.f32.mrf.mxu1  ;;  %v968_v5 = vsel %vm639_vm3, %v966_v3, -inf }
 0x51b   :  { %v965_v6 = vmul.f32 0.17677669, %v960_v4  ;;  %969 = vmax.xlane.f32.xlu0 %v968_v5 }
 0x51c   :  { %v2878_v7 = vpop.f32.mrf.mxu1 }
 0x51d   :  { %v967_v8 = vsel %vm3382_vm2, %v965_v6, -1e+30 }
 0x51e   :  { %v971_v9 = vsel %vm639_vm3, %v967_v8, -inf }
 0x51f   :  { %972 = vmax.xlane.f32.xlu1 %v971_v9 }
 0x530   :  { %1068 = vrot.lane.b32.xlu1 %v3373_v23, %s3191_s8 }
 0x534   :  { %1146 = vrot.lane.b32.xlu1 %v3345_v16, %s3192_s20 }
 0x538   :  { %1144 = vrot.lane.b32.xlu1 %v3352_v18, %s3192_s20 }
 0x53c   :  { %1222 = vrot.lane.b32.xlu1 %v3363_v20, %s3192_s20 }
 0x5a4   :  { %v970_v11 = vpop.xlane.xlu0 %969 }
 0x5a5   :  { %v974_v12 = vsub.f32 %v966_v3, %v970_v11 }
 0x5a7   :  { %v976_v13 = vmul.f32 1.442695, %v974_v12 }
 0x5a8   :  { %v973_v14 = vpop.xlane.xlu1 %972 }
 0x5a9   :  { %3005 = vpow2.f32 %v976_v13  ;;  %v975_v15 = vsub.f32 %v967_v8, %v973_v14 }
 0x5ab   :  { %v978_v17 = vmul.f32 1.442695, %v975_v15 }
 0x5ac   :  { %v1069_v32 = vpop.permute.xlu1 %1068 }
 0x5ad   :  { %3007 = vpow2.f32 %v978_v17 }
 0x5b0   :  { %v1147_v35 = vpop.permute.xlu1 %1146 }
 0x5b4   :  { %v1145_v38 = vpop.permute.xlu1 %1144 }
 0x5b6   :  { %v3006_v21 = vpop.eup %3005 }
 0x5b7   :  { %v980_v22 = vsel %vm639_vm3, %v3006_v21, 0.0 }
 0x5b8   :  { %981 = vadd.xlane.f32.xlu0 %v980_v22  ;;  %v1223_v40 = vpop.permute.xlu1 %1222 }
 0x5ba   :  { %v3008_v24 = vpop.eup %3007 }
 0x5bb   :  { %v983_v26 = vsel %vm639_vm3, %v3008_v24, 0.0 }
 0x5bc   :  { %984 = vadd.xlane.f32.xlu0 %v983_v26 }
 0x5d2   :  { %991 = vrot.lane.b32.xlu0 %v3375_v25, %s3191_s8 }
 0x5d6   :  { %1224 = vrot.lane.b32.xlu0 %v3355_v19, %s3192_s20 }
 0x641   :  { %v982_v28 = vpop.xlane.xlu0 %981 }
 0x642   :  { %3009 = vrcp.f32 %v982_v28 }
 0x645   :  { %v985_v29 = vpop.xlane.xlu0 %984 }
 0x646   :  { %3011 = vrcp.f32 %v985_v29 }
 0x649   :  { %v992_v31 = vpop.permute.xlu0 %991 }
 0x64a   :  { %2880 = vmatpush3.msra.mxu1 %v992_v31 }
 0x64b   :  { %2884 = vmatprep.subr.mxu1 %v3189_v10 }
 0x64d   :  { %v1225_v39 = vpop.permute.xlu0 %1224 }
 0x64f   :  { %v3010_v33 = vpop.eup %3009 }
 0x650   :  { %v987_v34 = vmul.f32 %v3010_v33, %v3006_v21 }
 0x652   :  { %2882 = vmatmul.mubr.msk.f32.vlgmr.msra.gmra.mxu1 %vm639_vm3, %v987_v34 }
 0x653   :  { %v3012_v36 = vpop.eup %3011  ;;  %2885 = vmatpush3.msra.mxu1 %v1069_v32  ;;  %2886 = vmatprep.mubr.msk.f32.mxu1 %vm3190_vm0, %v3189_v10 }
 0x654   :  { %2889 = vmatprep.subr.mxu1 %v3189_v10  ;;  %v989_v37 = vmul.f32 %v3012_v36, %v3008_v24 }
 0x656   :  { %2887 = vmatmul.mubr.msk.f32.vlgmr.msra.gmra.mxu1 %vm639_vm3, %v989_v37 }
 0x657   :  { %2890 = vmatpush3.xpose.msk.msra.mxu1 %vm480_vm1, %v1147_v35  ;;  %2891 = vmatprep.mubr.msk.f32.mxu1 %vm3190_vm0, %v3189_v10 }
 0x658   :  { %2894 = vmatprep.subr.mxu1 %v3189_v10 }
 0x65a   :  { %2892 = vmatmul.mubr.msk.f32.vlgmr.msra.gmra.mxu1 %vm480_vm1, %v1145_v38 }
 0x65b   :  { %2895 = vmatpush3.xpose.msk.msra.mxu1 %vm480_vm1, %v1225_v39  ;;  %2896 = vmatprep.mubr.msk.f32.mxu1 %vm3190_vm0, %v3189_v10 }
 0x65c   :  { %2899 = vmatprep.subr.mxu1 %v3189_v10 }
 0x65e   :  { %2897 = vmatmul.mubr.msk.f32.vlgmr.msra.gmra.mxu1 %vm480_vm1, %v1223_v40 }
 0x65f   :  { %2901 = vmatprep.mubr.msk.f32.mxu1 %vm3190_vm0, %v3189_v10 }
 0x712   :  { %v3462_v41 = vpop.f32.mrf.mxu1 }
 0x714   :  { %v2883_v42 = vpop.f32.mrf.mxu1 }
 0x716   :  { %v3464_v43 = vpop.f32.mrf.mxu1 }
 0x717   :  { %v2978_v44 = vpack.i.bf16 %v3464_v43, %v3462_v41 }
 0x718   :  { %v2888_v45 = vpop.f32.mrf.mxu1 }
 0x71a   :  { %v1218_v46 = vpop.f32.mrf.mxu1 }
 0x71b   :  { %v1300_v47 = vmul.f32 0.17677669, %v1218_v46 }
 0x71c   :  { %v2893_v48 = vpop.f32.mrf.mxu1 }
 0x71d   :  { %v1302_v49 = vsel %vm3382_vm2, %v1300_v47, -1e+30 }
 0x71e   :  { %v1296_v50 = vpop.f32.mrf.mxu1  ;;  %v1304_v51 = vsel %vm639_vm3, %v1302_v49, -inf }
 0x71f   :  { %v1301_v52 = vmul.f32 0.17677669, %v1296_v50  ;;  %1305 = vmax.xlane.f32.xlu0 %v1304_v51 }
 0x720   :  { %v2898_v53 = vpop.f32.mrf.mxu1 }
 0x721   :  { %v1303_v54 = vsel %vm3382_vm2, %v1301_v52, -1e+30  ;;  %v1858_v52 = vld [vmem:[#allocation7 + $0x70] sm:$0xff]  ;;  %v1857_v53 = vld [vmem:[#allocation7 + $0x68] sm:$0xff] }
 0x722   :  { %v1307_v55 = vsel %vm639_vm3, %v1303_v54, -inf }
 0x723   :  { %1308 = vmax.xlane.f32.xlu1 %v1307_v55  ;;  %v1855_v55 = vld [vmem:[#allocation7 + $0x58] sm:$0xff] }
 0x734   :  { %1402 = vrot.lane.b32.xlu1 %v3373_v23, %s3192_s20 }
 0x738   :  { %1480 = vrot.lane.b32.xlu1 %v3345_v16, %s3187_s1 }
 0x73c   :  { %1478 = vrot.lane.b32.xlu1 %v3352_v18, %s3187_s1 }
 0x740   :  { %1556 = vrot.lane.b32.xlu1 %v3363_v20, %s3187_s1 }
 0x7a8   :  { %v1306_v56 = vpop.xlane.xlu0 %1305 }
 0x7a9   :  { %v1310_v57 = vsub.f32 %v1302_v49, %v1306_v56  ;;  %v1854_v56 = vld [vmem:[#allocation7 + $0x50] sm:$0xff] }
 0x7ab   :  { %v1312_v58 = vmul.f32 1.442695, %v1310_v57  ;;  %v1853_v57 = vld [vmem:[#allocation7 + $0x48] sm:$0xff] }
 0x7ac   :  { %v1309_v59 = vpop.xlane.xlu1 %1308 }
 0x7ad   :  { %3013 = vpow2.f32 %v1312_v58  ;;  %v1311_v61 = vsub.f32 %v1303_v54, %v1309_v59  ;;  %v1856_v54 = vld [vmem:[#allocation7 + $0x60] sm:$0xff]  ;;  %v1851_v59 = vld [vmem:[#allocation7 + $0x38] sm:$0xff] }
 0x7ae   :  { %v1852_v58 = vld [vmem:[#allocation7 + $0x40] sm:$0xff] }
 0x7af   :  { %v1314_v63 = vmul.f32 1.442695, %v1311_v61  ;;  %v1850_v61 = vld [vmem:[#allocation7 + $0x30] sm:$0xff] }
 0x7b0   :  { %v1403_v4 = vpop.permute.xlu1 %1402 }
 0x7b1   :  { %3015 = vpow2.f32 %v1314_v63  ;;  %v1849_v63 = vld [vmem:[#allocation7 + $0x28] sm:$0xff] }
 0x7b4   :  { %v1481_v7 = vpop.permute.xlu1 %1480 }
 0x7b8   :  { %v1479_v9 = vpop.permute.xlu1 %1478 }
 0x7ba   :  { %v3014_v0 = vpop.eup %3013 }
 0x7bb   :  { %v1316_v1 = vsel %vm639_vm3, %v3014_v0, 0.0 }
 0x7bc   :  { %1317 = vadd.xlane.f32.xlu0 %v1316_v1  ;;  %v1557_v12 = vpop.permute.xlu1 %1556  ;;  %v1847_v1 = vld [vmem:[#allocation7 + $0x18] sm:$0xff] }
 0x7be   :  { %v3016_v2 = vpop.eup %3015 }
 0x7bf   :  { %v1319_v16 = vsel %vm639_vm3, %v3016_v2, 0.0 }
 0x7c0   :  { %1320 = vadd.xlane.f32.xlu0 %v1319_v16  ;;  %v1845_v16 = vld [vmem:[#allocation7 + $0x8] sm:$0xff] }
 0x7d6   :  { %1326 = vrot.lane.b32.xlu0 %v3375_v25, %s3192_s20 }
 0x7da   :  { %1558 = vrot.lane.b32.xlu0 %v3355_v19, %s3187_s1 }
 0x845   :  { %v1318_v18 = vpop.xlane.xlu0 %1317 }
 0x846   :  { %3017 = vrcp.f32 %v1318_v18  ;;  %v1844_v18 = vld [vmem:[#allocation7] sm:$0xff] }
 0x849   :  { %v1321_v20 = vpop.xlane.xlu0 %1320 }
 0x84a   :  { %3019 = vrcp.f32 %v1321_v20 }
 0x84d   :  { %v1327_v3 = vpop.permute.xlu0 %1326 }
 0x84e   :  { %2900 = vmatpush3.msra.mxu1 %v1327_v3 }
 0x84f   :  { %2904 = vmatprep.subr.mxu1 %v3189_v10 }
 0x851   :  { %v1559_v11 = vpop.permute.xlu0 %1558 }
 0x853   :  { %v3018_v5 = vpop.eup %3017 }
 0x854   :  { %v1323_v6 = vmul.f32 %v3018_v5, %v3014_v0  ;;  %v1848_v0 = vld [vmem:[#allocation7 + $0x20] sm:$0xff] }
 0x856   :  { %2902 = vmatmul.mubr.msk.f32.vlgmr.msra.gmra.mxu1 %vm639_vm3, %v1323_v6 }
 0x857   :  { %v3020_v8 = vpop.eup %3019  ;;  %2905 = vmatpush3.msra.mxu1 %v1403_v4  ;;  %2906 = vmatprep.mubr.msk.f32.mxu1 %vm3190_vm0, %v3189_v10 }
 0x858   :  { %2909 = vmatprep.subr.mxu1 %v3189_v10  ;;  %v1325_v19 = vmul.f32 %v3020_v8, %v3016_v2  ;;  %v1846_v2 = vld [vmem:[#allocation7 + $0x10] sm:$0xff] }
 0x85a   :  { %2907 = vmatmul.mubr.msk.f32.vlgmr.msra.gmra.mxu1 %vm639_vm3, %v1325_v19 }
 0x85b   :  { %2910 = vmatpush3.xpose.msk.msra.mxu1 %vm480_vm1, %v1481_v7  ;;  %2911 = vmatprep.mubr.msk.f32.mxu1 %vm3190_vm0, %v3189_v10 }
 0x85c   :  { %2914 = vmatprep.subr.mxu1 %v3189_v10 }
 0x85e   :  { %2912 = vmatmul.mubr.msk.f32.vlgmr.msra.gmra.mxu1 %vm480_vm1, %v1479_v9 }
 0x85f   :  { %2915 = vmatpush3.xpose.msk.msra.mxu1 %vm480_vm1, %v1559_v11  ;;  %2916 = vmatprep.mubr.msk.f32.mxu1 %vm3190_vm0, %v3189_v10 }
 0x860   :  { %2919 = vmatprep.subr.mxu1 %v3189_v10 }
 0x862   :  { %2917 = vmatmul.mubr.msk.f32.vlgmr.msra.gmra.mxu1 %vm480_vm1, %v1557_v12 }
 0x863   :  { %2921 = vmatprep.mubr.msk.f32.mxu1 %vm3190_vm0, %v3189_v10 }
 0x916   :  { %v1398_v13 = vpop.f32.mrf.mxu1 }
 0x918   :  { %v2903_v14 = vpop.f32.mrf.mxu1 }
 0x91a   :  { %v1474_v15 = vpop.f32.mrf.mxu1 }
 0x91b   :  { %v2983_v35 = vpack.i.bf16 %v1474_v15, %v1398_v13 }
 0x91c   :  { %v2908_v17 = vpop.f32.mrf.mxu1 }
 0x91e   :  { %v1552_v21 = vpop.f32.mrf.mxu1 }
 0x91f   :  { %v1634_v22 = vmul.f32 0.17677669, %v1552_v21 }
 0x920   :  { %v2913_v24 = vpop.f32.mrf.mxu1 }
 0x921   :  { %v1636_v26 = vsel %vm3382_vm2, %v1634_v22, -1e+30 }
 0x922   :  { %v1630_v28 = vpop.f32.mrf.mxu1  ;;  %v1638_v29 = vsel %vm639_vm3, %v1636_v26, -inf }
 0x923   :  { %v1635_v31 = vmul.f32 0.17677669, %v1630_v28  ;;  %1639 = vmax.xlane.f32.xlu0 %v1638_v29  ;;  %v2560_v29 = vld [vmem:[%s3633_s10] ss:$0 sm:$0xff] }
 0x924   :  { %v2918_v32 = vpop.f32.mrf.mxu1 }
 0x925   :  { %v1637_v33 = vsel %vm3382_vm2, %v1635_v31, -1e+30 }
 0x926   :  { %v1641_v34 = vsel %vm639_vm3, %v1637_v33, -inf }
 0x927   :  { %1642 = vmax.xlane.f32.xlu1 %v1641_v34 }
 0x938   :  { %1736 = vrot.lane.b32.xlu1 %v3373_v23, %s3187_s1 }
 0x93c   :  { %2979 = vrot.lane.b32.xlu1 %v2978_v44, %s3187_s1 }
 0x940   :  { %2984 = vrot.lane.b32.xlu1 %v2983_v35, %s3192_s20  ;;  %v3050_v35 = vld [vmem:[%s3644_s26] sm:$0xff] }
 0x9ac   :  { %v1640_v36 = vpop.xlane.xlu0 %1639 }
 0x9ad   :  { %v1644_v37 = vsub.f32 %v1636_v26, %v1640_v36 }
 0x9af   :  { %v1646_v38 = vmul.f32 1.442695, %v1644_v37  ;;  %v2045_v37 = vld [vmem:[#allocation9 + $0x1e8] sm:$0xff] }
 0x9b0   :  { %v1643_v39 = vpop.xlane.xlu1 %1642 }
 0x9b1   :  { %3021 = vpow2.f32 %v1646_v38  ;;  %v1645_v30 = vsub.f32 %v1637_v33, %v1643_v39  ;;  %v3049_v33 = vld [vmem:[%s3644_s26 + $0x8] sm:$0xff]  ;;  %v2047_v38 = vld [vmem:[#allocation9 + $0x1f8] sm:$0xff]  ;;  %v2044_v39 = vld [vmem:[#allocation9 + $0x1e0] sm:$0xff] }
 0x9b3   :  { %v1648_v40 = vmul.f32 1.442695, %v1645_v30  ;;  %v2046_v30 = vld [vmem:[#allocation9 + $0x1f0] sm:$0xff] }
 0x9b4   :  { %v1737_v49 = vpop.permute.xlu1 %1736 }
 0x9b5   :  { %3023 = vpow2.f32 %v1648_v40  ;;  %v2041_v40 = vld [vmem:[#allocation9 + $0x1c8] sm:$0xff] }
 0x9b8   :  { %v2980_v7 = vpop.permute.xlu1 %2979 }
 0x9b9   :  { %v2982_v19 = vunpack.i.h.bf16 %v2980_v7  ;;  %v2981_v9 = vunpack.i.l.bf16 %v2980_v7  ;;  %v2016_v7 = vld [vmem:[#allocation9 + $0x100] sm:$0xff] }
 0x9bb   :  { %v1837_v14 = vsel %vm480_vm1, %v3422_v62, %v2982_v19  ;;  %v1836_v21 = vsel %vm480_vm1, %v3420_v60, %v2981_v9  ;;  %v2013_v19 = vld [vmem:[#allocation9 + $0xe8] sm:$0xff]  ;;  %v2015_v9 = vld [vmem:[#allocation9 + $0xf8] sm:$0xff] }
 0x9bc   :  { %v2985_v8 = vpop.permute.xlu1 %2984 }
 0x9bd   :  { %v2987_v11 = vunpack.i.h.bf16 %v2985_v8  ;;  %v2986_v12 = vunpack.i.l.bf16 %v2985_v8  ;;  %v2018_v8 = vld [vmem:[#allocation9 + $0x110] sm:$0xff] }
 0x9be   :  { %v3022_v42 = vpop.eup %3021 }
 0x9bf   :  { %v1650_v45 = vsel %vm639_vm3, %v3022_v42, 0.0  ;;  %v1839_v22 = vsel %vm1838_vm4, %v1836_v21, %v2986_v12  ;;  %v1840_v24 = vsel %vm1838_vm4, %v1837_v14, %v2987_v11  ;;  %v2012_v11 = vld [vmem:[#allocation9 + $0xe0] sm:$0xff]  ;;  %v2014_v12 = vld [vmem:[#allocation9 + $0xf0] sm:$0xff]  ;;  %v2011_v14 = vld [vmem:[#allocation9 + $0xd8] sm:$0xff] }
 0x9c0   :  { %1651 = vadd.xlane.f32.xlu0 %v1650_v45  ;;  %v2040_v45 = vld [vmem:[#allocation9 + $0x1c0] sm:$0xff]  ;;  %v2005_v21 = vld [vmem:[#allocation9 + $0xa8] sm:$0xff] }
 0x9c2   :  { %v3024_v23 = vpop.eup %3023 }
 0x9c3   :  { %v1653_v46 = vsel %vm639_vm3, %v3024_v23, 0.0 }
 0x9c4   :  { %1654 = vadd.xlane.f32.xlu0 %v1653_v46  ;;  %v2037_v46 = vld [vmem:[#allocation9 + $0x1a8] sm:$0xff] }
 0x9da   :  { %1660 = vrot.lane.b32.xlu0 %v3375_v25, %s3187_s1  ;;  %v1859_v25 = vld [vmem:[#allocation7 + $0x78] sm:$0xff] }
 0x9db   :  { %2929 = vmatprep.subr.mxu0 %v1859_v25 }
 0x9dc   :  { %2930 = vmatpush3.msra.mxu0 %v1859_v25 }
 0x9dd   :  { %2931 = vmatprep.subr.mxu0 %v1858_v52 }
 0x9de   :  { %2932 = vmatpush3.msra.mxu0 %v1858_v52 }
 0x9df   :  { %2933 = vmatprep.subr.mxu0 %v1857_v53 }
 0x9e0   :  { %2934 = vmatpush3.msra.mxu0 %v1857_v53 }
 0x9e1   :  { %2935 = vmatprep.subr.mxu0 %v1856_v54 }
 0x9e2   :  { %2936 = vmatpush3.msra.mxu0 %v1856_v54 }
 0x9e3   :  { %2937 = vmatprep.subr.mxu0 %v1855_v55 }
 0x9e4   :  { %2938 = vmatpush3.msra.mxu0 %v1855_v55 }
 0x9e5   :  { %2939 = vmatprep.subr.mxu0 %v1854_v56 }
 0x9e6   :  { %2940 = vmatpush3.msra.mxu0 %v1854_v56 }
 0x9e7   :  { %2941 = vmatprep.subr.mxu0 %v1853_v57 }
 0x9e8   :  { %2942 = vmatpush3.msra.mxu0 %v1853_v57 }
 0x9e9   :  { %2943 = vmatprep.subr.mxu0 %v1852_v58 }
 0x9ea   :  { %2944 = vmatpush3.msra.mxu0 %v1852_v58  ;;  %v2029_v58 = vld [vmem:[#allocation9 + $0x168] sm:$0xff] }
 0x9eb   :  { %2945 = vmatprep.subr.mxu0 %v1851_v59 }
 0x9ec   :  { %2946 = vmatpush3.msra.mxu0 %v1851_v59  ;;  %v2031_v59 = vld [vmem:[#allocation9 + $0x178] sm:$0xff] }
 0x9ed   :  { %2947 = vmatprep.subr.mxu0 %v1850_v61 }
 0x9ee   :  { %2948 = vmatpush3.msra.mxu0 %v1850_v61  ;;  %v2028_v61 = vld [vmem:[#allocation9 + $0x160] sm:$0xff] }
 0x9ef   :  { %2949 = vmatprep.subr.mxu0 %v1849_v63 }
 0x9f0   :  { %2950 = vmatpush3.msra.mxu0 %v1849_v63  ;;  %v2030_v63 = vld [vmem:[#allocation9 + $0x170] sm:$0xff] }
 0x9f1   :  { %2951 = vmatprep.subr.mxu0 %v1848_v0 }
 0x9f2   :  { %2952 = vmatpush3.msra.mxu0 %v1848_v0  ;;  %v2025_v0 = vld [vmem:[#allocation9 + $0x148] sm:$0xff] }
 0x9f3   :  { %2953 = vmatprep.subr.mxu0 %v1847_v1 }
 0x9f4   :  { %2954 = vmatpush3.msra.mxu0 %v1847_v1  ;;  %v2027_v1 = vld [vmem:[#allocation9 + $0x158] sm:$0xff] }
 0x9f5   :  { %2955 = vmatprep.subr.mxu0 %v1846_v2 }
 0x9f6   :  { %2956 = vmatpush3.msra.mxu0 %v1846_v2  ;;  %v2024_v2 = vld [vmem:[#allocation9 + $0x140] sm:$0xff] }
 0x9f7   :  { %2957 = vmatprep.subr.mxu0 %v1845_v16 }
 0x9f8   :  { %2958 = vmatpush3.msra.mxu0 %v1845_v16  ;;  %v2026_v16 = vld [vmem:[#allocation9 + $0x150] sm:$0xff] }
 0x9f9   :  { %2959 = vmatprep.subr.mxu0 %v1844_v18 }
 0x9fa   :  { %2960 = vmatpush3.msra.mxu0 %v1844_v18  ;;  %v2021_v18 = vld [vmem:[#allocation9 + $0x128] sm:$0xff] }
 0x9fb   :  { %2147 = vmatprep.subr.mxu0 %v2047_v38  ;;  %v1995_v38 = vld [vmem:[#allocation9 + $0x58] sm:$0xff] }
 0xa49   :  { %v1652_v41 = vpop.xlane.xlu0 %1651 }
 0xa4a   :  { %3025 = vrcp.f32 %v1652_v41  ;;  %v2039_v41 = vld [vmem:[#allocation9 + $0x1b8] sm:$0xff] }
 0xa4d   :  { %v1655_v43 = vpop.xlane.xlu0 %1654 }
 0xa4e   :  { %3027 = vrcp.f32 %v1655_v43  ;;  %v2036_v43 = vld [vmem:[#allocation9 + $0x1a0] sm:$0xff] }
 0xa51   :  { %v1661_v44 = vpop.permute.xlu0 %1660 }
 0xa52   :  { %2920 = vmatpush3.msra.mxu1 %v1661_v44  ;;  %v2038_v44 = vld [vmem:[#allocation9 + $0x1b0] sm:$0xff] }
 0xa53   :  { %2924 = vmatprep.subr.mxu1 %v3189_v10 }
 0xa57   :  { %v3026_v47 = vpop.eup %3025 }
 0xa58   :  { %v1657_v48 = vmul.f32 %v3026_v47, %v3022_v42  ;;  %v2043_v42 = vld [vmem:[#allocation9 + $0x1d8] sm:$0xff]  ;;  %v2033_v47 = vld [vmem:[#allocation9 + $0x188] sm:$0xff] }
 0xa5a   :  { %2922 = vmatmul.mubr.msk.f32.vlgmr.msra.gmra.mxu1 %vm639_vm3, %v1657_v48  ;;  %v2035_v48 = vld [vmem:[#allocation9 + $0x198] sm:$0xff] }
 0xa5b   :  { %v3028_v50 = vpop.eup %3027  ;;  %2925 = vmatpush3.msra.mxu1 %v1737_v49  ;;  %2926 = vmatprep.mubr.msk.f32.mxu1 %vm3190_vm0, %v3189_v10  ;;  %v2032_v49 = vld [vmem:[#allocation9 + $0x180] sm:$0xff] }
 0xa5c   :  { %v1659_v51 = vmul.f32 %v3028_v50, %v3024_v23  ;;  %2070 = vmatprep.subr.mxu1 %v2045_v37  ;;  %v2042_v23 = vld [vmem:[#allocation9 + $0x1d0] sm:$0xff]  ;;  %v1993_v37 = vld [vmem:[#allocation9 + $0x48] sm:$0xff] }
 0xa5d   :  { %v2034_v50 = vld [vmem:[#allocation9 + $0x190] sm:$0xff] }
 0xa5e   :  { %2927 = vmatmul.mubr.msk.f32.vlgmr.msra.gmra.mxu1 %vm639_vm3, %v1659_v51 }
 0xa5f   :  { %2134 = vmatprep.mubr.f32.mxu1 %v3189_v10  ;;  %2071 = vmatpush1.msra.mxu1 %v2044_v39  ;;  %v1992_v39 = vld [vmem:[#allocation9 + $0x40] sm:$0xff] }
 0xa60   :  { %2072 = vmatprep.subr.mxu1 %v2041_v40  ;;  %v1989_v40 = vld [vmem:[#allocation9 + $0x28] sm:$0xff] }
 0xa61   :  { %2073 = vmatpush1.msra.mxu1 %v2040_v45  ;;  %v1988_v45 = vld [vmem:[#allocation9 + $0x20] sm:$0xff] }
 0xa62   :  { %2074 = vmatprep.subr.mxu1 %v2037_v46  ;;  %v1985_v46 = vld [vmem:[#allocation9 + $0x8] sm:$0xff] }
 0xa63   :  { %2075 = vmatpush1.msra.mxu1 %v2036_v43  ;;  %v1984_v43 = vld [vmem:[#allocation9] sm:$0xff] }
 0xa64   :  { %2076 = vmatprep.subr.mxu1 %v2033_v47 }
 0xa65   :  { %2077 = vmatpush1.msra.mxu1 %v2032_v49 }
 0xa66   :  { %2078 = vmatprep.subr.mxu1 %v2029_v58 }
 0xa67   :  { %2079 = vmatpush1.msra.mxu1 %v2028_v61 }
 0xa68   :  { %2080 = vmatprep.subr.mxu1 %v2025_v0 }
 0xa69   :  { %2081 = vmatpush1.msra.mxu1 %v2024_v2  ;;  %v2359_v2 = vld [vmem:[#allocation10 + $0x1f8] sm:$0xff] }
 0xa6a   :  { %2082 = vmatprep.subr.mxu1 %v2021_v18  ;;  %v2343_v18 = vld [vmem:[#allocation10 + $0x178] sm:$0xff] }
 0xb1a   :  { %v1732_v20 = vpop.f32.mrf.mxu1 }
 0xb1c   :  { %v2923_v3 = vpop.f32.mrf.mxu1 }
 0xb1d   :  { %v2020_v3 = vld [vmem:[#allocation9 + $0x120] sm:$0xff] }
 0xb1e   :  { %v1808_v4 = vpop.f32.mrf.mxu1  ;;  %2083 = vmatpush1.msra.mxu1 %v2020_v3  ;;  %v2310_v3 = vld [vmem:[#allocation10 + $0x70] sm:$0xff] }
 0xb1f   :  { %v2988_v5 = vpack.i.bf16 %v1808_v4, %v1732_v20  ;;  %v2023_v20 = vld [vmem:[#allocation9 + $0x138] sm:$0xff]  ;;  %v2022_v4 = vld [vmem:[#allocation9 + $0x130] sm:$0xff] }
 0xb20   :  { %v2928_v6 = vpop.f32.mrf.mxu1 }
 0xb21   :  { %2989 = vrot.lane.b32.xlu0 %v2988_v5, %s3191_s8  ;;  %v2017_v5 = vld [vmem:[#allocation9 + $0x108] sm:$0xff]  ;;  %v2019_v6 = vld [vmem:[#allocation9 + $0x118] sm:$0xff] }
 0xb22   :  { %2084 = vmatprep.subr.mxu1 %v2017_v5  ;;  %v2357_v5 = vld [vmem:[#allocation10 + $0x1e8] sm:$0xff] }
 0xb23   :  { %2085 = vmatpush1.msra.mxu1 %v2016_v7  ;;  %v2341_v7 = vld [vmem:[#allocation10 + $0x168] sm:$0xff] }
 0xb24   :  { %2086 = vmatprep.subr.mxu1 %v2013_v19  ;;  %v2356_v19 = vld [vmem:[#allocation10 + $0x1e0] sm:$0xff] }
 0xb25   :  { %2087 = vmatpush1.msra.mxu1 %v2012_v11  ;;  %v2340_v11 = vld [vmem:[#allocation10 + $0x160] sm:$0xff] }
 0xb93   :  { %v2990_v13 = vpop.permute.xlu0 %2989 }
 0xb94   :  { %v2992_v15 = vunpack.i.h.bf16 %v2990_v13  ;;  %v2991_v17 = vunpack.i.l.bf16 %v2990_v13  ;;  %v2009_v13 = vld [vmem:[#allocation9 + $0xc8] sm:$0xff] }
 0xb95   :  { %2088 = vmatprep.subr.mxu1 %v2009_v13  ;;  %v2355_v13 = vld [vmem:[#allocation10 + $0x1d8] sm:$0xff] }
 0xb96   :  { %v1842_v26 = vsel %vm1841_vm5, %v1839_v22, %v2991_v17  ;;  %v1843_v28 = vsel %vm1841_vm5, %v1840_v24, %v2992_v15  ;;  %v2008_v15 = vld [vmem:[#allocation9 + $0xc0] sm:$0xff]  ;;  %v2010_v17 = vld [vmem:[#allocation9 + $0xd0] sm:$0xff]  ;;  %v2007_v22 = vld [vmem:[#allocation9 + $0xb8] sm:$0xff] }
 0xb97   :  { %2961 = vmatprep.mubr.f32.mxu0 %v1842_v26  ;;  %v2004_v24 = vld [vmem:[#allocation9 + $0xa0] sm:$0xff]  ;;  %v2006_v26 = vld [vmem:[#allocation9 + $0xb0] sm:$0xff]  ;;  %2089 = vmatpush1.msra.mxu1 %v2008_v15  ;;  %v2339_v15 = vld [vmem:[#allocation10 + $0x158] sm:$0xff] }
 0xb98   :  { %2962 = vmatmul.mubr.f32.vlgmr.msra.gmra.mxu0 %v1843_v28  ;;  %v2001_v28 = vld [vmem:[#allocation9 + $0x88] sm:$0xff]  ;;  %2090 = vmatprep.subr.mxu1 %v2005_v21  ;;  %v2354_v21 = vld [vmem:[#allocation10 + $0x1d0] sm:$0xff] }
 0xb99   :  { %2211 = vmatprep.mubr.f32.mxu0 %v3189_v10  ;;  %2148 = vmatpush1.msra.mxu0 %v2046_v30  ;;  %v1994_v30 = vld [vmem:[#allocation9 + $0x50] sm:$0xff] }
 0xb9a   :  { %2149 = vmatprep.subr.mxu0 %v2043_v42  ;;  %2091 = vmatpush1.msra.mxu1 %v2004_v24  ;;  %v1991_v42 = vld [vmem:[#allocation9 + $0x38] sm:$0xff]  ;;  %v2338_v24 = vld [vmem:[#allocation10 + $0x150] sm:$0xff] }
 0xb9b   :  { %2150 = vmatpush1.msra.mxu0 %v2042_v23  ;;  %2092 = vmatprep.subr.mxu1 %v2001_v28  ;;  %v1990_v23 = vld [vmem:[#allocation9 + $0x30] sm:$0xff]  ;;  %v2353_v28 = vld [vmem:[#allocation10 + $0x1c8] sm:$0xff] }
 0xb9c   :  { %2151 = vmatprep.subr.mxu0 %v2039_v41  ;;  %v1987_v41 = vld [vmem:[#allocation9 + $0x18] sm:$0xff] }
 0xb9d   :  { %2152 = vmatpush1.msra.mxu0 %v2038_v44  ;;  %v1986_v44 = vld [vmem:[#allocation9 + $0x10] sm:$0xff] }
 0xb9e   :  { %2153 = vmatprep.subr.mxu0 %v2035_v48 }
 0xb9f   :  { %2154 = vmatpush1.msra.mxu0 %v2034_v50 }
 0xba0   :  { %2155 = vmatprep.subr.mxu0 %v2031_v59 }
 0xba1   :  { %2156 = vmatpush1.msra.mxu0 %v2030_v63 }
 0xba2   :  { %2157 = vmatprep.subr.mxu0 %v2027_v1 }
 0xba3   :  { %2158 = vmatpush1.msra.mxu0 %v2026_v16  ;;  %v2311_v16 = vld [vmem:[#allocation10 + $0x78] sm:$0xff] }
 0xba4   :  { %2159 = vmatprep.subr.mxu0 %v2023_v20  ;;  %v2326_v20 = vld [vmem:[#allocation10 + $0xf0] sm:$0xff] }
 0xba5   :  { %2160 = vmatpush1.msra.mxu0 %v2022_v4  ;;  %v2342_v4 = vld [vmem:[#allocation10 + $0x170] sm:$0xff] }
 0xba6   :  { %2161 = vmatprep.subr.mxu0 %v2019_v6  ;;  %v2309_v6 = vld [vmem:[#allocation10 + $0x68] sm:$0xff] }
 0xba7   :  { %2162 = vmatpush1.msra.mxu0 %v2018_v8  ;;  %v2324_v8 = vld [vmem:[#allocation10 + $0xe0] sm:$0xff] }
 0xba8   :  { %2163 = vmatprep.subr.mxu0 %v2015_v9  ;;  %v2308_v9 = vld [vmem:[#allocation10 + $0x60] sm:$0xff] }
 0xba9   :  { %2164 = vmatpush1.msra.mxu0 %v2014_v12  ;;  %v2323_v12 = vld [vmem:[#allocation10 + $0xd8] sm:$0xff] }
 0xbaa   :  { %2165 = vmatprep.subr.mxu0 %v2011_v14  ;;  %v2307_v14 = vld [vmem:[#allocation10 + $0x58] sm:$0xff] }
 0xbab   :  { %2166 = vmatpush1.msra.mxu0 %v2010_v17  ;;  %v2322_v17 = vld [vmem:[#allocation10 + $0xd0] sm:$0xff] }
 0xbac   :  { %2167 = vmatprep.subr.mxu0 %v2007_v22  ;;  %v2306_v22 = vld [vmem:[#allocation10 + $0x50] sm:$0xff] }
 0xbad   :  { %2168 = vmatpush1.msra.mxu0 %v2006_v26  ;;  %v2321_v26 = vld [vmem:[#allocation10 + $0xc8] sm:$0xff] }
 0xc58   :  { %v2963_v31 = vpop.f32.mrf.mxu0 }
 0xc59   :  { %v1939_v32 = vadd.f32 %v2963_v31, %v2560_v29  ;;  %v2000_v31 = vld [vmem:[#allocation9 + $0x80] sm:$0xff] }
 0xc5a   :  { %v1933_v62 = vpop.f32.mrf.mxu0  ;;  %2093 = vmatpush1.msra.mxu1 %v2000_v31  ;;  %v2337_v31 = vld [vmem:[#allocation10 + $0x148] sm:$0xff] }
 0xc5b   :  { %v3541_v60 = vadd.f32 %v3049_v33, %v1939_v32  ;;  %v1934_v34 = vadd.f32 %v2560_v29, %v1933_v62  ;;  %v2003_v29 = vld [vmem:[#allocation9 + $0x98] sm:$0xff]  ;;  %v2002_v32 = vld [vmem:[#allocation9 + $0x90] sm:$0xff]  ;;  %v1997_v62 = vld [vmem:[#allocation9 + $0x68] sm:$0xff] }
 0xc5c   :  { %v1999_v33 = vld [vmem:[#allocation9 + $0x78] sm:$0xff]  ;;  %2169 = vmatprep.subr.mxu0 %v2003_v29  ;;  %2094 = vmatprep.subr.mxu1 %v1997_v62  ;;  %v2305_v29 = vld [vmem:[#allocation10 + $0x48] sm:$0xff]  ;;  %v2352_v62 = vld [vmem:[#allocation10 + $0x1c0] sm:$0xff] }
 0xc5d   :  { %v3546_v36 = vadd.f32 %v3050_v35, %v1934_v34  ;;  %1948 = vadd.xlane.f32.xlu0 %v3541_v60  ;;  %v1996_v34 = vld [vmem:[#allocation9 + $0x60] sm:$0xff]  ;;  %v1998_v35 = vld [vmem:[#allocation9 + $0x70] sm:$0xff]  ;;  %2170 = vmatpush1.msra.mxu0 %v2002_v32 }
 0xc5e   :  { %2171 = vmatprep.subr.mxu0 %v1999_v33  ;;  %2095 = vmatpush1.msra.mxu1 %v1996_v34  ;;  %v2320_v32 = vld [vmem:[#allocation10 + $0xc0] sm:$0xff] }
 0xc5f   :  { %1946 = vadd.xlane.f32.xlu1 %v3546_v36  ;;  %2172 = vmatpush1.msra.mxu0 %v1998_v35  ;;  %v2304_v33 = vld [vmem:[#allocation10 + $0x40] sm:$0xff]  ;;  %v2319_v35 = vld [vmem:[#allocation10 + $0xb8] sm:$0xff] }
 0xc60   :  { %2096 = vmatprep.subr.mxu1 %v1993_v37  ;;  %2173 = vmatprep.subr.mxu0 %v1995_v38  ;;  %v2336_v34 = vld [vmem:[#allocation10 + $0x140] sm:$0xff]  ;;  %v2351_v37 = vld [vmem:[#allocation10 + $0x1b8] sm:$0xff] }
 0xc61   :  { %2097 = vmatpush1.msra.mxu1 %v1992_v39  ;;  %2174 = vmatpush1.msra.mxu0 %v1994_v30  ;;  %v2303_v38 = vld [vmem:[#allocation10 + $0x38] sm:$0xff]  ;;  %v2318_v30 = vld [vmem:[#allocation10 + $0xb0] sm:$0xff] }
 0xc62   :  { %2098 = vmatprep.subr.mxu1 %v1989_v40  ;;  %2175 = vmatprep.subr.mxu0 %v1991_v42  ;;  %v2335_v39 = vld [vmem:[#allocation10 + $0x138] sm:$0xff]  ;;  %v2350_v40 = vld [vmem:[#allocation10 + $0x1b0] sm:$0xff] }
 0xc63   :  { %2099 = vmatpush1.msra.mxu1 %v1988_v45  ;;  %2176 = vmatpush1.msra.mxu0 %v1990_v23  ;;  %v2302_v42 = vld [vmem:[#allocation10 + $0x30] sm:$0xff]  ;;  %v2317_v23 = vld [vmem:[#allocation10 + $0xa8] sm:$0xff] }
 0xc64   :  { %2100 = vmatprep.subr.mxu1 %v1985_v46  ;;  %2177 = vmatprep.subr.mxu0 %v1987_v41  ;;  %v2334_v45 = vld [vmem:[#allocation10 + $0x130] sm:$0xff]  ;;  %v2349_v46 = vld [vmem:[#allocation10 + $0x1a8] sm:$0xff] }
 0xc65   :  { %2101 = vmatpush1.msra.mxu1 %v1984_v43  ;;  %2178 = vmatpush1.msra.mxu0 %v1986_v44  ;;  %v2301_v41 = vld [vmem:[#allocation10 + $0x28] sm:$0xff]  ;;  %v2316_v44 = vld [vmem:[#allocation10 + $0xa0] sm:$0xff] }
 0xc66   :  { %2706 = vmatprep.subr.mxu0 %v2359_v2  ;;  %v2333_v43 = vld [vmem:[#allocation10 + $0x128] sm:$0xff]  ;;  %v2296_v2 = vld [vmem:[#allocation10] sm:$0xff] }
 0xce6   :  { %v1949_v51 = vpop.xlane.xlu0 %1948 }
 0xce7   :  { %v1951_v52 = vmul.f32 0.0078125, %v1949_v51 }
 0xce8   :  { %v1947_v25 = vpop.xlane.xlu1 %1946 }
 0xce9   :  { %v1950_v53 = vmul.f32 0.0078125, %v1947_v25  ;;  %v3554_v55 = vsub.f32 %v3541_v60, %v1951_v52 }
 0xceb   :  { %v3551_v54 = vsub.f32 %v3546_v36, %v1950_v53  ;;  %v1955_v57 = vmul.f32 %v3554_v55, %v3554_v55  ;;  %v2561_v53 = vld [vmem:[%s3634_s11] ss:$0 sm:$0xff] }
 0xced   :  { %v1954_v56 = vmul.f32 %v3551_v54, %v3551_v54 }
 0xcef   :  { %1956 = vadd.xlane.f32.xlu0 %v1954_v56 }
 0xcf3   :  { %1958 = vadd.xlane.f32.xlu0 %v1955_v57  ;;  %v2562_v57 = vld [vmem:[%s3635_s12] ss:$0 sm:$0xff] }
 0xd78   :  { %v1957_v47 = vpop.xlane.xlu0 %1956 }
 0xd79   :  { %v1960_v48 = vmul.f32 0.0078125, %v1957_v47  ;;  %v2348_v47 = vld [vmem:[#allocation10 + $0x1a0] sm:$0xff] }
 0xd7b   :  { %v1962_v49 = vadd.f32 1e-05, %v1960_v48  ;;  %v2300_v48 = vld [vmem:[#allocation10 + $0x20] sm:$0xff] }
 0xd7c   :  { %v1959_v50 = vpop.xlane.xlu0 %1958 }
 0xd7d   :  { %3029 = vrsqrt.f32 %v1962_v49  ;;  %v1961_v51 = vmul.f32 0.0078125, %v1959_v50  ;;  %v2332_v49 = vld [vmem:[#allocation10 + $0x120] sm:$0xff]  ;;  %v2315_v50 = vld [vmem:[#allocation10 + $0x98] sm:$0xff] }
 0xd7f   :  { %v1963_v25 = vadd.f32 1e-05, %v1961_v51  ;;  %v2347_v51 = vld [vmem:[#allocation10 + $0x198] sm:$0xff] }
 0xd81   :  { %3031 = vrsqrt.f32 %v1963_v25  ;;  %v2299_v25 = vld [vmem:[#allocation10 + $0x18] sm:$0xff] }
 0xd8a   :  { %v3030_v52 = vpop.eup %3029 }
 0xd8b   :  { %v1966_v56 = vmul.f32 %v3030_v52, %v3551_v54  ;;  %v2327_v54 = vld [vmem:[#allocation10 + $0xf8] sm:$0xff] }
 0xd8c   :  { %2668 = vmatprep.subr.mxu1 %v2327_v54  ;;  %v2331_v52 = vld [vmem:[#allocation10 + $0x118] sm:$0xff]  ;;  %v2344_v54 = vld [vmem:[#allocation10 + $0x180] sm:$0xff] }
 0xd8d   :  { %v1974_v58 = vmul.f32 %v2561_v53, %v1966_v56  ;;  %v2346_v56 = vld [vmem:[#allocation10 + $0x190] sm:$0xff] }
 0xd8e   :  { %v3032_v59 = vpop.eup %3031 }
 0xd8f   :  { %v1982_v61 = vadd.f32 %v2562_v57, %v1974_v58  ;;  %v1967_v63 = vmul.f32 %v3032_v59, %v3554_v55  ;;  %v2358_v55 = vld [vmem:[#allocation10 + $0x1f0] sm:$0xff]  ;;  %v2313_v59 = vld [vmem:[#allocation10 + $0x88] sm:$0xff] }
 0xd90   :  { %v2330_v58 = vld [vmem:[#allocation10 + $0x110] sm:$0xff] }
 0xd91   :  { %2135 = vmatmul.mubr.f32.vlgmr.msra.gmra.mxu1 %v1982_v61  ;;  %2212 = vmatmul.mubr.f32.vlgmr.msra.gmra.mxu0 %v1982_v61  ;;  %v1975_v0 = vmul.f32 %v2561_v53, %v1967_v63  ;;  %v2314_v53 = vld [vmem:[#allocation10 + $0x90] sm:$0xff]  ;;  %v2345_v61 = vld [vmem:[#allocation10 + $0x188] sm:$0xff] }
 0xd92   :  { %2140 = vmatprep.mubr.f32.mxu1 %v3189_v10  ;;  %2217 = vmatprep.mubr.f32.mxu0 %v3189_v10  ;;  %v2325_v10 = vld [vmem:[#allocation10 + $0xe8] sm:$0xff] }
 0xd93   :  { %v1983_v1 = vadd.f32 %v2562_v57, %v1975_v0  ;;  %2669 = vmatpush3.msra.mxu1 %v2311_v16  ;;  %2707 = vmatpush3.msra.mxu0 %v2343_v18  ;;  %v2298_v57 = vld [vmem:[#allocation10 + $0x10] sm:$0xff]  ;;  %v2297_v63 = vld [vmem:[#allocation10 + $0x8] sm:$0xff]  ;;  %v2328_v16 = vld [vmem:[#allocation10 + $0x100] sm:$0xff]  ;;  %v2052_v18 = vsub.s32 0, %v3379_v27 }
 0xd94   :  { %2670 = vmatprep.subr.mxu1 %v2326_v20  ;;  %2708 = vmatprep.subr.mxu0 %v2358_v55  ;;  %v2329_v0 = vld [vmem:[#allocation10 + $0x108] sm:$0xff]  ;;  %v2060_v20 = vsub.s32 2, %v3379_v27  ;;  %v2048_v55 = vld [vmem:[%s3637_s14] sm:$0xf] }
 0xd95   :  { %2141 = vmatmul.mubr.f32.gmra.mxu1 %v1983_v1  ;;  %2218 = vmatmul.mubr.f32.gmra.mxu0 %v1983_v1  ;;  %v2312_v1 = vld [vmem:[#allocation10 + $0x80] sm:$0xff] }
 0xd96   :  { %2671 = vmatpush3.msra.mxu1 %v2310_v3  ;;  %2709 = vmatpush3.msra.mxu0 %v2342_v4  ;;  %v2056_v3 = vsub.s32 1, %v3379_v27  ;;  %v2064_v4 = vsub.s32 3, %v3379_v27 }
 0xd97   :  { %2672 = vmatprep.subr.mxu1 %v2325_v10  ;;  %2710 = vmatprep.subr.mxu0 %v2357_v5  ;;  %v2053_v10 = vrot.slane %v2048_v55, %v2052_v18  ;;  %v2061_v5 = vrot.slane %v2048_v55, %v2060_v20 }
 0xd98   :  { %2673 = vmatpush3.msra.mxu1 %v2309_v6  ;;  %2711 = vmatpush3.msra.mxu0 %v2341_v7 }
 0xd99   :  { %2674 = vmatprep.subr.mxu1 %v2324_v8  ;;  %2712 = vmatprep.subr.mxu0 %v2356_v19  ;;  %v2057_v8 = vrot.slane %v2048_v55, %v2056_v3  ;;  %v2065_v19 = vrot.slane %v2048_v55, %v2064_v4 }
 0xd9a   :  { %2675 = vmatpush3.msra.mxu1 %v2308_v9  ;;  %2713 = vmatpush3.msra.mxu0 %v2340_v11 }
 0xd9b   :  { %2676 = vmatprep.subr.mxu1 %v2323_v12  ;;  %2714 = vmatprep.subr.mxu0 %v2355_v13 }
 0xd9c   :  { %2677 = vmatpush3.msra.mxu1 %v2307_v14  ;;  %2715 = vmatpush3.msra.mxu0 %v2339_v15 }
 0xd9d   :  { %2678 = vmatprep.subr.mxu1 %v2322_v17  ;;  %2716 = vmatprep.subr.mxu0 %v2354_v21 }
 0xd9e   :  { %2679 = vmatpush3.msra.mxu1 %v2306_v22  ;;  %2717 = vmatpush3.msra.mxu0 %v2338_v24 }
 0xd9f   :  { %2680 = vmatprep.subr.mxu1 %v2321_v26  ;;  %2718 = vmatprep.subr.mxu0 %v2353_v28 }
 0xda0   :  { %2681 = vmatpush3.msra.mxu1 %v2305_v29  ;;  %2719 = vmatpush3.msra.mxu0 %v2337_v31 }
 0xda1   :  { %2682 = vmatprep.subr.mxu1 %v2320_v32  ;;  %2720 = vmatprep.subr.mxu0 %v2352_v62 }
 0xda2   :  { %2683 = vmatpush3.msra.mxu1 %v2304_v33  ;;  %2721 = vmatpush3.msra.mxu0 %v2336_v34 }
 0xda3   :  { %2684 = vmatprep.subr.mxu1 %v2319_v35  ;;  %2722 = vmatprep.subr.mxu0 %v2351_v37 }
 0xda4   :  { %2685 = vmatpush3.msra.mxu1 %v2303_v38  ;;  %2723 = vmatpush3.msra.mxu0 %v2335_v39 }
 0xda5   :  { %2686 = vmatprep.subr.mxu1 %v2318_v30  ;;  %2724 = vmatprep.subr.mxu0 %v2350_v40 }
 0xda6   :  { %2687 = vmatpush3.msra.mxu1 %v2302_v42  ;;  %2725 = vmatpush3.msra.mxu0 %v2334_v45 }
 0xda7   :  { %2688 = vmatprep.subr.mxu1 %v2317_v23  ;;  %2726 = vmatprep.subr.mxu0 %v2349_v46 }
 0xda8   :  { %2689 = vmatpush3.msra.mxu1 %v2301_v41  ;;  %2727 = vmatpush3.msra.mxu0 %v2333_v43 }
 0xda9   :  { %2690 = vmatprep.subr.mxu1 %v2316_v44  ;;  %2728 = vmatprep.subr.mxu0 %v2348_v47 }
 0xdaa   :  { %2691 = vmatpush3.msra.mxu1 %v2300_v48  ;;  %2729 = vmatpush3.msra.mxu0 %v2332_v49 }
 0xdab   :  { %2692 = vmatprep.subr.mxu1 %v2315_v50  ;;  %2730 = vmatprep.subr.mxu0 %v2347_v51 }
 0xdac   :  { %2693 = vmatpush3.msra.mxu1 %v2299_v25  ;;  %2731 = vmatpush3.msra.mxu0 %v2331_v52 }
 0xdad   :  { %2694 = vmatprep.subr.mxu1 %v2314_v53  ;;  %2732 = vmatprep.subr.mxu0 %v2346_v56 }
 0xdae   :  { %2695 = vmatpush3.msra.mxu1 %v2298_v57  ;;  %2733 = vmatpush3.msra.mxu0 %v2330_v58 }
 0xdaf   :  { %2696 = vmatprep.subr.mxu1 %v2313_v59  ;;  %2734 = vmatprep.subr.mxu0 %v2345_v61 }
 0xdb0   :  { %2697 = vmatpush3.msra.mxu1 %v2297_v63  ;;  %2735 = vmatpush3.msra.mxu0 %v2329_v0 }
 0xdb1   :  { %2698 = vmatprep.subr.mxu1 %v2312_v1  ;;  %2736 = vmatprep.subr.mxu0 %v2344_v54 }
 0xdb2   :  { %2699 = vmatpush3.msra.mxu1 %v2296_v2  ;;  %2737 = vmatpush3.msra.mxu0 %v2328_v16 }
 0xe51   :  { %v2136_v6 = vpop.f32.mrf.mxu1  ;;  %v2213_v7 = vpop.f32.mrf.mxu0 }
 0xe52   :  { %v3577_v9 = vadd.f32 %v2136_v6, %v2053_v10  ;;  %v3579_v11 = vadd.f32 %v2213_v7, %v2061_v5 }
 0xe53   :  { %v2138_v12 = vpop.f32.mrf.mxu1  ;;  %v2215_v13 = vpop.f32.mrf.mxu0 }
 0xe54   :  { %v2232_v14 = vmul.f32 0.044715, %v3577_v9  ;;  %v2234_v15 = vmul.f32 0.044715, %v3579_v11  ;;  %v2139_v17 = vadd.f32 %v2138_v12, %v2057_v8  ;;  %v3583_v21 = vadd.f32 %v2215_v13, %v2065_v19 }
 0xe55   :  { %v2142_v27 = vpop.f32.mrf.mxu1  ;;  %v2219_v22 = vpop.f32.mrf.mxu0  ;;  %v2224_v12 = vmul.f32 0.5, %v3577_v9 }
 0xe56   :  { %v2240_v24 = vmul.f32 %v2232_v14, %v3577_v9  ;;  %v2242_v26 = vmul.f32 %v2234_v15, %v3579_v11  ;;  %v3587_v28 = vadd.f32 %v2142_v27, %v2053_v10  ;;  %v3589_v29 = vadd.f32 %v2219_v22, %v2061_v5 }
 0xe57   :  { %v2233_v31 = vmul.f32 0.044715, %v2139_v17  ;;  %v2235_v32 = vmul.f32 0.044715, %v3583_v21  ;;  %v2144_v62 = vpop.f32.mrf.mxu1  ;;  %v2221_v33 = vpop.f32.mrf.mxu0  ;;  %v2225_v7 = vmul.f32 0.5, %v2139_v17  ;;  %v2227_v13 = vmul.f32 0.5, %v3583_v21 }
 0xe58   :  { %v2248_v34 = vmul.f32 %v2240_v24, %v3577_v9  ;;  %v2250_v35 = vmul.f32 %v2242_v26, %v3579_v11  ;;  %v2236_v37 = vmul.f32 0.044715, %v3587_v28  ;;  %v2238_v38 = vmul.f32 0.044715, %v3589_v29 }
 0xe59   :  { %v2241_v39 = vmul.f32 %v2233_v31, %v2139_v17  ;;  %v2243_v30 = vmul.f32 %v2235_v32, %v3583_v21  ;;  %v2145_v40 = vadd.f32 %v2144_v62, %v2057_v8  ;;  %v2222_v42 = vadd.f32 %v2221_v33, %v2065_v19 }
 0xe5a   :  { %v2256_v45 = vadd.f32 %v2248_v34, %v3577_v9  ;;  %v2258_v23 = vadd.f32 %v2250_v35, %v3579_v11  ;;  %v2244_v46 = vmul.f32 %v2236_v37, %v3587_v28  ;;  %v2246_v50 = vmul.f32 %v2238_v38, %v3589_v29 }
 0xe5b   :  { %v2237_v41 = vmul.f32 0.044715, %v2145_v40  ;;  %v2239_v43 = vmul.f32 0.044715, %v2222_v42  ;;  %v2249_v44 = vmul.f32 %v2241_v39, %v2139_v17  ;;  %v2251_v47 = vmul.f32 %v2243_v30, %v3583_v21 }
 0xe5c   :  { %v2264_v48 = vmul.f32 0.7978846, %v2256_v45  ;;  %v2266_v49 = vmul.f32 0.7978846, %v2258_v23  ;;  %v2252_v56 = vmul.f32 %v2244_v46, %v3587_v28  ;;  %v2254_v0 = vmul.f32 %v2246_v50, %v3589_v29 }
 0xe5d   :  { %v2245_v51 = vmul.f32 %v2237_v41, %v2145_v40  ;;  %v2247_v25 = vmul.f32 %v2239_v43, %v2222_v42  ;;  %v2257_v52 = vadd.f32 %v2249_v44, %v2139_v17  ;;  %v2259_v53 = vadd.f32 %v2251_v47, %v3583_v21 }
 0xe5e   :  { %3033 = vtanh.f32 %v2264_v48  ;;  %v2260_v63 = vadd.f32 %v2252_v56, %v3587_v28  ;;  %v2262_v16 = vadd.f32 %v2254_v0, %v3589_v29  ;;  %v2226_v27 = vmul.f32 0.5, %v3579_v11 }
 0xe5f   :  { %3035 = vtanh.f32 %v2266_v49  ;;  %v2265_v57 = vmul.f32 0.7978846, %v2257_v52  ;;  %v2267_v58 = vmul.f32 0.7978846, %v2259_v53  ;;  %v2253_v59 = vmul.f32 %v2245_v51, %v2145_v40 }
 0xe60   :  { %v2255_v61 = vmul.f32 %v2247_v25, %v2222_v42  ;;  %v2268_v2 = vmul.f32 0.7978846, %v2260_v63  ;;  %v2270_v55 = vmul.f32 0.7978846, %v2262_v16  ;;  %v2229_v34 = vmul.f32 0.5, %v2145_v40 }
 0xe61   :  { %3037 = vtanh.f32 %v2265_v57  ;;  %v2261_v1 = vadd.f32 %v2253_v59, %v2145_v40  ;;  %v2231_v9 = vmul.f32 0.5, %v2222_v42  ;;  %v2228_v21 = vmul.f32 0.5, %v3587_v28 }
 0xe62   :  { %3039 = vtanh.f32 %v2267_v58  ;;  %v2263_v54 = vadd.f32 %v2255_v61, %v2222_v42  ;;  %v2230_v11 = vmul.f32 0.5, %v3589_v29  ;;  %v2563_v29 = vld [vmem:[%s3639_s16] ss:$0 sm:$0xff] }
 0xe63   :  { %v2269_v18 = vmul.f32 0.7978846, %v2261_v1  ;;  %3041 = vtanh.f32 %v2268_v2 }
 0xe64   :  { %v2271_v20 = vmul.f32 0.7978846, %v2263_v54 }
 0xe65   :  { %3043 = vtanh.f32 %v2269_v18 }
 0xe66   :  { %3045 = vtanh.f32 %v2271_v20 }
 0xe67   :  { %3047 = vtanh.f32 %v2270_v55 }
 0xe6b   :  { %v3034_v3 = vpop.eup %3033 }
 0xe6c   :  { %v3036_v4 = vpop.eup %3035  ;;  %v2280_v5 = vadd.f32 1.0, %v3034_v3 }
 0xe6d   :  { %v2282_v19 = vadd.f32 1.0, %v3036_v4 }
 0xe6e   :  { %v3038_v10 = vpop.eup %3037  ;;  %v2288_v31 = vmul.f32 %v2280_v5, %v2224_v12 }
 0xe6f   :  { %v3040_v6 = vpop.eup %3039  ;;  %v2281_v8 = vadd.f32 1.0, %v3038_v10  ;;  %v2290_v33 = vmul.f32 %v2282_v19, %v2226_v27 }
 0xe70   :  { %v2283_v14 = vadd.f32 1.0, %v3040_v6  ;;  %v3042_v15 = vpop.eup %3041 }
 0xe71   :  { %v2289_v22 = vmul.f32 %v2281_v8, %v2225_v7  ;;  %v2284_v32 = vadd.f32 1.0, %v3042_v15 }
 0xe72   :  { %v3044_v24 = vpop.eup %3043  ;;  %v2291_v26 = vmul.f32 %v2283_v14, %v2227_v13 }
 0xe73   :  { %v3046_v62 = vpop.eup %3045  ;;  %2424 = vmatprep.mubr.f32.mxu1 %v2289_v22  ;;  %v2285_v17 = vadd.f32 1.0, %v3044_v24  ;;  %v2292_v45 = vmul.f32 %v2284_v32, %v2228_v21 }
 0xe74   :  { %v3048_v35 = vpop.eup %3047  ;;  %2499 = vmatprep.mubr.f32.mxu0 %v2291_v26  ;;  %2425 = vmatmul.mubr.f32.vlgmr.msra.gmra.mxu1 %v2288_v31  ;;  %v2287_v37 = vadd.f32 1.0, %v3046_v62 }
 0xe75   :  { %2500 = vmatmul.mubr.f32.vlgmr.msra.gmra.mxu0 %v2290_v33  ;;  %v2293_v38 = vmul.f32 %v2285_v17, %v2229_v34  ;;  %v2286_v39 = vadd.f32 1.0, %v3048_v35 }
 0xe76   :  { %v2295_v30 = vmul.f32 %v2287_v37, %v2231_v9 }
 0xe77   :  { %2429 = vmatprep.mubr.f32.mxu1 %v2293_v38  ;;  %v2294_v23 = vmul.f32 %v2286_v39, %v2230_v11 }
 0xe78   :  { %2504 = vmatprep.mubr.f32.mxu0 %v2295_v30  ;;  %2430 = vmatmul.mubr.f32.gmra.mxu1 %v2292_v45 }
 0xe79   :  { %2505 = vmatmul.mubr.f32.gmra.mxu0 %v2294_v23 }
 0xf34   :  { %v2700_v40 = vpop.f32.mrf.mxu1 }
 0xf35   :  { %v2738_v46 = vpop.f32.mrf.mxu0 }
 0xf36   :  { %v2701_v41 = vpop.f32.mrf.mxu1 }
 0xf37   :  { %v2702_v43 = vadd.f32 %v2701_v41, %v2700_v40  ;;  %v2739_v42 = vpop.f32.mrf.mxu0 }
 0xf38   :  { %v2740_v44 = vadd.f32 %v2739_v42, %v2738_v46  ;;  %v2703_v47 = vpop.f32.mrf.mxu1 }
 0xf39   :  { %v2741_v28 = vpop.f32.mrf.mxu0 }
 0xf3a   :  { %v2502_v48 = vadd.f32 %v2740_v44, %v2702_v43  ;;  %v2704_v49 = vpop.f32.mrf.mxu1 }
 0xf3b   :  { %v2705_v50 = vadd.f32 %v2704_v49, %v2703_v47  ;;  %v2742_v51 = vpop.f32.mrf.mxu0 }
 0xf3c   :  { %v2510_v25 = vadd.f32 %v2502_v48, %v3546_v36  ;;  %v2743_v52 = vadd.f32 %v2742_v51, %v2741_v28 }
 0xf3e   :  { %v2519_v53 = vadd.f32 %v2563_v29, %v2510_v25  ;;  %v2507_v56 = vadd.f32 %v2743_v52, %v2705_v50 }
 0xf40   :  { %2521 = vst [vmem:[%s3640_s17] sm:$0xff] %v2519_v53  ;;  %v2511_v57 = vadd.f32 %v2507_v56, %v3541_v60 }
 0xf42   :  { %v2520_v58 = vadd.f32 %v2563_v29, %v2511_v57 }
 0xf44   :  { %2522 = vst [vmem:[%s3640_s17 + $0x8] sm:$0xff] %v2520_v58 }
 0xf45   :  { %2527 = vsyncpa [#allocation3], 1 }
 0xf46   :  { %2528 = vsyncpa [#allocation5], 1 }
 0xf47   :  { %2529 = vsyncpa [#allocation8], 1 }
 0xf48   :  { %2530 = vsyncpa [#allocation11], 1 }

// kernel: structured_transformer_block_forward.3
= control target key start
LH: loop header
LB: loop body
LE: loop exit
PB: predicated region body
PF: predicated region fallthrough
CT: control target
= control target key end

     0   :  { %v142_v25 = vlaneseq  ;;  %v18905_v26 = vmov 839922192   ;;  %v18906_v28 = vmov 1985246804   ;;  %vm18908_vm0 = vmmov 0   ;;  %s18910_s18 = smov 64   ;;  %s23276_s0 = inlined_call_operand.vmem [shape: f32[16,4,128], index: 0, kind: input, shape index: {}]   ;;  %s23277_s3 = inlined_call_operand.vmem [shape: f32[128,128], index: 3, kind: input, shape index: {}]   ;;  %s23278_s5 = inlined_call_operand.vmem [shape: f32[128,128], index: 5, kind: input, shape index: {}]   ;;  %s23279_s7 = inlined_call_operand.vmem [shape: f32[128,128], index: 7, kind: input, shape index: {}]   ;;  %s23280_s1 = inlined_call_operand.vmem [shape: f32[1,128], index: 1, kind: input, shape index: {}]   ;;  %s23281_s2 = inlined_call_operand.vmem [shape: f32[1,128], index: 2, kind: input, shape index: {}]   ;;  %s23282_s4 = inlined_call_operand.vmem [shape: f32[1,128], index: 4, kind: input, shape index: {}]   ;;  %s23283_s6 = inlined_call_operand.vmem [shape: f32[1,128], index: 6, kind: input, shape index: {}]   ;;  %s23284_s8 = inlined_call_operand.vmem [shape: f32[1,128], index: 8, kind: input, shape index: {}]   ;;  %s23285_s9 = inlined_call_operand.vmem [shape: f32[128,128], index: 9, kind: input, shape index: {}]   ;;  %s23286_s10 = inlined_call_operand.vmem [shape: f32[1,128], index: 10, kind: input, shape index: {}]   ;;  %s23287_s13 = inlined_call_operand.vmem [shape: f32[128,512], index: 13, kind: input, shape index: {}]   ;;  %s23288_s11 = inlined_call_operand.vmem [shape: f32[1,128], index: 11, kind: input, shape index: {}]   ;;  %s23289_s12 = inlined_call_operand.vmem [shape: f32[1,128], index: 12, kind: input, shape index: {}]   ;;  %s23290_s15 = inlined_call_operand.vmem [shape: f32[512,128], index: 15, kind: input, shape index: {}]   ;;  %s23291_s14 = inlined_call_operand.vmem [shape: f32[1,512], index: 14, kind: input, shape index: {}]   ;;  %s23292_s16 = inlined_call_operand.vmem [shape: f32[1,128], index: 16, kind: input, shape index: {}]   ;;  %s23293_s17 = inlined_call_operand.vmem [shape: f32[16,3,128], index: 17, kind: output, shape index: {}]  }
   0x1   :  { %23396 = sst [smem:[#allocation50_spill]] %s23276_s0  ;;  %v140_v27 = vunpack.c.l.s4 %v18905_v26  ;;  %v147_v29 = vunpack.c.l.s4 %v18906_v28  ;;  %vm1042_vm1 = vcmask 261120   ;;  %vm2457_vm2 = vcmask 1043456  }
   0x2   :  { %23397 = sst [smem:[#allocation51_spill]] %s23277_s3  ;;  %v19091_v30 = vshrl.u32 %v142_v25, 7  ;;  %vm2276_vm4 = vcmask 26624   ;;  %vm2453_vm5 = vcmask 31744   ;;  %vm14497_vm6 = vcmask 523264  }
   0x3   :  { %s23398_s26 = sld [smem:[#allocation50_spill]]  ;;  %v141_v31 = vunpack.c.0.s8 %v140_v27  ;;  %v148_v32 = vunpack.c.0.s8 %v147_v29  ;;  %vm14504_vm7 = vcmask 785408  }
   0x4   :  { %s23399_s30 = sld [smem:[#allocation51_spill]]  ;;  %23400 = vst [vmem:[#allocation2_spill] sm:$0xff] %v19091_v30 }
   0x5   :  { %v19094_v33 = vsub.s32 %v141_v31, %v19091_v30  ;;  %v19097_v34 = vsub.s32 %v148_v32, %v19091_v30 }
   0x9   :  { %v56_v0 = vld [vmem:[%s23398_s26] sm:$0xf]  ;;  %v57_v1 = vld [vmem:[%s23398_s26 + $0x4] sm:$0xf]  ;;  %v60_v2 = vld [vmem:[%s23398_s26 + $0x10] sm:$0xf] }
   0xa   :  { %v90_v3 = vcombine.low %v56_v0, %v57_v1  ;;  %v61_v4 = vld [vmem:[%s23398_s26 + $0x14] sm:$0xf]  ;;  %v19018_v5 = vld [vmem:[%s23398_s26 + $0x8] sm:$0xf]  ;;  %v19023_v7 = vld [vmem:[%s23398_s26 + $0xc] sm:$0xf] }
   0xb   :  { %v92_v6 = vcombine.low %v60_v2, %v61_v4  ;;  %v19028_v8 = vld [vmem:[%s23398_s26 + $0x18] sm:$0xf]  ;;  %v19033_v9 = vld [vmem:[%s23398_s26 + $0x1c] sm:$0xf]  ;;  %v91_v10 = vcombine.low %v19018_v5, %v19023_v7  ;;  %v19042_v12 = vld [vmem:[%s23398_s26 + $0x20] sm:$0xf] }
   0xc   :  { %106 = vadd.xlane.f32.xlu0 %v90_v3  ;;  %v93_v11 = vcombine.low %v19028_v8, %v19033_v9  ;;  %v19047_v13 = vld [vmem:[%s23398_s26 + $0x24] sm:$0xf]  ;;  %v19052_v14 = vld [vmem:[%s23398_s26 + $0x28] sm:$0xf]  ;;  %v19057_v15 = vld [vmem:[%s23398_s26 + $0x2c] sm:$0xf] }
   0xd   :  { %110 = vadd.xlane.f32.xlu1 %v92_v6  ;;  %v94_v16 = vcombine.low %v19042_v12, %v19047_v13  ;;  %v95_v17 = vcombine.low %v19052_v14, %v19057_v15  ;;  %v19066_v18 = vld [vmem:[%s23398_s26 + $0x30] sm:$0xf]  ;;  %v19071_v19 = vld [vmem:[%s23398_s26 + $0x34] sm:$0xf]  ;;  %v19078_v21 = vld [vmem:[%s23398_s26 + $0x38] sm:$0xf] }
   0xe   :  { %v96_v20 = vcombine.low %v19066_v18, %v19071_v19  ;;  %v19083_v22 = vld [vmem:[%s23398_s26 + $0x3c] sm:$0xf] }
   0xf   :  { %v97_v23 = vcombine.low %v19078_v21, %v19083_v22  ;;  %v586_v24 = vld [vmem:[%s23399_s30 + $0x78] sm:$0xff] }
  0x10   :  { %108 = vadd.xlane.f32.xlu0 %v91_v10  ;;  %17635 = vmatprep.subr.mxu0 %v586_v24 }
  0x11   :  { %112 = vadd.xlane.f32.xlu1 %v93_v11  ;;  %17636 = vmatpush3.msra.mxu0 %v586_v24 }
  0x14   :  { %114 = vadd.xlane.f32.xlu0 %v94_v16 }
  0x15   :  { %116 = vadd.xlane.f32.xlu1 %v95_v17 }
  0x18   :  { %118 = vadd.xlane.f32.xlu0 %v96_v20 }
  0x19   :  { %120 = vadd.xlane.f32.xlu1 %v97_v23 }
  0x95   :  { %v107_v35 = vpop.xlane.xlu0 %106 }
  0x96   :  { %v123_v36 = vmul.f32 0.0078125, %v107_v35  ;;  %v111_v37 = vpop.xlane.xlu1 %110 }
  0x97   :  { %v125_v38 = vmul.f32 0.0078125, %v111_v37 }
  0x98   :  { %v145_v39 = vrot.slane %v123_v36, %v19094_v33  ;;  %v152_v40 = vrot.slane %v123_v36, %v19097_v34 }
  0x99   :  { %v173_v41 = vrot.slane %v125_v38, %v19094_v33  ;;  %v180_v42 = vrot.slane %v125_v38, %v19097_v34  ;;  %v109_v43 = vpop.xlane.xlu0 %108 }
  0x9a   :  { %v124_v44 = vmul.f32 0.0078125, %v109_v43  ;;  %v113_v45 = vpop.xlane.xlu1 %112  ;;  %v19103_v46 = vsub.f32 %v56_v0, %v145_v39  ;;  %v19105_v47 = vsub.f32 %v57_v1, %v152_v40 }
  0x9b   :  { %v126_v48 = vmul.f32 0.0078125, %v113_v45  ;;  %v19107_v49 = vsub.f32 %v60_v2, %v173_v41  ;;  %v19109_v50 = vsub.f32 %v61_v4, %v180_v42  ;;  %v745_v45 = vld [vmem:[%s23278_s5 + $0x70] sm:$0xff] }
  0x9c   :  { %v159_v51 = vrot.slane %v124_v44, %v19094_v33  ;;  %v166_v52 = vrot.slane %v124_v44, %v19097_v34  ;;  %v283_v53 = vmul.f32 %v19103_v46, %v19103_v46  ;;  %v284_v54 = vmul.f32 %v19105_v47, %v19105_v47  ;;  %v746_v44 = vld [vmem:[%s23278_s5 + $0x78] sm:$0xff] }
  0x9d   :  { %v187_v55 = vrot.slane %v126_v48, %v19094_v33  ;;  %v194_v56 = vrot.slane %v126_v48, %v19097_v34  ;;  %v115_v57 = vpop.xlane.xlu0 %114  ;;  %v287_v58 = vmul.f32 %v19107_v49, %v19107_v49  ;;  %v288_v59 = vmul.f32 %v19109_v50, %v19109_v50  ;;  %17679 = vmatprep.subr.mxu1 %v746_v44 }
  0x9e   :  { %v127_v60 = vmul.f32 0.0078125, %v115_v57  ;;  %v315_v61 = vcombine.low %v283_v53, %v284_v54  ;;  %v117_v62 = vpop.xlane.xlu1 %116  ;;  %v19124_v63 = vsub.f32 %v19018_v5, %v159_v51  ;;  %v19127_v0 = vsub.f32 %v19023_v7, %v166_v52  ;;  %17680 = vmatpush3.msra.mxu1 %v746_v44  ;;  %v744_v54 = vld [vmem:[%s23278_s5 + $0x68] sm:$0xff] }
  0x9f   :  { %v128_v1 = vmul.f32 0.0078125, %v117_v62  ;;  %v317_v2 = vcombine.low %v287_v58, %v288_v59  ;;  %v19130_v3 = vsub.f32 %v19028_v8, %v187_v55  ;;  %v19133_v4 = vsub.f32 %v19033_v9, %v194_v56  ;;  %17681 = vmatprep.subr.mxu1 %v745_v45  ;;  %v583_v55 = vld [vmem:[%s23399_s30 + $0x60] sm:$0xff]  ;;  %v742_v59 = vld [vmem:[%s23278_s5 + $0x58] sm:$0xff]  ;;  %v580_v62 = vld [vmem:[%s23399_s30 + $0x48] sm:$0xff] }
  0xa0   :  { %v201_v6 = vrot.slane %v127_v60, %v19094_v33  ;;  %v208_v10 = vrot.slane %v127_v60, %v19097_v34  ;;  %331 = vadd.xlane.f32.xlu0 %v315_v61  ;;  %v285_v5 = vmul.f32 %v19124_v63, %v19124_v63  ;;  %v286_v7 = vmul.f32 %v19127_v0, %v19127_v0  ;;  %v743_v56 = vld [vmem:[%s23278_s5 + $0x60] sm:$0xff]  ;;  %v581_v60 = vld [vmem:[%s23399_s30 + $0x50] sm:$0xff] }
  0xa1   :  { %v215_v11 = vrot.slane %v128_v1, %v19094_v33  ;;  %v222_v16 = vrot.slane %v128_v1, %v19097_v34  ;;  %v119_v8 = vpop.xlane.xlu0 %118  ;;  %v289_v9 = vmul.f32 %v19130_v3, %v19130_v3  ;;  %v290_v17 = vmul.f32 %v19133_v4, %v19133_v4  ;;  %17682 = vmatpush3.msra.mxu1 %v745_v45  ;;  %v741_v61 = vld [vmem:[%s23278_s5 + $0x50] sm:$0xff]  ;;  %v740_v1 = vld [vmem:[%s23278_s5 + $0x48] sm:$0xff] }
  0xa2   :  { %v129_v20 = vmul.f32 0.0078125, %v119_v8  ;;  %v316_v23 = vcombine.low %v285_v5, %v286_v7  ;;  %v19148_v24 = vsub.f32 %v19042_v12, %v201_v6  ;;  %v19151_v26 = vsub.f32 %v19047_v13, %v208_v10  ;;  %v121_v42 = vpop.xlane.xlu1 %120  ;;  %17683 = vmatprep.subr.mxu1 %v744_v54  ;;  %v739_v6 = vld [vmem:[%s23278_s5 + $0x40] sm:$0xff]  ;;  %v578_v10 = vld [vmem:[%s23399_s30 + $0x38] sm:$0xff]  ;;  %v577_v7 = vld [vmem:[%s23399_s30 + $0x30] sm:$0xff] }
  0xa3   :  { %v318_v27 = vcombine.low %v289_v9, %v290_v17  ;;  %v19154_v28 = vsub.f32 %v19052_v14, %v215_v11  ;;  %v19157_v29 = vsub.f32 %v19057_v15, %v222_v16  ;;  %v130_v43 = vmul.f32 0.0078125, %v121_v42  ;;  %17684 = vmatpush3.msra.mxu1 %v744_v54  ;;  %v738_v5 = vld [vmem:[%s23278_s5 + $0x38] sm:$0xff]  ;;  %v737_v11 = vld [vmem:[%s23278_s5 + $0x30] sm:$0xff]  ;;  %v576_v16 = vld [vmem:[%s23399_s30 + $0x28] sm:$0xff] }
  0xa4   :  { %v229_v31 = vrot.slane %v129_v20, %v19094_v33  ;;  %v236_v32 = vrot.slane %v129_v20, %v19097_v34  ;;  %335 = vadd.xlane.f32.xlu0 %v317_v2  ;;  %333 = vadd.xlane.f32.xlu1 %v316_v23  ;;  %v291_v12 = vmul.f32 %v19148_v24, %v19148_v24  ;;  %v579_v2 = vld [vmem:[%s23399_s30 + $0x40] sm:$0xff]  ;;  %v736_v8 = vld [vmem:[%s23278_s5 + $0x28] sm:$0xff]  ;;  %v574_v20 = vld [vmem:[%s23399_s30 + $0x18] sm:$0xff] }
  0xa5   :  { %v292_v13 = vmul.f32 %v19151_v26, %v19151_v26  ;;  %v293_v35 = vmul.f32 %v19154_v28, %v19154_v28  ;;  %v294_v14 = vmul.f32 %v19157_v29, %v19157_v29  ;;  %v243_v48 = vrot.slane %v130_v43, %v19094_v33  ;;  %17685 = vmatprep.subr.mxu1 %v743_v56  ;;  %v575_v9 = vld [vmem:[%s23399_s30 + $0x20] sm:$0xff]  ;;  %v734_v23 = vld [vmem:[%s23278_s5 + $0x18] sm:$0xff] }
  0xa6   :  { %v19170_v15 = vsub.f32 %v19066_v18, %v229_v31  ;;  %v19173_v36 = vsub.f32 %v19071_v19, %v236_v32  ;;  %v585_v18 = vld [vmem:[%s23399_s30 + $0x70] sm:$0xff]  ;;  %v584_v19 = vld [vmem:[%s23399_s30 + $0x68] sm:$0xff]  ;;  %v250_v51 = vrot.slane %v130_v43, %v19097_v34  ;;  %17686 = vmatpush3.msra.mxu1 %v743_v56  ;;  %v735_v17 = vld [vmem:[%s23278_s5 + $0x20] sm:$0xff] }
  0xa7   :  { %v319_v37 = vcombine.low %v291_v12, %v292_v13  ;;  %v320_v38 = vcombine.low %v293_v35, %v294_v14  ;;  %17637 = vmatprep.subr.mxu0 %v585_v18  ;;  %v19194_v52 = vsub.f32 %v19078_v21, %v243_v48  ;;  %v582_v21 = vld [vmem:[%s23399_s30 + $0x58] sm:$0xff]  ;;  %17687 = vmatprep.subr.mxu1 %v742_v59  ;;  %v733_v31 = vld [vmem:[%s23278_s5 + $0x10] sm:$0xff]  ;;  %v572_v32 = vld [vmem:[%s23399_s30 + $0x8] sm:$0xff] }
  0xa8   :  { %337 = vadd.xlane.f32.xlu1 %v318_v27  ;;  %v295_v39 = vmul.f32 %v19170_v15, %v19170_v15  ;;  %v296_v40 = vmul.f32 %v19173_v36, %v19173_v36  ;;  %17638 = vmatpush3.msra.mxu0 %v585_v18  ;;  %v19197_v53 = vsub.f32 %v19083_v22, %v250_v51  ;;  %v573_v27 = vld [vmem:[%s23399_s30 + $0x10] sm:$0xff]  ;;  %v732_v12 = vld [vmem:[%s23278_s5 + $0x8] sm:$0xff]  ;;  %v571_v13 = vld [vmem:[%s23399_s30] sm:$0xff] }
  0xa9   :  { %339 = vadd.xlane.f32.xlu0 %v319_v37  ;;  %17639 = vmatprep.subr.mxu0 %v584_v19  ;;  %v297_v22 = vmul.f32 %v19194_v52, %v19194_v52  ;;  %v731_v35 = vld [vmem:[%s23278_s5] sm:$0xff]  ;;  %v19287_v14 = vld [vmem:[%s23279_s7 + $0x78] sm:$0xff] }
  0xaa   :  { %v321_v41 = vcombine.low %v295_v39, %v296_v40  ;;  %17640 = vmatpush3.msra.mxu0 %v584_v19  ;;  %v298_v57 = vmul.f32 %v19197_v53, %v19197_v53  ;;  %17688 = vmatpush3.msra.mxu1 %v742_v59 }
  0xab   :  { %17641 = vmatprep.subr.mxu0 %v583_v55  ;;  %17689 = vmatprep.subr.mxu1 %v741_v61 }
  0xac   :  { %341 = vadd.xlane.f32.xlu1 %v320_v38  ;;  %17642 = vmatpush3.msra.mxu0 %v583_v55  ;;  %v322_v58 = vcombine.low %v297_v22, %v298_v57 }
  0xad   :  { %343 = vadd.xlane.f32.xlu0 %v321_v41  ;;  %17643 = vmatprep.subr.mxu0 %v582_v21 }
  0xae   :  { %17644 = vmatpush3.msra.mxu0 %v582_v21  ;;  %17690 = vmatpush3.msra.mxu1 %v741_v61 }
  0xaf   :  { %17645 = vmatprep.subr.mxu0 %v581_v60  ;;  %17691 = vmatprep.subr.mxu1 %v740_v1 }
  0xb0   :  { %345 = vadd.xlane.f32.xlu1 %v322_v58  ;;  %17646 = vmatpush3.msra.mxu0 %v581_v60  ;;  %v19293_v60 = vld [vmem:[%s23280_s1] ss:$0 sm:$0xff]  ;;  %s18912_s1 = smov 32  }
  0xb1   :  { %17647 = vmatprep.subr.mxu0 %v580_v62  ;;  %17692 = vmatpush3.msra.mxu1 %v740_v1 }
  0xb2   :  { %17648 = vmatpush3.msra.mxu0 %v580_v62  ;;  %17693 = vmatprep.subr.mxu1 %v739_v6  ;;  %v19298_v62 = vld [vmem:[%s23281_s2] ss:$0 sm:$0xff] }
  0xb3   :  { %17649 = vmatprep.subr.mxu0 %v579_v2  ;;  %17694 = vmatpush3.msra.mxu1 %v739_v6  ;;  %v19304_v6 = vcombine.high %v19293_v60, %v19293_v60 }
  0xb4   :  { %17650 = vmatpush3.msra.mxu0 %v579_v2  ;;  %17695 = vmatprep.subr.mxu1 %v738_v5 }
  0xb5   :  { %17651 = vmatprep.subr.mxu0 %v578_v10  ;;  %17696 = vmatpush3.msra.mxu1 %v738_v5 }
  0xb6   :  { %17652 = vmatpush3.msra.mxu0 %v578_v10  ;;  %17697 = vmatprep.subr.mxu1 %v737_v11 }
  0xb7   :  { %17653 = vmatprep.subr.mxu0 %v577_v7  ;;  %17698 = vmatpush3.msra.mxu1 %v737_v11 }
  0xb8   :  { %17654 = vmatpush3.msra.mxu0 %v577_v7  ;;  %17699 = vmatprep.subr.mxu1 %v736_v8  ;;  %v19310_v7 = vcombine.high %v19298_v62, %v19298_v62 }
  0xb9   :  { %17655 = vmatprep.subr.mxu0 %v576_v16  ;;  %17700 = vmatpush3.msra.mxu1 %v736_v8 }
  0xba   :  { %17656 = vmatpush3.msra.mxu0 %v576_v16  ;;  %17701 = vmatprep.subr.mxu1 %v735_v17 }
  0xbb   :  { %17657 = vmatprep.subr.mxu0 %v575_v9  ;;  %17702 = vmatpush3.msra.mxu1 %v735_v17 }
  0xbc   :  { %17658 = vmatpush3.msra.mxu0 %v575_v9  ;;  %17703 = vmatprep.subr.mxu1 %v734_v23 }
  0xbd   :  { %17659 = vmatprep.subr.mxu0 %v574_v20  ;;  %17704 = vmatpush3.msra.mxu1 %v734_v23 }
  0xbe   :  { %17660 = vmatpush3.msra.mxu0 %v574_v20  ;;  %17705 = vmatprep.subr.mxu1 %v733_v31 }
  0xbf   :  { %17661 = vmatprep.subr.mxu0 %v573_v27  ;;  %17706 = vmatpush3.msra.mxu1 %v733_v31 }
  0xc0   :  { %17662 = vmatpush3.msra.mxu0 %v573_v27  ;;  %17707 = vmatprep.subr.mxu1 %v732_v12 }
  0xc1   :  { %17663 = vmatprep.subr.mxu0 %v572_v32  ;;  %17708 = vmatpush3.msra.mxu1 %v732_v12 }
  0xc2   :  { %17664 = vmatpush3.msra.mxu0 %v572_v32  ;;  %17709 = vmatprep.subr.mxu1 %v731_v35 }
  0xc3   :  { %17665 = vmatprep.subr.mxu0 %v571_v13  ;;  %17710 = vmatpush3.msra.mxu1 %v731_v35 }
  0xc4   :  { %17666 = vmatpush3.msra.mxu0 %v571_v13 }
  0xc5   :  { %17723 = vmatprep.subr.mxu0 %v19287_v14 }
 0x129   :  { %v332_v37 = vpop.xlane.xlu0 %331 }
 0x12a   :  { %v347_v38 = vmul.f32 0.0078125, %v332_v37 }
 0x12c   :  { %v355_v39 = vadd.f32 1e-05, %v347_v38 }
 0x12d   :  { %v334_v40 = vpop.xlane.xlu1 %333  ;;  %v336_v41 = vpop.xlane.xlu0 %335 }
 0x12e   :  { %18541 = vrsqrt.f32 %v355_v39  ;;  %v348_v42 = vmul.f32 0.0078125, %v334_v40  ;;  %v349_v18 = vmul.f32 0.0078125, %v336_v41 }
 0x130   :  { %v356_v19 = vadd.f32 1e-05, %v348_v42  ;;  %v357_v43 = vadd.f32 1e-05, %v349_v18 }
 0x131   :  { %v338_v44 = vpop.xlane.xlu1 %337 }
 0x132   :  { %18543 = vrsqrt.f32 %v356_v19  ;;  %v350_v45 = vmul.f32 0.0078125, %v338_v44  ;;  %v340_v48 = vpop.xlane.xlu0 %339 }
 0x133   :  { %18545 = vrsqrt.f32 %v357_v43  ;;  %v351_v51 = vmul.f32 0.0078125, %v340_v48 }
 0x134   :  { %v358_v54 = vadd.f32 1e-05, %v350_v45 }
 0x135   :  { %v359_v55 = vadd.f32 1e-05, %v351_v51  ;;  %v342_v56 = vpop.xlane.xlu1 %341 }
 0x136   :  { %18547 = vrsqrt.f32 %v358_v54  ;;  %v352_v21 = vmul.f32 0.0078125, %v342_v56  ;;  %v344_v22 = vpop.xlane.xlu0 %343 }
 0x137   :  { %v353_v57 = vmul.f32 0.0078125, %v344_v22  ;;  %18549 = vrsqrt.f32 %v359_v55 }
 0x138   :  { %v360_v58 = vadd.f32 1e-05, %v352_v21 }
 0x139   :  { %v361_v59 = vadd.f32 1e-05, %v353_v57  ;;  %v346_v27 = vpop.xlane.xlu1 %345 }
 0x13a   :  { %18551 = vrsqrt.f32 %v360_v58  ;;  %v354_v35 = vmul.f32 0.0078125, %v346_v27 }
 0x13b   :  { %v18542_v61 = vpop.eup %18541  ;;  %18553 = vrsqrt.f32 %v361_v59 }
 0x13c   :  { %v385_v1 = vrot.slane %v18542_v61, %v19094_v33  ;;  %v392_v2 = vrot.slane %v18542_v61, %v19097_v34  ;;  %v362_v19 = vadd.f32 1e-05, %v354_v35 }
 0x13e   :  { %v507_v10 = vmul.f32 %v385_v1, %v19103_v46  ;;  %v508_v5 = vmul.f32 %v392_v2, %v19105_v47  ;;  %18555 = vrsqrt.f32 %v362_v19 }
 0x13f   :  { %v18544_v11 = vpop.eup %18543 }
 0x140   :  { %v18546_v16 = vpop.eup %18545  ;;  %v531_v8 = vmul.f32 %v19293_v60, %v507_v10  ;;  %v532_v9 = vmul.f32 %v19304_v6, %v508_v5  ;;  %v399_v17 = vrot.slane %v18544_v11, %v19094_v33  ;;  %v406_v20 = vrot.slane %v18544_v11, %v19097_v34  ;;  %v872_v5 = vld [vmem:[%s23279_s7 + $0x68] sm:$0xff] }
 0x141   :  { %v413_v23 = vrot.slane %v18546_v16, %v19094_v33  ;;  %v420_v46 = vrot.slane %v18546_v16, %v19097_v34 }
 0x142   :  { %v555_v47 = vadd.f32 %v19298_v62, %v531_v8  ;;  %v556_v31 = vadd.f32 %v19310_v7, %v532_v9  ;;  %v509_v32 = vmul.f32 %v399_v17, %v19124_v63  ;;  %v510_v12 = vmul.f32 %v406_v20, %v19127_v0 }
 0x143   :  { %v18548_v13 = vpop.eup %18547  ;;  %v511_v37 = vmul.f32 %v413_v23, %v19107_v49  ;;  %v512_v38 = vmul.f32 %v420_v46, %v19109_v50  ;;  %v871_v46 = vld [vmem:[%s23279_s7 + $0x60] sm:$0xff] }
 0x144   :  { %v19324_v39 = vcombine.low %v555_v47, %v556_v31  ;;  %v533_v40 = vmul.f32 %v19293_v60, %v509_v32  ;;  %v534_v41 = vmul.f32 %v19304_v6, %v510_v12  ;;  %v427_v42 = vrot.slane %v18548_v13, %v19094_v33  ;;  %v18550_v18 = vpop.eup %18549 }
 0x145   :  { %v535_v63 = vmul.f32 %v19293_v60, %v511_v37  ;;  %v536_v0 = vmul.f32 %v19304_v6, %v512_v38  ;;  %v434_v43 = vrot.slane %v18548_v13, %v19097_v34  ;;  %v441_v21 = vrot.slane %v18550_v18, %v19094_v33 }
 0x146   :  { %17667 = vmatprep.mubr.f32.mxu0 %v19324_v39  ;;  %17711 = vmatprep.mubr.f32.mxu1 %v19324_v39  ;;  %v557_v49 = vadd.f32 %v19298_v62, %v533_v40  ;;  %v558_v50 = vadd.f32 %v19310_v7, %v534_v41  ;;  %v513_v44 = vmul.f32 %v427_v42, %v19130_v3  ;;  %v873_v3 = vld [vmem:[%s23279_s7 + $0x70] sm:$0xff] }
 0x147   :  { %v18552_v45 = vpop.eup %18551  ;;  %v559_v48 = vadd.f32 %v19298_v62, %v535_v63  ;;  %v560_v51 = vadd.f32 %v19310_v7, %v536_v0  ;;  %v514_v54 = vmul.f32 %v434_v43, %v19133_v4  ;;  %v448_v22 = vrot.slane %v18550_v18, %v19097_v34  ;;  %v869_v40 = vld [vmem:[%s23279_s7 + $0x50] sm:$0xff]  ;;  %v868_v63 = vld [vmem:[%s23279_s7 + $0x48] sm:$0xff] }
 0x148   :  { %v19340_v55 = vcombine.low %v557_v49, %v558_v50  ;;  %v537_v56 = vmul.f32 %v19293_v60, %v513_v44  ;;  %v18554_v57 = vpop.eup %18553  ;;  %v455_v61 = vrot.slane %v18552_v45, %v19094_v33  ;;  %v462_v4 = vrot.slane %v18552_v45, %v19097_v34  ;;  %v867_v49 = vld [vmem:[%s23279_s7 + $0x40] sm:$0xff]  ;;  %v866_v50 = vld [vmem:[%s23279_s7 + $0x38] sm:$0xff]  ;;  %v865_v45 = vld [vmem:[%s23279_s7 + $0x30] sm:$0xff] }
 0x149   :  { %v19345_v58 = vcombine.low %v559_v48, %v560_v51  ;;  %v538_v59 = vmul.f32 %v19304_v6, %v514_v54  ;;  %v515_v2 = vmul.f32 %v441_v21, %v19148_v24  ;;  %v516_v10 = vmul.f32 %v448_v22, %v19151_v26  ;;  %v859_v48 = vld [vmem:[%s23279_s7] sm:$0xff] }
 0x14a   :  { %17668 = vmatmul.mubr.f32.vlgmr.msra.gmra.mxu0 %v19340_v55  ;;  %17712 = vmatmul.mubr.f32.vlgmr.msra.gmra.mxu1 %v19340_v55  ;;  %v561_v1 = vadd.f32 %v19298_v62, %v537_v56  ;;  %v517_v16 = vmul.f32 %v455_v61, %v19154_v28  ;;  %v518_v8 = vmul.f32 %v462_v4, %v19157_v29  ;;  %v23296_v51 = vmov 0.0   ;;  %v19457_v56 = vld [vmem:[%s23282_s4] ss:$0 sm:$0xff] }
 0x14b   :  { %17724 = vmatpush3.msra.mxu0 %v19287_v14  ;;  %17670 = vmatprep.mubr.f32.mxu0 %v19345_v58  ;;  %v562_v11 = vadd.f32 %v19310_v7, %v538_v59  ;;  %v539_v24 = vmul.f32 %v19293_v60, %v515_v2  ;;  %v540_v26 = vmul.f32 %v19304_v6, %v516_v10  ;;  %v18556_v41 = vpop.eup %18555  ;;  %v19462_v21 = vld [vmem:[%s23283_s6] ss:$0 sm:$0xff] }
 0x14c   :  { %17714 = vmatprep.mubr.f32.mxu1 %v19345_v58  ;;  %17725 = vmatprep.subr.mxu0 %v873_v3  ;;  %v469_v14 = vrot.slane %v18554_v57, %v19094_v33  ;;  %v541_v17 = vmul.f32 %v19293_v60, %v517_v16  ;;  %v542_v20 = vmul.f32 %v19304_v6, %v518_v8 }
 0x14d   :  { %17726 = vmatpush3.msra.mxu0 %v873_v3  ;;  %v19370_v9 = vcombine.low %v561_v1, %v562_v11  ;;  %v476_v28 = vrot.slane %v18554_v57, %v19097_v34  ;;  %v563_v29 = vadd.f32 %v19298_v62, %v539_v24  ;;  %v564_v23 = vadd.f32 %v19310_v7, %v540_v26 }
 0x14e   :  { %17727 = vmatprep.subr.mxu0 %v872_v5  ;;  %v519_v27 = vmul.f32 %v469_v14, %v19170_v15  ;;  %v565_v47 = vadd.f32 %v19298_v62, %v541_v17  ;;  %v566_v31 = vadd.f32 %v19310_v7, %v542_v20  ;;  %v870_v15 = vld [vmem:[%s23279_s7 + $0x58] sm:$0xff]  ;;  %v483_v18 = vrot.slane %v18556_v41, %v19094_v33 }
 0x14f   :  { %17671 = vmatmul.mubr.f32.gmra.mxu0 %v19370_v9  ;;  %17715 = vmatmul.mubr.f32.gmra.mxu1 %v19370_v9  ;;  %v520_v32 = vmul.f32 %v476_v28, %v19173_v36  ;;  %v19386_v12 = vcombine.low %v563_v29, %v564_v23  ;;  %v490_v19 = vrot.slane %v18556_v41, %v19097_v34 }
 0x150   :  { %17728 = vmatpush3.msra.mxu0 %v872_v5  ;;  %v543_v13 = vmul.f32 %v19293_v60, %v519_v27  ;;  %v19392_v35 = vcombine.low %v565_v47, %v566_v31  ;;  %v521_v0 = vmul.f32 %v483_v18, %v19194_v52  ;;  %17767 = vmatprep.subr.mxu1 %v23296_v51 }
 0x151   :  { %17729 = vmatprep.subr.mxu0 %v871_v46  ;;  %v544_v37 = vmul.f32 %v19304_v6, %v520_v32  ;;  %17673 = vmatprep.mubr.f32.mxu0 %v19386_v12  ;;  %v522_v43 = vmul.f32 %v490_v19, %v19197_v53 }
 0x152   :  { %17717 = vmatprep.mubr.f32.mxu1 %v19386_v12  ;;  %v567_v36 = vadd.f32 %v19298_v62, %v543_v13  ;;  %17730 = vmatpush3.msra.mxu0 %v871_v46  ;;  %v545_v33 = vmul.f32 %v19293_v60, %v521_v0  ;;  %v864_v60 = vld [vmem:[%s23279_s7 + $0x28] sm:$0xff] }
 0x153   :  { %17718 = vmatmul.mubr.f32.gmra.mxu1 %v19392_v35  ;;  %v568_v38 = vadd.f32 %v19310_v7, %v544_v37  ;;  %17731 = vmatprep.subr.mxu0 %v870_v15  ;;  %v546_v34 = vmul.f32 %v19304_v6, %v522_v43  ;;  %v862_v6 = vld [vmem:[%s23279_s7 + $0x18] sm:$0xff] }
 0x154   :  { %17674 = vmatmul.mubr.f32.gmra.mxu0 %v19392_v35  ;;  %v569_v44 = vadd.f32 %v19298_v62, %v545_v33  ;;  %v863_v62 = vld [vmem:[%s23279_s7 + $0x20] sm:$0xff] }
 0x155   :  { %17732 = vmatpush3.msra.mxu0 %v870_v15  ;;  %v616_v42 = vcombine.low %v567_v36, %v568_v38  ;;  %v570_v52 = vadd.f32 %v19310_v7, %v546_v34  ;;  %v861_v7 = vld [vmem:[%s23279_s7 + $0x10] sm:$0xff] }
 0x156   :  { %17733 = vmatprep.subr.mxu0 %v869_v40 }
 0x157   :  { %17676 = vmatprep.mubr.f32.mxu0 %v616_v42  ;;  %17720 = vmatprep.mubr.f32.mxu1 %v616_v42  ;;  %v617_v53 = vcombine.low %v569_v44, %v570_v52 }
 0x158   :  { %17734 = vmatpush3.msra.mxu0 %v869_v40 }
 0x159   :  { %17735 = vmatprep.subr.mxu0 %v868_v63  ;;  %17677 = vmatmul.mubr.f32.gmra.mxu0 %v617_v53 }
 0x15a   :  { %17736 = vmatpush3.msra.mxu0 %v868_v63  ;;  %17721 = vmatmul.mubr.f32.gmra.mxu1 %v617_v53 }
 0x15b   :  { %17737 = vmatprep.subr.mxu0 %v867_v49  ;;  %17755 = vmatprep.mubr.f32.mxu0 %v19324_v39  ;;  %v860_v39 = vld [vmem:[%s23279_s7 + $0x8] sm:$0xff] }
 0x15c   :  { %17738 = vmatpush3.msra.mxu0 %v867_v49  ;;  %17769 = vmatprep.mubr.msk.f32.mxu1 %vm18908_vm0, %v23296_v51 }
 0x15d   :  { %17739 = vmatprep.subr.mxu0 %v866_v50 }
 0x15e   :  { %17740 = vmatpush3.msra.mxu0 %v866_v50 }
 0x15f   :  { %17741 = vmatprep.subr.mxu0 %v865_v45 }
 0x160   :  { %17742 = vmatpush3.msra.mxu0 %v865_v45 }
 0x161   :  { %17743 = vmatprep.subr.mxu0 %v864_v60 }
 0x162   :  { %17744 = vmatpush3.msra.mxu0 %v864_v60  ;;  %v19634_v60 = vld [vmem:[%s23284_s8] ss:$0 sm:$0xff]  ;;  %s18909_s8 = smov 96  }
 0x163   :  { %17745 = vmatprep.subr.mxu0 %v863_v62 }
 0x164   :  { %17746 = vmatpush3.msra.mxu0 %v863_v62 }
 0x165   :  { %17747 = vmatprep.subr.mxu0 %v862_v6 }
 0x166   :  { %17748 = vmatpush3.msra.mxu0 %v862_v6 }
 0x167   :  { %17749 = vmatprep.subr.mxu0 %v861_v7 }
 0x168   :  { %17750 = vmatpush3.msra.mxu0 %v861_v7 }
 0x169   :  { %17751 = vmatprep.subr.mxu0 %v860_v39 }
 0x16a   :  { %17752 = vmatpush3.msra.mxu0 %v860_v39 }
 0x16b   :  { %17753 = vmatprep.subr.mxu0 %v859_v48 }
 0x16c   :  { %17754 = vmatpush3.msra.mxu0 %v859_v48 }
 0x16d   :  { %17756 = vmatmul.mubr.f32.vlgmr.msra.gmra.mxu0 %v19340_v55  ;;  %17807 = vmatprep.subr.mxu0 %v23296_v51 }
 0x16e   :  { %17758 = vmatprep.mubr.f32.mxu0 %v19345_v58 }
 0x171   :  { %17759 = vmatmul.mubr.f32.gmra.mxu0 %v19370_v9 }
 0x172   :  { %17761 = vmatprep.mubr.f32.mxu0 %v19386_v12 }
 0x175   :  { %17762 = vmatmul.mubr.f32.gmra.mxu0 %v19392_v35 }
 0x176   :  { %17764 = vmatprep.mubr.f32.mxu0 %v616_v42 }
 0x179   :  { %17765 = vmatmul.mubr.f32.gmra.mxu0 %v617_v53 }
 0x17a   :  { %17809 = vmatprep.mubr.msk.f32.mxu0 %vm18908_vm0, %v23296_v51 }
 0x20a   :  { %v17669_v54 = vpop.f32.mrf.mxu0  ;;  %v17713_v55 = vpop.f32.mrf.mxu1 }
 0x20b   :  { %v698_v16 = vadd.f32 %v17669_v54, %v19457_v56  ;;  %v19492_v26 = vadd.f32 %v17713_v55, %v19462_v21 }
 0x20c   :  { %v692_v22 = vpop.f32.mrf.mxu0  ;;  %v820_v57 = vpop.f32.mrf.mxu1 }
 0x20d   :  { %v693_v58 = vadd.f32 %v19457_v56, %v692_v22  ;;  %v19466_v3 = vadd.f32 %v19462_v21, %v820_v57  ;;  %23405 = vst [vmem:[#allocation7_spill] sm:$0xff] %v19492_v26  ;;  %v1002_v28 = vcombine.high %v698_v16, %v698_v16  ;;  %v19506_v29 = vrot.slane %v698_v16, 1 }
 0x20e   :  { %v19520_v27 = vcombine.high %v19492_v26, %v19492_v26 }
 0x20f   :  { %23401 = vst [vmem:[#allocation3_spill] sm:$0xff] %v19466_v3  ;;  %v19468_v59 = vrot.slane %v693_v58, 1  ;;  %v19470_v61 = vpop.f32.mrf.mxu0  ;;  %v19472_v4 = vpop.f32.mrf.mxu1  ;;  %17768 = vmatpush3.xpose.msk.msra.mxu1 %vm1042_vm1, %v19466_v3  ;;  %v1001_v1 = vcombine.high %v693_v58, %v693_v58  ;;  %v19479_v5 = vcombine.high %v19466_v3, %v19466_v3  ;;  %v19531_v31 = vrot.slane %v1002_v28, 1 }
 0x210   :  { %17772 = vmatprep.subr.mxu1 %v23296_v51  ;;  %23406 = vst [vmem:[#allocation8_spill] sm:$0xff] %v19520_v27  ;;  %v708_v19 = vadd.f32 %v19470_v61, %v19457_v56  ;;  %v19586_v0 = vadd.f32 %v19472_v4, %v19462_v21 }
 0x211   :  { %23402 = vst [vmem:[#allocation4_spill] sm:$0xff] %v19468_v59  ;;  %v702_v2 = vpop.f32.mrf.mxu0  ;;  %v830_v10 = vpop.f32.mrf.mxu1  ;;  %23403 = vst [vmem:[#allocation5_spill] sm:$0xff] %v19479_v5  ;;  %v19488_v8 = vrot.slane %v1001_v1, 1 }
 0x212   :  { %17770 = vmatmul.mubr.msk.f32.vlgmr.msra.gmra.mxu1 %vm1042_vm1, %v19468_v59  ;;  %23408 = vst [vmem:[#allocation10_spill] sm:$0xff] %v19531_v31  ;;  %v703_v32 = vadd.f32 %v19457_v56, %v702_v2  ;;  %v19539_v12 = vadd.f32 %v19462_v21, %v830_v10  ;;  %23412 = vst [vmem:[#allocation14_spill] sm:$0xff] %v19586_v0  ;;  %v1004_v34 = vcombine.high %v708_v19, %v708_v19 }
 0x213   :  { %v17719_v11 = vpop.f32.mrf.mxu1  ;;  %17773 = vmatpush3.xpose.msk.msra.mxu1 %vm1042_vm1, %v19479_v5  ;;  %17774 = vmatprep.mubr.msk.f32.mxu1 %vm18908_vm0, %v23296_v51  ;;  %23404 = vst [vmem:[#allocation6_spill] sm:$0xff] %v19488_v8  ;;  %v19604_v50 = vrot.slane %v708_v19, 1  ;;  %v19618_v52 = vcombine.high %v19586_v0, %v19586_v0 }
 0x214   :  { %v17675_v24 = vpop.f32.mrf.mxu0  ;;  %17777 = vmatprep.subr.mxu1 %v23296_v51  ;;  %v19523_v47 = vadd.f32 %v17719_v11, %v19462_v21  ;;  %v1003_v37 = vcombine.high %v703_v32, %v703_v32  ;;  %v19554_v36 = vrot.slane %v703_v32, 1  ;;  %v19563_v41 = vcombine.high %v19539_v12, %v19539_v12 }
 0x215   :  { %v840_v14 = vpop.f32.mrf.mxu1  ;;  %v19512_v23 = vadd.f32 %v17675_v24, %v19457_v56  ;;  %v19627_v53 = vrot.slane %v1004_v34, 1  ;;  %v991_v32 = vadd.s32 1, %v19091_v30 }
 0x216   :  { %v712_v9 = vpop.f32.mrf.mxu0  ;;  %v19495_v17 = vadd.f32 %v19462_v21, %v840_v14  ;;  %17775 = vmatmul.mubr.msk.f32.vlgmr.msra.gmra.mxu1 %vm1042_vm1, %v19488_v8  ;;  %23407 = vst [vmem:[#allocation9_spill] sm:$0xff] %v19523_v47  ;;  %23409 = vst [vmem:[#allocation11_spill] sm:$0xff] %v19554_v36  ;;  %v19579_v63 = vrot.slane %v1003_v37, 1 }
 0x217   :  { %v19500_v20 = vadd.f32 %v19457_v56, %v712_v9  ;;  %17778 = vmatpush3.xpose.msk.msra.mxu1 %vm1042_vm1, %v19492_v26  ;;  %17779 = vmatprep.mubr.msk.f32.mxu1 %vm18908_vm0, %v23296_v51  ;;  %v19542_v13 = vrot.slane %v19512_v23, 1  ;;  %23410 = vst [vmem:[#allocation12_spill] sm:$0xff] %v19563_v41  ;;  %v1006_v39 = vcombine.high %v19512_v23, %v19512_v23  ;;  %v990_v23 = vand.u32 127, %v142_v25 }
 0x218   :  { %17808 = vmatpush3.xpose.msk.msra.mxu0 %vm1042_vm1, %v19495_v17  ;;  %17782 = vmatprep.subr.mxu1 %v23296_v51  ;;  %v19641_v62 = vcombine.high %v19495_v17, %v19495_v17 }
 0x219   :  { %v19515_v46 = vrot.slane %v19500_v20, 1  ;;  %17817 = vmatprep.subr.mxu0 %v23296_v51  ;;  %v17678_v15 = vpop.f32.mrf.mxu0  ;;  %v1005_v45 = vcombine.high %v19500_v20, %v19500_v20  ;;  %v19675_v57 = vrot.slane %v1006_v39, 1  ;;  %vm19734_vm3 = vcmp.le.s32.totalorder %v990_v23, %v991_v32 }
 0x21a   :  { %17780 = vmatmul.mubr.msk.f32.vlgmr.msra.gmra.mxu1 %vm1042_vm1, %v19506_v29  ;;  %v17722_v35 = vpop.f32.mrf.mxu1  ;;  %v19589_v43 = vadd.f32 %v17678_v15, %v19457_v56  ;;  %v23424_v15 = vmov 0 }
 0x21b   :  { %17810 = vmatmul.mubr.msk.f32.vlgmr.msra.gmra.mxu0 %vm1042_vm1, %v19515_v46  ;;  %17783 = vmatpush3.xpose.msk.msra.mxu1 %vm1042_vm1, %v19520_v27  ;;  %v722_v38 = vpop.f32.mrf.mxu0  ;;  %v19596_v33 = vadd.f32 %v17722_v35, %v19462_v21  ;;  %v19656_v48 = vrot.slane %v1005_v45, 1  ;;  %v23425_v15 = vsel %vm19734_vm3, 4294967295, %v23424_v15 }
 0x21c   :  { %17818 = vmatpush3.xpose.msk.msra.mxu0 %vm1042_vm1, %v19523_v47  ;;  %17784 = vmatprep.mubr.msk.f32.mxu1 %vm18908_vm0, %v23296_v51  ;;  %v850_v40 = vpop.f32.mrf.mxu1  ;;  %v19566_v42 = vadd.f32 %v19457_v56, %v722_v38  ;;  %v19611_v44 = vrot.slane %v19589_v43, 1  ;;  %v19664_v56 = vcombine.high %v19523_v47, %v19523_v47  ;;  %v1008_v10 = vcombine.high %v19589_v43, %v19589_v43 }
 0x21d   :  { %17819 = vmatprep.mubr.msk.f32.mxu0 %vm18908_vm0, %v23296_v51  ;;  %17787 = vmatprep.subr.mxu1 %v23296_v51  ;;  %v19569_v18 = vadd.f32 %v19462_v21, %v850_v40  ;;  %23413 = vst [vmem:[#allocation15_spill] sm:$0xff] %v19596_v33  ;;  %v19707_v24 = vcombine.high %v19596_v33, %v19596_v33  ;;  %23426 = vst [vmem:[#allocation26_spill] sm:$0xff] %v23425_v15 }
 0x21e   :  { %17785 = vmatmul.mubr.msk.f32.vlgmr.msra.gmra.mxu1 %vm1042_vm1, %v19531_v31  ;;  %17827 = vmatprep.subr.mxu0 %v23296_v51  ;;  %v19592_v49 = vrot.slane %v19566_v42, 1  ;;  %23416 = vst [vmem:[#allocation18_spill] sm:$0xff] %v19664_v56  ;;  %v1007_v58 = vcombine.high %v19566_v42, %v19566_v42  ;;  %v19718_v20 = vrot.slane %v1008_v10, 1 }
 0x21f   :  { %17820 = vmatmul.mubr.msk.f32.vlgmr.msra.gmra.mxu0 %vm1042_vm1, %v19542_v13  ;;  %17788 = vmatpush3.xpose.msk.msra.mxu1 %vm1042_vm1, %v19539_v12  ;;  %23411 = vst [vmem:[#allocation13_spill] sm:$0xff] %v19569_v18  ;;  %v19686_v4 = vcombine.high %v19569_v18, %v19569_v18  ;;  %23420 = vst [vmem:[#allocation22_spill] sm:$0xff] %v19707_v24 }
 0x220   :  { %17789 = vmatprep.mubr.msk.f32.mxu1 %vm18908_vm0, %v23296_v51  ;;  %17829 = vmatprep.mubr.msk.f32.mxu0 %vm18908_vm0, %v23296_v51  ;;  %v19700_v11 = vrot.slane %v1007_v58, 1  ;;  %23422 = vst [vmem:[#allocation24_spill] sm:$0xff] %v19718_v20 }
 0x221   :  { %17792 = vmatprep.subr.mxu1 %v23296_v51  ;;  %17828 = vmatpush3.xpose.msk.msra.mxu0 %vm1042_vm1, %v19569_v18  ;;  %23418 = vst [vmem:[#allocation20_spill] sm:$0xff] %v19686_v4 }
 0x222   :  { %17790 = vmatmul.mubr.msk.f32.vlgmr.msra.gmra.mxu1 %vm1042_vm1, %v19554_v36  ;;  %17837 = vmatprep.subr.mxu0 %v23296_v51 }
 0x223   :  { %17793 = vmatpush3.xpose.msk.msra.mxu1 %vm1042_vm1, %v19563_v41  ;;  %17794 = vmatprep.mubr.msk.f32.mxu1 %vm18908_vm0, %v23296_v51 }
 0x224   :  { %17797 = vmatprep.subr.mxu1 %v23296_v51  ;;  %17830 = vmatmul.mubr.msk.f32.vlgmr.msra.gmra.mxu0 %vm1042_vm1, %v19592_v49 }
 0x225   :  { %17838 = vmatpush3.xpose.msk.msra.mxu0 %vm1042_vm1, %v19596_v33  ;;  %17839 = vmatprep.mubr.msk.f32.mxu0 %vm18908_vm0, %v23296_v51 }
 0x226   :  { %17795 = vmatmul.mubr.msk.f32.vlgmr.msra.gmra.mxu1 %vm1042_vm1, %v19579_v63  ;;  %17847 = vmatprep.subr.mxu0 %v23296_v51 }
 0x227   :  { %17798 = vmatpush3.xpose.msk.msra.mxu1 %vm1042_vm1, %v19586_v0  ;;  %17799 = vmatprep.mubr.msk.f32.mxu1 %vm18908_vm0, %v23296_v51 }
 0x228   :  { %17802 = vmatprep.subr.mxu1 %v23296_v51  ;;  %17840 = vmatmul.mubr.msk.f32.vlgmr.msra.gmra.mxu0 %vm1042_vm1, %v19611_v44 }
 0x229   :  { %17849 = vmatprep.mubr.msk.f32.mxu0 %vm18908_vm0, %v23296_v51 }
 0x22a   :  { %17800 = vmatmul.mubr.msk.f32.vlgmr.msra.gmra.mxu1 %vm1042_vm1, %v19604_v50 }
 0x22b   :  { %17803 = vmatpush3.xpose.msk.msra.mxu1 %vm1042_vm1, %v19618_v52  ;;  %17804 = vmatprep.mubr.msk.f32.mxu1 %vm18908_vm0, %v23296_v51 }
 0x22c   :  { %17812 = vmatprep.subr.mxu1 %v23296_v51 }
 0x22d   :  { %v17757_v6 = vpop.f32.mrf.mxu0 }
 0x22e   :  { %17805 = vmatmul.mubr.msk.f32.vlgmr.msra.gmra.mxu1 %vm1042_vm1, %v19627_v53  ;;  %v19648_v7 = vadd.f32 %v17757_v6, %v19634_v60 }
 0x22f   :  { %17813 = vmatpush3.xpose.msk.msra.mxu1 %vm1042_vm1, %v19641_v62  ;;  %17814 = vmatprep.mubr.msk.f32.mxu1 %vm18908_vm0, %v23296_v51  ;;  %v948_v54 = vpop.f32.mrf.mxu0 }
 0x230   :  { %23414 = vst [vmem:[#allocation16_spill] sm:$0xff] %v19648_v7  ;;  %17822 = vmatprep.subr.mxu1 %v23296_v51  ;;  %v19660_v55 = vadd.f32 %v19634_v60, %v948_v54 }
 0x231   :  { %v17760_v21 = vpop.f32.mrf.mxu0 }
 0x232   :  { %23415 = vst [vmem:[#allocation17_spill] sm:$0xff] %v19660_v55  ;;  %17815 = vmatmul.mubr.msk.f32.vlgmr.msra.gmra.mxu1 %vm1042_vm1, %v19656_v48  ;;  %v19669_v22 = vadd.f32 %v17760_v21, %v19634_v60  ;;  %17848 = vmatpush3.msk.msra.mxu0 %vm2457_vm2, %v19660_v55  ;;  %v19723_v28 = vcombine.high %v19660_v55, %v19660_v55 }
 0x233   :  { %17823 = vmatpush3.xpose.msk.msra.mxu1 %vm1042_vm1, %v19664_v56  ;;  %v19679_v61 = vpop.f32.mrf.mxu0  ;;  %17824 = vmatprep.mubr.msk.f32.mxu1 %vm18908_vm0, %v23296_v51 }
 0x234   :  { %23417 = vst [vmem:[#allocation19_spill] sm:$0xff] %v19669_v22  ;;  %17832 = vmatprep.subr.mxu1 %v23296_v51  ;;  %17857 = vmatprep.subr.mxu0 %v23296_v51  ;;  %23423 = vst [vmem:[#allocation25_spill] sm:$0xff] %v19723_v28 }
 0x235   :  { %v17763_v1 = vpop.f32.mrf.mxu0 }
 0x236   :  { %17825 = vmatmul.mubr.msk.f32.vlgmr.msra.gmra.mxu1 %vm1042_vm1, %v19675_v57  ;;  %v19692_v2 = vadd.f32 %v17763_v1, %v19634_v60 }
 0x237   :  { %17833 = vmatpush3.xpose.msk.msra.mxu1 %vm1042_vm1, %v19686_v4  ;;  %17834 = vmatprep.mubr.msk.f32.mxu1 %vm18908_vm0, %v23296_v51  ;;  %v19702_v16 = vpop.f32.mrf.mxu0 }
 0x238   :  { %23419 = vst [vmem:[#allocation21_spill] sm:$0xff] %v19692_v2  ;;  %17842 = vmatprep.subr.mxu1 %v23296_v51 }
 0x239   :  { %v17766_v14 = vpop.f32.mrf.mxu0 }
 0x23a   :  { %17835 = vmatmul.mubr.msk.f32.vlgmr.msra.gmra.mxu1 %vm1042_vm1, %v19700_v11  ;;  %v19712_v9 = vadd.f32 %v17766_v14, %v19634_v60 }
 0x23b   :  { %17843 = vmatpush3.xpose.msk.msra.mxu1 %vm1042_vm1, %v19707_v24  ;;  %17844 = vmatprep.mubr.msk.f32.mxu1 %vm18908_vm0, %v23296_v51  ;;  %v19744_v34 = vpop.f32.mrf.mxu0 }
 0x23c   :  { %23421 = vst [vmem:[#allocation23_spill] sm:$0xff] %v19712_v9  ;;  %17852 = vmatprep.subr.mxu1 %v23296_v51 }
 0x23e   :  { %17845 = vmatmul.mubr.msk.f32.vlgmr.msra.gmra.mxu1 %vm1042_vm1, %v19718_v20 }
 0x23f   :  { %17853 = vmatpush3.msk.msra.mxu1 %vm2457_vm2, %v19723_v28  ;;  %17854 = vmatprep.mubr.msk.f32.mxu1 %vm18908_vm0, %v23296_v51 }
 0x240   :  { %17862 = vmatprep.subr.mxu1 %v23296_v51 }
 0x2d2   :  { %v1113_v35 = vpop.f32.mrf.mxu1 }
 0x2d3   :  { %v2242_v37 = vmul.f32 0.17677669, %v1113_v35 }
 0x2d4   :  { %v17771_v38 = vpop.f32.mrf.mxu1 }
 0x2d5   :  { %v19740_v40 = vsel %vm19734_vm3, %v2242_v37, -1e+30 }
 0x2d6   :  { %v1188_v42 = vpop.f32.mrf.mxu1  ;;  %v2277_v19 = vsel %vm2276_vm4, %v19740_v40, -inf }
 0x2d7   :  { %v2243_v43 = vmul.f32 0.17677669, %v1188_v42  ;;  %2278 = vmax.xlane.f32.xlu0 %v2277_v19 }
 0x2d8   :  { %v17776_v25 = vpop.f32.mrf.mxu1 }
 0x2d9   :  { %v19748_v45 = vsel %vm19734_vm3, %v2243_v43, -1e+30 }
 0x2da   :  { %v1263_v6 = vpop.f32.mrf.mxu1  ;;  %v2280_v39 = vsel %vm2276_vm4, %v19748_v45, -inf }
 0x2db   :  { %v2244_v54 = vmul.f32 0.17677669, %v1263_v6  ;;  %v1713_v21 = vpop.f32.mrf.mxu0  ;;  %2281 = vmax.xlane.f32.xlu1 %v2280_v39 }
 0x2dc   :  { %v2250_v58 = vmul.f32 0.17677669, %v1713_v21  ;;  %v17781_v1 = vpop.f32.mrf.mxu1 }
 0x2dd   :  { %v17811_v10 = vpop.f32.mrf.mxu0  ;;  %v19754_v14 = vsel %vm19734_vm3, %v2244_v54, -1e+30 }
 0x2de   :  { %v1338_v23 = vpop.f32.mrf.mxu1  ;;  %v2283_v32 = vsel %vm2276_vm4, %v19754_v14, -inf  ;;  %v19760_v38 = vsel %vm19734_vm3, %v2250_v58, -1e+30 }
 0x2df   :  { %v2245_v35 = vmul.f32 0.17677669, %v1338_v23  ;;  %v1863_v37 = vpop.f32.mrf.mxu0  ;;  %2284 = vmax.xlane.f32.xlu0 %v2283_v32  ;;  %v2301_v54 = vsel %vm2276_vm4, %v19760_v38, -inf }
 0x2e0   :  { %v2252_v42 = vmul.f32 0.17677669, %v1863_v37  ;;  %v17786_v19 = vpop.f32.mrf.mxu1 }
 0x2e1   :  { %v17821_v43 = vpop.f32.mrf.mxu0  ;;  %v19764_v25 = vsel %vm19734_vm3, %v2245_v35, -1e+30 }
 0x2e2   :  { %v1413_v6 = vpop.f32.mrf.mxu1  ;;  %v2286_v39 = vsel %vm2276_vm4, %v19764_v25, -inf  ;;  %v19772_v58 = vsel %vm19734_vm3, %v2252_v42, -1e+30 }
 0x2e3   :  { %v2246_v21 = vmul.f32 0.17677669, %v1413_v6  ;;  %2287 = vmax.xlane.f32.xlu1 %v2286_v39  ;;  %2302 = vmax.xlane.f32.xlu0 %v2301_v54  ;;  %v2307_v23 = vsel %vm2276_vm4, %v19772_v58, -inf }
 0x2e4   :  { %v17791_v1 = vpop.f32.mrf.mxu1  ;;  %v2013_v32 = vpop.f32.mrf.mxu0 }
 0x2e5   :  { %v19778_v37 = vsel %vm19734_vm3, %v2246_v21, -1e+30  ;;  %v2254_v19 = vmul.f32 0.17677669, %v2013_v32 }
 0x2e6   :  { %v1488_v10 = vpop.f32.mrf.mxu1  ;;  %v17831_v6 = vpop.f32.mrf.mxu0  ;;  %v2289_v1 = vsel %vm2276_vm4, %v19778_v37, -inf }
 0x2e7   :  { %v2247_v35 = vmul.f32 0.17677669, %v1488_v10  ;;  %2308 = vmax.xlane.f32.xlu0 %v2307_v23  ;;  %v19790_v21 = vsel %vm19734_vm3, %v2254_v19, -1e+30 }
 0x2e8   :  { %v17796_v43 = vpop.f32.mrf.mxu1  ;;  %v2163_v10 = vpop.f32.mrf.mxu0 }
 0x2e9   :  { %v19782_v39 = vsel %vm19734_vm3, %v2247_v35, -1e+30  ;;  %v2313_v35 = vsel %vm2276_vm4, %v19790_v21, -inf  ;;  %v2256_v51 = vmul.f32 0.17677669, %v2163_v10 }
 0x2ea   :  { %v1563_v42 = vpop.f32.mrf.mxu1  ;;  %v2292_v54 = vsel %vm2276_vm4, %v19782_v39, -inf  ;;  %v17841_v43 = vpop.f32.mrf.mxu0 }
 0x2eb   :  { %v2248_v23 = vmul.f32 0.17677669, %v1563_v42  ;;  %2293 = vmax.xlane.f32.xlu1 %v2292_v54  ;;  %2290 = vmax.xlane.f32.xlu0 %v2289_v1  ;;  %v19802_v19 = vsel %vm19734_vm3, %v2256_v51, -1e+30 }
 0x2ec   :  { %v17801_v32 = vpop.f32.mrf.mxu1  ;;  %v2319_v10 = vsel %vm2276_vm4, %v19802_v19, -inf }
 0x2ed   :  { %v19796_v30 = vsel %vm19734_vm3, %v2248_v23, -1e+30 }
 0x2ee   :  { %v1638_v6 = vpop.f32.mrf.mxu1  ;;  %v2295_v54 = vsel %vm2276_vm4, %v19796_v30, -inf }
 0x2ef   :  { %2314 = vmax.xlane.f32.xlu0 %v2313_v35  ;;  %v2249_v51 = vmul.f32 0.17677669, %v1638_v6 }
 0x2f0   :  { %v17806_v9 = vpop.f32.mrf.mxu1 }
 0x2f2   :  { %v1788_v42 = vpop.f32.mrf.mxu1 }
 0x2f3   :  { %2296 = vmax.xlane.f32.xlu0 %v2295_v54 }
 0x2f4   :  { %v17816_v1 = vpop.f32.mrf.mxu1 }
 0x2f5   :  { %v2251_v1 = vmul.f32 0.17677669, %v1788_v42 }
 0x2f6   :  { %v1938_v32 = vpop.f32.mrf.mxu1 }
 0x2f7   :  { %2320 = vmax.xlane.f32.xlu0 %v2319_v10  ;;  %v19820_v10 = vsel %vm19734_vm3, %v2249_v51, -1e+30 }
 0x2f8   :  { %v17826_v43 = vpop.f32.mrf.mxu1 }
 0x2f9   :  { %v2298_v43 = vsel %vm2276_vm4, %v19820_v10, -inf }
 0x2fa   :  { %v2088_v35 = vpop.f32.mrf.mxu1 }
 0x2fc   :  { %4119 = vrot.lane.b32.xlu1 %v19479_v5, %s18909_s8  ;;  %v17836_v9 = vpop.f32.mrf.mxu1 }
 0x2fd   :  { %v2253_v9 = vmul.f32 0.17677669, %v1938_v32 }
 0x2fe   :  { %v2238_v23 = vpop.f32.mrf.mxu1 }
 0x2ff   :  { %v19832_v6 = vsel %vm19734_vm3, %v2253_v9, -1e+30  ;;  %v2257_v51 = vmul.f32 0.17677669, %v2238_v23 }
 0x300   :  { %4039 = vrot.lane.b32.xlu1 %v19468_v59, %s18909_s8  ;;  %v17846_v54 = vpop.f32.mrf.mxu1  ;;  %v2255_v59 = vmul.f32 0.17677669, %v2088_v35  ;;  %v2310_v42 = vsel %vm2276_vm4, %v19832_v6, -inf }
 0x301   :  { %v19826_v54 = vsel %vm19734_vm3, %v2251_v1, -1e+30 }
 0x302   :  { %v19838_v32 = vsel %vm19734_vm3, %v2255_v59, -1e+30 }
 0x303   :  { %v2316_v1 = vsel %vm2276_vm4, %v19838_v32, -inf }
 0x304   :  { %4197 = vrot.lane.b32.xlu1 %v19492_v26, %s18909_s8 }
 0x308   :  { %4275 = vrot.lane.b32.xlu1 %v19520_v27, %s18909_s8  ;;  %v2304_v27 = vsel %vm2276_vm4, %v19826_v54, -inf }
 0x30d   :  { %4041 = vrot.lane.b32.xlu0 %v19466_v3, %s18909_s8 }
 0x311   :  { %4117 = vrot.lane.b32.xlu0 %v19488_v8, %s18909_s8 }
 0x32c   :  { %2299 = vmax.xlane.f32.xlu1 %v2298_v43 }
 0x330   :  { %2305 = vmax.xlane.f32.xlu1 %v2304_v27  ;;  %v19844_v27 = vsel %vm19734_vm3, %v2257_v51, -1e+30 }
 0x331   :  { %v2322_v35 = vsel %vm2276_vm4, %v19844_v27, -inf }
 0x334   :  { %2311 = vmax.xlane.f32.xlu1 %v2310_v42 }
 0x338   :  { %2317 = vmax.xlane.f32.xlu1 %v2316_v1 }
 0x33c   :  { %2323 = vmax.xlane.f32.xlu1 %v2322_v35 }
 0x360   :  { %v2279_v43 = vpop.xlane.xlu0 %2278 }
 0x361   :  { %v2325_v23 = vsub.f32 %v19740_v40, %v2279_v43 }
 0x363   :  { %v2341_v9 = vmul.f32 1.442695, %v2325_v23 }
 0x364   :  { %v2282_v42 = vpop.xlane.xlu1 %2281 }
 0x365   :  { %18557 = vpow2.f32 %v2341_v9  ;;  %v2326_v59 = vsub.f32 %v19748_v45, %v2282_v42 }
 0x367   :  { %v2343_v8 = vmul.f32 1.442695, %v2326_v59 }
 0x368   :  { %v2285_v26 = vpop.xlane.xlu0 %2284 }
 0x369   :  { %18559 = vpow2.f32 %v2343_v8  ;;  %v2327_v1 = vsub.f32 %v19754_v14, %v2285_v26 }
 0x36b   :  { %v2345_v15 = vmul.f32 1.442695, %v2327_v1 }
 0x36c   :  { %v2288_v51 = vpop.xlane.xlu1 %2287  ;;  %v2303_v3 = vpop.xlane.xlu0 %2302 }
 0x36d   :  { %18561 = vpow2.f32 %v2345_v15  ;;  %v2328_v5 = vsub.f32 %v19764_v25, %v2288_v51  ;;  %v2333_v35 = vsub.f32 %v19760_v38, %v2303_v3 }
 0x36f   :  { %v2347_v28 = vmul.f32 1.442695, %v2328_v5  ;;  %v2357_v40 = vmul.f32 1.442695, %v2333_v35 }
 0x370   :  { %v2309_v43 = vpop.xlane.xlu0 %2308 }
 0x371   :  { %18563 = vpow2.f32 %v2347_v28  ;;  %v2335_v23 = vsub.f32 %v19772_v58, %v2309_v43 }
 0x372   :  { %v19854_v45 = vpop.eup %18557  ;;  %18565 = vpow2.f32 %v2357_v40 }
 0x373   :  { %v2361_v8 = vmul.f32 1.442695, %v2335_v23  ;;  %v2373_v26 = vsel %vm2276_vm4, %v19854_v45, 0.0 }
 0x374   :  { %v2294_v14 = vpop.xlane.xlu1 %2293  ;;  %v2291_v9 = vpop.xlane.xlu0 %2290  ;;  %2374 = vadd.xlane.f32.xlu0 %v2373_v26 }
 0x375   :  { %18567 = vpow2.f32 %v2361_v8  ;;  %v2330_v15 = vsub.f32 %v19782_v39, %v2294_v14  ;;  %v2329_v3 = vsub.f32 %v19778_v37, %v2291_v9 }
 0x376   :  { %v19860_v5 = vpop.eup %18559 }
 0x377   :  { %v2351_v28 = vmul.f32 1.442695, %v2330_v15  ;;  %v2349_v38 = vmul.f32 1.442695, %v2329_v3  ;;  %v2376_v25 = vsel %vm2276_vm4, %v19860_v5, 0.0 }
 0x378   :  { %v2315_v58 = vpop.xlane.xlu0 %2314  ;;  %2377 = vadd.xlane.f32.xlu1 %v2376_v25 }
 0x379   :  { %18569 = vpow2.f32 %v2351_v28  ;;  %v2337_v42 = vsub.f32 %v19790_v21, %v2315_v58 }
 0x37a   :  { %v19865_v59 = vpop.eup %18561  ;;  %18571 = vpow2.f32 %v2349_v38 }
 0x37b   :  { %v2365_v1 = vmul.f32 1.442695, %v2337_v42  ;;  %v2379_v39 = vsel %vm2276_vm4, %v19865_v59, 0.0 }
 0x37c   :  { %v2297_v37 = vpop.xlane.xlu0 %2296  ;;  %2380 = vadd.xlane.f32.xlu0 %v2379_v39 }
 0x37d   :  { %18573 = vpow2.f32 %v2365_v1  ;;  %v2331_v40 = vsub.f32 %v19796_v30, %v2297_v37  ;;  %v19907_v37 = vpop.permute.xlu1 %4119 }
 0x37e   :  { %v19869_v51 = vpop.eup %18563 }
 0x37f   :  { %v19871_v35 = vpop.eup %18565  ;;  %v2382_v43 = vsel %vm2276_vm4, %v19869_v51, 0.0  ;;  %v2353_v14 = vmul.f32 1.442695, %v2331_v40 }
 0x380   :  { %v2397_v21 = vsel %vm2276_vm4, %v19871_v35, 0.0  ;;  %v2321_v23 = vpop.xlane.xlu0 %2320  ;;  %2383 = vadd.xlane.f32.xlu1 %v2382_v43 }
 0x381   :  { %2398 = vadd.xlane.f32.xlu0 %v2397_v21  ;;  %v2339_v8 = vsub.f32 %v19802_v19, %v2321_v23  ;;  %v19911_v40 = vpop.permute.xlu1 %4039 }
 0x382   :  { %v19879_v26 = vpop.eup %18567 }
 0x383   :  { %v2369_v9 = vmul.f32 1.442695, %v2339_v8  ;;  %v2403_v15 = vsel %vm2276_vm4, %v19879_v26, 0.0 }
 0x385   :  { %18575 = vpow2.f32 %v2369_v9  ;;  %2404 = vadd.xlane.f32.xlu0 %v2403_v15  ;;  %v19917_v43 = vpop.permute.xlu1 %4197 }
 0x386   :  { %v19883_v30 = vpop.eup %18569  ;;  %18577 = vpow2.f32 %v2353_v14 }
 0x387   :  { %v19885_v3 = vpop.eup %18571  ;;  %v2388_v28 = vsel %vm2276_vm4, %v19883_v30, 0.0 }
 0x388   :  { %v2385_v19 = vsel %vm2276_vm4, %v19885_v3, 0.0  ;;  %2389 = vadd.xlane.f32.xlu1 %v2388_v28 }
 0x389   :  { %2386 = vadd.xlane.f32.xlu0 %v2385_v19  ;;  %v19923_v21 = vpop.permute.xlu1 %4275 }
 0x38a   :  { %v19891_v38 = vpop.eup %18573 }
 0x38b   :  { %v2409_v25 = vsel %vm2276_vm4, %v19891_v38, 0.0 }
 0x38d   :  { %2410 = vadd.xlane.f32.xlu0 %v2409_v25 }
 0x392   :  { %v19895_v58 = vpop.eup %18575 }
 0x393   :  { %v2415_v42 = vsel %vm2276_vm4, %v19895_v58, 0.0  ;;  %v19899_v1 = vpop.eup %18577 }
 0x394   :  { %2416 = vadd.xlane.f32.xlu0 %v2415_v42  ;;  %v2391_v39 = vsel %vm2276_vm4, %v19899_v1, 0.0 }
 0x398   :  { %2392 = vadd.xlane.f32.xlu0 %v2391_v39 }
 0x399   :  { %4353 = vrot.lane.b32.xlu1 %v19539_v12, %s18909_s8 }
 0x39d   :  { %4431 = vrot.lane.b32.xlu1 %v19563_v41, %s18909_s8 }
 0x3a1   :  { %4509 = vrot.lane.b32.xlu1 %v19586_v0, %s18909_s8 }
 0x3a5   :  { %4587 = vrot.lane.b32.xlu1 %v19618_v52, %s18909_s8 }
 0x3a9   :  { %4665 = vrot.lane.b32.xlu1 %v19495_v17, %s18909_s8 }
 0x3ad   :  { %4743 = vrot.lane.b32.xlu1 %v19641_v62, %s18909_s8 }
 0x3ae   :  { %4195 = vrot.lane.b32.xlu0 %v19506_v29, %s18909_s8 }
 0x3b2   :  { %4273 = vrot.lane.b32.xlu0 %v19531_v31, %s18909_s8 }
 0x3b5   :  { %v2300_v23 = vpop.xlane.xlu1 %2299 }
 0x3b6   :  { %4351 = vrot.lane.b32.xlu0 %v19554_v36, %s18909_s8  ;;  %v2332_v8 = vsub.f32 %v19820_v10, %v2300_v23 }
 0x3b8   :  { %v2355_v9 = vmul.f32 1.442695, %v2332_v8 }
 0x3b9   :  { %v2306_v14 = vpop.xlane.xlu1 %2305 }
 0x3ba   :  { %4429 = vrot.lane.b32.xlu0 %v19579_v63, %s18909_s8  ;;  %v2334_v15 = vsub.f32 %v19826_v54, %v2306_v14  ;;  %18579 = vpow2.f32 %v2355_v9 }
 0x3bc   :  { %v2359_v19 = vmul.f32 1.442695, %v2334_v15 }
 0x3bd   :  { %v2312_v28 = vpop.xlane.xlu1 %2311 }
 0x3be   :  { %4507 = vrot.lane.b32.xlu0 %v19604_v50, %s18909_s8  ;;  %v2336_v25 = vsub.f32 %v19832_v6, %v2312_v28  ;;  %18581 = vpow2.f32 %v2359_v19 }
 0x3c0   :  { %v2363_v10 = vmul.f32 1.442695, %v2336_v25 }
 0x3c1   :  { %v2318_v42 = vpop.xlane.xlu1 %2317 }
 0x3c2   :  { %4585 = vrot.lane.b32.xlu0 %v19627_v53, %s18909_s8  ;;  %v2338_v39 = vsub.f32 %v19838_v32, %v2318_v42  ;;  %18583 = vpow2.f32 %v2363_v10 }
 0x3c4   :  { %v2367_v54 = vmul.f32 1.442695, %v2338_v39  ;;  %v19980_v39 = vcombine.high %v19648_v7, %v19648_v7 }
 0x3c5   :  { %v2324_v23 = vpop.xlane.xlu1 %2323 }
 0x3c6   :  { %4663 = vrot.lane.b32.xlu0 %v19515_v46, %s18909_s8  ;;  %v2340_v8 = vsub.f32 %v19844_v27, %v2324_v23  ;;  %18585 = vpow2.f32 %v2367_v54  ;;  %v19986_v23 = vadd.f32 %v19634_v60, %v19679_v61  ;;  %v20006_v61 = vcombine.high %v19669_v22, %v19669_v22 }
 0x3c7   :  { %v19944_v14 = vpop.eup %18579 }
 0x3c8   :  { %v2371_v6 = vmul.f32 1.442695, %v2340_v8  ;;  %v2394_v32 = vsel %vm2276_vm4, %v19944_v14, 0.0  ;;  %23427 = vst [vmem:[#allocation27_spill] sm:$0xff] %v19986_v23  ;;  %v19992_v54 = vcombine.high %v19986_v23, %v19986_v23  ;;  %v19998_v8 = vpop.permute.xlu0 %4041  ;;  %23429 = vst [vmem:[#allocation29_spill] sm:$0xff] %v20006_v61 }
 0x3ca   :  { %4741 = vrot.lane.b32.xlu0 %v19656_v48, %s18909_s8  ;;  %18587 = vpow2.f32 %v2371_v6  ;;  %23428 = vst [vmem:[#allocation28_spill] sm:$0xff] %v19992_v54 }
 0x3cb   :  { %v19950_v9 = vpop.eup %18581 }
 0x3cc   :  { %v2400_v27 = vsel %vm2276_vm4, %v19950_v9, 0.0  ;;  %v20008_v6 = vpop.permute.xlu0 %4117 }
 0x3ce   :  { %4819 = vrot.lane.b32.xlu0 %v19542_v13, %s18909_s8 }
 0x3cf   :  { %v19956_v15 = vpop.eup %18583 }
 0x3d0   :  { %v2406_v28 = vsel %vm2276_vm4, %v19956_v15, 0.0 }
 0x3d1   :  { %2395 = vadd.xlane.f32.xlu1 %v2394_v32  ;;  %v20016_v32 = vadd.f32 %v19634_v60, %v19702_v16 }
 0x3d2   :  { %4897 = vrot.lane.b32.xlu0 %v19675_v57, %s18909_s8 }
 0x3d3   :  { %v19962_v19 = vpop.eup %18585  ;;  %23430 = vst [vmem:[#allocation30_spill] sm:$0xff] %v20016_v32 }
 0x3d4   :  { %v2412_v25 = vsel %vm2276_vm4, %v19962_v19, 0.0 }
 0x3d5   :  { %2401 = vadd.xlane.f32.xlu1 %v2400_v27 }
 0x3d6   :  { %4975 = vrot.lane.b32.xlu0 %v19592_v49, %s18909_s8 }
 0x3d7   :  { %v19968_v42 = vpop.eup %18587 }
 0x3d8   :  { %v2418_v10 = vsel %vm2276_vm4, %v19968_v42, 0.0 }
 0x3d9   :  { %2407 = vadd.xlane.f32.xlu1 %v2406_v28  ;;  %v20024_v28 = vcombine.high %v20016_v32, %v20016_v32 }
 0x3da   :  { %5053 = vrot.lane.b32.xlu0 %v19700_v11, %s18909_s8 }
 0x3db   :  { %23431 = vst [vmem:[#allocation31_spill] sm:$0xff] %v20024_v28 }
 0x3dd   :  { %2413 = vadd.xlane.f32.xlu1 %v2412_v25 }
 0x3de   :  { %5131 = vrot.lane.b32.xlu0 %v19611_v44, %s18909_s8 }
 0x3e1   :  { %2419 = vadd.xlane.f32.xlu1 %v2418_v10  ;;  %v20036_v10 = vadd.f32 %v19634_v60, %v19744_v34  ;;  %v23434_v34 = vld [vmem:[#allocation25_spill] sm:$0xff] }
 0x3e2   :  { %5495 = vrot.lane.b32.xlu0 %v19660_v55, %s18909_s8 }
 0x3e3   :  { %23432 = vst [vmem:[#allocation32_spill] sm:$0xff] %v20036_v10 }
 0x3e6   :  { %5649 = vrot.lane.b32.xlu0 %v19648_v7, %s18909_s8 }
 0x3ea   :  { %5726 = vrot.lane.b32.xlu0 %v19980_v39, %s18909_s8 }
 0x3ee   :  { %5803 = vrot.lane.b32.xlu0 %v19986_v23, %s18909_s8 }
 0x3f2   :  { %5880 = vrot.lane.b32.xlu0 %v19992_v54, %s18909_s8  ;;  %4821 = vrot.lane.b32.xlu1 %v19523_v47, %s18909_s8 }
 0x3f6   :  { %5957 = vrot.lane.b32.xlu0 %v19669_v22, %s18909_s8  ;;  %4899 = vrot.lane.b32.xlu1 %v19664_v56, %s18909_s8 }
 0x3fa   :  { %6034 = vrot.lane.b32.xlu0 %v20006_v61, %s18909_s8  ;;  %4977 = vrot.lane.b32.xlu1 %v19569_v18, %s18909_s8 }
 0x3fd   :  { %v2375_v27 = vpop.xlane.xlu0 %2374 }
 0x3fe   :  { %18589 = vrcp.f32 %v2375_v27  ;;  %6111 = vrot.lane.b32.xlu0 %v20016_v32, %s18909_s8  ;;  %5055 = vrot.lane.b32.xlu1 %v19686_v4, %s18909_s8  ;;  %v23437_v4 = vld [vmem:[#allocation23_spill] sm:$0xff] }
 0x401   :  { %v2378_v25 = vpop.xlane.xlu1 %2377 }
 0x402   :  { %18591 = vrcp.f32 %v2378_v25  ;;  %6188 = vrot.lane.b32.xlu0 %v20024_v28, %s18909_s8  ;;  %5133 = vrot.lane.b32.xlu1 %v19596_v33, %s18909_s8 }
 0x405   :  { %v2381_v16 = vpop.xlane.xlu0 %2380 }
 0x406   :  { %18593 = vrcp.f32 %v2381_v16  ;;  %6265 = vrot.lane.b32.xlu0 %v19692_v2, %s18909_s8  ;;  %5211 = vrot.lane.b32.xlu1 %v19707_v24, %s18909_s8  ;;  %v20045_v24 = vcombine.high %v20036_v10, %v20036_v10 }
 0x408   :  { %23433 = vst [vmem:[#allocation33_spill] sm:$0xff] %v20045_v24 }
 0x409   :  { %v2384_v27 = vpop.xlane.xlu1 %2383 }
 0x40a   :  { %v2399_v25 = vpop.xlane.xlu0 %2398  ;;  %18595 = vrcp.f32 %v2384_v27  ;;  %6419 = vrot.lane.b32.xlu0 %v20036_v10, %s18909_s8  ;;  %5209 = vrot.lane.b32.xlu1 %v19718_v20, %s18909_s8 }
 0x40b   :  { %v18590_v16 = vpop.eup %18589 }
 0x40c   :  { %v2422_v55 = vmul.f32 %v18590_v16, %v19854_v45  ;;  %v23435_v45 = vmov 0.0  }
 0x40e   :  { %v2405_v33 = vpop.xlane.xlu0 %2404  ;;  %17850 = vmatmul.mubr.msk.f32.vlgmr.msra.gmra.mxu0 %vm2453_vm5, %v2422_v55  ;;  %6496 = vrot.lane.b32.xlu0 %v20045_v24, %s18909_s8  ;;  %v20060_v55 = vcombine.high %v19692_v2, %v19692_v2 }
 0x40f   :  { %v18592_v60 = vpop.eup %18591  ;;  %17858 = vmatpush3.msk.msra.mxu0 %vm2457_vm2, %v19648_v7  ;;  %5572 = vrot.lane.b32.xlu1 %v23434_v34, %s18909_s8 }
 0x410   :  { %v2424_v27 = vmul.f32 %v18592_v60, %v19860_v5  ;;  %17859 = vmatprep.mubr.msk.f32.mxu0 %vm18908_vm0, %v23435_v45  ;;  %17867 = vmatprep.subr.mxu0 %v23435_v45  ;;  %23436 = vst [vmem:[#allocation25_spill] sm:$0xff] %v20060_v55  ;;  %v20072_v60 = vcombine.high %v23437_v4, %v23437_v4 }
 0x411   :  { %v2390_v16 = vpop.xlane.xlu1 %2389 }
 0x412   :  { %v2387_v20 = vpop.xlane.xlu0 %2386  ;;  %18597 = vrcp.f32 %v2390_v16  ;;  %6573 = vrot.lane.b32.xlu0 %v23437_v4, %s18909_s8  ;;  %17855 = vmatmul.mubr.msk.f32.vlgmr.msra.gmra.mxu1 %vm2453_vm5, %v2424_v27  ;;  %23438 = vst [vmem:[#allocation34_spill] sm:$0xff] %v20072_v60  ;;  %v23440_v16 = vld [vmem:[#allocation3_spill] sm:$0xff] }
 0x413   :  { %v18594_v18 = vpop.eup %18593  ;;  %18599 = vrcp.f32 %v2387_v20  ;;  %6342 = vrot.lane.b32.xlu1 %v20060_v55, %s18909_s8  ;;  %17863 = vmatpush3.msk.msra.mxu1 %vm2457_vm2, %v19980_v39 }
 0x414   :  { %v2426_v5 = vmul.f32 %v18594_v18, %v19865_v59  ;;  %17864 = vmatprep.mubr.msk.f32.mxu1 %vm18908_vm0, %v23435_v45  ;;  %17872 = vmatprep.subr.mxu1 %v23435_v45  ;;  %v23439_v18 = vld [vmem:[#allocation5_spill] sm:$0xff] }
 0x416   :  { %17860 = vmatmul.mubr.msk.f32.vlgmr.msra.gmra.mxu0 %vm2453_vm5, %v2426_v5  ;;  %6650 = vrot.lane.b32.xlu0 %v20072_v60, %s18909_s8  ;;  %v2411_v27 = vpop.xlane.xlu0 %2410  ;;  %v23441_v5 = vld [vmem:[#allocation7_spill] sm:$0xff] }
 0x417   :  { %v18596_v20 = vpop.eup %18595  ;;  %17868 = vmatpush3.msk.msra.mxu0 %vm2457_vm2, %v19986_v23  ;;  %7191 = vrot.lane.b32.xlu1 %v23439_v18, %s18910_s18 }
 0x418   :  { %v2428_v59 = vmul.f32 %v18596_v20, %v19869_v51  ;;  %17869 = vmatprep.mubr.msk.f32.mxu0 %vm18908_vm0, %v23435_v45  ;;  %17877 = vmatprep.subr.mxu0 %v23435_v45  ;;  %v23442_v20 = vld [vmem:[#allocation4_spill] sm:$0xff] }
 0x41a   :  { %7113 = vrot.lane.b32.xlu0 %v23440_v16, %s18910_s18  ;;  %17865 = vmatmul.mubr.msk.f32.vlgmr.msra.gmra.mxu1 %vm2453_vm5, %v2428_v59  ;;  %v23443_v16 = vld [vmem:[#allocation8_spill] sm:$0xff] }
 0x41b   :  { %7269 = vrot.lane.b32.xlu1 %v23441_v5, %s18910_s18  ;;  %17873 = vmatpush3.msk.msra.mxu1 %vm2457_vm2, %v19992_v54  ;;  %v23444_v54 = vld [vmem:[#allocation6_spill] sm:$0xff] }
 0x41c   :  { %17874 = vmatprep.mubr.msk.f32.mxu1 %vm18908_vm0, %v23435_v45  ;;  %17882 = vmatprep.subr.mxu1 %v23435_v45 }
 0x41d   :  { %v2417_v51 = vpop.xlane.xlu0 %2416 }
 0x41e   :  { %7111 = vrot.lane.b32.xlu0 %v23442_v20, %s18910_s18 }
 0x41f   :  { %v18598_v18 = vpop.eup %18597  ;;  %7347 = vrot.lane.b32.xlu1 %v23443_v16, %s18910_s18 }
 0x420   :  { %v18600_v59 = vpop.eup %18599  ;;  %v2432_v56 = vmul.f32 %v18598_v18, %v19883_v30 }
 0x421   :  { %v2393_v5 = vpop.xlane.xlu0 %2392  ;;  %v2430_v47 = vmul.f32 %v18600_v59, %v19885_v3 }
 0x422   :  { %18601 = vrcp.f32 %v2393_v5  ;;  %7189 = vrot.lane.b32.xlu0 %v23444_v54, %s18910_s18  ;;  %17875 = vmatmul.mubr.msk.f32.vlgmr.msra.gmra.mxu1 %vm2453_vm5, %v2432_v56 }
 0x423   :  { %17870 = vmatmul.mubr.msk.f32.vlgmr.msra.gmra.mxu0 %vm2453_vm5, %v2430_v47  ;;  %17883 = vmatpush3.msk.msra.mxu1 %vm2457_vm2, %v20006_v61  ;;  %18603 = vrcp.f32 %v2399_v25 }
 0x424   :  { %17878 = vmatpush3.msk.msra.mxu0 %vm2457_vm2, %v19669_v22  ;;  %17879 = vmatprep.mubr.msk.f32.mxu0 %vm18908_vm0, %v23435_v45  ;;  %18605 = vrcp.f32 %v2405_v33 }
 0x425   :  { %17887 = vmatprep.subr.mxu0 %v23435_v45  ;;  %17884 = vmatprep.mubr.msk.f32.mxu1 %vm18908_vm0, %v23435_v45  ;;  %18607 = vrcp.f32 %v2411_v27  ;;  %v4196_v3 = vpop.permute.xlu0 %4195 }
 0x426   :  { %17892 = vmatprep.subr.mxu1 %v23435_v45  ;;  %18609 = vrcp.f32 %v2417_v51 }
 0x429   :  { %v20127_v18 = vpop.permute.xlu0 %4273 }
 0x42d   :  { %v4352_v59 = vpop.permute.xlu0 %4351 }
 0x42f   :  { %v18602_v47 = vpop.eup %18601 }
 0x430   :  { %v2434_v56 = vmul.f32 %v18602_v47, %v19899_v1  ;;  %v18604_v30 = vpop.eup %18603  ;;  %v4354_v1 = vpop.permute.xlu1 %4353 }
 0x431   :  { %v2438_v25 = vmul.f32 %v18604_v30, %v19871_v35  ;;  %v18606_v33 = vpop.eup %18605 }
 0x432   :  { %17880 = vmatmul.mubr.msk.f32.vlgmr.msra.gmra.mxu0 %vm2453_vm5, %v2434_v56  ;;  %v2442_v27 = vmul.f32 %v18606_v33, %v19879_v26  ;;  %v18608_v5 = vpop.eup %18607  ;;  %v20152_v56 = vpop.permute.xlu0 %4429 }
 0x433   :  { %17888 = vmatpush3.msk.msra.mxu0 %vm2457_vm2, %v20016_v32  ;;  %17889 = vmatprep.mubr.msk.f32.mxu0 %vm18908_vm0, %v23435_v45  ;;  %v2446_v35 = vmul.f32 %v18608_v5, %v19891_v38  ;;  %v18610_v51 = vpop.eup %18609 }
 0x434   :  { %17897 = vmatprep.subr.mxu0 %v23435_v45  ;;  %v20142_v47 = vpop.permute.xlu1 %4431  ;;  %v2450_v26 = vmul.f32 %v18610_v51, %v19895_v58 }
 0x436   :  { %17890 = vmatmul.mubr.msk.f32.vlgmr.msra.gmra.mxu0 %vm2453_vm5, %v2438_v25  ;;  %v4508_v58 = vpop.permute.xlu0 %4507 }
 0x437   :  { %17898 = vmatpush3.msk.msra.mxu0 %vm2457_vm2, %v19692_v2  ;;  %17899 = vmatprep.mubr.msk.f32.mxu0 %vm18908_vm0, %v23435_v45 }
 0x438   :  { %17907 = vmatprep.subr.mxu0 %v23435_v45  ;;  %v4510_v38 = vpop.permute.xlu1 %4509 }
 0x43a   :  { %17900 = vmatmul.mubr.msk.f32.vlgmr.msra.gmra.mxu0 %vm2453_vm5, %v2442_v27 }
 0x43b   :  { %17908 = vmatpush3.msk.msra.mxu0 %vm2457_vm2, %v20036_v10  ;;  %17909 = vmatprep.mubr.msk.f32.mxu0 %vm18908_vm0, %v23435_v45 }
 0x43c   :  { %17917 = vmatprep.subr.mxu0 %v23435_v45  ;;  %v20166_v30 = vpop.permute.xlu1 %4587 }
 0x43e   :  { %17910 = vmatmul.mubr.msk.f32.vlgmr.msra.gmra.mxu0 %vm2453_vm5, %v2446_v35 }
 0x43f   :  { %17918 = vmatpush3.msk.msra.mxu0 %vm2457_vm2, %v23437_v4  ;;  %17919 = vmatprep.mubr.msk.f32.mxu0 %vm18908_vm0, %v23435_v45 }
 0x440   :  { %17927 = vmatprep.subr.mxu0 %v23435_v45 }
 0x442   :  { %17920 = vmatmul.mubr.msk.f32.vlgmr.msra.gmra.mxu0 %vm2453_vm5, %v2450_v26 }
 0x443   :  { %17928 = vmatpush3.xpose.msk.msra.mxu0 %vm1042_vm1, %v19998_v8  ;;  %17929 = vmatprep.mubr.msk.f32.mxu0 %vm18908_vm0, %v23435_v45 }
 0x444   :  { %17937 = vmatprep.subr.mxu0 %v23435_v45 }
 0x446   :  { %17930 = vmatmul.mubr.msk.f32.vlgmr.msra.gmra.mxu0 %vm1042_vm1, %v19911_v40  ;;  %v20174_v40 = vpop.permute.xlu0 %4585 }
 0x447   :  { %17938 = vmatpush3.xpose.msk.msra.mxu0 %vm1042_vm1, %v19917_v43  ;;  %17939 = vmatprep.mubr.msk.f32.mxu0 %vm18908_vm0, %v23435_v45  ;;  %v4666_v43 = vpop.permute.xlu1 %4665 }
 0x448   :  { %17947 = vmatprep.subr.mxu0 %v23435_v45 }
 0x44a   :  { %17940 = vmatmul.mubr.msk.f32.vlgmr.msra.gmra.mxu0 %vm1042_vm1, %v4196_v3  ;;  %v4664_v8 = vpop.permute.xlu0 %4663 }
 0x44b   :  { %17948 = vmatpush3.xpose.msk.msra.mxu0 %vm1042_vm1, %v4354_v1  ;;  %17949 = vmatprep.mubr.msk.f32.mxu0 %vm18908_vm0, %v23435_v45  ;;  %v20185_v3 = vpop.permute.xlu1 %4743 }
 0x44c   :  { %17957 = vmatprep.subr.mxu0 %v23435_v45 }
 0x44e   :  { %17950 = vmatmul.mubr.msk.f32.vlgmr.msra.gmra.mxu0 %vm1042_vm1, %v4352_v59  ;;  %v20190_v33 = vpop.permute.xlu0 %4741 }
 0x44f   :  { %17958 = vmatpush3.xpose.msk.msra.mxu0 %vm1042_vm1, %v4510_v38  ;;  %17959 = vmatprep.mubr.msk.f32.mxu0 %vm18908_vm0, %v23435_v45 }
 0x450   :  { %17967 = vmatprep.subr.mxu0 %v23435_v45 }
 0x452   :  { %17960 = vmatmul.mubr.msk.f32.vlgmr.msra.gmra.mxu0 %vm1042_vm1, %v4508_v58  ;;  %v4820_v5 = vpop.permute.xlu0 %4819 }
 0x453   :  { %17968 = vmatpush3.xpose.msk.msra.mxu0 %vm1042_vm1, %v4666_v43  ;;  %17969 = vmatprep.mubr.msk.f32.mxu0 %vm18908_vm0, %v23435_v45 }
 0x454   :  { %17977 = vmatprep.subr.mxu0 %v23435_v45 }
 0x456   :  { %17970 = vmatmul.mubr.msk.f32.vlgmr.msra.gmra.mxu0 %vm1042_vm1, %v4664_v8  ;;  %v20193_v26 = vpop.permute.xlu0 %4897 }
 0x457   :  { %17979 = vmatprep.mubr.msk.f32.mxu0 %vm18908_vm0, %v23435_v45 }
 0x45a   :  { %v2396_v25 = vpop.xlane.xlu1 %2395 }
 0x45b   :  { %18611 = vrcp.f32 %v2396_v25  ;;  %v4976_v25 = vpop.permute.xlu0 %4975 }
 0x45e   :  { %v2402_v1 = vpop.xlane.xlu1 %2401 }
 0x45f   :  { %18613 = vrcp.f32 %v2402_v1 }
 0x462   :  { %v2408_v27 = vpop.xlane.xlu1 %2407 }
 0x463   :  { %18615 = vrcp.f32 %v2408_v27 }
 0x466   :  { %v2414_v35 = vpop.xlane.xlu1 %2413 }
 0x467   :  { %18617 = vrcp.f32 %v2414_v35  ;;  %v5054_v35 = vpop.permute.xlu0 %5053 }
 0x468   :  { %v18612_v51 = vpop.eup %18611 }
 0x469   :  { %v2436_v59 = vmul.f32 %v18612_v51, %v19944_v14 }
 0x46a   :  { %v2420_v38 = vpop.xlane.xlu1 %2419 }
 0x46b   :  { %18619 = vrcp.f32 %v2420_v38  ;;  %17885 = vmatmul.mubr.msk.f32.vlgmr.msra.gmra.mxu1 %vm2453_vm5, %v2436_v59  ;;  %v5132_v38 = vpop.permute.xlu0 %5131 }
 0x46c   :  { %v18614_v58 = vpop.eup %18613  ;;  %17893 = vmatpush3.msk.msra.mxu1 %vm2457_vm2, %v20024_v28  ;;  %17894 = vmatprep.mubr.msk.f32.mxu1 %vm18908_vm0, %v23435_v45 }
 0x46d   :  { %17902 = vmatprep.subr.mxu1 %v23435_v45  ;;  %v2440_v43 = vmul.f32 %v18614_v58, %v19950_v9 }
 0x46e   :  { %v4822_v8 = vpop.permute.xlu1 %4821 }
 0x46f   :  { %17895 = vmatmul.mubr.msk.f32.vlgmr.msra.gmra.mxu1 %vm2453_vm5, %v2440_v43  ;;  %17978 = vmatpush3.xpose.msk.msra.mxu0 %vm1042_vm1, %v4822_v8 }
 0x470   :  { %v18616_v14 = vpop.eup %18615  ;;  %17903 = vmatpush3.msk.msra.mxu1 %vm2457_vm2, %v20060_v55  ;;  %17904 = vmatprep.mubr.msk.f32.mxu1 %vm18908_vm0, %v23435_v45 }
 0x471   :  { %17912 = vmatprep.subr.mxu1 %v23435_v45  ;;  %v2444_v1 = vmul.f32 %v18616_v14, %v19956_v15  ;;  %17987 = vmatprep.subr.mxu0 %v23435_v45 }
 0x472   :  { %17980 = vmatmul.mubr.msk.f32.vlgmr.msra.gmra.mxu0 %vm1042_vm1, %v4820_v5  ;;  %v4900_v9 = vpop.permute.xlu1 %4899 }
 0x473   :  { %17905 = vmatmul.mubr.msk.f32.vlgmr.msra.gmra.mxu1 %vm2453_vm5, %v2444_v1  ;;  %17989 = vmatprep.mubr.msk.f32.mxu0 %vm18908_vm0, %v23435_v45 }
 0x474   :  { %v18618_v27 = vpop.eup %18617  ;;  %17913 = vmatpush3.msk.msra.mxu1 %vm2457_vm2, %v20045_v24  ;;  %17914 = vmatprep.mubr.msk.f32.mxu1 %vm18908_vm0, %v23435_v45 }
 0x475   :  { %17922 = vmatprep.subr.mxu1 %v23435_v45  ;;  %v2448_v15 = vmul.f32 %v18618_v27, %v19962_v19 }
 0x476   :  { %v4978_v51 = vpop.permute.xlu1 %4977 }
 0x477   :  { %17915 = vmatmul.mubr.msk.f32.vlgmr.msra.gmra.mxu1 %vm2453_vm5, %v2448_v15  ;;  %17988 = vmatpush3.xpose.msk.msra.mxu0 %vm1042_vm1, %v4978_v51 }
 0x478   :  { %v18620_v5 = vpop.eup %18619  ;;  %17923 = vmatpush3.msk.msra.mxu1 %vm2457_vm2, %v20072_v60  ;;  %17924 = vmatprep.mubr.msk.f32.mxu1 %vm18908_vm0, %v23435_v45 }
 0x479   :  { %17932 = vmatprep.subr.mxu1 %v23435_v45  ;;  %v2452_v59 = vmul.f32 %v18620_v5, %v19968_v42  ;;  %17997 = vmatprep.subr.mxu0 %v23435_v45 }
 0x47a   :  { %17990 = vmatmul.mubr.msk.f32.vlgmr.msra.gmra.mxu0 %vm1042_vm1, %v4976_v25  ;;  %v5056_v19 = vpop.permute.xlu1 %5055 }
 0x47b   :  { %17925 = vmatmul.mubr.msk.f32.vlgmr.msra.gmra.mxu1 %vm2453_vm5, %v2452_v59  ;;  %17999 = vmatprep.mubr.msk.f32.mxu0 %vm18908_vm0, %v23435_v45 }
 0x47c   :  { %17933 = vmatpush3.xpose.msk.msra.mxu1 %vm1042_vm1, %v19907_v37  ;;  %17934 = vmatprep.mubr.msk.f32.mxu1 %vm18908_vm0, %v23435_v45  ;;  %v5496_v37 = vpop.permute.xlu0 %5495 }
 0x47d   :  { %17942 = vmatprep.subr.mxu1 %v23435_v45 }
 0x47e   :  { %v5134_v42 = vpop.permute.xlu1 %5133 }
 0x47f   :  { %17935 = vmatmul.mubr.msk.f32.vlgmr.msra.gmra.mxu1 %vm1042_vm1, %v20008_v6  ;;  %17998 = vmatpush3.xpose.msk.msra.mxu0 %vm1042_vm1, %v5134_v42 }
 0x480   :  { %17943 = vmatpush3.xpose.msk.msra.mxu1 %vm1042_vm1, %v19923_v21  ;;  %17944 = vmatprep.mubr.msk.f32.mxu1 %vm18908_vm0, %v23435_v45 }
 0x481   :  { %17952 = vmatprep.subr.mxu1 %v23435_v45  ;;  %18007 = vmatprep.subr.mxu0 %v23435_v45 }
 0x482   :  { %18000 = vmatmul.mubr.msk.f32.vlgmr.msra.gmra.mxu0 %vm1042_vm1, %v5132_v38  ;;  %v5212_v21 = vpop.permute.xlu1 %5211 }
 0x483   :  { %17945 = vmatmul.mubr.msk.f32.vlgmr.msra.gmra.mxu1 %vm1042_vm1, %v20127_v18  ;;  %18008 = vmatpush3.msk.msra.mxu0 %vm2457_vm2, %v5496_v37 }
 0x484   :  { %17953 = vmatpush3.xpose.msk.msra.mxu1 %vm1042_vm1, %v20142_v47  ;;  %17954 = vmatprep.mubr.msk.f32.mxu1 %vm18908_vm0, %v23435_v45  ;;  %v18911_v47 = vmov 1966171168  }
 0x485   :  { %17962 = vmatprep.subr.mxu1 %v23435_v45  ;;  %18009 = vmatprep.mubr.msk.f32.mxu0 %vm18908_vm0, %v23435_v45 }
 0x486   :  { %18017 = vmatprep.subr.mxu0 %v23435_v45  ;;  %v5210_v6 = vpop.permute.xlu1 %5209 }
 0x487   :  { %17955 = vmatmul.mubr.msk.f32.vlgmr.msra.gmra.mxu1 %vm1042_vm1, %v20152_v56  ;;  %v3672_v56 = vunpack.c.l.s4 %v18911_v47 }
 0x488   :  { %17963 = vmatpush3.xpose.msk.msra.mxu1 %vm1042_vm1, %v20166_v30  ;;  %17964 = vmatprep.mubr.msk.f32.mxu1 %vm18908_vm0, %v23435_v45 }
 0x489   :  { %17972 = vmatprep.subr.mxu1 %v23435_v45  ;;  %v3673_v30 = vunpack.c.0.s8 %v3672_v56 }
 0x48a   :  { %v5573_v18 = vpop.permute.xlu1 %5572 }
 0x48b   :  { %17965 = vmatmul.mubr.msk.f32.vlgmr.msra.gmra.mxu1 %vm1042_vm1, %v20174_v40  ;;  %v23445_v40 = vld [vmem:[#allocation2_spill] sm:$0xff] }
 0x48c   :  { %17973 = vmatpush3.xpose.msk.msra.mxu1 %vm1042_vm1, %v20185_v3  ;;  %17974 = vmatprep.mubr.msk.f32.mxu1 %vm18908_vm0, %v23435_v45  ;;  %v20297_v3 = vsub.s32 %v3673_v30, %v23445_v40 }
 0x48d   :  { %17982 = vmatprep.subr.mxu1 %v23435_v45 }
 0x48e   :  { %23446 = vst [vmem:[#allocation35_spill] sm:$0xff] %v20297_v3 }
 0x48f   :  { %17975 = vmatmul.mubr.msk.f32.vlgmr.msra.gmra.mxu1 %vm1042_vm1, %v20190_v33 }
 0x490   :  { %17983 = vmatpush3.xpose.msk.msra.mxu1 %vm1042_vm1, %v4900_v9  ;;  %17984 = vmatprep.mubr.msk.f32.mxu1 %vm18908_vm0, %v23435_v45 }
 0x491   :  { %17992 = vmatprep.subr.mxu1 %v23435_v45 }
 0x493   :  { %17985 = vmatmul.mubr.msk.f32.vlgmr.msra.gmra.mxu1 %vm1042_vm1, %v20193_v26 }
 0x494   :  { %17993 = vmatpush3.xpose.msk.msra.mxu1 %vm1042_vm1, %v5056_v19  ;;  %17994 = vmatprep.mubr.msk.f32.mxu1 %vm18908_vm0, %v23435_v45 }
 0x495   :  { %18002 = vmatprep.subr.mxu1 %v23435_v45 }
 0x497   :  { %17995 = vmatmul.mubr.msk.f32.vlgmr.msra.gmra.mxu1 %vm1042_vm1, %v5054_v35 }
 0x498   :  { %18003 = vmatpush3.xpose.msk.msra.mxu1 %vm1042_vm1, %v5212_v21  ;;  %18004 = vmatprep.mubr.msk.f32.mxu1 %vm18908_vm0, %v23435_v45 }
 0x499   :  { %18012 = vmatprep.subr.mxu1 %v23435_v45 }
 0x49b   :  { %18005 = vmatmul.mubr.msk.f32.vlgmr.msra.gmra.mxu1 %vm1042_vm1, %v5210_v6 }
 0x49c   :  { %18013 = vmatpush3.msk.msra.mxu1 %vm2457_vm2, %v5573_v18  ;;  %18014 = vmatprep.mubr.msk.f32.mxu1 %vm18908_vm0, %v23435_v45 }
 0x49d   :  { %18022 = vmatprep.subr.mxu1 %v23435_v45 }
 0x4ce   :  { %v2526_v33 = vpop.f32.mrf.mxu0 }
 0x4cf   :  { %v3677_v26 = vrot.slane %v2526_v33, %v20297_v3 }
 0x4d0   :  { %v17851_v58 = vpop.f32.mrf.mxu0 }
 0x4d1   :  { %v3678_v43 = vcombine.high %v3677_v26, %v3677_v26  ;;  %v3685_v8 = vrot.slane %v3677_v26, %v20297_v3 }
 0x4d2   :  { %v2601_v14 = vpop.f32.mrf.mxu1 }
 0x4d3   :  { %v3692_v25 = vrot.slane %v3678_v43, %v20297_v3  ;;  %v3700_v1 = vrot.slane %v2601_v14, %v20297_v3  ;;  %v3693_v27 = vcombine.high %v3685_v8, %v3685_v8 }
 0x4d4   :  { %v17856_v9 = vpop.f32.mrf.mxu1 }
 0x4d5   :  { %v13255_v15 = vcombine.low %v3685_v8, %v3692_v25  ;;  %v3701_v35 = vcombine.high %v3700_v1, %v3700_v1  ;;  %v3708_v51 = vrot.slane %v3700_v1, %v20297_v3 }
 0x4d6   :  { %v2676_v5 = vpop.f32.mrf.mxu0 }
 0x4d7   :  { %v13256_v59 = vcombine.low %v3693_v27, %v3708_v51  ;;  %v3715_v19 = vrot.slane %v3701_v35, %v20297_v3  ;;  %v3716_v38 = vcombine.high %v3708_v51, %v3708_v51  ;;  %v3723_v42 = vrot.slane %v2676_v5, %v20297_v3 }
 0x4d8   :  { %v17861_v37 = vpop.f32.mrf.mxu0  ;;  %v13265_v21 = vrot.slane %v13255_v15, %v20297_v3 }
 0x4d9   :  { %v13272_v6 = vrot.slane %v13256_v59, %v20297_v3  ;;  %v3724_v18 = vcombine.high %v3723_v42, %v3723_v42  ;;  %v3731_v47 = vrot.slane %v3723_v42, %v20297_v3  ;;  %v13257_v26 = vcombine.low %v3715_v19, %v3716_v38 }
 0x4da   :  { %v2751_v56 = vpop.f32.mrf.mxu1 }
 0x4db   :  { %v13287_v30 = vcombine.low %v13265_v21, %v13272_v6  ;;  %v3746_v33 = vrot.slane %v2751_v56, %v20297_v3  ;;  %v3738_v58 = vrot.slane %v3724_v18, %v20297_v3  ;;  %v3739_v8 = vcombine.high %v3731_v47, %v3731_v47 }
 0x4dc   :  { %v17866_v43 = vpop.f32.mrf.mxu1  ;;  %v13279_v35 = vrot.slane %v13257_v26, %v20297_v3 }
 0x4dd   :  { %v3747_v14 = vcombine.high %v3746_v33, %v3746_v33  ;;  %v3754_v25 = vrot.slane %v3746_v33, %v20297_v3  ;;  %v13258_v1 = vcombine.low %v3731_v47, %v3738_v58  ;;  %v13295_v21 = vrot.slane %v13287_v30, %v20297_v3 }
 0x4df   :  { %v3761_v9 = vrot.slane %v3747_v14, %v20297_v3  ;;  %v3762_v27 = vcombine.high %v3754_v25, %v3754_v25  ;;  %v13304_v15 = vcombine.low %v3739_v8, %v3754_v25  ;;  %v13286_v51 = vrot.slane %v13258_v1, %v20297_v3 }
 0x4e1   :  { %v13305_v5 = vcombine.low %v3761_v9, %v3762_v27  ;;  %v13288_v59 = vcombine.low %v13279_v35, %v13286_v51  ;;  %v13314_v19 = vrot.slane %v13304_v15, %v20297_v3 }
 0x4e2   :  { %v2901_v42 = vpop.f32.mrf.mxu1 }
 0x4e3   :  { %v13321_v38 = vrot.slane %v13305_v5, %v20297_v3  ;;  %v2826_v37 = vpop.f32.mrf.mxu0  ;;  %v13302_v6 = vrot.slane %v13288_v59, %v20297_v3  ;;  %v3792_v47 = vrot.slane %v2901_v42, %v20297_v3 }
 0x4e4   :  { %v3769_v18 = vrot.slane %v2826_v37, %v20297_v3  ;;  %v17876_v56 = vpop.f32.mrf.mxu1 }
 0x4e5   :  { %v13336_v33 = vcombine.low %v13314_v19, %v13321_v38  ;;  %v17871_v26 = vpop.f32.mrf.mxu0  ;;  %v20322_v8 = vcombine.low %v13295_v21, %v13302_v6  ;;  %v3800_v1 = vrot.slane %v3792_v47, %v20297_v3  ;;  %v3793_v51 = vcombine.high %v3792_v47, %v3792_v47 }
 0x4e6   :  { %v3770_v58 = vcombine.high %v3769_v18, %v3769_v18  ;;  %v3777_v43 = vrot.slane %v3769_v18, %v20297_v3 }
 0x4e7   :  { %23447 = vst [vmem:[#allocation36_spill] sm:$0xff] %v20322_v8  ;;  %v13344_v5 = vrot.slane %v13336_v33, %v20297_v3  ;;  %v3807_v38 = vrot.slane %v3793_v51, %v20297_v3  ;;  %v3808_v37 = vcombine.high %v3800_v1, %v3800_v1 }
 0x4e8   :  { %v3784_v14 = vrot.slane %v3770_v58, %v20297_v3  ;;  %v3785_v25 = vcombine.high %v3777_v43, %v3777_v43 }
 0x4e9   :  { %v13353_v26 = vcombine.low %v3807_v38, %v3808_v37 }
 0x4ea   :  { %v13306_v30 = vcombine.low %v3777_v43, %v3784_v14  ;;  %v13307_v9 = vcombine.low %v3785_v25, %v3800_v1 }
 0x4eb   :  { %v13363_v25 = vrot.slane %v13353_v26, %v20297_v3 }
 0x4ec   :  { %v13328_v27 = vrot.slane %v13306_v30, %v20297_v3  ;;  %v13335_v15 = vrot.slane %v13307_v9, %v20297_v3 }
 0x4ee   :  { %v13337_v35 = vcombine.low %v13328_v27, %v13335_v15 }
 0x4f0   :  { %v13351_v59 = vrot.slane %v13337_v35, %v20297_v3 }
 0x4f2   :  { %v2976_v42 = vpop.f32.mrf.mxu0  ;;  %v20330_v19 = vcombine.low %v13344_v5, %v13351_v59 }
 0x4f3   :  { %v3815_v21 = vrot.slane %v2976_v42, %v20297_v3 }
 0x4f4   :  { %23448 = vst [vmem:[#allocation37_spill] sm:$0xff] %v20330_v19  ;;  %v17881_v6 = vpop.f32.mrf.mxu0 }
 0x4f5   :  { %v3816_v18 = vcombine.high %v3815_v21, %v3815_v21  ;;  %v3823_v58 = vrot.slane %v3815_v21, %v20297_v3 }
 0x4f6   :  { %v3126_v56 = vpop.f32.mrf.mxu0 }
 0x4f7   :  { %v3830_v47 = vrot.slane %v3816_v18, %v20297_v3 }
 0x4f8   :  { %v17891_v43 = vpop.f32.mrf.mxu0 }
 0x4f9   :  { %v13354_v33 = vcombine.low %v3823_v58, %v3830_v47 }
 0x4fa   :  { %v3276_v14 = vpop.f32.mrf.mxu0 }
 0x4fb   :  { %v13370_v30 = vrot.slane %v13354_v33, %v20297_v3 }
 0x4fc   :  { %v17901_v9 = vpop.f32.mrf.mxu0 }
 0x4fd   :  { %v20338_v27 = vcombine.low %v13363_v25, %v13370_v30 }
 0x4fe   :  { %v3426_v1 = vpop.f32.mrf.mxu0 }
 0x4ff   :  { %v3953_v8 = vrot.slane %v3426_v1, %v20297_v3 }
 0x500   :  { %v17911_v15 = vpop.f32.mrf.mxu0 }
 0x501   :  { %v3954_v4 = vcombine.high %v3953_v8, %v3953_v8 }
 0x502   :  { %v3576_v35 = vpop.f32.mrf.mxu0 }
 0x503   :  { %v3999_v19 = vrot.slane %v3576_v35, %v20297_v3  ;;  %v13393_v35 = vrot.slane %v20338_v27, %v20297_v3 }
 0x504   :  { %v17921_v51 = vpop.f32.mrf.mxu0 }
 0x506   :  { %v4113_v5 = vpop.f32.mrf.mxu0 }
 0x507   :  { %v5287_v59 = vmul.f32 0.17677669, %v4113_v5  ;;  %v3861_v5 = vrot.slane %v3126_v56, %v20297_v3 }
 0x508   :  { %v17931_v42 = vpop.f32.mrf.mxu0 }
 0x509   :  { %v20342_v37 = vsel %vm19734_vm3, %v5287_v59, -1e+30  ;;  %v3907_v59 = vrot.slane %v3276_v14, %v20297_v3  ;;  %v3862_v42 = vcombine.high %v3861_v5, %v3861_v5 }
 0x50a   :  { %v4269_v21 = vpop.f32.mrf.mxu0  ;;  %v5319_v6 = vsel %vm2276_vm4, %v20342_v37, -inf }
 0x50b   :  { %v5289_v18 = vmul.f32 0.17677669, %v4269_v21  ;;  %5320 = vmax.xlane.f32.xlu0 %v5319_v6  ;;  %v3908_v21 = vcombine.high %v3907_v59, %v3907_v59  ;;  %v3915_v14 = vrot.slane %v3907_v59, %v20297_v3  ;;  %v3961_v59 = vrot.slane %v3953_v8, %v20297_v3  ;;  %v20382_v8 = vpop.permute.xlu0 %5649 }
 0x50c   :  { %v17941_v26 = vpop.f32.mrf.mxu0 }
 0x50d   :  { %v20348_v47 = vsel %vm19734_vm3, %v5289_v18, -1e+30  ;;  %v3869_v26 = vrot.slane %v3861_v5, %v20297_v3 }
 0x50e   :  { %v20350_v43 = vpop.f32.mrf.mxu0  ;;  %v5325_v33 = vsel %vm2276_vm4, %v20348_v47, -inf }
 0x50f   :  { %5326 = vmax.xlane.f32.xlu0 %v5325_v33  ;;  %v3876_v33 = vrot.slane %v3862_v42, %v20297_v3  ;;  %v3877_v16 = vcombine.high %v3869_v26, %v3869_v26 }
 0x510   :  { %v17951_v25 = vpop.f32.mrf.mxu0 }
 0x511   :  { %v3922_v25 = vrot.slane %v3908_v21, %v20297_v3  ;;  %v13402_v21 = vcombine.low %v3869_v26, %v3876_v33 }
 0x512   :  { %v20354_v30 = vpop.f32.mrf.mxu0 }
 0x514   :  { %v17961_v9 = vpop.f32.mrf.mxu0 }
 0x515   :  { %v3831_v9 = vcombine.high %v3823_v58, %v3823_v58 }
 0x516   :  { %v20356_v15 = vpop.f32.mrf.mxu0 }
 0x518   :  { %v17971_v51 = vpop.f32.mrf.mxu0 }
 0x52b   :  { %v3051_v6 = vpop.f32.mrf.mxu1 }
 0x52c   :  { %v3838_v18 = vrot.slane %v3051_v6, %v20297_v3 }
 0x52d   :  { %v17886_v40 = vpop.f32.mrf.mxu1 }
 0x52e   :  { %v3839_v51 = vcombine.high %v3838_v18, %v3838_v18  ;;  %v3846_v56 = vrot.slane %v3838_v18, %v20297_v3  ;;  %v13405_v40 = vcombine.low %v3915_v14, %v3922_v25 }
 0x52f   :  { %v3201_v54 = vpop.f32.mrf.mxu1 }
 0x530   :  { %v3853_v6 = vrot.slane %v3839_v51, %v20297_v3  ;;  %v3854_v20 = vcombine.high %v3846_v56, %v3846_v56  ;;  %v13355_v5 = vcombine.low %v3831_v9, %v3846_v56  ;;  %v3884_v42 = vrot.slane %v3201_v54, %v20297_v3 }
 0x531   :  { %v17896_v58 = vpop.f32.mrf.mxu1  ;;  %v4000_v51 = vcombine.high %v3999_v19, %v3999_v19 }
 0x532   :  { %v13356_v1 = vcombine.low %v3853_v6, %v3854_v20  ;;  %v3885_v28 = vcombine.high %v3884_v42, %v3884_v42  ;;  %v3892_v18 = vrot.slane %v3884_v42, %v20297_v3  ;;  %v20371_v60 = vpop.f32.mrf.mxu0  ;;  %v13377_v9 = vrot.slane %v13355_v5, %v20297_v3 }
 0x533   :  { %v3351_v54 = vpop.f32.mrf.mxu1  ;;  %v13412_v6 = vrot.slane %v13402_v21, %v20297_v3  ;;  %v3923_v42 = vcombine.high %v3915_v14, %v3915_v14  ;;  %v13433_v58 = vrot.slane %v13405_v40, %v20297_v3  ;;  %v3968_v5 = vrot.slane %v3954_v4, %v20297_v3 }
 0x534   :  { %v13384_v26 = vrot.slane %v13356_v1, %v20297_v3  ;;  %v3899_v33 = vrot.slane %v3885_v28, %v20297_v3  ;;  %v3900_v25 = vcombine.high %v3892_v18, %v3892_v18  ;;  %v13403_v20 = vcombine.low %v3877_v16, %v3892_v18  ;;  %v17981_v56 = vpop.f32.mrf.mxu0 }
 0x535   :  { %v3930_v27 = vrot.slane %v3351_v54, %v20297_v3  ;;  %v17906_v24 = vpop.f32.mrf.mxu1  ;;  %v3969_v28 = vcombine.high %v3961_v59, %v3961_v59  ;;  %v4014_v16 = vrot.slane %v4000_v51, %v20297_v3  ;;  %v4007_v4 = vrot.slane %v3999_v19, %v20297_v3  ;;  %v20399_v19 = vpop.permute.xlu0 %5726 }
 0x536   :  { %v13386_v10 = vcombine.low %v13377_v9, %v13384_v26  ;;  %v13404_v55 = vcombine.low %v3899_v33, %v3900_v25  ;;  %v13419_v1 = vrot.slane %v13403_v20, %v20297_v3  ;;  %v13453_v20 = vcombine.low %v3961_v59, %v3968_v5 }
 0x537   :  { %v3931_v18 = vcombine.high %v3930_v27, %v3930_v27  ;;  %v3938_v21 = vrot.slane %v3930_v27, %v20297_v3  ;;  %v3501_v14 = vpop.f32.mrf.mxu1 }
 0x538   :  { %v13400_v40 = vrot.slane %v13386_v10, %v20297_v3  ;;  %v13426_v54 = vrot.slane %v13404_v55, %v20297_v3  ;;  %v13434_v24 = vcombine.low %v13412_v6, %v13419_v1  ;;  %v3976_v56 = vrot.slane %v3501_v14, %v20297_v3 }
 0x539   :  { %v3945_v9 = vrot.slane %v3931_v18, %v20297_v3  ;;  %v3946_v26 = vcombine.high %v3938_v21, %v3938_v21  ;;  %v13451_v33 = vcombine.low %v3923_v42, %v3938_v21  ;;  %v17916_v25 = vpop.f32.mrf.mxu1  ;;  %v13501_v10 = vcombine.low %v4007_v4, %v4014_v16 }
 0x53a   :  { %v13435_v51 = vcombine.low %v13426_v54, %v13433_v58  ;;  %v3977_v2 = vcombine.high %v3976_v56, %v3976_v56  ;;  %v3984_v27 = vrot.slane %v3976_v56, %v20297_v3  ;;  %v20394_v32 = vpop.f32.mrf.mxu0  ;;  %v13442_v55 = vrot.slane %v13434_v24, %v20297_v3 }
 0x53b   :  { %v13452_v6 = vcombine.low %v3945_v9, %v3946_v26  ;;  %v3651_v1 = vpop.f32.mrf.mxu1  ;;  %v20397_v14 = vcombine.low %v13393_v35, %v13400_v40  ;;  %v13461_v21 = vrot.slane %v13451_v33, %v20297_v3  ;;  %v13475_v56 = vrot.slane %v13453_v20, %v20297_v3 }
 0x53c   :  { %v13449_v18 = vrot.slane %v13435_v51, %v20297_v3  ;;  %v3991_v42 = vrot.slane %v3977_v2, %v20297_v3  ;;  %v3992_v59 = vcombine.high %v3984_v27, %v3984_v27  ;;  %v13454_v58 = vcombine.low %v3969_v28, %v3984_v27  ;;  %v17991_v5 = vpop.f32.mrf.mxu0 }
 0x53d   :  { %23450 = vst [vmem:[#allocation38_spill] sm:$0xff] %v20397_v14  ;;  %v13468_v54 = vrot.slane %v13452_v6, %v20297_v3  ;;  %v4022_v16 = vrot.slane %v3651_v1, %v20297_v3  ;;  %v17926_v24 = vpop.f32.mrf.mxu1  ;;  %v4015_v26 = vcombine.high %v4007_v4, %v4007_v4  ;;  %v13517_v33 = vrot.slane %v13501_v10, %v20297_v3 }
 0x53e   :  { %v13482_v35 = vrot.slane %v13454_v58, %v20297_v3  ;;  %v13500_v40 = vcombine.low %v3991_v42, %v3992_v59  ;;  %v20408_v9 = vcombine.low %v13442_v55, %v13449_v18  ;;  %v20414_v42 = vpop.permute.xlu0 %5803 }
 0x53f   :  { %v13483_v25 = vcombine.low %v13461_v21, %v13468_v54  ;;  %v4023_v2 = vcombine.high %v4022_v16, %v4022_v16  ;;  %v4030_v28 = vrot.slane %v4022_v16, %v20297_v3  ;;  %v4191_v51 = vpop.f32.mrf.mxu1 }
 0x540   :  { %23451 = vst [vmem:[#allocation39_spill] sm:$0xff] %v20408_v9  ;;  %v13484_v27 = vcombine.low %v13475_v56, %v13482_v35  ;;  %v13510_v6 = vrot.slane %v13500_v40, %v20297_v3  ;;  %v5288_v1 = vmul.f32 0.17677669, %v4191_v51  ;;  %v5291_v56 = vmul.f32 0.17677669, %v20350_v43 }
 0x541   :  { %v4037_v5 = vrot.slane %v4023_v2, %v20297_v3  ;;  %v4038_v20 = vcombine.high %v4030_v28, %v4030_v28  ;;  %v13502_v24 = vcombine.low %v4015_v26, %v4030_v28  ;;  %v17936_v58 = vpop.f32.mrf.mxu1  ;;  %v13491_v4 = vrot.slane %v13483_v25, %v20297_v3 }
 0x542   :  { %v13498_v55 = vrot.slane %v13484_v27, %v20297_v3  ;;  %v13532_v18 = vcombine.low %v13510_v6, %v13517_v33  ;;  %v20418_v59 = vpop.f32.mrf.mxu0  ;;  %v20422_v10 = vsel %vm19734_vm3, %v5288_v1, -1e+30  ;;  %v20437_v43 = vpop.permute.xlu0 %5880  ;;  %v20441_v1 = vsel %vm19734_vm3, %v5291_v56, -1e+30 }
 0x543   :  { %v13503_v21 = vcombine.low %v4037_v5, %v4038_v20  ;;  %v4347_v54 = vpop.f32.mrf.mxu1  ;;  %v5322_v16 = vsel %vm2276_vm4, %v20422_v10, -inf  ;;  %v13524_v25 = vrot.slane %v13502_v24, %v20297_v3  ;;  %v5293_v5 = vmul.f32 0.17677669, %v20354_v30 }
 0x544   :  { %v5290_v35 = vmul.f32 0.17677669, %v4347_v54  ;;  %v18001_v40 = vpop.f32.mrf.mxu0  ;;  %5323 = vmax.xlane.f32.xlu1 %v5322_v16  ;;  %v20427_v26 = vcombine.low %v13491_v4, %v13498_v55  ;;  %v13540_v24 = vrot.slane %v13532_v18, %v20297_v3  ;;  %v5331_v54 = vsel %vm2276_vm4, %v20441_v1, -inf }
 0x545   :  { %v13531_v2 = vrot.slane %v13503_v21, %v20297_v3  ;;  %v17946_v28 = vpop.f32.mrf.mxu1  ;;  %v20458_v30 = vsel %vm19734_vm3, %v5293_v5, -1e+30  ;;  %v5295_v18 = vmul.f32 0.17677669, %v20356_v15 }
 0x546   :  { %23452 = vst [vmem:[#allocation40_spill] sm:$0xff] %v20427_v26  ;;  %v20433_v51 = vsel %vm19734_vm3, %v5290_v35, -1e+30 }
 0x547   :  { %v13533_v33 = vcombine.low %v13524_v25, %v13531_v2  ;;  %v4503_v27 = vpop.f32.mrf.mxu1  ;;  %v5328_v6 = vsel %vm2276_vm4, %v20433_v51, -inf  ;;  %v20461_v25 = vpop.permute.xlu0 %5957  ;;  %v20473_v15 = vsel %vm19734_vm3, %v5295_v18, -1e+30 }
 0x548   :  { %v5292_v20 = vmul.f32 0.17677669, %v4503_v27  ;;  %5329 = vmax.xlane.f32.xlu0 %v5328_v6  ;;  %v5297_v6 = vmul.f32 0.17677669, %v20371_v60 }
 0x549   :  { %v13547_v58 = vrot.slane %v13533_v33, %v20297_v3  ;;  %v17956_v4 = vpop.f32.mrf.mxu1  ;;  %v5337_v33 = vsel %vm2276_vm4, %v20458_v30, -inf }
 0x54a   :  { %v20448_v55 = vsel %vm19734_vm3, %v5292_v20, -1e+30  ;;  %v5343_v4 = vsel %vm2276_vm4, %v20473_v15, -inf  ;;  %v20488_v60 = vsel %vm19734_vm3, %v5297_v6, -1e+30 }
 0x54b   :  { %v4659_v21 = vpop.f32.mrf.mxu1  ;;  %v5334_v16 = vsel %vm2276_vm4, %v20448_v55, -inf  ;;  %v20454_v56 = vcombine.low %v13540_v24, %v13547_v58 }
 0x54c   :  { %v5294_v35 = vmul.f32 0.17677669, %v4659_v21  ;;  %5332 = vmax.xlane.f32.xlu0 %v5331_v54  ;;  %5335 = vmax.xlane.f32.xlu1 %v5334_v16  ;;  %v20484_v54 = vpop.permute.xlu0 %6034  ;;  %v5299_v16 = vmul.f32 0.17677669, %v20394_v32  ;;  %v5301_v32 = vmul.f32 0.17677669, %v20418_v59 }
 0x54d   :  { %23453 = vst [vmem:[#allocation41_spill] sm:$0xff] %v20454_v56  ;;  %v17966_v40 = vpop.f32.mrf.mxu1 }
 0x54e   :  { %v20465_v2 = vsel %vm19734_vm3, %v5294_v35, -1e+30  ;;  %v20501_v6 = vsel %vm19734_vm3, %v5299_v16, -1e+30  ;;  %v20516_v59 = vsel %vm19734_vm3, %v5301_v32, -1e+30 }
 0x54f   :  { %v4815_v28 = vpop.f32.mrf.mxu1  ;;  %v5340_v27 = vsel %vm2276_vm4, %v20465_v2, -inf }
 0x550   :  { %v5296_v5 = vmul.f32 0.17677669, %v4815_v28  ;;  %5338 = vmax.xlane.f32.xlu0 %v5337_v33  ;;  %5341 = vmax.xlane.f32.xlu1 %v5340_v27  ;;  %v5349_v33 = vsel %vm2276_vm4, %v20488_v60, -inf }
 0x551   :  { %v17976_v20 = vpop.f32.mrf.mxu1 }
 0x552   :  { %v20478_v24 = vsel %vm19734_vm3, %v5296_v5, -1e+30 }
 0x553   :  { %v4971_v58 = vpop.f32.mrf.mxu1  ;;  %v5346_v21 = vsel %vm2276_vm4, %v20478_v24, -inf }
 0x554   :  { %v5298_v18 = vmul.f32 0.17677669, %v4971_v58  ;;  %5344 = vmax.xlane.f32.xlu0 %v5343_v4  ;;  %5347 = vmax.xlane.f32.xlu1 %v5346_v21  ;;  %v20504_v58 = vpop.permute.xlu0 %6111 }
 0x555   :  { %v17986_v35 = vpop.f32.mrf.mxu1 }
 0x556   :  { %v20493_v40 = vsel %vm19734_vm3, %v5298_v18, -1e+30  ;;  %v5355_v18 = vsel %vm2276_vm4, %v20501_v6, -inf }
 0x557   :  { %v5127_v28 = vpop.f32.mrf.mxu1  ;;  %v5352_v27 = vsel %vm2276_vm4, %v20493_v40, -inf }
 0x558   :  { %v5300_v5 = vmul.f32 0.17677669, %v5127_v28  ;;  %5350 = vmax.xlane.f32.xlu0 %v5349_v33  ;;  %5353 = vmax.xlane.f32.xlu1 %v5352_v27  ;;  %v5361_v28 = vsel %vm2276_vm4, %v20516_v59, -inf  ;;  %v20520_v33 = vpop.permute.xlu0 %6188 }
 0x559   :  { %v17996_v20 = vpop.f32.mrf.mxu1 }
 0x55a   :  { %v20508_v4 = vsel %vm19734_vm3, %v5300_v5, -1e+30 }
 0x55b   :  { %v5283_v21 = vpop.f32.mrf.mxu1  ;;  %v5358_v16 = vsel %vm2276_vm4, %v20508_v4, -inf }
 0x55c   :  { %5356 = vmax.xlane.f32.xlu0 %v5355_v18  ;;  %5359 = vmax.xlane.f32.xlu1 %v5358_v16  ;;  %v20522_v27 = vpop.permute.xlu0 %6265  ;;  %v5302_v26 = vmul.f32 0.17677669, %v5283_v21 }
 0x55d   :  { %v18006_v35 = vpop.f32.mrf.mxu1 }
 0x55e   :  { %v20552_v14 = vsel %vm19734_vm3, %v5302_v26, -1e+30 }
 0x560   :  { %5362 = vmax.xlane.f32.xlu0 %v5361_v28  ;;  %v20524_v5 = vpop.permute.xlu0 %6419 }
 0x564   :  { %v20530_v32 = vpop.permute.xlu0 %6496 }
 0x568   :  { %v20536_v20 = vpop.permute.xlu0 %6573 }
 0x569   :  { %23454 = vst [vmem:[#allocation42_spill] sm:$0xff] %v20536_v20 }
 0x56c   :  { %v20540_v18 = vpop.permute.xlu0 %6650 }
 0x56d   :  { %7425 = vrot.lane.b32.xlu1 %v19539_v12, %s18910_s18  ;;  %23455 = vst [vmem:[#allocation43_spill] sm:$0xff] %v20540_v18 }
 0x570   :  { %v20544_v16 = vpop.permute.xlu0 %7113 }
 0x571   :  { %7503 = vrot.lane.b32.xlu1 %v19563_v41, %s18910_s18  ;;  %23456 = vst [vmem:[#allocation44_spill] sm:$0xff] %v20544_v16 }
 0x574   :  { %v20546_v35 = vpop.permute.xlu0 %7111 }
 0x575   :  { %7581 = vrot.lane.b32.xlu1 %v19586_v0, %s18910_s18  ;;  %23457 = vst [vmem:[#allocation45_spill] sm:$0xff] %v20546_v35 }
 0x576   :  { %7267 = vrot.lane.b32.xlu0 %v19506_v29, %s18910_s18 }
 0x578   :  { %v20548_v28 = vpop.permute.xlu0 %7189 }
 0x579   :  { %23458 = vst [vmem:[#allocation46_spill] sm:$0xff] %v20548_v28 }
 0x57a   :  { %7345 = vrot.lane.b32.xlu0 %v19531_v31, %s18910_s18  ;;  %v5364_v31 = vsel %vm2276_vm4, %v20552_v14, -inf }
 0x57e   :  { %7423 = vrot.lane.b32.xlu0 %v19554_v36, %s18910_s18 }
 0x594   :  { %v5321_v56 = vpop.xlane.xlu0 %5320 }
 0x595   :  { %v5367_v9 = vsub.f32 %v20342_v37, %v5321_v56 }
 0x597   :  { %v5383_v0 = vmul.f32 1.442695, %v5367_v9  ;;  %v20566_v9 = vpop.permute.xlu1 %6342 }
 0x598   :  { %v5327_v41 = vpop.xlane.xlu0 %5326 }
 0x599   :  { %18621 = vpow2.f32 %v5383_v0  ;;  %v5369_v36 = vsub.f32 %v20348_v47, %v5327_v41  ;;  %5365 = vmax.xlane.f32.xlu1 %v5364_v31 }
 0x59b   :  { %v5387_v3 = vmul.f32 1.442695, %v5369_v36  ;;  %v20568_v0 = vpop.permute.xlu1 %7191 }
 0x59c   :  { %23459 = vst [vmem:[#allocation47_spill] sm:$0xff] %v20568_v0 }
 0x59d   :  { %18623 = vpow2.f32 %v5387_v3 }
 0x59f   :  { %v20570_v41 = vpop.permute.xlu1 %7269 }
 0x5a0   :  { %23460 = vst [vmem:[#allocation48_spill] sm:$0xff] %v20570_v41 }
 0x5a3   :  { %v20572_v31 = vpop.permute.xlu1 %7347 }
 0x5a4   :  { %23461 = vst [vmem:[#allocation49_spill] sm:$0xff] %v20572_v31 }
 0x5a6   :  { %v20558_v28 = vpop.eup %18621 }
 0x5a7   :  { %v5415_v21 = vsel %vm2276_vm4, %v20558_v28, 0.0 }
 0x5a8   :  { %5416 = vadd.xlane.f32.xlu0 %v5415_v21 }
 0x5aa   :  { %v20562_v26 = vpop.eup %18623 }
 0x5ab   :  { %v5421_v37 = vsel %vm2276_vm4, %v20562_v26, 0.0 }
 0x5ac   :  { %5422 = vadd.xlane.f32.xlu0 %v5421_v37 }
 0x5cd   :  { %v5324_v36 = vpop.xlane.xlu1 %5323 }
 0x5ce   :  { %v5368_v3 = vsub.f32 %v20422_v10, %v5324_v36 }
 0x5d0   :  { %v5385_v47 = vmul.f32 1.442695, %v5368_v3 }
 0x5d1   :  { %v5330_v56 = vpop.xlane.xlu0 %5329 }
 0x5d2   :  { %18625 = vpow2.f32 %v5385_v47  ;;  %v5370_v21 = vsub.f32 %v20433_v51, %v5330_v56 }
 0x5d4   :  { %v5389_v38 = vmul.f32 1.442695, %v5370_v21 }
 0x5d5   :  { %v5333_v35 = vpop.xlane.xlu0 %5332  ;;  %v5336_v16 = vpop.xlane.xlu1 %5335 }
 0x5d6   :  { %18627 = vpow2.f32 %v5389_v38  ;;  %v5371_v37 = vsub.f32 %v20441_v1, %v5333_v35  ;;  %v5372_v0 = vsub.f32 %v20448_v55, %v5336_v16 }
 0x5d8   :  { %v5391_v18 = vmul.f32 1.442695, %v5371_v37  ;;  %v5393_v41 = vmul.f32 1.442695, %v5372_v0 }
 0x5d9   :  { %v5339_v20 = vpop.xlane.xlu0 %5338  ;;  %v5342_v31 = vpop.xlane.xlu1 %5341 }
 0x5da   :  { %18629 = vpow2.f32 %v5391_v18  ;;  %v5373_v10 = vsub.f32 %v20458_v30, %v5339_v20  ;;  %v5374_v36 = vsub.f32 %v20465_v2, %v5342_v31 }
 0x5db   :  { %18631 = vpow2.f32 %v5393_v41 }
 0x5dc   :  { %v5395_v3 = vmul.f32 1.442695, %v5373_v10  ;;  %v5397_v51 = vmul.f32 1.442695, %v5374_v36 }
 0x5dd   :  { %v5345_v47 = vpop.xlane.xlu0 %5344  ;;  %v5348_v56 = vpop.xlane.xlu1 %5347 }
 0x5de   :  { %18633 = vpow2.f32 %v5395_v3  ;;  %v5375_v38 = vsub.f32 %v20473_v15, %v5345_v47  ;;  %v5376_v1 = vsub.f32 %v20478_v24, %v5348_v56 }
 0x5df   :  { %v20582_v55 = vpop.eup %18625  ;;  %18635 = vpow2.f32 %v5397_v51 }
 0x5e0   :  { %v5399_v16 = vmul.f32 1.442695, %v5375_v38  ;;  %v5401_v35 = vmul.f32 1.442695, %v5376_v1  ;;  %v5418_v30 = vsel %vm2276_vm4, %v20582_v55, 0.0 }
 0x5e1   :  { %v5351_v20 = vpop.xlane.xlu0 %5350  ;;  %v5354_v2 = vpop.xlane.xlu1 %5353  ;;  %5419 = vadd.xlane.f32.xlu1 %v5418_v30 }
 0x5e2   :  { %18637 = vpow2.f32 %v5399_v16  ;;  %v5377_v18 = vsub.f32 %v20488_v60, %v5351_v20  ;;  %v5378_v0 = vsub.f32 %v20493_v40, %v5354_v2 }
 0x5e3   :  { %v20588_v41 = vpop.eup %18627  ;;  %18639 = vpow2.f32 %v5401_v35 }
 0x5e4   :  { %v5403_v15 = vmul.f32 1.442695, %v5377_v18  ;;  %v5405_v24 = vmul.f32 1.442695, %v5378_v0  ;;  %v5424_v31 = vsel %vm2276_vm4, %v20588_v41, 0.0 }
 0x5e5   :  { %v5357_v21 = vpop.xlane.xlu0 %5356  ;;  %5425 = vadd.xlane.f32.xlu1 %v5424_v31 }
 0x5e6   :  { %18641 = vpow2.f32 %v5403_v15  ;;  %v5379_v37 = vsub.f32 %v20501_v6, %v5357_v21 }
 0x5e7   :  { %v20593_v10 = vpop.eup %18629  ;;  %18643 = vpow2.f32 %v5405_v24  ;;  %v5360_v24 = vpop.xlane.xlu1 %5359 }
 0x5e8   :  { %v20595_v36 = vpop.eup %18631  ;;  %v5407_v60 = vmul.f32 1.442695, %v5379_v37  ;;  %v5427_v40 = vsel %vm2276_vm4, %v20593_v10, 0.0  ;;  %v5380_v37 = vsub.f32 %v20508_v4, %v5360_v24 }
 0x5e9   :  { %5428 = vadd.xlane.f32.xlu0 %v5427_v40  ;;  %v5430_v3 = vsel %vm2276_vm4, %v20595_v36, 0.0 }
 0x5ea   :  { %18645 = vpow2.f32 %v5407_v60  ;;  %5431 = vadd.xlane.f32.xlu1 %v5430_v3  ;;  %v5363_v60 = vpop.xlane.xlu0 %5362  ;;  %v5409_v40 = vmul.f32 1.442695, %v5380_v37 }
 0x5eb   :  { %v20601_v51 = vpop.eup %18633  ;;  %v20637_v31 = vpop.permute.xlu1 %7425  ;;  %v5381_v3 = vsub.f32 %v20516_v59, %v5363_v60 }
 0x5ec   :  { %v20603_v47 = vpop.eup %18635  ;;  %v5433_v6 = vsel %vm2276_vm4, %v20601_v51, 0.0  ;;  %18647 = vpow2.f32 %v5409_v40 }
 0x5ed   :  { %5434 = vadd.xlane.f32.xlu0 %v5433_v6  ;;  %v5436_v56 = vsel %vm2276_vm4, %v20603_v47, 0.0 }
 0x5ee   :  { %5437 = vadd.xlane.f32.xlu1 %v5436_v56  ;;  %v20653_v56 = vpop.permute.xlu0 %7267 }
 0x5ef   :  { %v20609_v38 = vpop.eup %18637  ;;  %v20643_v21 = vpop.permute.xlu1 %7503 }
 0x5f0   :  { %v20611_v1 = vpop.eup %18639  ;;  %v5439_v16 = vsel %vm2276_vm4, %v20609_v38, 0.0 }
 0x5f1   :  { %5440 = vadd.xlane.f32.xlu0 %v5439_v16  ;;  %v5442_v35 = vsel %vm2276_vm4, %v20611_v1, 0.0  ;;  %v5411_v16 = vmul.f32 1.442695, %v5381_v3 }
 0x5f2   :  { %5443 = vadd.xlane.f32.xlu1 %v5442_v35 }
 0x5f3   :  { %v20617_v30 = vpop.eup %18641  ;;  %v20649_v6 = vpop.permute.xlu1 %7581  ;;  %18649 = vpow2.f32 %v5411_v16 }
 0x5f4   :  { %v20619_v20 = vpop.eup %18643  ;;  %v5445_v2 = vsel %vm2276_vm4, %v20617_v30, 0.0 }
 0x5f5   :  { %5446 = vadd.xlane.f32.xlu0 %v5445_v2  ;;  %v5448_v18 = vsel %vm2276_vm4, %v20619_v20, 0.0 }
 0x5f6   :  { %5449 = vadd.xlane.f32.xlu1 %v5448_v18  ;;  %v20658_v18 = vpop.permute.xlu0 %7345 }
 0x5f7   :  { %v20625_v0 = vpop.eup %18645 }
 0x5f8   :  { %v5451_v15 = vsel %vm2276_vm4, %v20625_v0, 0.0 }
 0x5f9   :  { %5452 = vadd.xlane.f32.xlu0 %v5451_v15  ;;  %v20666_v15 = vpop.eup %18647 }
 0x5fa   :  { %v20664_v59 = vpop.permute.xlu0 %7423  ;;  %v5454_v24 = vsel %vm2276_vm4, %v20666_v15, 0.0 }
 0x600   :  { %v20672_v37 = vpop.eup %18649 }
 0x601   :  { %v5457_v40 = vsel %vm2276_vm4, %v20672_v37, 0.0 }
 0x607   :  { %7659 = vrot.lane.b32.xlu1 %v19618_v52, %s18910_s18 }
 0x60b   :  { %7737 = vrot.lane.b32.xlu1 %v19495_v17, %s18910_s18 }
 0x60f   :  { %7815 = vrot.lane.b32.xlu1 %v19641_v62, %s18910_s18  ;;  %7501 = vrot.lane.b32.xlu0 %v19579_v63, %s18910_s18 }
 0x613   :  { %7579 = vrot.lane.b32.xlu0 %v19604_v50, %s18910_s18 }
 0x617   :  { %7657 = vrot.lane.b32.xlu0 %v19627_v53, %s18910_s18 }
 0x61b   :  { %7735 = vrot.lane.b32.xlu0 %v19515_v46, %s18910_s18 }
 0x61f   :  { %7813 = vrot.lane.b32.xlu0 %v19656_v48, %s18910_s18 }
 0x622   :  { %v5366_v35 = vpop.xlane.xlu1 %5365 }
 0x623   :  { %v5382_v2 = vsub.f32 %v20552_v14, %v5366_v35  ;;  %7891 = vrot.lane.b32.xlu0 %v19542_v13, %s18910_s18 }
 0x625   :  { %v5413_v4 = vmul.f32 1.442695, %v5382_v2 }
 0x627   :  { %7969 = vrot.lane.b32.xlu0 %v19675_v57, %s18910_s18  ;;  %18651 = vpow2.f32 %v5413_v4 }
 0x62b   :  { %8047 = vrot.lane.b32.xlu0 %v19592_v49, %s18910_s18 }
 0x62f   :  { %8125 = vrot.lane.b32.xlu0 %v19700_v11, %s18910_s18 }
 0x631   :  { %v5417_v14 = vpop.xlane.xlu0 %5416 }
 0x632   :  { %18653 = vrcp.f32 %v5417_v14 }
 0x633   :  { %5455 = vadd.xlane.f32.xlu1 %v5454_v24  ;;  %8203 = vrot.lane.b32.xlu0 %v19611_v44, %s18910_s18  ;;  %v23466_v24 = vld [vmem:[#allocation13_spill] sm:$0xff] }
 0x634   :  { %v20678_v3 = vpop.eup %18651 }
 0x635   :  { %v5423_v60 = vpop.xlane.xlu0 %5422  ;;  %v5460_v16 = vsel %vm2276_vm4, %v20678_v3, 0.0 }
 0x636   :  { %18655 = vrcp.f32 %v5423_v60  ;;  %v23467_v60 = vld [vmem:[#allocation21_spill] sm:$0xff] }
 0x637   :  { %5458 = vadd.xlane.f32.xlu1 %v5457_v40  ;;  %8644 = vrot.lane.b32.xlu0 %v23434_v34, %s18910_s18  ;;  %v23468_v40 = vld [vmem:[#allocation20_spill] sm:$0xff] }
 0x63b   :  { %5461 = vadd.xlane.f32.xlu1 %v5460_v16  ;;  %8721 = vrot.lane.b32.xlu0 %v19648_v7, %s18910_s18  ;;  %v23469_v16 = vld [vmem:[#allocation25_spill] sm:$0xff] }
 0x63f   :  { %v18654_v35 = vpop.eup %18653  ;;  %8798 = vrot.lane.b32.xlu0 %v19980_v39, %s18910_s18 }
 0x640   :  { %v5464_v2 = vmul.f32 %v18654_v35, %v20558_v28  ;;  %v23462_v28 = vld [vmem:[#allocation28_spill] sm:$0xff]  ;;  %v23470_v35 = vld [vmem:[#allocation15_spill] sm:$0xff] }
 0x642   :  { %18010 = vmatmul.mubr.msk.f32.vlgmr.msra.gmra.mxu0 %vm2453_vm5, %v5464_v2  ;;  %v23471_v2 = vld [vmem:[#allocation32_spill] sm:$0xff] }
 0x643   :  { %v18656_v4 = vpop.eup %18655  ;;  %18018 = vmatpush3.msk.msra.mxu0 %vm2457_vm2, %v20382_v8  ;;  %8875 = vrot.lane.b32.xlu0 %v19986_v23, %s18910_s18  ;;  %v23463_v8 = vld [vmem:[#allocation9_spill] sm:$0xff] }
 0x644   :  { %18019 = vmatprep.mubr.msk.f32.mxu0 %vm18908_vm0, %v23435_v45  ;;  %18027 = vmatprep.subr.mxu0 %v23435_v45  ;;  %v5468_v14 = vmul.f32 %v18656_v4, %v20562_v26  ;;  %v23464_v26 = vld [vmem:[#allocation18_spill] sm:$0xff] }
 0x645   :  { %v23472_v4 = vld [vmem:[#allocation22_spill] sm:$0xff] }
 0x646   :  { %18020 = vmatmul.mubr.msk.f32.vlgmr.msra.gmra.mxu0 %vm2453_vm5, %v5468_v14  ;;  %v23473_v14 = vld [vmem:[#allocation33_spill] sm:$0xff] }
 0x647   :  { %18028 = vmatpush3.msk.msra.mxu0 %vm2457_vm2, %v20414_v42  ;;  %8952 = vrot.lane.b32.xlu0 %v23462_v28, %s18910_s18  ;;  %v23465_v42 = vld [vmem:[#allocation30_spill] sm:$0xff] }
 0x648   :  { %18029 = vmatprep.mubr.msk.f32.mxu0 %vm18908_vm0, %v23435_v45  ;;  %18037 = vmatprep.subr.mxu0 %v23435_v45 }
 0x64b   :  { %9029 = vrot.lane.b32.xlu0 %v19669_v22, %s18910_s18  ;;  %v23480_v22 = vld [vmem:[#allocation23_spill] sm:$0xff] }
 0x64c   :  { %7893 = vrot.lane.b32.xlu1 %v23463_v8, %s18910_s18 }
 0x64f   :  { %9106 = vrot.lane.b32.xlu0 %v20006_v61, %s18910_s18  ;;  %v23475_v61 = vld [vmem:[#allocation34_spill] sm:$0xff] }
 0x650   :  { %7971 = vrot.lane.b32.xlu1 %v23464_v26, %s18910_s18 }
 0x653   :  { %9183 = vrot.lane.b32.xlu0 %v23465_v42, %s18910_s18  ;;  %v23478_v42 = vld [vmem:[#allocation31_spill] sm:$0xff] }
 0x654   :  { %8049 = vrot.lane.b32.xlu1 %v23466_v24, %s18910_s18 }
 0x657   :  { %9337 = vrot.lane.b32.xlu0 %v23467_v60, %s18910_s18  ;;  %v23474_v60 = vld [vmem:[#allocation24_spill] sm:$0xff] }
 0x658   :  { %8127 = vrot.lane.b32.xlu1 %v23468_v40, %s18910_s18 }
 0x65b   :  { %9414 = vrot.lane.b32.xlu0 %v23469_v16, %s18910_s18  ;;  %v23476_v16 = vld [vmem:[#allocation17_spill] sm:$0xff] }
 0x65c   :  { %8205 = vrot.lane.b32.xlu1 %v23470_v35, %s18910_s18 }
 0x65f   :  { %9491 = vrot.lane.b32.xlu0 %v23471_v2, %s18910_s18  ;;  %v23477_v2 = vld [vmem:[#allocation5_spill] sm:$0xff] }
 0x660   :  { %8283 = vrot.lane.b32.xlu1 %v23472_v4, %s18910_s18 }
 0x663   :  { %9568 = vrot.lane.b32.xlu0 %v23473_v14, %s18910_s18  ;;  %v23479_v14 = vld [vmem:[#allocation7_spill] sm:$0xff] }
 0x664   :  { %8281 = vrot.lane.b32.xlu1 %v23474_v60, %s18910_s18 }
 0x667   :  { %9722 = vrot.lane.b32.xlu0 %v23475_v61, %s18910_s18 }
 0x668   :  { %8567 = vrot.lane.b32.xlu1 %v23476_v16, %s18910_s18 }
 0x66a   :  { %v5420_v28 = vpop.xlane.xlu1 %5419 }
 0x66b   :  { %18657 = vrcp.f32 %v5420_v28  ;;  %10263 = vrot.lane.b32.xlu0 %v23477_v2, %s18912_s1  ;;  %v23481_v28 = vld [vmem:[#allocation8_spill] sm:$0xff]  ;;  %v23482_v2 = vld [vmem:[#allocation3_spill] sm:$0xff] }
 0x66c   :  { %9260 = vrot.lane.b32.xlu1 %v23478_v42, %s18910_s18 }
 0x66e   :  { %v5426_v7 = vpop.xlane.xlu1 %5425 }
 0x66f   :  { %18659 = vrcp.f32 %v5426_v7  ;;  %10341 = vrot.lane.b32.xlu0 %v23479_v14, %s18912_s1  ;;  %v23483_v14 = vld [vmem:[#allocation4_spill] sm:$0xff] }
 0x670   :  { %9645 = vrot.lane.b32.xlu1 %v23480_v22, %s18910_s18 }
 0x672   :  { %v5429_v61 = vpop.xlane.xlu0 %5428 }
 0x673   :  { %18661 = vrcp.f32 %v5429_v61  ;;  %v5432_v16 = vpop.xlane.xlu1 %5431  ;;  %10419 = vrot.lane.b32.xlu0 %v23481_v28, %s18912_s1 }
 0x674   :  { %18663 = vrcp.f32 %v5432_v16  ;;  %10185 = vrot.lane.b32.xlu1 %v23482_v2, %s18912_s1 }
 0x676   :  { %v5435_v23 = vpop.xlane.xlu0 %5434 }
 0x677   :  { %18665 = vrcp.f32 %v5435_v23  ;;  %v5438_v42 = vpop.xlane.xlu1 %5437  ;;  %10497 = vrot.lane.b32.xlu0 %v19539_v12, %s18912_s1  ;;  %v23484_v23 = vld [vmem:[#allocation6_spill] sm:$0xff] }
 0x678   :  { %v18658_v7 = vpop.eup %18657  ;;  %18667 = vrcp.f32 %v5438_v42  ;;  %10183 = vrot.lane.b32.xlu1 %v23483_v14, %s18912_s1 }
 0x679   :  { %v5466_v61 = vmul.f32 %v18658_v7, %v20582_v55 }
 0x67a   :  { %v5441_v22 = vpop.xlane.xlu0 %5440 }
 0x67b   :  { %18669 = vrcp.f32 %v5441_v22  ;;  %v5444_v28 = vpop.xlane.xlu1 %5443  ;;  %18015 = vmatmul.mubr.msk.f32.vlgmr.msra.gmra.mxu1 %vm2453_vm5, %v5466_v61 }
 0x67c   :  { %v18660_v16 = vpop.eup %18659  ;;  %18671 = vrcp.f32 %v5444_v28  ;;  %10261 = vrot.lane.b32.xlu1 %v23484_v23, %s18912_s1  ;;  %18023 = vmatpush3.msk.msra.mxu1 %vm2457_vm2, %v20399_v19 }
 0x67d   :  { %18024 = vmatprep.mubr.msk.f32.mxu1 %vm18908_vm0, %v23435_v45  ;;  %18032 = vmatprep.subr.mxu1 %v23435_v45  ;;  %v5470_v12 = vmul.f32 %v18660_v16, %v20588_v41 }
 0x67e   :  { %v5447_v55 = vpop.xlane.xlu0 %5446 }
 0x67f   :  { %18673 = vrcp.f32 %v5447_v55  ;;  %v5450_v22 = vpop.xlane.xlu1 %5449  ;;  %18025 = vmatmul.mubr.msk.f32.vlgmr.msra.gmra.mxu1 %vm2453_vm5, %v5470_v12 }
 0x680   :  { %v18662_v42 = vpop.eup %18661  ;;  %18675 = vrcp.f32 %v5450_v22  ;;  %10339 = vrot.lane.b32.xlu1 %v19506_v29, %s18912_s1  ;;  %18033 = vmatpush3.msk.msra.mxu1 %vm2457_vm2, %v20437_v43 }
 0x681   :  { %v18664_v19 = vpop.eup %18663  ;;  %18034 = vmatprep.mubr.msk.f32.mxu1 %vm18908_vm0, %v23435_v45  ;;  %18042 = vmatprep.subr.mxu1 %v23435_v45  ;;  %v5472_v41 = vmul.f32 %v18662_v42, %v20593_v10 }
 0x682   :  { %v5453_v2 = vpop.xlane.xlu0 %5452  ;;  %v5474_v7 = vmul.f32 %v18664_v19, %v20595_v36 }
 0x683   :  { %18677 = vrcp.f32 %v5453_v2  ;;  %18030 = vmatmul.mubr.msk.f32.vlgmr.msra.gmra.mxu0 %vm2453_vm5, %v5472_v41  ;;  %v23486_v2 = vld [vmem:[#allocation43_spill] sm:$0xff] }
 0x684   :  { %v18666_v14 = vpop.eup %18665  ;;  %18035 = vmatmul.mubr.msk.f32.vlgmr.msra.gmra.mxu1 %vm2453_vm5, %v5474_v7  ;;  %18038 = vmatpush3.msk.msra.mxu0 %vm2457_vm2, %v20461_v25 }
 0x685   :  { %v18668_v29 = vpop.eup %18667  ;;  %18043 = vmatpush3.msk.msra.mxu1 %vm2457_vm2, %v20484_v54  ;;  %18039 = vmatprep.mubr.msk.f32.mxu0 %vm18908_vm0, %v23435_v45  ;;  %v5476_v43 = vmul.f32 %v18666_v14, %v20601_v51 }
 0x686   :  { %18047 = vmatprep.subr.mxu0 %v23435_v45  ;;  %18044 = vmatprep.mubr.msk.f32.mxu1 %vm18908_vm0, %v23435_v45  ;;  %v5478_v10 = vmul.f32 %v18668_v29, %v20603_v47 }
 0x687   :  { %18052 = vmatprep.subr.mxu1 %v23435_v45  ;;  %18040 = vmatmul.mubr.msk.f32.vlgmr.msra.gmra.mxu0 %vm2453_vm5, %v5476_v43 }
 0x688   :  { %v18670_v25 = vpop.eup %18669  ;;  %18045 = vmatmul.mubr.msk.f32.vlgmr.msra.gmra.mxu1 %vm2453_vm5, %v5478_v10  ;;  %18048 = vmatpush3.msk.msra.mxu0 %vm2457_vm2, %v20504_v58 }
 0x689   :  { %v18672_v54 = vpop.eup %18671  ;;  %18053 = vmatpush3.msk.msra.mxu1 %vm2457_vm2, %v20520_v33  ;;  %18049 = vmatprep.mubr.msk.f32.mxu0 %vm18908_vm0, %v23435_v45  ;;  %v5480_v36 = vmul.f32 %v18670_v25, %v20609_v38  ;;  %v23489_v25 = vld [vmem:[#allocation47_spill] sm:$0xff] }
 0x68a   :  { %18057 = vmatprep.subr.mxu0 %v23435_v45  ;;  %18054 = vmatprep.mubr.msk.f32.mxu1 %vm18908_vm0, %v23435_v45  ;;  %v5482_v51 = vmul.f32 %v18672_v54, %v20611_v1  ;;  %v23485_v1 = vld [vmem:[#allocation42_spill] sm:$0xff]  ;;  %v23490_v54 = vld [vmem:[#allocation48_spill] sm:$0xff] }
 0x68b   :  { %18062 = vmatprep.subr.mxu1 %v23435_v45  ;;  %18050 = vmatmul.mubr.msk.f32.vlgmr.msra.gmra.mxu0 %vm2453_vm5, %v5480_v36 }
 0x68c   :  { %v18674_v58 = vpop.eup %18673  ;;  %18055 = vmatmul.mubr.msk.f32.vlgmr.msra.gmra.mxu1 %vm2453_vm5, %v5482_v51  ;;  %18058 = vmatpush3.msk.msra.mxu0 %vm2457_vm2, %v20522_v27  ;;  %v23491_v51 = vld [vmem:[#allocation46_spill] sm:$0xff] }
 0x68d   :  { %v18676_v33 = vpop.eup %18675  ;;  %18063 = vmatpush3.msk.msra.mxu1 %vm2457_vm2, %v20566_v9  ;;  %18059 = vmatprep.mubr.msk.f32.mxu0 %vm18908_vm0, %v23435_v45  ;;  %v5484_v47 = vmul.f32 %v18674_v58, %v20617_v30  ;;  %v23492_v58 = vld [vmem:[#allocation49_spill] sm:$0xff] }
 0x68e   :  { %18067 = vmatprep.subr.mxu0 %v23435_v45  ;;  %18064 = vmatprep.mubr.msk.f32.mxu1 %vm18908_vm0, %v23435_v45  ;;  %v5486_v38 = vmul.f32 %v18676_v33, %v20619_v20  ;;  %v7502_v20 = vpop.permute.xlu0 %7501 }
 0x68f   :  { %18072 = vmatprep.subr.mxu1 %v23435_v45  ;;  %18060 = vmatmul.mubr.msk.f32.vlgmr.msra.gmra.mxu0 %vm2453_vm5, %v5484_v47 }
 0x690   :  { %v18678_v27 = vpop.eup %18677  ;;  %18065 = vmatmul.mubr.msk.f32.vlgmr.msra.gmra.mxu1 %vm2453_vm5, %v5486_v38  ;;  %18068 = vmatpush3.msk.msra.mxu0 %vm2457_vm2, %v20524_v5  ;;  %v7660_v5 = vpop.permute.xlu1 %7659 }
 0x691   :  { %18073 = vmatpush3.msk.msra.mxu1 %vm2457_vm2, %v20530_v32  ;;  %18069 = vmatprep.mubr.msk.f32.mxu0 %vm18908_vm0, %v23435_v45  ;;  %v5488_v9 = vmul.f32 %v18678_v27, %v20625_v0 }
 0x692   :  { %18077 = vmatprep.subr.mxu0 %v23435_v45  ;;  %18074 = vmatprep.mubr.msk.f32.mxu1 %vm18908_vm0, %v23435_v45  ;;  %v7580_v61 = vpop.permute.xlu0 %7579 }
 0x693   :  { %18070 = vmatmul.mubr.msk.f32.vlgmr.msra.gmra.mxu0 %vm2453_vm5, %v5488_v9  ;;  %18082 = vmatprep.subr.mxu1 %v23435_v45 }
 0x694   :  { %18078 = vmatpush3.msk.msra.mxu0 %vm2457_vm2, %v23485_v1  ;;  %18079 = vmatprep.mubr.msk.f32.mxu0 %vm18908_vm0, %v23435_v45  ;;  %v7738_v32 = vpop.permute.xlu1 %7737 }
 0x695   :  { %18087 = vmatprep.subr.mxu0 %v23435_v45 }
 0x696   :  { %v7658_v23 = vpop.permute.xlu0 %7657 }
 0x698   :  { %v20835_v30 = vpop.permute.xlu1 %7815 }
 0x69a   :  { %v7736_v22 = vpop.permute.xlu0 %7735 }
 0x69e   :  { %v7814_v14 = vpop.permute.xlu0 %7813 }
 0x6a2   :  { %v7892_v36 = vpop.permute.xlu0 %7891 }
 0x6a6   :  { %v7970_v33 = vpop.permute.xlu0 %7969 }
 0x6bc   :  { %v5456_v0 = vpop.xlane.xlu1 %5455 }
 0x6bd   :  { %18679 = vrcp.f32 %v5456_v0 }
 0x6c0   :  { %v5459_v28 = vpop.xlane.xlu1 %5458 }
 0x6c1   :  { %18681 = vrcp.f32 %v5459_v28 }
 0x6c4   :  { %v5462_v16 = vpop.xlane.xlu1 %5461 }
 0x6c5   :  { %18683 = vrcp.f32 %v5462_v16 }
 0x6c8   :  { %v7894_v12 = vpop.permute.xlu1 %7893 }
 0x6ca   :  { %v18680_v55 = vpop.eup %18679 }
 0x6cb   :  { %v5490_v42 = vmul.f32 %v18680_v55, %v20666_v15  ;;  %v23487_v15 = vld [vmem:[#allocation44_spill] sm:$0xff] }
 0x6cc   :  { %v20838_v19 = vpop.permute.xlu1 %7971 }
 0x6cd   :  { %18075 = vmatmul.mubr.msk.f32.vlgmr.msra.gmra.mxu1 %vm2453_vm5, %v5490_v42 }
 0x6ce   :  { %v18682_v41 = vpop.eup %18681  ;;  %18083 = vmatpush3.msk.msra.mxu1 %vm2457_vm2, %v23486_v2  ;;  %18084 = vmatprep.mubr.msk.f32.mxu1 %vm18908_vm0, %v23435_v45 }
 0x6cf   :  { %v5492_v7 = vmul.f32 %v18682_v41, %v20672_v37  ;;  %18092 = vmatprep.subr.mxu1 %v23435_v45  ;;  %v23488_v37 = vld [vmem:[#allocation45_spill] sm:$0xff] }
 0x6d0   :  { %v8050_v43 = vpop.permute.xlu1 %8049 }
 0x6d1   :  { %18080 = vmatmul.mubr.msk.f32.vlgmr.msra.gmra.mxu0 %vm2453_vm5, %v5492_v7 }
 0x6d2   :  { %v18684_v29 = vpop.eup %18683  ;;  %18088 = vmatpush3.xpose.msk.msra.mxu0 %vm1042_vm1, %v23487_v15  ;;  %18089 = vmatprep.mubr.msk.f32.mxu0 %vm18908_vm0, %v23435_v45 }
 0x6d3   :  { %18097 = vmatprep.subr.mxu0 %v23435_v45  ;;  %v5494_v10 = vmul.f32 %v18684_v29, %v20678_v3 }
 0x6d4   :  { %v8128_v3 = vpop.permute.xlu1 %8127 }
 0x6d5   :  { %18085 = vmatmul.mubr.msk.f32.vlgmr.msra.gmra.mxu1 %vm2453_vm5, %v5494_v10  ;;  %18090 = vmatmul.mubr.msk.f32.vlgmr.msra.gmra.mxu0 %vm1042_vm1, %v23488_v37 }
 0x6d6   :  { %18093 = vmatpush3.xpose.msk.msra.mxu1 %vm1042_vm1, %v23489_v25  ;;  %18098 = vmatpush3.xpose.msk.msra.mxu0 %vm1042_vm1, %v23490_v54 }
 0x6d7   :  { %18094 = vmatprep.mubr.msk.f32.mxu1 %vm18908_vm0, %v23435_v45  ;;  %18099 = vmatprep.mubr.msk.f32.mxu0 %vm18908_vm0, %v23435_v45 }
 0x6d8   :  { %18102 = vmatprep.subr.mxu1 %v23435_v45  ;;  %18107 = vmatprep.subr.mxu0 %v23435_v45 }
 0x6d9   :  { %18095 = vmatmul.mubr.msk.f32.vlgmr.msra.gmra.mxu1 %vm1042_vm1, %v23491_v51  ;;  %18100 = vmatmul.mubr.msk.f32.vlgmr.msra.gmra.mxu0 %vm1042_vm1, %v20653_v56 }
 0x6da   :  { %18103 = vmatpush3.xpose.msk.msra.mxu1 %vm1042_vm1, %v23492_v58  ;;  %18108 = vmatpush3.xpose.msk.msra.mxu0 %vm1042_vm1, %v20637_v31  ;;  %v8206_v31 = vpop.permute.xlu1 %8205 }
 0x6db   :  { %18104 = vmatprep.mubr.msk.f32.mxu1 %vm18908_vm0, %v23435_v45  ;;  %18109 = vmatprep.mubr.msk.f32.mxu0 %vm18908_vm0, %v23435_v45 }
 0x6dc   :  { %18112 = vmatprep.subr.mxu1 %v23435_v45  ;;  %18117 = vmatprep.subr.mxu0 %v23435_v45 }
 0x6dd   :  { %18105 = vmatmul.mubr.msk.f32.vlgmr.msra.gmra.mxu1 %vm1042_vm1, %v20658_v18  ;;  %18110 = vmatmul.mubr.msk.f32.vlgmr.msra.gmra.mxu0 %vm1042_vm1, %v20664_v59 }
 0x6de   :  { %18113 = vmatpush3.xpose.msk.msra.mxu1 %vm1042_vm1, %v20643_v21  ;;  %18118 = vmatpush3.xpose.msk.msra.mxu0 %vm1042_vm1, %v20649_v6  ;;  %v8048_v21 = vpop.permute.xlu0 %8047  ;;  %v8284_v6 = vpop.permute.xlu1 %8283 }
 0x6df   :  { %18114 = vmatprep.mubr.msk.f32.mxu1 %vm18908_vm0, %v23435_v45  ;;  %18119 = vmatprep.mubr.msk.f32.mxu0 %vm18908_vm0, %v23435_v45 }
 0x6e0   :  { %18122 = vmatprep.subr.mxu1 %v23435_v45  ;;  %18127 = vmatprep.subr.mxu0 %v23435_v45 }
 0x6e1   :  { %18115 = vmatmul.mubr.msk.f32.vlgmr.msra.gmra.mxu1 %vm1042_vm1, %v7502_v20  ;;  %18120 = vmatmul.mubr.msk.f32.vlgmr.msra.gmra.mxu0 %vm1042_vm1, %v7580_v61 }
 0x6e2   :  { %18123 = vmatpush3.xpose.msk.msra.mxu1 %vm1042_vm1, %v7660_v5  ;;  %18128 = vmatpush3.xpose.msk.msra.mxu0 %vm1042_vm1, %v7738_v32  ;;  %v8126_v56 = vpop.permute.xlu0 %8125  ;;  %v8282_v18 = vpop.permute.xlu1 %8281  ;;  %v23493_v32 = vld [vmem:[#allocation35_spill] sm:$0xff] }
 0x6e3   :  { %18124 = vmatprep.mubr.msk.f32.mxu1 %vm18908_vm0, %v23435_v45  ;;  %18129 = vmatprep.mubr.msk.f32.mxu0 %vm18908_vm0, %v23435_v45 }
 0x6e4   :  { %18132 = vmatprep.subr.mxu1 %v23435_v45  ;;  %18137 = vmatprep.subr.mxu0 %v23435_v45 }
 0x6e5   :  { %18125 = vmatmul.mubr.msk.f32.vlgmr.msra.gmra.mxu1 %vm1042_vm1, %v7658_v23  ;;  %18130 = vmatmul.mubr.msk.f32.vlgmr.msra.gmra.mxu0 %vm1042_vm1, %v7736_v22 }
 0x6e6   :  { %18133 = vmatpush3.xpose.msk.msra.mxu1 %vm1042_vm1, %v20835_v30  ;;  %18138 = vmatpush3.xpose.msk.msra.mxu0 %vm1042_vm1, %v7894_v12  ;;  %v8204_v59 = vpop.permute.xlu0 %8203  ;;  %v8568_v47 = vpop.permute.xlu1 %8567 }
 0x6e7   :  { %18134 = vmatprep.mubr.msk.f32.mxu1 %vm18908_vm0, %v23435_v45  ;;  %18139 = vmatprep.mubr.msk.f32.mxu0 %vm18908_vm0, %v23435_v45 }
 0x6e8   :  { %18142 = vmatprep.subr.mxu1 %v23435_v45  ;;  %18147 = vmatprep.subr.mxu0 %v23435_v45 }
 0x6e9   :  { %18135 = vmatmul.mubr.msk.f32.vlgmr.msra.gmra.mxu1 %vm1042_vm1, %v7814_v14  ;;  %18140 = vmatmul.mubr.msk.f32.vlgmr.msra.gmra.mxu0 %vm1042_vm1, %v7892_v36 }
 0x6ea   :  { %18143 = vmatpush3.xpose.msk.msra.mxu1 %vm1042_vm1, %v20838_v19  ;;  %18148 = vmatpush3.xpose.msk.msra.mxu0 %vm1042_vm1, %v8050_v43  ;;  %v8645_v38 = vpop.permute.xlu0 %8644 }
 0x6eb   :  { %18144 = vmatprep.mubr.msk.f32.mxu1 %vm18908_vm0, %v23435_v45  ;;  %18149 = vmatprep.mubr.msk.f32.mxu0 %vm18908_vm0, %v23435_v45 }
 0x6ec   :  { %18152 = vmatprep.subr.mxu1 %v23435_v45  ;;  %18157 = vmatprep.subr.mxu0 %v23435_v45 }
 0x6ed   :  { %18145 = vmatmul.mubr.msk.f32.vlgmr.msra.gmra.mxu1 %vm1042_vm1, %v7970_v33  ;;  %18150 = vmatmul.mubr.msk.f32.vlgmr.msra.gmra.mxu0 %vm1042_vm1, %v8048_v21 }
 0x6ee   :  { %18153 = vmatpush3.xpose.msk.msra.mxu1 %vm1042_vm1, %v8128_v3  ;;  %18158 = vmatpush3.xpose.msk.msra.mxu0 %vm1042_vm1, %v8206_v31 }
 0x6ef   :  { %18154 = vmatprep.mubr.msk.f32.mxu1 %vm18908_vm0, %v23435_v45  ;;  %18159 = vmatprep.mubr.msk.f32.mxu0 %vm18908_vm0, %v23435_v45 }
 0x6f0   :  { %18162 = vmatprep.subr.mxu1 %v23435_v45  ;;  %18167 = vmatprep.subr.mxu0 %v23435_v45 }
 0x6f1   :  { %18155 = vmatmul.mubr.msk.f32.vlgmr.msra.gmra.mxu1 %vm1042_vm1, %v8126_v56  ;;  %18160 = vmatmul.mubr.msk.f32.vlgmr.msra.gmra.mxu0 %vm1042_vm1, %v8204_v59 }
 0x6f2   :  { %18163 = vmatpush3.xpose.msk.msra.mxu1 %vm1042_vm1, %v8284_v6  ;;  %18168 = vmatpush3.msk.msra.mxu0 %vm2457_vm2, %v8568_v47 }
 0x6f3   :  { %18164 = vmatprep.mubr.msk.f32.mxu1 %vm18908_vm0, %v23435_v45  ;;  %18172 = vmatprep.subr.mxu1 %v23435_v45 }
 0x6f4   :  { %18169 = vmatprep.mubr.msk.f32.mxu0 %vm18908_vm0, %v23435_v45  ;;  %18177 = vmatprep.subr.mxu0 %v23435_v45 }
 0x6f5   :  { %18165 = vmatmul.mubr.msk.f32.vlgmr.msra.gmra.mxu1 %vm1042_vm1, %v8282_v18 }
 0x6f6   :  { %18173 = vmatpush3.msk.msra.mxu1 %vm2457_vm2, %v8645_v38  ;;  %18174 = vmatprep.mubr.msk.f32.mxu1 %vm18908_vm0, %v23435_v45 }
 0x6f7   :  { %18182 = vmatprep.subr.mxu1 %v23435_v45 }
 0x702   :  { %v5568_v27 = vpop.f32.mrf.mxu0 }
 0x703   :  { %v6749_v30 = vrot.slane %v5568_v27, %v23493_v32 }
 0x704   :  { %v18011_v9 = vpop.f32.mrf.mxu0 }
 0x705   :  { %v6750_v0 = vcombine.high %v6749_v30, %v6749_v30  ;;  %v6757_v16 = vrot.slane %v6749_v30, %v23493_v32 }
 0x706   :  { %v5722_v1 = vpop.f32.mrf.mxu0 }
 0x707   :  { %v6795_v20 = vrot.slane %v5722_v1, %v23493_v32  ;;  %v6764_v28 = vrot.slane %v6750_v0, %v23493_v32  ;;  %v6765_v41 = vcombine.high %v6757_v16, %v6757_v16 }
 0x708   :  { %v18021_v5 = vpop.f32.mrf.mxu0 }
 0x709   :  { %v6796_v61 = vcombine.high %v6795_v20, %v6795_v20  ;;  %v13555_v22 = vcombine.low %v6757_v16, %v6764_v28  ;;  %v6803_v42 = vrot.slane %v6795_v20, %v23493_v32 }
 0x70b   :  { %v6810_v23 = vrot.slane %v6796_v61, %v23493_v32  ;;  %v13565_v25 = vrot.slane %v13555_v22, %v23493_v32  ;;  %v6811_v33 = vcombine.high %v6803_v42, %v6803_v42 }
 0x70d   :  { %v13558_v14 = vcombine.low %v6803_v42, %v6810_v23 }
 0x70f   :  { %v13586_v31 = vrot.slane %v13558_v14, %v23493_v32 }
 0x73b   :  { %v5645_v12 = vpop.f32.mrf.mxu1 }
 0x73c   :  { %v6772_v55 = vrot.slane %v5645_v12, %v23493_v32 }
 0x73d   :  { %v18016_v19 = vpop.f32.mrf.mxu1 }
 0x73e   :  { %v6773_v2 = vcombine.high %v6772_v55, %v6772_v55  ;;  %v6780_v7 = vrot.slane %v6772_v55, %v23493_v32 }
 0x73f   :  { %v5799_v29 = vpop.f32.mrf.mxu1 }
 0x740   :  { %v6787_v15 = vrot.slane %v6773_v2, %v23493_v32  ;;  %v6788_v43 = vcombine.high %v6780_v7, %v6780_v7  ;;  %v13556_v10 = vcombine.low %v6765_v41, %v6780_v7  ;;  %v6818_v37 = vrot.slane %v5799_v29, %v23493_v32 }
 0x741   :  { %v18026_v54 = vpop.f32.mrf.mxu1 }
 0x742   :  { %v13557_v36 = vcombine.low %v6787_v15, %v6788_v43  ;;  %v13572_v3 = vrot.slane %v13556_v10, %v23493_v32  ;;  %v6819_v51 = vcombine.high %v6818_v37, %v6818_v37  ;;  %v6826_v58 = vrot.slane %v6818_v37, %v23493_v32 }
 0x743   :  { %v5876_v21 = vpop.f32.mrf.mxu0 }
 0x744   :  { %v13579_v6 = vrot.slane %v13557_v36, %v23493_v32  ;;  %v13587_v56 = vcombine.low %v13565_v25, %v13572_v3  ;;  %v6833_v18 = vrot.slane %v6819_v51, %v23493_v32  ;;  %v6834_v59 = vcombine.high %v6826_v58, %v6826_v58  ;;  %v5953_v47 = vpop.f32.mrf.mxu1 }
 0x745   :  { %v13604_v38 = vcombine.low %v6811_v33, %v6826_v58  ;;  %v6841_v27 = vrot.slane %v5876_v21, %v23493_v32  ;;  %v6864_v9 = vrot.slane %v5953_v47, %v23493_v32  ;;  %v18031_v1 = vpop.f32.mrf.mxu0 }
 0x746   :  { %v13588_v5 = vcombine.low %v13579_v6, %v13586_v31  ;;  %v13595_v30 = vrot.slane %v13587_v56, %v23493_v32  ;;  %v13605_v20 = vcombine.low %v6833_v18, %v6834_v59  ;;  %v18036_v0 = vpop.f32.mrf.mxu1 }
 0x747   :  { %v13614_v61 = vrot.slane %v13604_v38, %v23493_v32  ;;  %v6842_v28 = vcombine.high %v6841_v27, %v6841_v27  ;;  %v6849_v16 = vrot.slane %v6841_v27, %v23493_v32  ;;  %v6865_v23 = vcombine.high %v6864_v9, %v6864_v9  ;;  %v6030_v12 = vpop.f32.mrf.mxu0 }
 0x748   :  { %v13621_v55 = vrot.slane %v13605_v20, %v23493_v32  ;;  %v6872_v22 = vrot.slane %v6864_v9, %v23493_v32  ;;  %v6887_v42 = vrot.slane %v6030_v12, %v23493_v32  ;;  %v6107_v19 = vpop.f32.mrf.mxu1  ;;  %v13602_v41 = vrot.slane %v13588_v5, %v23493_v32 }
 0x749   :  { %v6856_v2 = vrot.slane %v6842_v28, %v23493_v32  ;;  %v6857_v7 = vcombine.high %v6849_v16, %v6849_v16  ;;  %v6879_v14 = vrot.slane %v6865_v23, %v23493_v32  ;;  %v6910_v29 = vrot.slane %v6107_v19, %v23493_v32  ;;  %v18041_v15 = vpop.f32.mrf.mxu0 }
 0x74a   :  { %v20980_v43 = vcombine.low %v13614_v61, %v13621_v55  ;;  %v6880_v10 = vcombine.high %v6872_v22, %v6872_v22  ;;  %v6888_v37 = vcombine.high %v6887_v42, %v6887_v42  ;;  %v6895_v25 = vrot.slane %v6887_v42, %v23493_v32  ;;  %v18046_v54 = vpop.f32.mrf.mxu1 }
 0x74b   :  { %v13606_v36 = vcombine.low %v6849_v16, %v6856_v2  ;;  %v13607_v3 = vcombine.low %v6857_v7, %v6872_v22  ;;  %v6911_v51 = vcombine.high %v6910_v29, %v6910_v29  ;;  %v6918_v58 = vrot.slane %v6910_v29, %v23493_v32  ;;  %v6184_v33 = vpop.f32.mrf.mxu0 }
 0x74c   :  { %v13644_v31 = vrot.slane %v20980_v43, %v23493_v32  ;;  %v13653_v21 = vcombine.low %v6879_v14, %v6880_v10  ;;  %v6902_v6 = vrot.slane %v6888_v37, %v23493_v32  ;;  %v6903_v56 = vcombine.high %v6895_v25, %v6895_v25  ;;  %v6261_v18 = vpop.f32.mrf.mxu1 }
 0x74d   :  { %v13628_v59 = vrot.slane %v13606_v36, %v23493_v32  ;;  %v13635_v47 = vrot.slane %v13607_v3, %v23493_v32  ;;  %v6925_v38 = vrot.slane %v6911_v51, %v23493_v32  ;;  %v6926_v27 = vcombine.high %v6918_v58, %v6918_v58  ;;  %v18051_v9 = vpop.f32.mrf.mxu0 }
 0x74e   :  { %v13663_v1 = vrot.slane %v13653_v21, %v23493_v32  ;;  %v13654_v5 = vcombine.low %v6895_v25, %v6902_v6  ;;  %v13655_v20 = vcombine.low %v6903_v56, %v6918_v58  ;;  %v6933_v0 = vrot.slane %v6184_v33, %v23493_v32  ;;  %v18056_v61 = vpop.f32.mrf.mxu1 }
 0x74f   :  { %v13637_v28 = vcombine.low %v13628_v59, %v13635_v47  ;;  %v13656_v16 = vcombine.low %v6925_v38, %v6926_v27  ;;  %v6956_v23 = vrot.slane %v6261_v18, %v23493_v32  ;;  %v6338_v12 = vpop.f32.mrf.mxu0  ;;  %v20993_v55 = vcombine.low %v13595_v30, %v13602_v41 }
 0x750   :  { %v13670_v22 = vrot.slane %v13654_v5, %v23493_v32  ;;  %v13677_v42 = vrot.slane %v13655_v20, %v23493_v32  ;;  %v6934_v19 = vcombine.high %v6933_v0, %v6933_v0  ;;  %v6941_v2 = vrot.slane %v6933_v0, %v23493_v32  ;;  %v6415_v7 = vpop.f32.mrf.mxu1 }
 0x751   :  { %23494 = vst [vmem:[#allocation9_spill] sm:$0xff] %v20993_v55  ;;  %v13651_v14 = vrot.slane %v13637_v28, %v23493_v32  ;;  %v13684_v29 = vrot.slane %v13656_v16, %v23493_v32  ;;  %v6957_v15 = vcombine.high %v6956_v23, %v6956_v23  ;;  %v6964_v43 = vrot.slane %v6956_v23, %v23493_v32  ;;  %v18061_v10 = vpop.f32.mrf.mxu0 }
 0x752   :  { %v13685_v37 = vcombine.low %v13663_v1, %v13670_v22  ;;  %v6948_v30 = vrot.slane %v6934_v19, %v23493_v32  ;;  %v6949_v41 = vcombine.high %v6941_v2, %v6941_v2  ;;  %v6979_v25 = vrot.slane %v6338_v12, %v23493_v32  ;;  %v18066_v54 = vpop.f32.mrf.mxu1 }
 0x753   :  { %v13686_v36 = vcombine.low %v13677_v42, %v13684_v29  ;;  %v6971_v3 = vrot.slane %v6957_v15, %v23493_v32  ;;  %v6972_v51 = vcombine.high %v6964_v43, %v6964_v43  ;;  %v7002_v58 = vrot.slane %v6415_v7, %v23493_v32  ;;  %v6492_v33 = vpop.f32.mrf.mxu0 }
 0x754   :  { %v13693_v21 = vrot.slane %v13685_v37, %v23493_v32  ;;  %v13702_v6 = vcombine.low %v6941_v2, %v6948_v30  ;;  %v13703_v56 = vcombine.low %v6949_v41, %v6964_v43  ;;  %v6980_v18 = vcombine.high %v6979_v25, %v6979_v25 }
 0x755   :  { %v13700_v59 = vrot.slane %v13686_v36, %v23493_v32  ;;  %v13704_v47 = vcombine.low %v6971_v3, %v6972_v51  ;;  %v6987_v38 = vrot.slane %v6979_v25, %v23493_v32  ;;  %v7003_v27 = vcombine.high %v7002_v58, %v7002_v58  ;;  %v18071_v9 = vpop.f32.mrf.mxu0 }
 0x756   :  { %v13712_v1 = vrot.slane %v13702_v6, %v23493_v32  ;;  %v13719_v5 = vrot.slane %v13703_v56, %v23493_v32  ;;  %v6994_v20 = vrot.slane %v6980_v18, %v23493_v32  ;;  %v7010_v0 = vrot.slane %v7002_v58, %v23493_v32 }
 0x757   :  { %v6995_v61 = vcombine.high %v6987_v38, %v6987_v38  ;;  %v7017_v28 = vrot.slane %v7003_v27, %v23493_v32  ;;  %v21013_v22 = vcombine.low %v13644_v31, %v13651_v14  ;;  %v21015_v19 = vcombine.low %v13693_v21, %v13700_v59 }
 0x758   :  { %v13734_v16 = vcombine.low %v13712_v1, %v13719_v5  ;;  %v13705_v23 = vcombine.low %v6987_v38, %v6994_v20  ;;  %v7018_v12 = vcombine.high %v7010_v0, %v7010_v0  ;;  %v13726_v2 = vrot.slane %v13704_v47, %v23493_v32 }
 0x759   :  { %23495 = vst [vmem:[#allocation18_spill] sm:$0xff] %v21013_v22  ;;  %v13751_v42 = vcombine.low %v6995_v61, %v7010_v0  ;;  %23496 = vst [vmem:[#allocation13_spill] sm:$0xff] %v21015_v19  ;;  %v7025_v54 = vrot.slane %v6492_v33, %v23493_v32 }
 0x75a   :  { %v13733_v7 = vrot.slane %v13705_v23, %v23493_v32  ;;  %v13752_v29 = vcombine.low %v7017_v28, %v7018_v12  ;;  %v13742_v30 = vrot.slane %v13734_v16, %v23493_v32 }
 0x75b   :  { %v13761_v43 = vrot.slane %v13751_v42, %v23493_v32  ;;  %v7026_v36 = vcombine.high %v7025_v54, %v7025_v54  ;;  %v7033_v3 = vrot.slane %v7025_v54, %v23493_v32 }
 0x75c   :  { %v13735_v10 = vcombine.low %v13726_v2, %v13733_v7  ;;  %v13768_v37 = vrot.slane %v13752_v29, %v23493_v32 }
 0x75d   :  { %v7040_v51 = vrot.slane %v7026_v36, %v23493_v32  ;;  %v7041_v56 = vcombine.high %v7033_v3, %v7033_v3 }
 0x75e   :  { %v13749_v31 = vrot.slane %v13735_v10, %v23493_v32  ;;  %v13783_v14 = vcombine.low %v13761_v43, %v13768_v37 }
 0x75f   :  { %v13753_v18 = vcombine.low %v7033_v3, %v7040_v51 }
 0x760   :  { %v21025_v41 = vcombine.low %v13742_v30, %v13749_v31  ;;  %v13791_v37 = vrot.slane %v13783_v14, %v23493_v32 }
 0x761   :  { %v13775_v20 = vrot.slane %v13753_v18, %v23493_v32 }
 0x762   :  { %23497 = vst [vmem:[#allocation20_spill] sm:$0xff] %v21025_v41 }
 0x78d   :  { %v6569_v58 = vpop.f32.mrf.mxu1 }
 0x78e   :  { %v7048_v21 = vrot.slane %v6569_v58, %v23493_v32 }
 0x78f   :  { %v18076_v6 = vpop.f32.mrf.mxu1 }
 0x790   :  { %v7049_v59 = vcombine.high %v7048_v21, %v7048_v21  ;;  %v7056_v47 = vrot.slane %v7048_v21, %v23493_v32 }
 0x791   :  { %v6646_v38 = vpop.f32.mrf.mxu0 }
 0x792   :  { %v7063_v27 = vrot.slane %v7049_v59, %v23493_v32  ;;  %v7064_v9 = vcombine.high %v7056_v47, %v7056_v47  ;;  %v13754_v1 = vcombine.low %v7041_v56, %v7056_v47  ;;  %v7071_v33 = vrot.slane %v6646_v38, %v23493_v32 }
 0x793   :  { %v18081_v5 = vpop.f32.mrf.mxu0 }
 0x794   :  { %v13782_v0 = vrot.slane %v13754_v1, %v23493_v32  ;;  %v13800_v61 = vcombine.low %v7063_v27, %v7064_v9  ;;  %v7072_v28 = vcombine.high %v7071_v33, %v7071_v33  ;;  %v7079_v16 = vrot.slane %v7071_v33, %v23493_v32 }
 0x795   :  { %v6723_v23 = vpop.f32.mrf.mxu1  ;;  %v7185_v12 = vpop.f32.mrf.mxu0 }
 0x796   :  { %v13784_v42 = vcombine.low %v13775_v20, %v13782_v0  ;;  %v7086_v2 = vrot.slane %v7072_v28, %v23493_v32  ;;  %v7094_v7 = vrot.slane %v6723_v23, %v23493_v32  ;;  %v8359_v29 = vmul.f32 0.17677669, %v7185_v12 }
 0x797   :  { %v18086_v43 = vpop.f32.mrf.mxu1  ;;  %v18091_v10 = vpop.f32.mrf.mxu0  ;;  %v13810_v31 = vrot.slane %v13800_v61, %v23493_v32  ;;  %v7087_v36 = vcombine.high %v7079_v16, %v7079_v16 }
 0x798   :  { %v13798_v30 = vrot.slane %v13784_v42, %v23493_v32  ;;  %v13801_v54 = vcombine.low %v7079_v16, %v7086_v2  ;;  %v7095_v3 = vcombine.high %v7094_v7, %v7094_v7  ;;  %v7102_v51 = vrot.slane %v7094_v7, %v23493_v32 }
 0x799   :  { %v21047_v21 = vsel %vm19734_vm3, %v8359_v29, -1e+30  ;;  %v7263_v6 = vpop.f32.mrf.mxu1  ;;  %v7341_v56 = vpop.f32.mrf.mxu0 }
 0x79a   :  { %v13817_v18 = vrot.slane %v13801_v54, %v23493_v32  ;;  %v8360_v59 = vmul.f32 0.17677669, %v7263_v6  ;;  %v8361_v47 = vmul.f32 0.17677669, %v7341_v56  ;;  %v8391_v14 = vsel %vm2276_vm4, %v21047_v21, -inf }
 0x79b   :  { %v7109_v38 = vrot.slane %v7095_v3, %v23493_v32  ;;  %v7110_v27 = vcombine.high %v7102_v51, %v7102_v51  ;;  %v13802_v9 = vcombine.low %v7087_v36, %v7102_v51  ;;  %8392 = vmax.xlane.f32.xlu0 %v8391_v14  ;;  %v18096_v1 = vpop.f32.mrf.mxu1  ;;  %v18101_v33 = vpop.f32.mrf.mxu0  ;;  %v21053_v5 = vcombine.low %v13791_v37, %v13798_v30 }
 0x79c   :  { %v13832_v20 = vcombine.low %v13810_v31, %v13817_v18  ;;  %v21057_v0 = vsel %vm19734_vm3, %v8360_v59, -1e+30  ;;  %v21061_v61 = vsel %vm19734_vm3, %v8361_v47, -1e+30 }
 0x79d   :  { %23499 = vst [vmem:[#allocation15_spill] sm:$0xff] %v21053_v5  ;;  %v13803_v28 = vcombine.low %v7109_v38, %v7110_v27  ;;  %v7419_v16 = vpop.f32.mrf.mxu1  ;;  %v21063_v23 = vpop.f32.mrf.mxu0  ;;  %v8397_v12 = vsel %vm2276_vm4, %v21061_v61, -inf  ;;  %v8394_v42 = vsel %vm2276_vm4, %v21057_v0, -inf  ;;  %v13824_v7 = vrot.slane %v13802_v9, %v23493_v32 }
 0x79e   :  { %v8362_v2 = vmul.f32 0.17677669, %v7419_v16  ;;  %8395 = vmax.xlane.f32.xlu1 %v8394_v42  ;;  %v13840_v51 = vrot.slane %v13832_v20, %v23493_v32 }
 0x79f   :  { %v13831_v29 = vrot.slane %v13803_v28, %v23493_v32  ;;  %8398 = vmax.xlane.f32.xlu0 %v8397_v12  ;;  %v18106_v43 = vpop.f32.mrf.mxu1  ;;  %v18111_v10 = vpop.f32.mrf.mxu0 }
 0x7a0   :  { %v21073_v37 = vsel %vm19734_vm3, %v8362_v2, -1e+30 }
 0x7a1   :  { %v13833_v30 = vcombine.low %v13824_v7, %v13831_v29  ;;  %v7575_v31 = vpop.f32.mrf.mxu1  ;;  %v7653_v54 = vpop.f32.mrf.mxu0  ;;  %v8400_v36 = vsel %vm2276_vm4, %v21073_v37, -inf }
 0x7a2   :  { %v8364_v3 = vmul.f32 0.17677669, %v7575_v31 }
 0x7a3   :  { %v13847_v6 = vrot.slane %v13833_v30, %v23493_v32  ;;  %8401 = vmax.xlane.f32.xlu0 %v8400_v36  ;;  %v18116_v56 = vpop.f32.mrf.mxu1  ;;  %v18121_v18 = vpop.f32.mrf.mxu0 }
 0x7a4   :  { %v21081_v59 = vsel %vm19734_vm3, %v8364_v3, -1e+30 }
 0x7a5   :  { %v7731_v47 = vpop.f32.mrf.mxu1  ;;  %v7809_v14 = vpop.f32.mrf.mxu0  ;;  %v8406_v38 = vsel %vm2276_vm4, %v21081_v59, -inf  ;;  %v21085_v27 = vcombine.low %v13840_v51, %v13847_v6  ;;  %v23501_v51 = vld [vmem:[#allocation10_spill] sm:$0xff] }
 0x7a6   :  { %v8366_v9 = vmul.f32 0.17677669, %v7731_v47 }
 0x7a7   :  { %23500 = vst [vmem:[#allocation22_spill] sm:$0xff] %v21085_v27  ;;  %8407 = vmax.xlane.f32.xlu0 %v8406_v38  ;;  %v18126_v1 = vpop.f32.mrf.mxu1  ;;  %v18131_v33 = vpop.f32.mrf.mxu0 }
 0x7a8   :  { %v21091_v28 = vsel %vm19734_vm3, %v8366_v9, -1e+30 }
 0x7a9   :  { %v7887_v16 = vpop.f32.mrf.mxu1  ;;  %v7965_v12 = vpop.f32.mrf.mxu0  ;;  %v8412_v42 = vsel %vm2276_vm4, %v21091_v28, -inf }
 0x7aa   :  { %v8368_v2 = vmul.f32 0.17677669, %v7887_v16 }
 0x7ab   :  { %8413 = vmax.xlane.f32.xlu0 %v8412_v42  ;;  %v18136_v7 = vpop.f32.mrf.mxu1  ;;  %v18141_v29 = vpop.f32.mrf.mxu0 }
 0x7ac   :  { %v21097_v43 = vsel %vm19734_vm3, %v8368_v2, -1e+30 }
 0x7ad   :  { %v8043_v10 = vpop.f32.mrf.mxu1  ;;  %v8121_v30 = vpop.f32.mrf.mxu0  ;;  %v8418_v31 = vsel %vm2276_vm4, %v21097_v43, -inf }
 0x7ae   :  { %v8370_v36 = vmul.f32 0.17677669, %v8043_v10 }
 0x7af   :  { %8419 = vmax.xlane.f32.xlu0 %v8418_v31  ;;  %v18151_v3 = vpop.f32.mrf.mxu0  ;;  %10417 = vrot.lane.b32.xlu1 %v23501_v51, %s18912_s1  ;;  %v18146_v6 = vpop.f32.mrf.mxu1 }
 0x7b0   :  { %v21105_v56 = vsel %vm19734_vm3, %v8370_v36, -1e+30  ;;  %v21121_v36 = vpop.permute.xlu0 %8721  ;;  %v8363_v3 = vmul.f32 0.17677669, %v21063_v23  ;;  %v8367_v23 = vmul.f32 0.17677669, %v7809_v14 }
 0x7b1   :  { %v8199_v18 = vpop.f32.mrf.mxu1  ;;  %v8277_v47 = vpop.f32.mrf.mxu0  ;;  %v8424_v38 = vsel %vm2276_vm4, %v21105_v56, -inf }
 0x7b2   :  { %v8372_v9 = vmul.f32 0.17677669, %v8199_v18  ;;  %v21128_v6 = vsel %vm19734_vm3, %v8363_v3, -1e+30  ;;  %v8365_v18 = vmul.f32 0.17677669, %v7653_v54 }
 0x7b3   :  { %8425 = vmax.xlane.f32.xlu0 %v8424_v38  ;;  %v18156_v1 = vpop.f32.mrf.mxu1  ;;  %v18161_v33 = vpop.f32.mrf.mxu0  ;;  %v23502_v38 = vld [vmem:[#allocation12_spill] sm:$0xff] }
 0x7b4   :  { %v21111_v16 = vsel %vm19734_vm3, %v8372_v9, -1e+30  ;;  %v21124_v51 = vpop.permute.xlu0 %8798  ;;  %v8403_v1 = vsel %vm2276_vm4, %v21128_v6, -inf  ;;  %v21138_v33 = vsel %vm19734_vm3, %v8365_v18, -1e+30 }
 0x7b5   :  { %v8355_v42 = vpop.f32.mrf.mxu1  ;;  %v8430_v2 = vsel %vm2276_vm4, %v21111_v16, -inf  ;;  %v8409_v54 = vsel %vm2276_vm4, %v21138_v33, -inf  ;;  %v8373_v18 = vmul.f32 0.17677669, %v8277_v47 }
 0x7b6   :  { %v8374_v7 = vmul.f32 0.17677669, %v8355_v42  ;;  %v21146_v42 = vsel %vm19734_vm3, %v8367_v23, -1e+30 }
 0x7b7   :  { %8431 = vmax.xlane.f32.xlu0 %v8430_v2  ;;  %v18166_v29 = vpop.f32.mrf.mxu1  ;;  %v8369_v2 = vmul.f32 0.17677669, %v7965_v12  ;;  %v8415_v14 = vsel %vm2276_vm4, %v21146_v42, -inf }
 0x7b8   :  { %v21117_v10 = vsel %vm19734_vm3, %v8374_v7, -1e+30  ;;  %v21132_v9 = vpop.permute.xlu0 %8875  ;;  %v8371_v29 = vmul.f32 0.17677669, %v8121_v30 }
 0x7b9   :  { %v8436_v31 = vsel %vm2276_vm4, %v21117_v10, -inf }
 0x7ba   :  { %v21164_v3 = vsel %vm19734_vm3, %v8371_v29, -1e+30  ;;  %v23504_v29 = vld [vmem:[#allocation14_spill] sm:$0xff] }
 0x7bb   :  { %8437 = vmax.xlane.f32.xlu0 %v8436_v31 }
 0x7bc   :  { %v21148_v7 = vpop.permute.xlu0 %8952 }
 0x7c0   :  { %v21158_v31 = vpop.permute.xlu0 %9029 }
 0x7c4   :  { %v21172_v30 = vpop.permute.xlu0 %9106 }
 0x7c8   :  { %v21176_v23 = vpop.permute.xlu0 %9183 }
 0x7d1   :  { %10575 = vrot.lane.b32.xlu0 %v23502_v38, %s18912_s1  ;;  %v21170_v38 = vsel %vm19734_vm3, %v8373_v18, -1e+30  ;;  %v21192_v18 = vpop.permute.xlu1 %9260 }
 0x7d3   :  { %8404 = vmax.xlane.f32.xlu1 %v8403_v1  ;;  %v8433_v1 = vsel %vm2276_vm4, %v21170_v38, -inf }
 0x7d5   :  { %10573 = vrot.lane.b32.xlu0 %v19579_v63, %s18912_s1  ;;  %v21156_v63 = vsel %vm19734_vm3, %v8369_v2, -1e+30  ;;  %v23503_v2 = vld [vmem:[#allocation11_spill] sm:$0xff] }
 0x7d6   :  { %v8421_v12 = vsel %vm2276_vm4, %v21156_v63, -inf }
 0x7d7   :  { %8410 = vmax.xlane.f32.xlu1 %v8409_v54  ;;  %v21178_v54 = vpop.permute.xlu0 %9337 }
 0x7d9   :  { %10731 = vrot.lane.b32.xlu0 %v19618_v52, %s18912_s1  ;;  %v8427_v52 = vsel %vm2276_vm4, %v21164_v3, -inf }
 0x7db   :  { %8416 = vmax.xlane.f32.xlu1 %v8415_v14  ;;  %v21180_v47 = vpop.permute.xlu0 %9414 }
 0x7df   :  { %8422 = vmax.xlane.f32.xlu1 %v8421_v12  ;;  %v21184_v14 = vpop.permute.xlu0 %9491 }
 0x7e3   :  { %8428 = vmax.xlane.f32.xlu1 %v8427_v52  ;;  %v21190_v12 = vpop.permute.xlu0 %9568 }
 0x7e7   :  { %8434 = vmax.xlane.f32.xlu1 %v8433_v1  ;;  %v21194_v52 = vpop.permute.xlu0 %9722  ;;  %v21196_v1 = vpop.permute.xlu1 %9645 }
 0x7eb   :  { %v21198_v20 = vpop.permute.xlu0 %10263  ;;  %v21200_v25 = vpop.permute.xlu1 %10185 }
 0x7ec   :  { %23505 = vst [vmem:[#allocation24_spill] sm:$0xff] %v21198_v20  ;;  %23506 = vst [vmem:[#allocation5_spill] sm:$0xff] %v21200_v25 }
 0x7ef   :  { %v21204_v15 = vpop.permute.xlu1 %10183 }
 0x7f0   :  { %23508 = vst [vmem:[#allocation8_spill] sm:$0xff] %v21204_v15 }
 0x7f3   :  { %v21208_v5 = vpop.permute.xlu1 %10261 }
 0x7f4   :  { %23510 = vst [vmem:[#allocation4_spill] sm:$0xff] %v21208_v5 }
 0x7f7   :  { %v21212_v27 = vpop.permute.xlu1 %10339 }
 0x7f8   :  { %10495 = vrot.lane.b32.xlu1 %v23503_v2, %s18912_s1  ;;  %v21202_v2 = vpop.permute.xlu0 %10341  ;;  %23512 = vst [vmem:[#allocation42_spill] sm:$0xff] %v21212_v27 }
 0x7f9   :  { %23507 = vst [vmem:[#allocation7_spill] sm:$0xff] %v21202_v2 }
 0x7fc   :  { %10653 = vrot.lane.b32.xlu1 %v23504_v29, %s18912_s1  ;;  %v21206_v29 = vpop.permute.xlu0 %10419 }
 0x7fd   :  { %23509 = vst [vmem:[#allocation3_spill] sm:$0xff] %v21206_v29 }
 0x800   :  { %10651 = vrot.lane.b32.xlu1 %v19604_v50, %s18912_s1  ;;  %v21210_v50 = vpop.permute.xlu0 %10497 }
 0x801   :  { %23511 = vst [vmem:[#allocation6_spill] sm:$0xff] %v21210_v50 }
 0x824   :  { %v8393_v19 = vpop.xlane.xlu0 %8392 }
 0x825   :  { %v8439_v41 = vsub.f32 %v21047_v21, %v8393_v19 }
 0x827   :  { %v8455_v55 = vmul.f32 1.442695, %v8439_v41  ;;  %v8396_v22 = vpop.xlane.xlu1 %8395 }
 0x828   :  { %v8399_v58 = vpop.xlane.xlu0 %8398  ;;  %v8440_v32 = vsub.f32 %v21057_v0, %v8396_v22 }
 0x829   :  { %18685 = vpow2.f32 %v8455_v55  ;;  %v8441_v2 = vsub.f32 %v21061_v61, %v8399_v58 }
 0x82a   :  { %v8457_v15 = vmul.f32 1.442695, %v8440_v32 }
 0x82b   :  { %v8459_v25 = vmul.f32 1.442695, %v8441_v2 }
 0x82c   :  { %18687 = vpow2.f32 %v8457_v15  ;;  %v8402_v29 = vpop.xlane.xlu0 %8401 }
 0x82d   :  { %18689 = vpow2.f32 %v8459_v25  ;;  %v8442_v50 = vsub.f32 %v21073_v37, %v8402_v29 }
 0x82f   :  { %v8461_v5 = vmul.f32 1.442695, %v8442_v50 }
 0x830   :  { %v8408_v27 = vpop.xlane.xlu0 %8407 }
 0x831   :  { %18691 = vpow2.f32 %v8461_v5  ;;  %v8444_v19 = vsub.f32 %v21081_v59, %v8408_v27 }
 0x833   :  { %v8465_v41 = vmul.f32 1.442695, %v8444_v19 }
 0x834   :  { %v8414_v21 = vpop.xlane.xlu0 %8413 }
 0x835   :  { %18693 = vpow2.f32 %v8465_v41  ;;  %v8446_v22 = vsub.f32 %v21091_v28, %v8414_v21 }
 0x836   :  { %v21220_v55 = vpop.eup %18685 }
 0x837   :  { %v8469_v58 = vmul.f32 1.442695, %v8446_v22  ;;  %v8487_v32 = vsel %vm2276_vm4, %v21220_v55, 0.0 }
 0x838   :  { %8488 = vadd.xlane.f32.xlu1 %v8487_v32  ;;  %v8420_v15 = vpop.xlane.xlu0 %8419 }
 0x839   :  { %v21224_v25 = vpop.eup %18687  ;;  %18695 = vpow2.f32 %v8469_v58  ;;  %v8448_v5 = vsub.f32 %v21097_v43, %v8420_v15 }
 0x83a   :  { %v21227_v0 = vpop.eup %18689  ;;  %v8490_v61 = vsel %vm2276_vm4, %v21224_v25, 0.0 }
 0x83b   :  { %v8473_v37 = vmul.f32 1.442695, %v8448_v5  ;;  %v8493_v59 = vsel %vm2276_vm4, %v21227_v0, 0.0  ;;  %8491 = vadd.xlane.f32.xlu0 %v8490_v61 }
 0x83c   :  { %8494 = vadd.xlane.f32.xlu1 %v8493_v59  ;;  %v8426_v27 = vpop.xlane.xlu0 %8425  ;;  %v21259_v59 = vpop.permute.xlu1 %10417 }
 0x83d   :  { %18697 = vpow2.f32 %v8473_v37  ;;  %v8450_v28 = vsub.f32 %v21105_v56, %v8426_v27  ;;  %23513 = vst [vmem:[#allocation43_spill] sm:$0xff] %v21259_v59 }
 0x83e   :  { %v21234_v2 = vpop.eup %18691 }
 0x83f   :  { %v8477_v29 = vmul.f32 1.442695, %v8450_v28  ;;  %v8496_v43 = vsel %vm2276_vm4, %v21234_v2, 0.0 }
 0x840   :  { %v8432_v50 = vpop.xlane.xlu0 %8431  ;;  %8497 = vadd.xlane.f32.xlu0 %v8496_v43 }
 0x841   :  { %18699 = vpow2.f32 %v8477_v29  ;;  %v8452_v19 = vsub.f32 %v21111_v16, %v8432_v50 }
 0x842   :  { %v21239_v41 = vpop.eup %18693 }
 0x843   :  { %v8481_v21 = vmul.f32 1.442695, %v8452_v19  ;;  %v8502_v22 = vsel %vm2276_vm4, %v21239_v41, 0.0 }
 0x844   :  { %8503 = vadd.xlane.f32.xlu0 %v8502_v22 }
 0x845   :  { %18701 = vpow2.f32 %v8481_v21 }
 0x846   :  { %v21243_v56 = vpop.eup %18695 }
 0x847   :  { %v8508_v58 = vsel %vm2276_vm4, %v21243_v56, 0.0 }
 0x848   :  { %8509 = vadd.xlane.f32.xlu0 %v8508_v58 }
 0x84a   :  { %v21247_v32 = vpop.eup %18697 }
 0x84b   :  { %v8514_v15 = vsel %vm2276_vm4, %v21247_v32, 0.0 }
 0x84c   :  { %8515 = vadd.xlane.f32.xlu0 %v8514_v15  ;;  %v8438_v15 = vpop.xlane.xlu0 %8437 }
 0x84d   :  { %v8454_v59 = vsub.f32 %v21117_v10, %v8438_v15 }
 0x84e   :  { %v21251_v16 = vpop.eup %18699 }
 0x84f   :  { %v8520_v5 = vsel %vm2276_vm4, %v21251_v16, 0.0 }
 0x850   :  { %8521 = vadd.xlane.f32.xlu0 %v8520_v5 }
 0x852   :  { %v21255_v61 = vpop.eup %18701 }
 0x853   :  { %v8526_v37 = vsel %vm2276_vm4, %v21255_v61, 0.0 }
 0x854   :  { %8527 = vadd.xlane.f32.xlu0 %v8526_v37 }
 0x85c   :  { %v8405_v27 = vpop.xlane.xlu1 %8404 }
 0x85d   :  { %v8443_v28 = vsub.f32 %v21128_v6, %v8405_v27 }
 0x85f   :  { %v8463_v29 = vmul.f32 1.442695, %v8443_v28 }
 0x860   :  { %v8411_v43 = vpop.xlane.xlu1 %8410 }
 0x861   :  { %18703 = vpow2.f32 %v8463_v29  ;;  %v8445_v50 = vsub.f32 %v21138_v33, %v8411_v43  ;;  %v8485_v33 = vmul.f32 1.442695, %v8454_v59 }
 0x863   :  { %v8467_v19 = vmul.f32 1.442695, %v8445_v50 }
 0x864   :  { %v8417_v21 = vpop.xlane.xlu1 %8416 }
 0x865   :  { %18705 = vpow2.f32 %v8467_v19  ;;  %v8447_v22 = vsub.f32 %v21146_v42, %v8417_v21 }
 0x867   :  { %v8471_v58 = vmul.f32 1.442695, %v8447_v22 }
 0x868   :  { %v8423_v5 = vpop.xlane.xlu1 %8422 }
 0x869   :  { %18707 = vpow2.f32 %v8471_v58  ;;  %v8449_v37 = vsub.f32 %v21156_v63, %v8423_v5 }
 0x86b   :  { %v8475_v20 = vmul.f32 1.442695, %v8449_v37 }
 0x86c   :  { %v8429_v6 = vpop.xlane.xlu1 %8428 }
 0x86d   :  { %18709 = vpow2.f32 %v8475_v20  ;;  %v8451_v27 = vsub.f32 %v21164_v3, %v8429_v6 }
 0x86e   :  { %v21267_v28 = vpop.eup %18703 }
 0x86f   :  { %v8479_v29 = vmul.f32 1.442695, %v8451_v27  ;;  %v8499_v42 = vsel %vm2276_vm4, %v21267_v28, 0.0 }
 0x870   :  { %8500 = vadd.xlane.f32.xlu1 %v8499_v42  ;;  %v8435_v43 = vpop.xlane.xlu1 %8434 }
 0x871   :  { %18711 = vpow2.f32 %v8479_v29  ;;  %v8453_v50 = vsub.f32 %v21170_v38, %v8435_v43 }
 0x872   :  { %v21272_v63 = vpop.eup %18705  ;;  %18713 = vpow2.f32 %v8485_v33 }
 0x873   :  { %v8483_v10 = vmul.f32 1.442695, %v8453_v50  ;;  %v8505_v20 = vsel %vm2276_vm4, %v21272_v63, 0.0 }
 0x874   :  { %8506 = vadd.xlane.f32.xlu1 %v8505_v20 }
 0x875   :  { %18715 = vpow2.f32 %v8483_v10 }
 0x876   :  { %v21276_v3 = vpop.eup %18707 }
 0x877   :  { %v8511_v59 = vsel %vm2276_vm4, %v21276_v3, 0.0 }
 0x878   :  { %8512 = vadd.xlane.f32.xlu1 %v8511_v59 }
 0x87a   :  { %v21280_v19 = vpop.eup %18709 }
 0x87b   :  { %v8517_v38 = vsel %vm2276_vm4, %v21280_v19, 0.0 }
 0x87c   :  { %8518 = vadd.xlane.f32.xlu1 %v8517_v38 }
 0x87e   :  { %v21284_v21 = vpop.eup %18711 }
 0x87f   :  { %v8523_v22 = vsel %vm2276_vm4, %v21284_v21, 0.0  ;;  %v21288_v58 = vpop.eup %18713 }
 0x880   :  { %8524 = vadd.xlane.f32.xlu1 %v8523_v22  ;;  %v8532_v37 = vsel %vm2276_vm4, %v21288_v58, 0.0 }
 0x882   :  { %v21290_v15 = vpop.eup %18715 }
 0x883   :  { %v8529_v5 = vsel %vm2276_vm4, %v21290_v15, 0.0 }
 0x884   :  { %8530 = vadd.xlane.f32.xlu0 %v8529_v5  ;;  %8533 = vadd.xlane.f32.xlu1 %v8532_v37 }
 0x895   :  { %10809 = vrot.lane.b32.xlu1 %v19495_v17, %s18912_s1  ;;  %v21322_v17 = vpop.permute.xlu1 %10495 }
 0x899   :  { %10807 = vrot.lane.b32.xlu1 %v19515_v46, %s18912_s1  ;;  %v21328_v46 = vpop.permute.xlu0 %10575 }
 0x89a   :  { %10729 = vrot.lane.b32.xlu0 %v19627_v53, %s18912_s1  ;;  %v23514_v53 = vld [vmem:[#allocation27_spill] sm:$0xff] }
 0x89d   :  { %10965 = vrot.lane.b32.xlu1 %v23463_v8, %s18912_s1 }
 0x89e   :  { %10887 = vrot.lane.b32.xlu0 %v19641_v62, %s18912_s1  ;;  %v23515_v62 = vld [vmem:[#allocation17_spill] sm:$0xff] }
 0x8a1   :  { %10963 = vrot.lane.b32.xlu1 %v19542_v13, %s18912_s1  ;;  %v21334_v13 = vpop.permute.xlu1 %10653 }
 0x8a2   :  { %10885 = vrot.lane.b32.xlu0 %v19656_v48, %s18912_s1 }
 0x8a5   :  { %11121 = vrot.lane.b32.xlu1 %v23466_v24, %s18912_s1  ;;  %v23519_v24 = vld [vmem:[#allocation28_spill] sm:$0xff] }
 0x8a6   :  { %11043 = vrot.lane.b32.xlu0 %v23464_v26, %s18912_s1  ;;  %v23518_v26 = vld [vmem:[#allocation30_spill] sm:$0xff] }
 0x8a9   :  { %11119 = vrot.lane.b32.xlu1 %v19592_v49, %s18912_s1  ;;  %v21338_v49 = vpop.permute.xlu0 %10573 }
 0x8aa   :  { %11041 = vrot.lane.b32.xlu0 %v19675_v57, %s18912_s1 }
 0x8ad   :  { %11277 = vrot.lane.b32.xlu1 %v23470_v35, %s18912_s1  ;;  %v21348_v48 = vpop.permute.xlu0 %10731 }
 0x8ae   :  { %11199 = vrot.lane.b32.xlu0 %v23468_v40, %s18912_s1  ;;  %v23520_v40 = vld [vmem:[#allocation29_spill] sm:$0xff] }
 0x8b1   :  { %11275 = vrot.lane.b32.xlu1 %v19611_v44, %s18912_s1  ;;  %v21342_v44 = vpop.permute.xlu1 %10651 }
 0x8b2   :  { %11197 = vrot.lane.b32.xlu0 %v19700_v11, %s18912_s1  ;;  %v23516_v11 = vld [vmem:[#allocation19_spill] sm:$0xff] }
 0x8b5   :  { %11716 = vrot.lane.b32.xlu1 %v23434_v34, %s18912_s1 }
 0x8b6   :  { %11355 = vrot.lane.b32.xlu0 %v23472_v4, %s18912_s1 }
 0x8b9   :  { %11870 = vrot.lane.b32.xlu1 %v19980_v39, %s18912_s1  ;;  %v23517_v39 = vld [vmem:[#allocation16_spill] sm:$0xff] }
 0x8ba   :  { %11353 = vrot.lane.b32.xlu0 %v23474_v60, %s18912_s1 }
 0x8bd   :  { %11947 = vrot.lane.b32.xlu1 %v23514_v53, %s18912_s1 }
 0x8be   :  { %11639 = vrot.lane.b32.xlu0 %v23515_v62, %s18912_s1 }
 0x8c1   :  { %v8489_v57 = vpop.xlane.xlu1 %8488  ;;  %12101 = vrot.lane.b32.xlu1 %v23516_v11, %s18912_s1 }
 0x8c2   :  { %18717 = vrcp.f32 %v8489_v57  ;;  %11793 = vrot.lane.b32.xlu0 %v23517_v39, %s18912_s1 }
 0x8c4   :  { %v8492_v34 = vpop.xlane.xlu0 %8491 }
 0x8c5   :  { %v8495_v8 = vpop.xlane.xlu1 %8494  ;;  %18719 = vrcp.f32 %v8492_v34  ;;  %12255 = vrot.lane.b32.xlu1 %v23518_v26, %s18912_s1 }
 0x8c6   :  { %18721 = vrcp.f32 %v8495_v8  ;;  %12024 = vrot.lane.b32.xlu0 %v23519_v24, %s18912_s1 }
 0x8c9   :  { %v8498_v60 = vpop.xlane.xlu0 %8497 }
 0x8ca   :  { %18723 = vrcp.f32 %v8498_v60  ;;  %12178 = vrot.lane.b32.xlu0 %v23520_v40, %s18912_s1  ;;  %v23524_v40 = vld [vmem:[#allocation8_spill] sm:$0xff] }
 0x8cd   :  { %v8504_v35 = vpop.xlane.xlu0 %8503 }
 0x8ce   :  { %18725 = vrcp.f32 %v8504_v35  ;;  %v23525_v35 = vld [vmem:[#allocation3_spill] sm:$0xff] }
 0x8cf   :  { %v18718_v4 = vpop.eup %18717 }
 0x8d0   :  { %v8536_v6 = vmul.f32 %v18718_v4, %v21220_v55  ;;  %v23526_v4 = vld [vmem:[#allocation7_spill] sm:$0xff] }
 0x8d1   :  { %v8510_v27 = vpop.xlane.xlu0 %8509 }
 0x8d2   :  { %v18720_v33 = vpop.eup %18719  ;;  %18727 = vrcp.f32 %v8510_v27  ;;  %18170 = vmatmul.mubr.msk.f32.vlgmr.msra.gmra.mxu0 %vm2453_vm5, %v8536_v6  ;;  %v23527_v27 = vld [vmem:[#allocation43_spill] sm:$0xff] }
 0x8d3   :  { %v18722_v29 = vpop.eup %18721  ;;  %18178 = vmatpush3.msk.msra.mxu0 %vm2457_vm2, %v21121_v36  ;;  %18179 = vmatprep.mubr.msk.f32.mxu0 %vm18908_vm0, %v23435_v45  ;;  %v8538_v42 = vmul.f32 %v18720_v33, %v21224_v25 }
 0x8d4   :  { %18187 = vmatprep.subr.mxu0 %v23435_v45  ;;  %v8540_v43 = vmul.f32 %v18722_v29, %v21227_v0  ;;  %v23528_v29 = vld [vmem:[#allocation42_spill] sm:$0xff] }
 0x8d5   :  { %v8516_v50 = vpop.xlane.xlu0 %8515  ;;  %18175 = vmatmul.mubr.msk.f32.vlgmr.msra.gmra.mxu1 %vm2453_vm5, %v8538_v42  ;;  %v23529_v42 = vld [vmem:[#allocation6_spill] sm:$0xff] }
 0x8d6   :  { %18729 = vrcp.f32 %v8516_v50  ;;  %18180 = vmatmul.mubr.msk.f32.vlgmr.msra.gmra.mxu0 %vm2453_vm5, %v8540_v43  ;;  %18183 = vmatpush3.msk.msra.mxu1 %vm2457_vm2, %v21124_v51 }
 0x8d7   :  { %v18724_v55 = vpop.eup %18723  ;;  %18188 = vmatpush3.msk.msra.mxu0 %vm2457_vm2, %v21132_v9  ;;  %18184 = vmatprep.mubr.msk.f32.mxu1 %vm18908_vm0, %v23435_v45 }
 0x8d8   :  { %18192 = vmatprep.subr.mxu1 %v23435_v45  ;;  %v8542_v36 = vmul.f32 %v18724_v55, %v21234_v2  ;;  %18189 = vmatprep.mubr.msk.f32.mxu0 %vm18908_vm0, %v23435_v45 }
 0x8d9   :  { %v8522_v25 = vpop.xlane.xlu0 %8521  ;;  %18197 = vmatprep.subr.mxu0 %v23435_v45 }
 0x8da   :  { %18731 = vrcp.f32 %v8522_v25  ;;  %18185 = vmatmul.mubr.msk.f32.vlgmr.msra.gmra.mxu1 %vm2453_vm5, %v8542_v36  ;;  %v23530_v36 = vld [vmem:[#allocation35_spill] sm:$0xff] }
 0x8db   :  { %v18726_v51 = vpop.eup %18725  ;;  %18193 = vmatpush3.msk.msra.mxu1 %vm2457_vm2, %v21148_v7  ;;  %18194 = vmatprep.mubr.msk.f32.mxu1 %vm18908_vm0, %v23435_v45 }
 0x8dc   :  { %18202 = vmatprep.subr.mxu1 %v23435_v45  ;;  %v8546_v9 = vmul.f32 %v18726_v51, %v21239_v41 }
 0x8dd   :  { %v8528_v0 = vpop.xlane.xlu0 %8527 }
 0x8de   :  { %18733 = vrcp.f32 %v8528_v0  ;;  %18195 = vmatmul.mubr.msk.f32.vlgmr.msra.gmra.mxu1 %vm2453_vm5, %v8546_v9 }
 0x8df   :  { %v18728_v2 = vpop.eup %18727  ;;  %18203 = vmatpush3.msk.msra.mxu1 %vm2457_vm2, %v21172_v30  ;;  %18204 = vmatprep.mubr.msk.f32.mxu1 %vm18908_vm0, %v23435_v45 }
 0x8e0   :  { %18212 = vmatprep.subr.mxu1 %v23435_v45  ;;  %v8550_v7 = vmul.f32 %v18728_v2, %v21243_v56 }
 0x8e2   :  { %18205 = vmatmul.mubr.msk.f32.vlgmr.msra.gmra.mxu1 %vm2453_vm5, %v8550_v7 }
 0x8e3   :  { %v18730_v10 = vpop.eup %18729  ;;  %18213 = vmatpush3.msk.msra.mxu1 %vm2457_vm2, %v21192_v18  ;;  %18214 = vmatprep.mubr.msk.f32.mxu1 %vm18908_vm0, %v23435_v45 }
 0x8e4   :  { %18222 = vmatprep.subr.mxu1 %v23435_v45  ;;  %v8554_v30 = vmul.f32 %v18730_v10, %v21247_v32 }
 0x8e6   :  { %18215 = vmatmul.mubr.msk.f32.vlgmr.msra.gmra.mxu1 %vm2453_vm5, %v8554_v30 }
 0x8e7   :  { %v18732_v41 = vpop.eup %18731  ;;  %18223 = vmatpush3.msk.msra.mxu1 %vm2457_vm2, %v21180_v47  ;;  %18224 = vmatprep.mubr.msk.f32.mxu1 %vm18908_vm0, %v23435_v45 }
 0x8e8   :  { %18232 = vmatprep.subr.mxu1 %v23435_v45  ;;  %v8558_v18 = vmul.f32 %v18732_v41, %v21251_v16 }
 0x8ea   :  { %18225 = vmatmul.mubr.msk.f32.vlgmr.msra.gmra.mxu1 %vm2453_vm5, %v8558_v18 }
 0x8eb   :  { %v18734_v56 = vpop.eup %18733  ;;  %18233 = vmatpush3.msk.msra.mxu1 %vm2457_vm2, %v21190_v12  ;;  %18234 = vmatprep.mubr.msk.f32.mxu1 %vm18908_vm0, %v23435_v45 }
 0x8ec   :  { %18242 = vmatprep.subr.mxu1 %v23435_v45  ;;  %v8562_v47 = vmul.f32 %v18734_v56, %v21255_v61 }
 0x8ee   :  { %18235 = vmatmul.mubr.msk.f32.vlgmr.msra.gmra.mxu1 %vm2453_vm5, %v8562_v47 }
 0x8ef   :  { %18243 = vmatpush3.msk.msra.mxu1 %vm2457_vm2, %v21194_v52  ;;  %18244 = vmatprep.mubr.msk.f32.mxu1 %vm18908_vm0, %v23435_v45 }
 0x8f0   :  { %18252 = vmatprep.subr.mxu1 %v23435_v45 }
 0x8f9   :  { %v8501_v32 = vpop.xlane.xlu1 %8500 }
 0x8fa   :  { %18735 = vrcp.f32 %v8501_v32 }
 0x8fd   :  { %v8507_v12 = vpop.xlane.xlu1 %8506 }
 0x8fe   :  { %18737 = vrcp.f32 %v8507_v12 }
 0x901   :  { %v8513_v16 = vpop.xlane.xlu1 %8512 }
 0x902   :  { %18739 = vrcp.f32 %v8513_v16 }
 0x905   :  { %v8519_v20 = vpop.xlane.xlu1 %8518 }
 0x906   :  { %18741 = vrcp.f32 %v8519_v20 }
 0x907   :  { %v18736_v59 = vpop.eup %18735 }
 0x908   :  { %v8544_v61 = vmul.f32 %v18736_v59, %v21267_v28 }
 0x909   :  { %v8525_v38 = vpop.xlane.xlu1 %8524 }
 0x90a   :  { %18743 = vrcp.f32 %v8525_v38  ;;  %18190 = vmatmul.mubr.msk.f32.vlgmr.msra.gmra.mxu0 %vm2453_vm5, %v8544_v61 }
 0x90b   :  { %v18738_v52 = vpop.eup %18737  ;;  %18198 = vmatpush3.msk.msra.mxu0 %vm2457_vm2, %v21158_v31  ;;  %18199 = vmatprep.mubr.msk.f32.mxu0 %vm18908_vm0, %v23435_v45 }
 0x90c   :  { %18207 = vmatprep.subr.mxu0 %v23435_v45  ;;  %v8548_v22 = vmul.f32 %v18738_v52, %v21272_v63 }
 0x90d   :  { %v8534_v5 = vpop.xlane.xlu1 %8533  ;;  %v8531_v37 = vpop.xlane.xlu0 %8530 }
 0x90e   :  { %18745 = vrcp.f32 %v8534_v5  ;;  %18200 = vmatmul.mubr.msk.f32.vlgmr.msra.gmra.mxu0 %vm2453_vm5, %v8548_v22 }
 0x90f   :  { %v18740_v28 = vpop.eup %18739  ;;  %18747 = vrcp.f32 %v8531_v37  ;;  %18208 = vmatpush3.msk.msra.mxu0 %vm2457_vm2, %v21176_v23  ;;  %18209 = vmatprep.mubr.msk.f32.mxu0 %vm18908_vm0, %v23435_v45 }
 0x910   :  { %18217 = vmatprep.subr.mxu0 %v23435_v45  ;;  %v8552_v31 = vmul.f32 %v18740_v28, %v21276_v3 }
 0x911   :  { %v21438_v53 = vpop.permute.xlu1 %10809  ;;  %v21440_v63 = vpop.permute.xlu0 %10729 }
 0x912   :  { %18210 = vmatmul.mubr.msk.f32.vlgmr.msra.gmra.mxu0 %vm2453_vm5, %v8552_v31 }
 0x913   :  { %v18742_v62 = vpop.eup %18741  ;;  %18218 = vmatpush3.msk.msra.mxu0 %vm2457_vm2, %v21178_v54  ;;  %18219 = vmatprep.mubr.msk.f32.mxu0 %vm18908_vm0, %v23435_v45 }
 0x914   :  { %18227 = vmatprep.subr.mxu0 %v23435_v45  ;;  %v8556_v23 = vmul.f32 %v18742_v62, %v21280_v19 }
 0x915   :  { %v21449_v57 = vpop.permute.xlu1 %10807  ;;  %v10888_v3 = vpop.permute.xlu0 %10887 }
 0x916   :  { %18220 = vmatmul.mubr.msk.f32.vlgmr.msra.gmra.mxu0 %vm2453_vm5, %v8556_v23 }
 0x917   :  { %v18744_v11 = vpop.eup %18743  ;;  %18228 = vmatpush3.msk.msra.mxu0 %vm2457_vm2, %v21184_v14  ;;  %18229 = vmatprep.mubr.msk.f32.mxu0 %vm18908_vm0, %v23435_v45 }
 0x918   :  { %18237 = vmatprep.subr.mxu0 %v23435_v45  ;;  %v8560_v54 = vmul.f32 %v18744_v11, %v21284_v21  ;;  %v23521_v21 = vld [vmem:[#allocation24_spill] sm:$0xff] }
 0x919   :  { %v10886_v39 = vpop.permute.xlu0 %10885  ;;  %v10966_v34 = vpop.permute.xlu1 %10965 }
 0x91a   :  { %18230 = vmatmul.mubr.msk.f32.vlgmr.msra.gmra.mxu0 %vm2453_vm5, %v8560_v54 }
 0x91b   :  { %v18746_v19 = vpop.eup %18745  ;;  %18238 = vmatpush3.msk.msra.mxu0 %vm2457_vm2, %v21196_v1  ;;  %18239 = vmatprep.mubr.msk.f32.mxu0 %vm18908_vm0, %v23435_v45  ;;  %v23522_v1 = vld [vmem:[#allocation5_spill] sm:$0xff] }
 0x91c   :  { %v18748_v8 = vpop.eup %18747  ;;  %18247 = vmatprep.subr.mxu0 %v23435_v45  ;;  %v8566_v14 = vmul.f32 %v18746_v19, %v21288_v58 }
 0x91d   :  { %v11044_v26 = vpop.permute.xlu0 %11043  ;;  %v8564_v24 = vmul.f32 %v18748_v8, %v21290_v15  ;;  %v10964_v60 = vpop.permute.xlu1 %10963  ;;  %v23523_v15 = vld [vmem:[#allocation4_spill] sm:$0xff] }
 0x91e   :  { %18245 = vmatmul.mubr.msk.f32.vlgmr.msra.gmra.mxu1 %vm2453_vm5, %v8566_v14 }
 0x91f   :  { %18240 = vmatmul.mubr.msk.f32.vlgmr.msra.gmra.mxu0 %vm2453_vm5, %v8564_v24  ;;  %18253 = vmatpush3.xpose.msk.msra.mxu1 %vm1042_vm1, %v23521_v21 }
 0x920   :  { %18248 = vmatpush3.xpose.msk.msra.mxu0 %vm1042_vm1, %v23522_v1  ;;  %18249 = vmatprep.mubr.msk.f32.mxu0 %vm18908_vm0, %v23435_v45 }
 0x921   :  { %18254 = vmatprep.mubr.msk.f32.mxu1 %vm18908_vm0, %v23435_v45  ;;  %18257 = vmatprep.subr.mxu0 %v23435_v45  ;;  %v11042_v58 = vpop.permute.xlu0 %11041  ;;  %v11122_v6 = vpop.permute.xlu1 %11121 }
 0x922   :  { %18262 = vmatprep.subr.mxu1 %v23435_v45  ;;  %18255 = vmatmul.mubr.msk.f32.vlgmr.msra.gmra.mxu1 %vm1042_vm1, %v23523_v15 }
 0x923   :  { %18250 = vmatmul.mubr.msk.f32.vlgmr.msra.gmra.mxu0 %vm1042_vm1, %v23524_v40  ;;  %18263 = vmatpush3.xpose.msk.msra.mxu1 %vm1042_vm1, %v23525_v35 }
 0x924   :  { %18258 = vmatpush3.xpose.msk.msra.mxu0 %vm1042_vm1, %v23526_v4  ;;  %18259 = vmatprep.mubr.msk.f32.mxu0 %vm18908_vm0, %v23435_v45 }
 0x925   :  { %18264 = vmatprep.mubr.msk.f32.mxu1 %vm18908_vm0, %v23435_v45  ;;  %18267 = vmatprep.subr.mxu0 %v23435_v45  ;;  %v11200_v33 = vpop.permute.xlu0 %11199 }
 0x926   :  { %18272 = vmatprep.subr.mxu1 %v23435_v45  ;;  %18265 = vmatmul.mubr.msk.f32.vlgmr.msra.gmra.mxu1 %vm1042_vm1, %v23527_v27 }
 0x927   :  { %18260 = vmatmul.mubr.msk.f32.vlgmr.msra.gmra.mxu0 %vm1042_vm1, %v23528_v29  ;;  %18273 = vmatpush3.xpose.msk.msra.mxu1 %vm1042_vm1, %v21328_v46  ;;  %v11120_v46 = vpop.permute.xlu1 %11119 }
 0x928   :  { %18268 = vmatpush3.xpose.msk.msra.mxu0 %vm1042_vm1, %v23529_v42  ;;  %18269 = vmatprep.mubr.msk.f32.mxu0 %vm18908_vm0, %v23435_v45 }
 0x929   :  { %18274 = vmatprep.mubr.msk.f32.mxu1 %vm18908_vm0, %v23435_v45  ;;  %18277 = vmatprep.subr.mxu0 %v23435_v45  ;;  %v11198_v43 = vpop.permute.xlu0 %11197 }
 0x92a   :  { %18282 = vmatprep.subr.mxu1 %v23435_v45  ;;  %18275 = vmatmul.mubr.msk.f32.vlgmr.msra.gmra.mxu1 %vm1042_vm1, %v21338_v49 }
 0x92b   :  { %18270 = vmatmul.mubr.msk.f32.vlgmr.msra.gmra.mxu0 %vm1042_vm1, %v21322_v17  ;;  %18283 = vmatpush3.xpose.msk.msra.mxu1 %vm1042_vm1, %v21348_v48  ;;  %v11278_v17 = vpop.permute.xlu1 %11277 }
 0x92c   :  { %18278 = vmatpush3.xpose.msk.msra.mxu0 %vm1042_vm1, %v21334_v13  ;;  %18279 = vmatprep.mubr.msk.f32.mxu0 %vm18908_vm0, %v23435_v45 }
 0x92d   :  { %18284 = vmatprep.mubr.msk.f32.mxu1 %vm18908_vm0, %v23435_v45  ;;  %18287 = vmatprep.subr.mxu0 %v23435_v45  ;;  %v11356_v13 = vpop.permute.xlu0 %11355 }
 0x92e   :  { %18292 = vmatprep.subr.mxu1 %v23435_v45  ;;  %18285 = vmatmul.mubr.msk.f32.vlgmr.msra.gmra.mxu1 %vm1042_vm1, %v21440_v63 }
 0x92f   :  { %18280 = vmatmul.mubr.msk.f32.vlgmr.msra.gmra.mxu0 %vm1042_vm1, %v21342_v44  ;;  %18293 = vmatpush3.xpose.msk.msra.mxu1 %vm1042_vm1, %v10888_v3  ;;  %v11276_v49 = vpop.permute.xlu1 %11275 }
 0x930   :  { %18288 = vmatpush3.xpose.msk.msra.mxu0 %vm1042_vm1, %v21438_v53  ;;  %18289 = vmatprep.mubr.msk.f32.mxu0 %vm18908_vm0, %v23435_v45 }
 0x931   :  { %18294 = vmatprep.mubr.msk.f32.mxu1 %vm18908_vm0, %v23435_v45  ;;  %18297 = vmatprep.subr.mxu0 %v23435_v45  ;;  %v11354_v44 = vpop.permute.xlu0 %11353 }
 0x932   :  { %18302 = vmatprep.subr.mxu1 %v23435_v45  ;;  %18295 = vmatmul.mubr.msk.f32.vlgmr.msra.gmra.mxu1 %vm1042_vm1, %v10886_v39 }
 0x933   :  { %18290 = vmatmul.mubr.msk.f32.vlgmr.msra.gmra.mxu0 %vm1042_vm1, %v21449_v57  ;;  %18303 = vmatpush3.xpose.msk.msra.mxu1 %vm1042_vm1, %v11044_v26  ;;  %v11717_v48 = vpop.permute.xlu1 %11716 }
 0x934   :  { %18298 = vmatpush3.xpose.msk.msra.mxu0 %vm1042_vm1, %v10966_v34  ;;  %18299 = vmatprep.mubr.msk.f32.mxu0 %vm18908_vm0, %v23435_v45 }
 0x935   :  { %18304 = vmatprep.mubr.msk.f32.mxu1 %vm18908_vm0, %v23435_v45  ;;  %18307 = vmatprep.subr.mxu0 %v23435_v45  ;;  %v11640_v50 = vpop.permute.xlu0 %11639 }
 0x936   :  { %18312 = vmatprep.subr.mxu1 %v23435_v45  ;;  %18305 = vmatmul.mubr.msk.f32.vlgmr.msra.gmra.mxu1 %vm1042_vm1, %v11042_v58 }
 0x937   :  { %18300 = vmatmul.mubr.msk.f32.vlgmr.msra.gmra.mxu0 %vm1042_vm1, %v10964_v60  ;;  %18313 = vmatpush3.xpose.msk.msra.mxu1 %vm1042_vm1, %v11200_v33 }
 0x938   :  { %18308 = vmatpush3.xpose.msk.msra.mxu0 %vm1042_vm1, %v11122_v6  ;;  %18309 = vmatprep.mubr.msk.f32.mxu0 %vm18908_vm0, %v23435_v45 }
 0x939   :  { %18314 = vmatprep.mubr.msk.f32.mxu1 %vm18908_vm0, %v23435_v45  ;;  %18317 = vmatprep.subr.mxu0 %v23435_v45 }
 0x93a   :  { %18322 = vmatprep.subr.mxu1 %v23435_v45  ;;  %18315 = vmatmul.mubr.msk.f32.vlgmr.msra.gmra.mxu1 %vm1042_vm1, %v11198_v43 }
 0x93b   :  { %18310 = vmatmul.mubr.msk.f32.vlgmr.msra.gmra.mxu0 %vm1042_vm1, %v11120_v46  ;;  %18323 = vmatpush3.xpose.msk.msra.mxu1 %vm1042_vm1, %v11356_v13 }
 0x93c   :  { %18318 = vmatpush3.xpose.msk.msra.mxu0 %vm1042_vm1, %v11278_v17  ;;  %18319 = vmatprep.mubr.msk.f32.mxu0 %vm18908_vm0, %v23435_v45 }
 0x93d   :  { %18324 = vmatprep.mubr.msk.f32.mxu1 %vm18908_vm0, %v23435_v45  ;;  %18327 = vmatprep.subr.mxu0 %v23435_v45 }
 0x93e   :  { %18332 = vmatprep.subr.mxu1 %v23435_v45  ;;  %18325 = vmatmul.mubr.msk.f32.vlgmr.msra.gmra.mxu1 %vm1042_vm1, %v11354_v44 }
 0x93f   :  { %18320 = vmatmul.mubr.msk.f32.vlgmr.msra.gmra.mxu0 %vm1042_vm1, %v11276_v49  ;;  %18333 = vmatpush3.msk.msra.mxu1 %vm2457_vm2, %v11717_v48 }
 0x940   :  { %18328 = vmatpush3.msk.msra.mxu0 %vm2457_vm2, %v11640_v50  ;;  %18329 = vmatprep.mubr.msk.f32.mxu0 %vm18908_vm0, %v23435_v45 }
 0x941   :  { %18334 = vmatprep.mubr.msk.f32.mxu1 %vm18908_vm0, %v23435_v45  ;;  %18337 = vmatprep.subr.mxu0 %v23435_v45 }
 0x942   :  { %18342 = vmatprep.subr.mxu1 %v23435_v45 }
 0x992   :  { %v8640_v55 = vpop.f32.mrf.mxu0 }
 0x993   :  { %v9821_v25 = vrot.slane %v8640_v55, %v23530_v36 }
 0x994   :  { %v18171_v51 = vpop.f32.mrf.mxu0 }
 0x995   :  { %v9822_v9 = vcombine.high %v9821_v25, %v9821_v25  ;;  %v9829_v0 = vrot.slane %v9821_v25, %v23530_v36  ;;  %v8717_v2 = vpop.f32.mrf.mxu1 }
 0x996   :  { %v9844_v7 = vrot.slane %v8717_v2, %v23530_v36  ;;  %v8794_v10 = vpop.f32.mrf.mxu0 }
 0x997   :  { %v9836_v30 = vrot.slane %v9822_v9, %v23530_v36  ;;  %v9867_v41 = vrot.slane %v8794_v10, %v23530_v36  ;;  %v18176_v18 = vpop.f32.mrf.mxu1  ;;  %v9837_v56 = vcombine.high %v9829_v0, %v9829_v0 }
 0x998   :  { %v9845_v47 = vcombine.high %v9844_v7, %v9844_v7  ;;  %v9852_v32 = vrot.slane %v9844_v7, %v23530_v36  ;;  %v18181_v12 = vpop.f32.mrf.mxu0 }
 0x999   :  { %v13867_v16 = vcombine.low %v9829_v0, %v9836_v30  ;;  %v9868_v20 = vcombine.high %v9867_v41, %v9867_v41  ;;  %v9875_v59 = vrot.slane %v9867_v41, %v23530_v36 }
 0x99a   :  { %v9859_v61 = vrot.slane %v9845_v47, %v23530_v36  ;;  %v9860_v38 = vcombine.high %v9852_v32, %v9852_v32  ;;  %v13868_v52 = vcombine.low %v9837_v56, %v9852_v32  ;;  %v8871_v22 = vpop.f32.mrf.mxu1 }
 0x99b   :  { %v9882_v5 = vrot.slane %v9868_v20, %v23530_v36  ;;  %v9890_v37 = vrot.slane %v8871_v22, %v23530_v36  ;;  %v13877_v28 = vrot.slane %v13867_v16, %v23530_v36  ;;  %v9883_v62 = vcombine.high %v9875_v59, %v9875_v59 }
 0x99c   :  { %v13869_v31 = vcombine.low %v9859_v61, %v9860_v38  ;;  %v13884_v53 = vrot.slane %v13868_v52, %v23530_v36  ;;  %v18186_v63 = vpop.f32.mrf.mxu1 }
 0x99d   :  { %v13870_v23 = vcombine.low %v9875_v59, %v9882_v5  ;;  %v9891_v57 = vcombine.high %v9890_v37, %v9890_v37  ;;  %v9898_v3 = vrot.slane %v9890_v37, %v23530_v36 }
 0x99e   :  { %v13891_v11 = vrot.slane %v13869_v31, %v23530_v36  ;;  %v13899_v54 = vcombine.low %v13877_v28, %v13884_v53  ;;  %v9025_v39 = vpop.f32.mrf.mxu1 }
 0x99f   :  { %v13898_v34 = vrot.slane %v13870_v23, %v23530_v36  ;;  %v9905_v19 = vrot.slane %v9891_v57, %v23530_v36  ;;  %v9906_v8 = vcombine.high %v9898_v3, %v9898_v3  ;;  %v13916_v14 = vcombine.low %v9883_v62, %v9898_v3 }
 0x9a0   :  { %v9936_v26 = vrot.slane %v9025_v39, %v23530_v36  ;;  %v18196_v24 = vpop.f32.mrf.mxu1  ;;  %v13907_v40 = vrot.slane %v13899_v54, %v23530_v36 }
 0x9a1   :  { %v13900_v21 = vcombine.low %v13891_v11, %v13898_v34  ;;  %v13917_v60 = vcombine.low %v9905_v19, %v9906_v8  ;;  %v13926_v4 = vrot.slane %v13916_v14, %v23530_v36 }
 0x9a2   :  { %v9937_v1 = vcombine.high %v9936_v26, %v9936_v26  ;;  %v9944_v58 = vrot.slane %v9936_v26, %v23530_v36  ;;  %v9179_v15 = vpop.f32.mrf.mxu1 }
 0x9a3   :  { %v13914_v35 = vrot.slane %v13900_v21, %v23530_v36  ;;  %v13933_v6 = vrot.slane %v13917_v60, %v23530_v36  ;;  %v9982_v55 = vrot.slane %v9179_v15, %v23530_v36 }
 0x9a4   :  { %v9951_v27 = vrot.slane %v9937_v1, %v23530_v36  ;;  %v9952_v33 = vcombine.high %v9944_v58, %v9944_v58  ;;  %v18206_v29 = vpop.f32.mrf.mxu1 }
 0x9a5   :  { %v21597_v42 = vcombine.low %v13926_v4, %v13933_v6  ;;  %v21599_v46 = vcombine.low %v13907_v40, %v13914_v35  ;;  %v9983_v25 = vcombine.high %v9982_v55, %v9982_v55  ;;  %v9990_v51 = vrot.slane %v9982_v55, %v23530_v36 }
 0x9a6   :  { %v21601_v43 = vcombine.low %v9951_v27, %v9952_v33  ;;  %v9333_v17 = vpop.f32.mrf.mxu1 }
 0x9a7   :  { %v10028_v9 = vrot.slane %v9333_v17, %v23530_v36  ;;  %v9997_v7 = vrot.slane %v9983_v25, %v23530_v36  ;;  %v9998_v10 = vcombine.high %v9990_v51, %v9990_v51  ;;  %v13956_v16 = vrot.slane %v21597_v42, %v23530_v36 }
 0x9a8   :  { %v18216_v13 = vpop.f32.mrf.mxu1  ;;  %v13975_v62 = vrot.slane %v21601_v43, %v23530_v36 }
 0x9a9   :  { %v10029_v47 = vcombine.high %v10028_v9, %v10028_v9  ;;  %v13968_v38 = vcombine.low %v9997_v7, %v9998_v10  ;;  %v10036_v52 = vrot.slane %v10028_v9, %v23530_v36 }
 0x9aa   :  { %v9487_v49 = vpop.f32.mrf.mxu1 }
 0x9ab   :  { %v10074_v30 = vrot.slane %v9487_v49, %v23530_v36  ;;  %v10043_v23 = vrot.slane %v10029_v47, %v23530_v36  ;;  %v10044_v8 = vcombine.high %v10036_v52, %v10036_v52  ;;  %v13996_v60 = vrot.slane %v13968_v38, %v23530_v36 }
 0x9ac   :  { %v18226_v44 = vpop.f32.mrf.mxu1 }
 0x9ad   :  { %v10075_v22 = vcombine.high %v10074_v30, %v10074_v30  ;;  %v10082_v5 = vrot.slane %v10074_v30, %v23530_v36  ;;  %v14016_v17 = vcombine.low %v10043_v23, %v10044_v8 }
 0x9ae   :  { %v9641_v48 = vpop.f32.mrf.mxu1 }
 0x9af   :  { %v10120_v32 = vrot.slane %v9641_v48, %v23530_v36  ;;  %v10089_v14 = vrot.slane %v10075_v22, %v23530_v36  ;;  %v10090_v26 = vcombine.high %v10082_v5, %v10082_v5  ;;  %v14038_v22 = vrot.slane %v14016_v17, %v23530_v36 }
 0x9b0   :  { %v18236_v50 = vpop.f32.mrf.mxu1 }
 0x9b1   :  { %v10121_v57 = vcombine.high %v10120_v32, %v10120_v32  ;;  %v21622_v3 = vrot.slane %v10120_v32, %v23530_v36  ;;  %v14064_v13 = vcombine.low %v10089_v14, %v10090_v26 }
 0x9b3   :  { %v10135_v40 = vrot.slane %v10121_v57, %v23530_v36  ;;  %v10136_v35 = vcombine.high %v21622_v3, %v21622_v3 }
 0x9b5   :  { %v21640_v9 = vcombine.low %v10135_v40, %v10136_v35 }
 0x9ca   :  { %v8948_v0 = vpop.f32.mrf.mxu0 }
 0x9cb   :  { %v9913_v2 = vrot.slane %v8948_v0, %v23530_v36 }
 0x9cc   :  { %v18191_v41 = vpop.f32.mrf.mxu0 }
 0x9cd   :  { %v9914_v18 = vcombine.high %v9913_v2, %v9913_v2  ;;  %v9921_v56 = vrot.slane %v9913_v2, %v23530_v36 }
 0x9ce   :  { %v9102_v12 = vpop.f32.mrf.mxu0 }
 0x9cf   :  { %v9928_v20 = vrot.slane %v9914_v18, %v23530_v36  ;;  %v9929_v59 = vcombine.high %v9921_v56, %v9921_v56  ;;  %v9959_v61 = vrot.slane %v9102_v12, %v23530_v36 }
 0x9d0   :  { %v18201_v37 = vpop.f32.mrf.mxu0 }
 0x9d1   :  { %v13918_v28 = vcombine.low %v9921_v56, %v9928_v20  ;;  %v13919_v31 = vcombine.low %v9929_v59, %v9944_v58  ;;  %v9960_v53 = vcombine.high %v9959_v61, %v9959_v61  ;;  %v9967_v63 = vrot.slane %v9959_v61, %v23530_v36 }
 0x9d2   :  { %v9256_v11 = vpop.f32.mrf.mxu0  ;;  %v14080_v37 = vrot.slane %v14064_v13, %v23530_v36 }
 0x9d3   :  { %v13940_v54 = vrot.slane %v13918_v28, %v23530_v36  ;;  %v13947_v39 = vrot.slane %v13919_v31, %v23530_v36  ;;  %v9974_v34 = vrot.slane %v9960_v53, %v23530_v36  ;;  %v9975_v19 = vcombine.high %v9967_v63, %v9967_v63 }
 0x9d4   :  { %v10005_v24 = vrot.slane %v9256_v11, %v23530_v36  ;;  %v18211_v21 = vpop.f32.mrf.mxu0 }
 0x9d5   :  { %v13949_v1 = vcombine.low %v13940_v54, %v13947_v39  ;;  %v13966_v58 = vcombine.low %v9967_v63, %v9974_v34  ;;  %v13967_v15 = vcombine.low %v9975_v19, %v9990_v51 }
 0x9d6   :  { %v10006_v4 = vcombine.high %v10005_v24, %v10005_v24  ;;  %v10013_v6 = vrot.slane %v10005_v24, %v23530_v36  ;;  %v9410_v27 = vpop.f32.mrf.mxu0 }
 0x9d7   :  { %v13963_v33 = vrot.slane %v13949_v1, %v23530_v36  ;;  %v13982_v29 = vrot.slane %v13966_v58, %v23530_v36  ;;  %v13989_v42 = vrot.slane %v13967_v15, %v23530_v36  ;;  %v10051_v43 = vrot.slane %v9410_v27, %v23530_v36 }
 0x9d8   :  { %v10020_v49 = vrot.slane %v10006_v4, %v23530_v36  ;;  %v10021_v44 = vcombine.high %v10013_v6, %v10013_v6  ;;  %v18221_v48 = vpop.f32.mrf.mxu0 }
 0x9d9   :  { %v13997_v50 = vcombine.low %v13975_v62, %v13982_v29  ;;  %v13998_v55 = vcombine.low %v13989_v42, %v13996_v60  ;;  %v10052_v25 = vcombine.high %v10051_v43, %v10051_v43  ;;  %v10059_v51 = vrot.slane %v10051_v43, %v23530_v36 }
 0x9da   :  { %v14014_v0 = vcombine.low %v10013_v6, %v10020_v49  ;;  %v14015_v2 = vcombine.low %v10021_v44, %v10036_v52  ;;  %v9564_v7 = vpop.f32.mrf.mxu0  ;;  %v21642_v10 = vcombine.low %v13956_v16, %v13963_v33  ;;  %v21796_v44 = vpop.permute.xlu1 %11870 }
 0x9db   :  { %v14005_v30 = vrot.slane %v13997_v50, %v23530_v36  ;;  %v10066_v41 = vrot.slane %v10052_v25, %v23530_v36  ;;  %v10067_v18 = vcombine.high %v10059_v51, %v10059_v51  ;;  %v10097_v56 = vrot.slane %v9564_v7, %v23530_v36 }
 0x9dc   :  { %v14024_v47 = vrot.slane %v14014_v0, %v23530_v36  ;;  %v14031_v32 = vrot.slane %v14015_v2, %v23530_v36  ;;  %v18231_v12 = vpop.f32.mrf.mxu0  ;;  %v18493_v20 = vpack.i.bf16 %v21642_v10, %v21599_v46  ;;  %v14012_v59 = vrot.slane %v13998_v55, %v23530_v36 }
 0x9dd   :  { %v14017_v61 = vcombine.low %v10059_v51, %v10066_v41  ;;  %v14063_v16 = vcombine.low %v10067_v18, %v10082_v5  ;;  %v10098_v38 = vcombine.high %v10097_v56, %v10097_v56  ;;  %v10105_v52 = vrot.slane %v10097_v56, %v23530_v36 }
 0x9de   :  { %v14046_v28 = vcombine.low %v14024_v47, %v14031_v32  ;;  %v9795_v31 = vpop.f32.mrf.mxu1  ;;  %v21655_v53 = vcombine.low %v14005_v30, %v14012_v59  ;;  %v14122_v5 = vrot.slane %v21640_v9, %v23530_v36 }
 0x9df   :  { %v14045_v63 = vrot.slane %v14017_v61, %v23530_v36  ;;  %v14073_v62 = vrot.slane %v14063_v16, %v23530_v36  ;;  %v10112_v23 = vrot.slane %v10098_v38, %v23530_v36  ;;  %v10113_v57 = vcombine.high %v10105_v52, %v10105_v52  ;;  %v9718_v11 = vpop.f32.mrf.mxu0 }
 0x9e0   :  { %v14054_v54 = vrot.slane %v14046_v28, %v23530_v36  ;;  %v10143_v39 = vrot.slane %v9718_v11, %v23530_v36  ;;  %v10166_v34 = vrot.slane %v9795_v31, %v23530_v36  ;;  %v18246_v19 = vpop.f32.mrf.mxu1 }
 0x9e1   :  { %v14047_v8 = vcombine.low %v14038_v22, %v14045_v63  ;;  %v14095_v14 = vcombine.low %v14073_v62, %v14080_v37  ;;  %v14065_v26 = vcombine.low %v10105_v52, %v10112_v23  ;;  %v14066_v24 = vcombine.low %v10113_v57, %v21622_v3  ;;  %v18241_v21 = vpop.f32.mrf.mxu0 }
 0x9e2   :  { %v10144_v60 = vcombine.high %v10143_v39, %v10143_v39  ;;  %v10151_v1 = vrot.slane %v10143_v39, %v23530_v36  ;;  %v10167_v58 = vcombine.high %v10166_v34, %v10166_v34  ;;  %v10174_v15 = vrot.slane %v10166_v34, %v23530_v36  ;;  %v10335_v40 = vpop.f32.mrf.mxu1 }
 0x9e3   :  { %v14061_v35 = vrot.slane %v14047_v8, %v23530_v36  ;;  %v14087_v4 = vrot.slane %v14065_v26, %v23530_v36  ;;  %v14094_v6 = vrot.slane %v14066_v24, %v23530_v36  ;;  %v10257_v27 = vpop.f32.mrf.mxu0  ;;  %v11432_v33 = vmul.f32 0.17677669, %v10335_v40 }
 0x9e4   :  { %v10158_v29 = vrot.slane %v10144_v60, %v23530_v36  ;;  %v10159_v42 = vcombine.high %v10151_v1, %v10151_v1  ;;  %v10181_v3 = vrot.slane %v10167_v58, %v23530_v36  ;;  %v10182_v43 = vcombine.high %v10174_v15, %v10174_v15  ;;  %v18256_v17 = vpop.f32.mrf.mxu1 }
 0x9e5   :  { %v14096_v13 = vcombine.low %v14087_v4, %v14094_v6  ;;  %v11431_v49 = vmul.f32 0.17677669, %v10257_v27  ;;  %v21675_v48 = vsel %vm19734_vm3, %v11432_v33, -1e+30  ;;  %v18251_v50 = vpop.f32.mrf.mxu0  ;;  %v21677_v55 = vcombine.low %v14054_v54, %v14061_v35 }
 0x9e6   :  { %v14113_v25 = vcombine.low %v10151_v1, %v10158_v29  ;;  %v14114_v51 = vcombine.low %v10159_v42, %v10174_v15  ;;  %v14115_v9 = vcombine.low %v10181_v3, %v10182_v43  ;;  %v10491_v0 = vpop.f32.mrf.mxu1  ;;  %v11466_v2 = vsel %vm2276_vm4, %v21675_v48, -inf }
 0x9e7   :  { %v14110_v7 = vrot.slane %v14096_v13, %v23530_v36  ;;  %v21684_v30 = vsel %vm19734_vm3, %v11431_v49, -1e+30  ;;  %v10413_v41 = vpop.f32.mrf.mxu0  ;;  %v11434_v18 = vmul.f32 0.17677669, %v10491_v0  ;;  %11467 = vmax.xlane.f32.xlu0 %v11466_v2  ;;  %v18508_v56 = vpack.i.bf16 %v21677_v55, %v21655_v53  ;;  %v23532_v49 = vld [vmem:[#allocation21_spill] sm:$0xff]  ;;  %v23546_v53 = vld [vmem:[#allocation15_spill] sm:$0xff] }
 0x9e8   :  { %v14129_v47 = vrot.slane %v14113_v25, %v23530_v36  ;;  %v14136_v32 = vrot.slane %v14114_v51, %v23530_v36  ;;  %v14143_v12 = vrot.slane %v14115_v9, %v23530_v36  ;;  %v11433_v59 = vmul.f32 0.17677669, %v10413_v41  ;;  %v18266_v61 = vpop.f32.mrf.mxu1  ;;  %v23533_v9 = vld [vmem:[#allocation31_spill] sm:$0xff] }
 0x9e9   :  { %v21693_v16 = vsel %vm19734_vm3, %v11434_v18, -1e+30  ;;  %v11463_v38 = vsel %vm2276_vm4, %v21684_v30, -inf  ;;  %v18261_v52 = vpop.f32.mrf.mxu0  ;;  %v14103_v22 = vrot.slane %v14095_v14, %v23530_v36 }
 0x9ea   :  { %v14144_v37 = vcombine.low %v14122_v5, %v14129_v47  ;;  %v14145_v28 = vcombine.low %v14136_v32, %v14143_v12  ;;  %v21700_v31 = vsel %vm19734_vm3, %v11433_v59, -1e+30  ;;  %11464 = vmax.xlane.f32.xlu1 %v11463_v38  ;;  %v10647_v63 = vpop.f32.mrf.mxu1  ;;  %v11472_v57 = vsel %vm2276_vm4, %v21693_v16, -inf }
 0x9eb   :  { %v10569_v62 = vpop.f32.mrf.mxu0  ;;  %v11469_v23 = vsel %vm2276_vm4, %v21700_v31, -inf  ;;  %v21706_v11 = vcombine.low %v14103_v22, %v14110_v7  ;;  %v11436_v0 = vmul.f32 0.17677669, %v10647_v63 }
 0x9ec   :  { %v14152_v54 = vrot.slane %v14144_v37, %v23530_v36  ;;  %v14159_v5 = vrot.slane %v14145_v28, %v23530_v36  ;;  %v11435_v39 = vmul.f32 0.17677669, %v10569_v62  ;;  %11470 = vmax.xlane.f32.xlu0 %v11469_v23  ;;  %v18276_v34 = vpop.f32.mrf.mxu1 }
 0x9ed   :  { %v18271_v19 = vpop.f32.mrf.mxu0  ;;  %v21726_v7 = vsel %vm19734_vm3, %v11436_v0, -1e+30 }
 0x9ee   :  { %v21712_v8 = vsel %vm19734_vm3, %v11435_v39, -1e+30  ;;  %11473 = vmax.xlane.f32.xlu1 %v11472_v57  ;;  %v10803_v14 = vpop.f32.mrf.mxu1  ;;  %v21714_v26 = vcombine.low %v14152_v54, %v14159_v5  ;;  %v11478_v32 = vsel %vm2276_vm4, %v21726_v7, -inf }
 0x9ef   :  { %v10725_v24 = vpop.f32.mrf.mxu0  ;;  %v11475_v21 = vsel %vm2276_vm4, %v21712_v8, -inf  ;;  %v11438_v41 = vmul.f32 0.17677669, %v10803_v14 }
 0x9f0   :  { %11476 = vmax.xlane.f32.xlu0 %v11475_v21  ;;  %v18286_v60 = vpop.f32.mrf.mxu1  ;;  %v18523_v1 = vpack.i.bf16 %v21714_v26, %v21706_v11  ;;  %v11437_v2 = vmul.f32 0.17677669, %v10725_v24 }
 0x9f1   :  { %v18281_v58 = vpop.f32.mrf.mxu0  ;;  %v21736_v12 = vsel %vm19734_vm3, %v11438_v41, -1e+30 }
 0x9f2   :  { %v10959_v15 = vpop.f32.mrf.mxu1  ;;  %v21730_v18 = vsel %vm19734_vm3, %v11437_v2, -1e+30  ;;  %v11484_v22 = vsel %vm2276_vm4, %v21736_v12, -inf }
 0x9f3   :  { %v10881_v40 = vpop.f32.mrf.mxu0  ;;  %v11440_v59 = vmul.f32 0.17677669, %v10959_v15  ;;  %v11481_v61 = vsel %vm2276_vm4, %v21730_v18, -inf }
 0x9f4   :  { %v18296_v35 = vpop.f32.mrf.mxu1  ;;  %v11439_v47 = vmul.f32 0.17677669, %v10881_v40 }
 0x9f5   :  { %v18291_v4 = vpop.f32.mrf.mxu0  ;;  %v21748_v37 = vsel %vm19734_vm3, %v11440_v59, -1e+30 }
 0x9f6   :  { %v11115_v6 = vpop.f32.mrf.mxu1  ;;  %v21742_v38 = vsel %vm19734_vm3, %v11439_v47, -1e+30  ;;  %v11490_v57 = vsel %vm2276_vm4, %v21748_v37, -inf }
 0x9f7   :  { %v11037_v27 = vpop.f32.mrf.mxu0  ;;  %v11442_v28 = vmul.f32 0.17677669, %v11115_v6  ;;  %v11487_v63 = vsel %vm2276_vm4, %v21742_v38, -inf  ;;  %v23534_v6 = vld [vmem:[#allocation32_spill] sm:$0xff] }
 0x9f8   :  { %v18306_v33 = vpop.f32.mrf.mxu1  ;;  %v11441_v52 = vmul.f32 0.17677669, %v11037_v27  ;;  %v23535_v27 = vld [vmem:[#allocation25_spill] sm:$0xff] }
 0x9f9   :  { %v18301_v29 = vpop.f32.mrf.mxu0  ;;  %v21760_v54 = vsel %vm19734_vm3, %v11442_v28, -1e+30  ;;  %v23536_v33 = vld [vmem:[#allocation33_spill] sm:$0xff] }
 0x9fa   :  { %v11271_v42 = vpop.f32.mrf.mxu1  ;;  %v21754_v62 = vsel %vm19734_vm3, %v11441_v52, -1e+30  ;;  %v11496_v14 = vsel %vm2276_vm4, %v21760_v54, -inf  ;;  %v21798_v29 = vpop.permute.xlu0 %11793 }
 0x9fb   :  { %v11193_v3 = vpop.f32.mrf.mxu0  ;;  %v11444_v5 = vmul.f32 0.17677669, %v11271_v42  ;;  %v11493_v39 = vsel %vm2276_vm4, %v21754_v62, -inf  ;;  %v21800_v42 = vpop.permute.xlu1 %11947 }
 0x9fc   :  { %v18316_v43 = vpop.f32.mrf.mxu1  ;;  %v11443_v23 = vmul.f32 0.17677669, %v11193_v3 }
 0x9fd   :  { %v18311_v17 = vpop.f32.mrf.mxu0  ;;  %v21772_v24 = vsel %vm19734_vm3, %v11444_v5, -1e+30 }
 0x9fe   :  { %v11427_v13 = vpop.f32.mrf.mxu1  ;;  %v21766_v34 = vsel %vm19734_vm3, %v11443_v23, -1e+30  ;;  %v11502_v15 = vsel %vm2276_vm4, %v21772_v24, -inf  ;;  %v21802_v3 = vpop.permute.xlu0 %12024 }
 0x9ff   :  { %12409 = vrot.lane.b32.xlu1 %v23532_v49, %s18912_s1  ;;  %v11349_v50 = vpop.f32.mrf.mxu0  ;;  %v11446_v21 = vmul.f32 0.17677669, %v11427_v13  ;;  %v11499_v60 = vsel %vm2276_vm4, %v21766_v34, -inf  ;;  %v21804_v43 = vpop.permute.xlu1 %12101 }
 0xa00   :  { %v18326_v25 = vpop.f32.mrf.mxu1  ;;  %v11445_v19 = vmul.f32 0.17677669, %v11349_v50 }
 0xa01   :  { %v18321_v51 = vpop.f32.mrf.mxu0  ;;  %v21784_v40 = vsel %vm19734_vm3, %v11446_v21, -1e+30 }
 0xa02   :  { %v21778_v58 = vsel %vm19734_vm3, %v11445_v19, -1e+30  ;;  %v11508_v4 = vsel %vm2276_vm4, %v21784_v40, -inf  ;;  %v21806_v17 = vpop.permute.xlu0 %12178 }
 0xa03   :  { %v11505_v35 = vsel %vm2276_vm4, %v21778_v58, -inf  ;;  %v21808_v13 = vpop.permute.xlu1 %12255 }
 0xa06   :  { %12332 = vrot.lane.b32.xlu0 %v23533_v9, %s18912_s1 }
 0xa23   :  { %11479 = vmax.xlane.f32.xlu1 %v11478_v32 }
 0xa25   :  { %11482 = vmax.xlane.f32.xlu0 %v11481_v61 }
 0xa27   :  { %11485 = vmax.xlane.f32.xlu1 %v11484_v22 }
 0xa29   :  { %11488 = vmax.xlane.f32.xlu0 %v11487_v63 }
 0xa2b   :  { %11491 = vmax.xlane.f32.xlu1 %v11490_v57 }
 0xa2d   :  { %11494 = vmax.xlane.f32.xlu0 %v11493_v39 }
 0xa2f   :  { %11497 = vmax.xlane.f32.xlu1 %v11496_v14 }
 0xa31   :  { %11500 = vmax.xlane.f32.xlu0 %v11499_v60 }
 0xa33   :  { %11503 = vmax.xlane.f32.xlu1 %v11502_v15 }
 0xa35   :  { %11506 = vmax.xlane.f32.xlu0 %v11505_v35 }
 0xa37   :  { %11509 = vmax.xlane.f32.xlu1 %v11508_v4 }
 0xa48   :  { %12563 = vrot.lane.b32.xlu1 %v23534_v6, %s18912_s1 }
 0xa4b   :  { %12486 = vrot.lane.b32.xlu0 %v23535_v27, %s18912_s1 }
 0xa4f   :  { %12640 = vrot.lane.b32.xlu0 %v23536_v33, %s18912_s1 }
 0xa70   :  { %v11468_v49 = vpop.xlane.xlu0 %11467 }
 0xa71   :  { %v11512_v50 = vsub.f32 %v21675_v48, %v11468_v49 }
 0xa73   :  { %v11465_v25 = vpop.xlane.xlu1 %11464  ;;  %v11529_v51 = vmul.f32 1.442695, %v11512_v50 }
 0xa74   :  { %v11511_v9 = vsub.f32 %v21684_v30, %v11465_v25 }
 0xa75   :  { %18749 = vpow2.f32 %v11529_v51  ;;  %v11471_v0 = vpop.xlane.xlu0 %11470 }
 0xa76   :  { %v11527_v2 = vmul.f32 1.442695, %v11511_v9  ;;  %v11513_v41 = vsub.f32 %v21700_v31, %v11471_v0 }
 0xa77   :  { %v11474_v47 = vpop.xlane.xlu1 %11473 }
 0xa78   :  { %18751 = vpow2.f32 %v11527_v2  ;;  %v11531_v32 = vmul.f32 1.442695, %v11513_v41  ;;  %v11514_v59 = vsub.f32 %v21693_v16, %v11474_v47 }
 0xa79   :  { %v11477_v61 = vpop.xlane.xlu0 %11476 }
 0xa7a   :  { %18753 = vpow2.f32 %v11531_v32  ;;  %v11533_v52 = vmul.f32 1.442695, %v11514_v59  ;;  %v11515_v22 = vsub.f32 %v21712_v8, %v11477_v61 }
 0xa7b   :  { %v21835_v19 = vpop.permute.xlu1 %12409 }
 0xa7c   :  { %18755 = vpow2.f32 %v11533_v52  ;;  %v11535_v48 = vmul.f32 1.442695, %v11515_v22 }
 0xa7d   :  { %v21837_v14 = vpop.permute.xlu0 %12332 }
 0xa7e   :  { %18757 = vpow2.f32 %v11535_v48 }
 0xa82   :  { %v21815_v28 = vpop.eup %18749 }
 0xa83   :  { %v11562_v30 = vsel %vm2276_vm4, %v21815_v28, 0.0 }
 0xa84   :  { %11563 = vadd.xlane.f32.xlu1 %v11562_v30 }
 0xa85   :  { %v21819_v31 = vpop.eup %18751 }
 0xa86   :  { %v11559_v63 = vsel %vm2276_vm4, %v21819_v31, 0.0 }
 0xa87   :  { %v21823_v16 = vpop.eup %18753  ;;  %11560 = vadd.xlane.f32.xlu0 %v11559_v63 }
 0xa88   :  { %v11565_v8 = vsel %vm2276_vm4, %v21823_v16, 0.0 }
 0xa89   :  { %v21827_v23 = vpop.eup %18755 }
 0xa8a   :  { %v11568_v57 = vsel %vm2276_vm4, %v21827_v23, 0.0 }
 0xa8b   :  { %v21831_v5 = vpop.eup %18757  ;;  %11566 = vadd.xlane.f32.xlu0 %v11565_v8  ;;  %11569 = vadd.xlane.f32.xlu1 %v11568_v57 }
 0xa8c   :  { %v11571_v39 = vsel %vm2276_vm4, %v21831_v5, 0.0 }
 0xa8f   :  { %11572 = vadd.xlane.f32.xlu0 %v11571_v39 }
 0xaac   :  { %v11480_v21 = vpop.xlane.xlu1 %11479 }
 0xaad   :  { %v11516_v60 = vsub.f32 %v21726_v7, %v11480_v21 }
 0xaae   :  { %v11483_v15 = vpop.xlane.xlu0 %11482 }
 0xaaf   :  { %v11537_v35 = vmul.f32 1.442695, %v11516_v60  ;;  %v11517_v4 = vsub.f32 %v21730_v18, %v11483_v15 }
 0xab0   :  { %v11486_v6 = vpop.xlane.xlu1 %11485 }
 0xab1   :  { %18759 = vpow2.f32 %v11537_v35  ;;  %v11539_v27 = vmul.f32 1.442695, %v11517_v4  ;;  %v11518_v33 = vsub.f32 %v21736_v12, %v11486_v6 }
 0xab2   :  { %v11489_v49 = vpop.xlane.xlu0 %11488 }
 0xab3   :  { %18761 = vpow2.f32 %v11539_v27  ;;  %v11541_v50 = vmul.f32 1.442695, %v11518_v33  ;;  %v11519_v25 = vsub.f32 %v21742_v38, %v11489_v49 }
 0xab4   :  { %v11492_v51 = vpop.xlane.xlu1 %11491 }
 0xab5   :  { %18763 = vpow2.f32 %v11541_v50  ;;  %v11543_v9 = vmul.f32 1.442695, %v11519_v25  ;;  %v11520_v0 = vsub.f32 %v21748_v37, %v11492_v51 }
 0xab6   :  { %v11495_v7 = vpop.xlane.xlu0 %11494 }
 0xab7   :  { %18765 = vpow2.f32 %v11543_v9  ;;  %v11545_v2 = vmul.f32 1.442695, %v11520_v0  ;;  %v11521_v18 = vsub.f32 %v21754_v62, %v11495_v7 }
 0xab8   :  { %v11498_v41 = vpop.xlane.xlu1 %11497 }
 0xab9   :  { %18767 = vpow2.f32 %v11545_v2  ;;  %v11547_v47 = vmul.f32 1.442695, %v11521_v18  ;;  %v11522_v12 = vsub.f32 %v21760_v54, %v11498_v41  ;;  %v23537_v18 = vld [vmem:[#allocation23_spill] sm:$0xff]  ;;  %v23538_v41 = vld [vmem:[#allocation18_spill] sm:$0xff] }
 0xaba   :  { %v11501_v32 = vpop.xlane.xlu0 %11500 }
 0xabb   :  { %18769 = vpow2.f32 %v11547_v47  ;;  %v11549_v59 = vmul.f32 1.442695, %v11522_v12  ;;  %v11523_v38 = vsub.f32 %v21766_v34, %v11501_v32  ;;  %v23539_v47 = vld [vmem:[#allocation9_spill] sm:$0xff]  ;;  %v23541_v32 = vld [vmem:[#allocation34_spill] sm:$0xff] }
 0xabc   :  { %v11504_v61 = vpop.xlane.xlu1 %11503  ;;  %v23540_v12 = vpack.i.bf16 %v23538_v41, %v23539_v47 }
 0xabd   :  { %18771 = vpow2.f32 %v11549_v59  ;;  %v11551_v52 = vmul.f32 1.442695, %v11523_v38  ;;  %v11524_v37 = vsub.f32 %v21772_v24, %v11504_v61  ;;  %v23542_v59 = vld [vmem:[#allocation20_spill] sm:$0xff]  ;;  %v23543_v38 = vld [vmem:[#allocation13_spill] sm:$0xff] }
 0xabe   :  { %v21848_v22 = vpop.eup %18759  ;;  %v11507_v48 = vpop.xlane.xlu0 %11506  ;;  %v23544_v61 = vpack.i.bf16 %v23542_v59, %v23543_v38 }
 0xabf   :  { %18773 = vpow2.f32 %v11551_v52  ;;  %v11553_v62 = vmul.f32 1.442695, %v11524_v37  ;;  %v11525_v30 = vsub.f32 %v21778_v58, %v11507_v48  ;;  %v11574_v54 = vsel %vm2276_vm4, %v21848_v22, 0.0 }
 0xac0   :  { %v21853_v63 = vpop.eup %18761  ;;  %11575 = vadd.xlane.f32.xlu1 %v11574_v54  ;;  %v11510_v8 = vpop.xlane.xlu1 %11509 }
 0xac1   :  { %18775 = vpow2.f32 %v11553_v62  ;;  %v11555_v34 = vmul.f32 1.442695, %v11525_v30  ;;  %v11526_v57 = vsub.f32 %v21784_v40, %v11510_v8  ;;  %v11577_v24 = vsel %vm2276_vm4, %v21853_v63, 0.0 }
 0xac2   :  { %v21858_v39 = vpop.eup %18763  ;;  %11578 = vadd.xlane.f32.xlu0 %v11577_v24  ;;  %v21910_v52 = vpop.permute.xlu0 %12486 }
 0xac3   :  { %18777 = vpow2.f32 %v11555_v34  ;;  %v11557_v21 = vmul.f32 1.442695, %v11526_v57  ;;  %v11580_v58 = vsel %vm2276_vm4, %v21858_v39, 0.0 }
 0xac4   :  { %v21862_v60 = vpop.eup %18765  ;;  %11581 = vadd.xlane.f32.xlu1 %v11580_v58  ;;  %v21912_v37 = vpop.permute.xlu1 %12563 }
 0xac5   :  { %18779 = vpow2.f32 %v11557_v21  ;;  %v11583_v15 = vsel %vm2276_vm4, %v21862_v60, 0.0 }
 0xac6   :  { %v21866_v35 = vpop.eup %18767  ;;  %11584 = vadd.xlane.f32.xlu0 %v11583_v15  ;;  %v21914_v48 = vpop.permute.xlu0 %12640 }
 0xac7   :  { %v11586_v40 = vsel %vm2276_vm4, %v21866_v35, 0.0 }
 0xac8   :  { %v21870_v4 = vpop.eup %18769  ;;  %11587 = vadd.xlane.f32.xlu1 %v11586_v40 }
 0xac9   :  { %v11589_v6 = vsel %vm2276_vm4, %v21870_v4, 0.0 }
 0xaca   :  { %v21874_v27 = vpop.eup %18771  ;;  %11590 = vadd.xlane.f32.xlu0 %v11589_v6 }
 0xacb   :  { %v11592_v33 = vsel %vm2276_vm4, %v21874_v27, 0.0 }
 0xacc   :  { %v21878_v49 = vpop.eup %18773  ;;  %11593 = vadd.xlane.f32.xlu1 %v11592_v33 }
 0xacd   :  { %v11595_v50 = vsel %vm2276_vm4, %v21878_v49, 0.0 }
 0xace   :  { %v21882_v25 = vpop.eup %18775  ;;  %11596 = vadd.xlane.f32.xlu0 %v11595_v50 }
 0xacf   :  { %v11598_v51 = vsel %vm2276_vm4, %v21882_v25, 0.0 }
 0xad0   :  { %v21886_v9 = vpop.eup %18777  ;;  %11599 = vadd.xlane.f32.xlu1 %v11598_v51 }
 0xad1   :  { %v11601_v0 = vsel %vm2276_vm4, %v21886_v9, 0.0 }
 0xad2   :  { %v21890_v7 = vpop.eup %18779 }
 0xad3   :  { %v11604_v2 = vsel %vm2276_vm4, %v21890_v7, 0.0 }
 0xad4   :  { %11602 = vadd.xlane.f32.xlu1 %v11601_v0  ;;  %11605 = vadd.xlane.f32.xlu0 %v11604_v2 }
 0xae5   :  { %12717 = vrot.lane.b32.xlu1 %v23537_v18, %s18912_s1 }
 0xae9   :  { %18489 = vrot.lane.b32.xlu1 %v23540_v12, %s18912_s1 }
 0xaea   :  { %12794 = vrot.lane.b32.xlu0 %v23541_v32, %s18912_s1 }
 0xaee   :  { %18494 = vrot.lane.b32.xlu0 %v18493_v20, %s18910_s18 }
 0xaf2   :  { %18504 = vrot.lane.b32.xlu0 %v23544_v61, %s18912_s1  ;;  %v14910_v61 = vld [vmem:[%s23285_s9 + $0x78] sm:$0xff] }
 0xb0d   :  { %v11564_v62 = vpop.xlane.xlu1 %11563 }
 0xb0e   :  { %18781 = vrcp.f32 %v11564_v62  ;;  %v14904_v62 = vld [vmem:[%s23285_s9 + $0x48] sm:$0xff] }
 0xb10   :  { %v11561_v30 = vpop.xlane.xlu0 %11560 }
 0xb11   :  { %18783 = vrcp.f32 %v11561_v30  ;;  %v14903_v30 = vld [vmem:[%s23285_s9 + $0x40] sm:$0xff] }
 0xb14   :  { %v11567_v54 = vpop.xlane.xlu0 %11566  ;;  %v11570_v8 = vpop.xlane.xlu1 %11569 }
 0xb15   :  { %18785 = vrcp.f32 %v11567_v54  ;;  %v14902_v54 = vld [vmem:[%s23285_s9 + $0x38] sm:$0xff] }
 0xb16   :  { %18787 = vrcp.f32 %v11570_v8  ;;  %v14901_v8 = vld [vmem:[%s23285_s9 + $0x30] sm:$0xff] }
 0xb18   :  { %v11573_v46 = vpop.xlane.xlu0 %11572 }
 0xb19   :  { %18789 = vrcp.f32 %v11573_v46  ;;  %v14900_v46 = vld [vmem:[%s23285_s9 + $0x28] sm:$0xff] }
 0xb1b   :  { %v18782_v10 = vpop.eup %18781 }
 0xb1c   :  { %v11610_v20 = vmul.f32 %v18782_v10, %v21815_v28  ;;  %v14899_v10 = vld [vmem:[%s23285_s9 + $0x20] sm:$0xff] }
 0xb1e   :  { %v18784_v34 = vpop.eup %18783  ;;  %18335 = vmatmul.mubr.msk.f32.vlgmr.msra.gmra.mxu1 %vm2453_vm5, %v11610_v20  ;;  %v14898_v20 = vld [vmem:[%s23285_s9 + $0x18] sm:$0xff] }
 0xb1f   :  { %v11608_v57 = vmul.f32 %v18784_v34, %v21819_v31  ;;  %18343 = vmatpush3.msk.msra.mxu1 %vm2457_vm2, %v21796_v44  ;;  %18344 = vmatprep.mubr.msk.f32.mxu1 %vm18908_vm0, %v23435_v45 }
 0xb20   :  { %18352 = vmatprep.subr.mxu1 %v23435_v45 }
 0xb21   :  { %18330 = vmatmul.mubr.msk.f32.vlgmr.msra.gmra.mxu0 %vm2453_vm5, %v11608_v57  ;;  %v14897_v57 = vld [vmem:[%s23285_s9 + $0x10] sm:$0xff] }
 0xb22   :  { %v18786_v24 = vpop.eup %18785  ;;  %18338 = vmatpush3.msk.msra.mxu0 %vm2457_vm2, %v21798_v29  ;;  %18339 = vmatprep.mubr.msk.f32.mxu0 %vm18908_vm0, %v23435_v45 }
 0xb23   :  { %v18788_v28 = vpop.eup %18787  ;;  %v11612_v31 = vmul.f32 %v18786_v24, %v21823_v16  ;;  %18347 = vmatprep.subr.mxu0 %v23435_v45 }
 0xb24   :  { %v11614_v44 = vmul.f32 %v18788_v28, %v21827_v23 }
 0xb25   :  { %18340 = vmatmul.mubr.msk.f32.vlgmr.msra.gmra.mxu0 %vm2453_vm5, %v11612_v31 }
 0xb26   :  { %v18790_v21 = vpop.eup %18789  ;;  %18345 = vmatmul.mubr.msk.f32.vlgmr.msra.gmra.mxu1 %vm2453_vm5, %v11614_v44  ;;  %18348 = vmatpush3.msk.msra.mxu0 %vm2457_vm2, %v21800_v42 }
 0xb27   :  { %v11616_v29 = vmul.f32 %v18790_v21, %v21831_v5  ;;  %18353 = vmatpush3.msk.msra.mxu1 %vm2457_vm2, %v21802_v3  ;;  %18349 = vmatprep.mubr.msk.f32.mxu0 %vm18908_vm0, %v23435_v45 }
 0xb28   :  { %18357 = vmatprep.subr.mxu0 %v23435_v45  ;;  %18354 = vmatprep.mubr.msk.f32.mxu1 %vm18908_vm0, %v23435_v45 }
 0xb29   :  { %18350 = vmatmul.mubr.msk.f32.vlgmr.msra.gmra.mxu0 %vm2453_vm5, %v11616_v29  ;;  %18362 = vmatprep.subr.mxu1 %v23435_v45 }
 0xb2a   :  { %18358 = vmatpush3.msk.msra.mxu0 %vm2457_vm2, %v21804_v43  ;;  %18359 = vmatprep.mubr.msk.f32.mxu0 %vm18908_vm0, %v23435_v45 }
 0xb2b   :  { %18367 = vmatprep.subr.mxu0 %v23435_v45 }
 0xb49   :  { %v11576_v42 = vpop.xlane.xlu1 %11575 }
 0xb4a   :  { %18791 = vrcp.f32 %v11576_v42 }
 0xb4b   :  { %v11579_v3 = vpop.xlane.xlu0 %11578 }
 0xb4c   :  { %18793 = vrcp.f32 %v11579_v3 }
 0xb4d   :  { %v11582_v16 = vpop.xlane.xlu1 %11581 }
 0xb4e   :  { %18795 = vrcp.f32 %v11582_v16 }
 0xb4f   :  { %v11585_v23 = vpop.xlane.xlu0 %11584 }
 0xb50   :  { %18797 = vrcp.f32 %v11585_v23 }
 0xb51   :  { %v11588_v5 = vpop.xlane.xlu1 %11587 }
 0xb52   :  { %18799 = vrcp.f32 %v11588_v5 }
 0xb53   :  { %v11591_v58 = vpop.xlane.xlu0 %11590 }
 0xb54   :  { %18801 = vrcp.f32 %v11591_v58 }
 0xb55   :  { %v11594_v15 = vpop.xlane.xlu1 %11593 }
 0xb56   :  { %18803 = vrcp.f32 %v11594_v15 }
 0xb57   :  { %v18792_v43 = vpop.eup %18791  ;;  %v11597_v40 = vpop.xlane.xlu0 %11596 }
 0xb58   :  { %v11618_v6 = vmul.f32 %v18792_v43, %v21848_v22  ;;  %18805 = vrcp.f32 %v11597_v40 }
 0xb59   :  { %v18794_v33 = vpop.eup %18793  ;;  %v11600_v50 = vpop.xlane.xlu1 %11599 }
 0xb5a   :  { %v11620_v51 = vmul.f32 %v18794_v33, %v21853_v63  ;;  %18807 = vrcp.f32 %v11600_v50  ;;  %18355 = vmatmul.mubr.msk.f32.vlgmr.msra.gmra.mxu1 %vm2453_vm5, %v11618_v6 }
 0xb5b   :  { %v18796_v0 = vpop.eup %18795  ;;  %18363 = vmatpush3.msk.msra.mxu1 %vm2457_vm2, %v21806_v17  ;;  %18364 = vmatprep.mubr.msk.f32.mxu1 %vm18908_vm0, %v23435_v45 }
 0xb5c   :  { %v11622_v2 = vmul.f32 %v18796_v0, %v21858_v39  ;;  %18372 = vmatprep.subr.mxu1 %v23435_v45  ;;  %18360 = vmatmul.mubr.msk.f32.vlgmr.msra.gmra.mxu0 %vm2453_vm5, %v11620_v51 }
 0xb5d   :  { %v18798_v22 = vpop.eup %18797  ;;  %v11606_v18 = vpop.xlane.xlu0 %11605  ;;  %18368 = vmatpush3.msk.msra.mxu0 %vm2457_vm2, %v21808_v13  ;;  %18369 = vmatprep.mubr.msk.f32.mxu0 %vm18908_vm0, %v23435_v45 }
 0xb5e   :  { %v11603_v41 = vpop.xlane.xlu1 %11602  ;;  %v11624_v17 = vmul.f32 %v18798_v22, %v21862_v60  ;;  %18809 = vrcp.f32 %v11606_v18  ;;  %18365 = vmatmul.mubr.msk.f32.vlgmr.msra.gmra.mxu1 %vm2453_vm5, %v11622_v2  ;;  %18377 = vmatprep.subr.mxu0 %v23435_v45 }
 0xb5f   :  { %v18800_v63 = vpop.eup %18799  ;;  %18811 = vrcp.f32 %v11603_v41  ;;  %18373 = vmatpush3.msk.msra.mxu1 %vm2457_vm2, %v21837_v14  ;;  %18374 = vmatprep.mubr.msk.f32.mxu1 %vm18908_vm0, %v23435_v45 }
 0xb60   :  { %v11626_v13 = vmul.f32 %v18800_v63, %v21866_v35  ;;  %18382 = vmatprep.subr.mxu1 %v23435_v45  ;;  %18370 = vmatmul.mubr.msk.f32.vlgmr.msra.gmra.mxu0 %vm2453_vm5, %v11624_v17 }
 0xb61   :  { %v18802_v39 = vpop.eup %18801  ;;  %18378 = vmatpush3.msk.msra.mxu0 %vm2457_vm2, %v21835_v19  ;;  %18379 = vmatprep.mubr.msk.f32.mxu0 %vm18908_vm0, %v23435_v45 }
 0xb62   :  { %v11628_v60 = vmul.f32 %v18802_v39, %v21870_v4  ;;  %18375 = vmatmul.mubr.msk.f32.vlgmr.msra.gmra.mxu1 %vm2453_vm5, %v11626_v13  ;;  %18387 = vmatprep.subr.mxu0 %v23435_v45  ;;  %v12718_v12 = vpop.permute.xlu1 %12717 }
 0xb63   :  { %v18804_v14 = vpop.eup %18803  ;;  %18383 = vmatpush3.msk.msra.mxu1 %vm2457_vm2, %v21910_v52  ;;  %18384 = vmatprep.mubr.msk.f32.mxu1 %vm18908_vm0, %v23435_v45  ;;  %v14909_v52 = vld [vmem:[%s23285_s9 + $0x70] sm:$0xff] }
 0xb64   :  { %v11630_v35 = vmul.f32 %v18804_v14, %v21874_v27  ;;  %18392 = vmatprep.subr.mxu1 %v23435_v45  ;;  %18380 = vmatmul.mubr.msk.f32.vlgmr.msra.gmra.mxu0 %vm2453_vm5, %v11628_v60 }
 0xb65   :  { %v18806_v19 = vpop.eup %18805  ;;  %18388 = vmatpush3.msk.msra.mxu0 %vm2457_vm2, %v21912_v37  ;;  %18389 = vmatprep.mubr.msk.f32.mxu0 %vm18908_vm0, %v23435_v45  ;;  %v14906_v37 = vld [vmem:[%s23285_s9 + $0x58] sm:$0xff] }
 0xb66   :  { %v11632_v4 = vmul.f32 %v18806_v19, %v21878_v49  ;;  %18385 = vmatmul.mubr.msk.f32.vlgmr.msra.gmra.mxu1 %vm2453_vm5, %v11630_v35  ;;  %18397 = vmatprep.subr.mxu0 %v23435_v45  ;;  %v12795_v49 = vpop.permute.xlu0 %12794 }
 0xb67   :  { %v18808_v47 = vpop.eup %18807  ;;  %18393 = vmatpush3.msk.msra.mxu1 %vm2457_vm2, %v21914_v48  ;;  %18394 = vmatprep.mubr.msk.f32.mxu1 %vm18908_vm0, %v23435_v45  ;;  %v14905_v48 = vld [vmem:[%s23285_s9 + $0x50] sm:$0xff] }
 0xb68   :  { %v11634_v27 = vmul.f32 %v18808_v47, %v21882_v25  ;;  %18402 = vmatprep.subr.mxu1 %v23435_v45  ;;  %18390 = vmatmul.mubr.msk.f32.vlgmr.msra.gmra.mxu0 %vm2453_vm5, %v11632_v4 }
 0xb69   :  { %18398 = vmatpush3.msk.msra.mxu0 %vm2457_vm2, %v12718_v12  ;;  %18399 = vmatprep.mubr.msk.f32.mxu0 %vm18908_vm0, %v23435_v45 }
 0xb6a   :  { %18395 = vmatmul.mubr.msk.f32.vlgmr.msra.gmra.mxu1 %vm2453_vm5, %v11634_v27  ;;  %18407 = vmatprep.subr.mxu0 %v14910_v61 }
 0xb6b   :  { %v18810_v32 = vpop.eup %18809  ;;  %18403 = vmatpush3.msk.msra.mxu1 %vm2457_vm2, %v12795_v49  ;;  %18404 = vmatprep.mubr.msk.f32.mxu1 %vm18908_vm0, %v23435_v45 }
 0xb6c   :  { %v18812_v25 = vpop.eup %18811  ;;  %v11638_v59 = vmul.f32 %v18810_v32, %v21890_v7  ;;  %v14907_v7 = vld [vmem:[%s23285_s9 + $0x60] sm:$0xff] }
 0xb6d   :  { %v11636_v38 = vmul.f32 %v18812_v25, %v21886_v9  ;;  %v14908_v9 = vld [vmem:[%s23285_s9 + $0x68] sm:$0xff] }
 0xb6e   :  { %18405 = vmatmul.mubr.msk.f32.vlgmr.msra.gmra.mxu1 %vm2453_vm5, %v11638_v59 }
 0xb6f   :  { %18400 = vmatmul.mubr.msk.f32.vlgmr.msra.gmra.mxu0 %vm2453_vm5, %v11636_v38  ;;  %15561 = vmatprep.mubr.f32.mxu1 %v23435_v45 }
 0xb70   :  { %18408 = vmatpush3.msra.mxu0 %v14910_v61 }
 0xb71   :  { %18409 = vmatprep.subr.mxu0 %v14909_v52 }
 0xb72   :  { %18410 = vmatpush3.msra.mxu0 %v14909_v52 }
 0xb73   :  { %18411 = vmatprep.subr.mxu0 %v14908_v9 }
 0xb74   :  { %18412 = vmatpush3.msra.mxu0 %v14908_v9 }
 0xb75   :  { %18413 = vmatprep.subr.mxu0 %v14907_v7 }
 0xb76   :  { %18414 = vmatpush3.msra.mxu0 %v14907_v7 }
 0xb77   :  { %18415 = vmatprep.subr.mxu0 %v14906_v37 }
 0xb78   :  { %18416 = vmatpush3.msra.mxu0 %v14906_v37 }
 0xb79   :  { %18417 = vmatprep.subr.mxu0 %v14905_v48 }
 0xb7a   :  { %18418 = vmatpush3.msra.mxu0 %v14905_v48 }
 0xb7b   :  { %18419 = vmatprep.subr.mxu0 %v14904_v62 }
 0xb7c   :  { %18420 = vmatpush3.msra.mxu0 %v14904_v62 }
 0xb7d   :  { %18421 = vmatprep.subr.mxu0 %v14903_v30 }
 0xb7e   :  { %18422 = vmatpush3.msra.mxu0 %v14903_v30 }
 0xb7f   :  { %18423 = vmatprep.subr.mxu0 %v14902_v54 }
 0xb80   :  { %18424 = vmatpush3.msra.mxu0 %v14902_v54 }
 0xb81   :  { %18425 = vmatprep.subr.mxu0 %v14901_v8 }
 0xb82   :  { %18426 = vmatpush3.msra.mxu0 %v14901_v8 }
 0xb83   :  { %18427 = vmatprep.subr.mxu0 %v14900_v46 }
 0xb84   :  { %18428 = vmatpush3.msra.mxu0 %v14900_v46 }
 0xb85   :  { %18429 = vmatprep.subr.mxu0 %v14899_v10 }
 0xb86   :  { %18430 = vmatpush3.msra.mxu0 %v14899_v10 }
 0xb87   :  { %18431 = vmatprep.subr.mxu0 %v14898_v20 }
 0xb88   :  { %18432 = vmatpush3.msra.mxu0 %v14898_v20 }
 0xb89   :  { %18433 = vmatprep.subr.mxu0 %v14897_v57 }
 0xb8a   :  { %18434 = vmatpush3.msra.mxu0 %v14897_v57 }
 0xbde   :  { %v11789_v34 = vpop.f32.mrf.mxu1 }
 0xbdf   :  { %v12916_v24 = vrot.slane %v11789_v34, %v23530_v36 }
 0xbe0   :  { %v18336_v28 = vpop.f32.mrf.mxu1 }
 0xbe1   :  { %v11712_v31 = vpop.f32.mrf.mxu0  ;;  %v12917_v44 = vcombine.high %v12916_v24, %v12916_v24  ;;  %v12924_v21 = vrot.slane %v12916_v24, %v23530_v36 }
 0xbe2   :  { %v12893_v29 = vrot.slane %v11712_v31, %v23530_v36 }
 0xbe3   :  { %v18331_v42 = vpop.f32.mrf.mxu0  ;;  %v12931_v23 = vrot.slane %v12917_v44, %v23530_v36  ;;  %v12932_v5 = vcombine.high %v12924_v21, %v12924_v21 }
 0xbe4   :  { %v12894_v3 = vcombine.high %v12893_v29, %v12893_v29  ;;  %v12901_v16 = vrot.slane %v12893_v29, %v23530_v36 }
 0xbe5   :  { %v11866_v58 = vpop.f32.mrf.mxu0  ;;  %v14181_v22 = vcombine.low %v12931_v23, %v12932_v5 }
 0xbe6   :  { %v12908_v15 = vrot.slane %v12894_v3, %v23530_v36  ;;  %v12909_v43 = vcombine.high %v12901_v16, %v12901_v16  ;;  %v12939_v40 = vrot.slane %v11866_v58, %v23530_v36  ;;  %v11943_v6 = vpop.f32.mrf.mxu1 }
 0xbe7   :  { %v18341_v33 = vpop.f32.mrf.mxu0  ;;  %v14203_v35 = vrot.slane %v14181_v22, %v23530_v36  ;;  %v12962_v49 = vrot.slane %v11943_v6, %v23530_v36 }
 0xbe8   :  { %v14179_v50 = vcombine.low %v12901_v16, %v12908_v15  ;;  %v14180_v51 = vcombine.low %v12909_v43, %v12924_v21  ;;  %v12940_v0 = vcombine.high %v12939_v40, %v12939_v40  ;;  %v18346_v2 = vpop.f32.mrf.mxu1  ;;  %v12947_v63 = vrot.slane %v12939_v40, %v23530_v36 }
 0xbe9   :  { %v12020_v18 = vpop.f32.mrf.mxu0  ;;  %v12963_v32 = vcombine.high %v12962_v49, %v12962_v49  ;;  %v12970_v25 = vrot.slane %v12962_v49, %v23530_v36 }
 0xbea   :  { %v14189_v41 = vrot.slane %v14179_v50, %v23530_v36  ;;  %v14196_v17 = vrot.slane %v14180_v51, %v23530_v36  ;;  %v12954_v13 = vrot.slane %v12940_v0, %v23530_v36  ;;  %v12985_v59 = vrot.slane %v12020_v18, %v23530_v36 }
 0xbeb   :  { %v18351_v39 = vpop.f32.mrf.mxu0  ;;  %v12955_v38 = vcombine.high %v12947_v63, %v12947_v63  ;;  %v12977_v61 = vrot.slane %v12963_v32, %v23530_v36  ;;  %v12978_v52 = vcombine.high %v12970_v25, %v12970_v25 }
 0xbec   :  { %v14211_v60 = vcombine.low %v14189_v41, %v14196_v17  ;;  %v14182_v14 = vcombine.low %v12947_v63, %v12954_v13  ;;  %v12986_v9 = vcombine.high %v12985_v59, %v12985_v59  ;;  %v12993_v7 = vrot.slane %v12985_v59, %v23530_v36 }
 0xbed   :  { %v14228_v37 = vcombine.low %v12955_v38, %v12970_v25  ;;  %v14229_v48 = vcombine.low %v12977_v61, %v12978_v52 }
 0xbee   :  { %v14210_v19 = vrot.slane %v14182_v14, %v23530_v36  ;;  %v14219_v47 = vrot.slane %v14211_v60, %v23530_v36  ;;  %v13000_v54 = vrot.slane %v12986_v9, %v23530_v36  ;;  %v13001_v10 = vcombine.high %v12993_v7, %v12993_v7 }
 0xbef   :  { %v14238_v24 = vrot.slane %v14228_v37, %v23530_v36  ;;  %v14245_v28 = vrot.slane %v14229_v48, %v23530_v36  ;;  %v14896_v37 = vld [vmem:[%s23285_s9 + $0x8] sm:$0xff] }
 0xbf0   :  { %v14212_v4 = vcombine.low %v14203_v35, %v14210_v19  ;;  %v14230_v16 = vcombine.low %v12993_v7, %v13000_v54  ;;  %18435 = vmatprep.subr.mxu0 %v14896_v37 }
 0xbf1   :  { %v22090_v6 = vcombine.low %v14238_v24, %v14245_v28  ;;  %18436 = vmatpush3.msra.mxu0 %v14896_v37 }
 0xbf2   :  { %v14226_v27 = vrot.slane %v14212_v4, %v23530_v36  ;;  %v14252_v17 = vrot.slane %v14230_v16, %v23530_v36 }
 0xbf4   :  { %v22072_v12 = vcombine.low %v14219_v47, %v14226_v27  ;;  %v14268_v27 = vrot.slane %v22090_v6, %v23530_v36 }
 0xc1a   :  { %v12097_v62 = vpop.f32.mrf.mxu1 }
 0xc1b   :  { %v13008_v30 = vrot.slane %v12097_v62, %v23530_v36 }
 0xc1c   :  { %v18356_v8 = vpop.f32.mrf.mxu1  ;;  %v12174_v46 = vpop.f32.mrf.mxu0 }
 0xc1d   :  { %v13009_v20 = vcombine.high %v13008_v30, %v13008_v30  ;;  %v13016_v34 = vrot.slane %v13008_v30, %v23530_v36  ;;  %v13031_v57 = vrot.slane %v12174_v46, %v23530_v36 }
 0xc1e   :  { %v12251_v31 = vpop.f32.mrf.mxu1  ;;  %v18361_v44 = vpop.f32.mrf.mxu0 }
 0xc1f   :  { %v13023_v21 = vrot.slane %v13009_v20, %v23530_v36  ;;  %v13024_v29 = vcombine.high %v13016_v34, %v13016_v34  ;;  %v14231_v42 = vcombine.low %v13001_v10, %v13016_v34  ;;  %v13032_v3 = vcombine.high %v13031_v57, %v13031_v57  ;;  %v14895_v10 = vld [vmem:[%s23285_s9] sm:$0xff] }
 0xc20   :  { %v13039_v23 = vrot.slane %v13031_v57, %v23530_v36  ;;  %v13054_v5 = vrot.slane %v12251_v31, %v23530_v36  ;;  %v18366_v58 = vpop.f32.mrf.mxu1  ;;  %v12328_v15 = vpop.f32.mrf.mxu0  ;;  %18437 = vmatprep.subr.mxu0 %v14895_v10 }
 0xc21   :  { %v13046_v43 = vrot.slane %v13032_v3, %v23530_v36  ;;  %v13077_v40 = vrot.slane %v12328_v15, %v23530_v36  ;;  %v14259_v22 = vrot.slane %v14231_v42, %v23530_v36  ;;  %v14277_v18 = vcombine.low %v13023_v21, %v13024_v29  ;;  %18438 = vmatpush3.msra.mxu0 %v14895_v10 }
 0xc22   :  { %v13047_v33 = vcombine.high %v13039_v23, %v13039_v23  ;;  %v13055_v50 = vcombine.high %v13054_v5, %v13054_v5  ;;  %v13062_v51 = vrot.slane %v13054_v5, %v23530_v36  ;;  %v12405_v0 = vpop.f32.mrf.mxu1  ;;  %v18371_v2 = vpop.f32.mrf.mxu0 }
 0xc23   :  { %v13078_v41 = vcombine.high %v13077_v40, %v13077_v40  ;;  %v13085_v39 = vrot.slane %v13077_v40, %v23530_v36  ;;  %v14278_v35 = vcombine.low %v13039_v23, %v13046_v43  ;;  %v13100_v47 = vrot.slane %v12405_v0, %v23530_v36 }
 0xc24   :  { %v13069_v63 = vrot.slane %v13055_v50, %v23530_v36  ;;  %v13070_v13 = vcombine.high %v13062_v51, %v13062_v51  ;;  %v18376_v60 = vpop.f32.mrf.mxu1  ;;  %v12482_v14 = vpop.f32.mrf.mxu0  ;;  %v14279_v19 = vcombine.low %v13047_v33, %v13062_v51  ;;  %v14261_v61 = vcombine.low %v14252_v17, %v14259_v22 }
 0xc25   :  { %v13092_v4 = vrot.slane %v13078_v41, %v23530_v36  ;;  %v13093_v32 = vcombine.high %v13085_v39, %v13085_v39  ;;  %v13123_v25 = vrot.slane %v12482_v14, %v23530_v36  ;;  %v14287_v52 = vrot.slane %v14277_v18, %v23530_v36 }
 0xc26   :  { %v14280_v49 = vcombine.low %v13069_v63, %v13070_v13  ;;  %v12559_v59 = vpop.f32.mrf.mxu1  ;;  %v18381_v38 = vpop.f32.mrf.mxu0  ;;  %v13101_v9 = vcombine.high %v13100_v47, %v13100_v47  ;;  %v13108_v7 = vrot.slane %v13100_v47, %v23530_v36  ;;  %v14294_v20 = vrot.slane %v14278_v35, %v23530_v36 }
 0xc27   :  { %v14326_v48 = vcombine.low %v13085_v39, %v13092_v4  ;;  %v13124_v62 = vcombine.high %v13123_v25, %v13123_v25  ;;  %v13131_v30 = vrot.slane %v13123_v25, %v23530_v36  ;;  %v13146_v54 = vrot.slane %v12559_v59, %v23530_v36 }
 0xc28   :  { %v18386_v8 = vpop.f32.mrf.mxu1  ;;  %v12636_v46 = vpop.f32.mrf.mxu0  ;;  %v14301_v34 = vrot.slane %v14279_v19, %v23530_v36  ;;  %v13115_v57 = vrot.slane %v13101_v9, %v23530_v36  ;;  %v13116_v24 = vcombine.high %v13108_v7, %v13108_v7  ;;  %v14308_v28 = vrot.slane %v14280_v49, %v23530_v36 }
 0xc29   :  { %v14327_v31 = vcombine.low %v13093_v32, %v13108_v7  ;;  %v13138_v44 = vrot.slane %v13124_v62, %v23530_v36  ;;  %v13139_v21 = vcombine.high %v13131_v30, %v13131_v30  ;;  %v13147_v16 = vcombine.high %v13146_v54, %v13146_v54 }
 0xc2a   :  { %v12713_v29 = vpop.f32.mrf.mxu1  ;;  %v18391_v42 = vpop.f32.mrf.mxu0  ;;  %v14328_v3 = vcombine.low %v13115_v57, %v13116_v24  ;;  %v13154_v23 = vrot.slane %v13146_v54, %v23530_v36  ;;  %v13169_v5 = vrot.slane %v12636_v46, %v23530_v36  ;;  %v14336_v58 = vrot.slane %v14326_v48, %v23530_v36 }
 0xc2b   :  { %v14343_v15 = vrot.slane %v14327_v31, %v23530_v36  ;;  %v14329_v43 = vcombine.low %v13131_v30, %v13138_v44  ;;  %v13192_v40 = vrot.slane %v12713_v29, %v23530_v36  ;;  %v14275_v50 = vrot.slane %v14261_v61, %v23530_v36 }
 0xc2c   :  { %v18396_v33 = vpop.f32.mrf.mxu1  ;;  %v14309_v51 = vcombine.low %v14287_v52, %v14294_v20  ;;  %v13161_v0 = vrot.slane %v13147_v16, %v23530_v36  ;;  %v13162_v2 = vcombine.high %v13154_v23, %v13154_v23  ;;  %v14350_v22 = vrot.slane %v14328_v3, %v23530_v36 }
 0xc2d   :  { %v14357_v18 = vrot.slane %v14329_v43, %v23530_v36  ;;  %v13170_v41 = vcombine.high %v13169_v5, %v13169_v5  ;;  %v13177_v17 = vrot.slane %v13169_v5, %v23530_v36  ;;  %v14310_v13 = vcombine.low %v14301_v34, %v14308_v28 }
 0xc2e   :  { %v12867_v63 = vpop.f32.mrf.mxu1  ;;  %v14375_v39 = vcombine.low %v13139_v21, %v13154_v23  ;;  %v13193_v60 = vcombine.high %v13192_v40, %v13192_v40  ;;  %v13200_v14 = vrot.slane %v13192_v40, %v23530_v36  ;;  %v14358_v19 = vcombine.low %v14336_v58, %v14343_v15 }
 0xc2f   :  { %v12790_v35 = vpop.f32.mrf.mxu0  ;;  %v14359_v4 = vcombine.low %v14350_v22, %v14357_v18  ;;  %v13184_v47 = vrot.slane %v13170_v41, %v23530_v36  ;;  %v13185_v49 = vcombine.high %v13177_v17, %v13177_v17  ;;  %v14317_v25 = vrot.slane %v14309_v51, %v23530_v36  ;;  %v23545_v18 = vld [vmem:[#allocation22_spill] sm:$0xff] }
 0xc30   :  { %v18406_v32 = vpop.f32.mrf.mxu1  ;;  %v14376_v59 = vcombine.low %v13161_v0, %v13162_v2  ;;  %v13207_v38 = vrot.slane %v13193_v60, %v23530_v36  ;;  %v14276_v61 = vcombine.low %v14268_v27, %v14275_v50  ;;  %v13208_v7 = vcombine.high %v13200_v14, %v13200_v14  ;;  %v18490_v60 = vpop.permute.xlu1 %18489 }
 0xc31   :  { %v18401_v52 = vpop.f32.mrf.mxu0  ;;  %v14377_v9 = vcombine.low %v13177_v17, %v13184_v47  ;;  %v14378_v37 = vcombine.low %v13185_v49, %v13200_v14  ;;  %v13215_v48 = vrot.slane %v12790_v35, %v23530_v36  ;;  %v14324_v62 = vrot.slane %v14310_v13, %v23530_v36  ;;  %v18495_v14 = vpop.permute.xlu0 %18494  ;;  %v23548_v49 = vld [vmem:[#allocation37_spill] sm:$0xff] }
 0xc32   :  { %v14373_v30 = vrot.slane %v14359_v4, %v23530_v36  ;;  %v18498_v54 = vpack.i.bf16 %v14276_v61, %v22072_v12  ;;  %v13238_v8 = vrot.slane %v12867_v63, %v23530_v36  ;;  %v14366_v46 = vrot.slane %v14358_v19, %v23530_v36 }
 0xc33   :  { %v14385_v10 = vrot.slane %v14375_v39, %v23530_v36  ;;  %v13216_v6 = vcombine.high %v13215_v48, %v13215_v48  ;;  %v13223_v27 = vrot.slane %v13215_v48, %v23530_v36  ;;  %v14399_v20 = vrot.slane %v14377_v9, %v23530_v36 }
 0xc34   :  { %v14406_v34 = vrot.slane %v14378_v37, %v23530_v36  ;;  %18499 = vrot.lane.b32.xlu1 %v18498_v54, %s18909_s8  ;;  %v13239_v57 = vcombine.high %v13238_v8, %v13238_v8  ;;  %v13246_v24 = vrot.slane %v13238_v8, %v23530_v36  ;;  %v14392_v12 = vrot.slane %v14376_v59, %v23530_v36 }
 0xc35   :  { %v14424_v28 = vcombine.low %v13207_v38, %v13208_v7  ;;  %v13230_v31 = vrot.slane %v13216_v6, %v23530_v36  ;;  %v13231_v44 = vcombine.high %v13223_v27, %v13223_v27  ;;  %v14325_v42 = vcombine.low %v14317_v25, %v14324_v62  ;;  %v23549_v25 = vld [vmem:[#allocation36_spill] sm:$0xff]  ;;  %v18505_v11 = vpop.permute.xlu0 %18504 }
 0xc36   :  { %v13253_v21 = vrot.slane %v13239_v57, %v23530_v36  ;;  %v13254_v29 = vcombine.high %v13246_v24, %v13246_v24  ;;  %v14374_v3 = vcombine.low %v14366_v46, %v14373_v30  ;;  %v14408_v5 = vcombine.low %v14399_v20, %v14406_v34  ;;  %v23550_v46 = vld [vmem:[#allocation39_spill] sm:$0xff]  ;;  %v23551_v20 = vld [vmem:[#allocation38_spill] sm:$0xff] }
 0xc37   :  { %v14425_v16 = vcombine.low %v13223_v27, %v13230_v31  ;;  %v14426_v23 = vcombine.low %v13231_v44, %v13246_v24  ;;  %v14434_v43 = vrot.slane %v14424_v28, %v23530_v36  ;;  %v14407_v50 = vcombine.low %v14385_v10, %v14392_v12 }
 0xc38   :  { %v14427_v58 = vcombine.low %v13253_v21, %v13254_v29  ;;  %18509 = vrot.lane.b32.xlu1 %v18508_v56, %s18910_s18  ;;  %v18513_v15 = vpack.i.bf16 %v14374_v3, %v14325_v42  ;;  %v14422_v2 = vrot.slane %v14408_v5, %v23530_v36  ;;  %v23547_v55 = vpack.i.bf16 %v23545_v18, %v23546_v53  ;;  %v18891_v18 = vld.sshfl [vmem:[%s23398_s26 + $0x10] sm:$0x33 pattern:$0x75316420] }
 0xc39   :  { %v14441_v40 = vrot.slane %v14425_v16, %v23530_v36  ;;  %v14448_v33 = vrot.slane %v14426_v23, %v23530_v36  ;;  %v14415_v41 = vrot.slane %v14407_v50, %v23530_v36  ;;  %v18492_v35 = vunpack.i.h.bf16 %v18490_v60  ;;  %v23552_v23 = vld [vmem:[#allocation41_spill] sm:$0xff] }
 0xc3a   :  { %v14455_v51 = vrot.slane %v14427_v58, %v23530_v36  ;;  %18514 = vrot.lane.b32.xlu0 %v18513_v15, %s18909_s8  ;;  %v18491_v19 = vunpack.i.l.bf16 %v18490_v60  ;;  %v18497_v4 = vunpack.i.h.bf16 %v18495_v14  ;;  %v18496_v47 = vunpack.i.l.bf16 %v18495_v14 }
 0xc3b   :  { %v14456_v0 = vcombine.low %v14434_v43, %v14441_v40  ;;  %v14423_v63 = vcombine.low %v14415_v41, %v14422_v2  ;;  %v14492_v32 = vsel %vm1042_vm1, %v23548_v49, %v18492_v35  ;;  %v18507_v9 = vunpack.i.h.bf16 %v18505_v11  ;;  %v23553_v43 = vld [vmem:[#allocation40_spill] sm:$0xff]  ;;  %v18889_v2 = vld.sshfl [vmem:[%s23398_s26] sm:$0x33 pattern:$0x75316420] }
 0xc3c   :  { %v14457_v22 = vcombine.low %v14448_v33, %v14455_v51  ;;  %18519 = vrot.lane.b32.xlu1 %v23547_v55, %s18912_s1  ;;  %v14491_v59 = vsel %vm1042_vm1, %v23549_v25, %v18491_v19  ;;  %v14499_v52 = vsel %vm14497_vm6, %v14492_v32, %v18497_v4  ;;  %v18506_v7 = vunpack.i.l.bf16 %v18505_v11  ;;  %v18892_v55 = vld.sshfl [vmem:[%s23398_s26 + $0x14] sm:$0x33 pattern:$0x75316420] }
 0xc3d   :  { %v14464_v56 = vrot.slane %v14456_v0, %v23530_v36  ;;  %v14498_v61 = vsel %vm14497_vm6, %v14491_v59, %v18496_v47  ;;  %v14494_v10 = vsel %vm1042_vm1, %v23550_v46, %v18507_v9  ;;  %v14518_v53 = vcombine.high %v18889_v2, %v18889_v2  ;;  %v18895_v4 = vld.sshfl [vmem:[%s23398_s26 + $0xc] sm:$0x33 pattern:$0x75316420] }
 0xc3e   :  { %v14471_v17 = vrot.slane %v14457_v22, %v23530_v36  ;;  %18524 = vrot.lane.b32.xlu0 %v18523_v1, %s18910_s18  ;;  %v14493_v34 = vsel %vm1042_vm1, %v23551_v20, %v18506_v7  ;;  %v18890_v22 = vld.sshfl [vmem:[%s23398_s26 + $0x4] sm:$0x33 pattern:$0x75316420]  ;;  %v14525_v41 = vrot.slane %v18889_v2, %v23530_v36  ;;  %v14638_v14 = vcombine.high %v18892_v55, %v18892_v55 }
 0xc3f   :  { %v14532_v60 = vrot.slane %v14518_v53, %v23530_v36  ;;  %v18896_v47 = vld.sshfl [vmem:[%s23398_s26 + $0x1c] sm:$0x33 pattern:$0x75316420]  ;;  %v14549_v49 = vrot.slane %v18890_v22, %v23530_v36 }
 0xc40   :  { %v14472_v13 = vcombine.low %v14464_v56, %v14471_v17  ;;  %v18893_v56 = vld.sshfl [vmem:[%s23398_s26 + $0x8] sm:$0x33 pattern:$0x75316420]  ;;  %v14542_v17 = vcombine.high %v18890_v22, %v18890_v22  ;;  %v14533_v19 = vcombine.high %v14525_v41, %v14525_v41 }
 0xc41   :  { %v14566_v35 = vcombine.high %v18893_v56, %v18893_v56  ;;  %v18897_v59 = vld.sshfl [vmem:[%s23398_s26 + $0x20] sm:$0x33 pattern:$0x75316420] }
 0xc42   :  { %v18528_v39 = vpack.i.bf16 %v14472_v13, %v14423_v63  ;;  %v18894_v63 = vld.sshfl [vmem:[%s23398_s26 + $0x18] sm:$0x33 pattern:$0x75316420]  ;;  %v14614_v13 = vcombine.high %v18891_v18, %v18891_v18  ;;  %v14556_v32 = vrot.slane %v14542_v17, %v23530_v36  ;;  %v22233_v7 = vcombine.low %v14532_v60, %v14533_v19 }
 0xc43   :  { %v14662_v25 = vcombine.high %v18894_v63, %v18894_v63  ;;  %v14580_v9 = vrot.slane %v14566_v35, %v23530_v36  ;;  %v18898_v46 = vld.sshfl [vmem:[%s23398_s26 + $0x24] sm:$0x33 pattern:$0x75316420] }
 0xc44   :  { %18529 = vrot.lane.b32.xlu1 %v18528_v39, %s18909_s8  ;;  %v14621_v39 = vrot.slane %v18891_v18, %v23530_v36  ;;  %v14628_v11 = vrot.slane %v14614_v13, %v23530_v36  ;;  %v18899_v20 = vld.sshfl [vmem:[%s23398_s26 + $0x28] sm:$0x33 pattern:$0x75316420] }
 0xc45   :  { %v18903_v13 = vld.sshfl [vmem:[%s23398_s26 + $0x34] sm:$0x33 pattern:$0x75316420] }
 0xc46   :  { %v18904_v35 = vld.sshfl [vmem:[%s23398_s26 + $0x3c] sm:$0x33 pattern:$0x75316420] }
 0xca6   :  { %v18500_v26 = vpop.permute.xlu1 %18499 }
 0xca7   :  { %v18502_v1 = vunpack.i.h.bf16 %v18500_v26  ;;  %v18501_v38 = vunpack.i.l.bf16 %v18500_v26  ;;  %v14629_v26 = vcombine.high %v14621_v39, %v14621_v39 }
 0xca9   :  { %v14505_v37 = vsel %vm14504_vm7, %v14498_v61, %v18501_v38  ;;  %v14506_v48 = vsel %vm14504_vm7, %v14499_v52, %v18502_v1  ;;  %v14645_v1 = vrot.slane %v18892_v55, %v23530_v36  ;;  %v14534_v38 = vcombine.high %v14532_v60, %v14532_v60 }
 0xcaa   :  { %v18510_v62 = vpop.permute.xlu1 %18509  ;;  %18439 = vmatprep.mubr.f32.mxu0 %v14505_v37  ;;  %v14652_v61 = vrot.slane %v14638_v14, %v23530_v36  ;;  %v14573_v52 = vrot.slane %v18893_v56, %v23530_v36  ;;  %v14590_v37 = vcombine.high %v18895_v4, %v18895_v4  ;;  %v14741_v55 = vrot.slane %v18898_v46, %v23530_v36 }
 0xcab   :  { %v18512_v30 = vunpack.i.h.bf16 %v18510_v62  ;;  %v18511_v54 = vunpack.i.l.bf16 %v18510_v62  ;;  %18440 = vmatmul.mubr.f32.vlgmr.msra.gmra.mxu0 %v14506_v48  ;;  %v14669_v48 = vrot.slane %v18894_v63, %v23530_v36  ;;  %v14686_v62 = vcombine.high %v18896_v47, %v18896_v47 }
 0xcac   :  { %v18515_v8 = vpop.permute.xlu0 %18514 }
 0xcad   :  { %v18517_v6 = vunpack.i.h.bf16 %v18515_v8  ;;  %v18516_v27 = vunpack.i.l.bf16 %v18515_v8  ;;  %v14500_v57 = vsel %vm14497_vm6, %v14493_v34, %v18511_v54  ;;  %v14501_v24 = vsel %vm14497_vm6, %v14494_v10, %v18512_v30 }
 0xcae   :  { %v18520_v31 = vpop.permute.xlu1 %18519  ;;  %v22236_v30 = vcombine.high %v14549_v49, %v14556_v32  ;;  %v14676_v54 = vrot.slane %v14662_v25, %v23530_v36  ;;  %v14710_v8 = vcombine.high %v18897_v59, %v18897_v59  ;;  %v14630_v10 = vcombine.high %v14628_v11, %v14628_v11 }
 0xcaf   :  { %v14507_v12 = vsel %vm14504_vm7, %v14500_v57, %v18516_v27  ;;  %v14508_v28 = vsel %vm14504_vm7, %v14501_v24, %v18517_v6  ;;  %v18522_v21 = vunpack.i.h.bf16 %v18520_v31  ;;  %v18521_v29 = vunpack.i.l.bf16 %v18520_v31 }
 0xcb0   :  { %18442 = vmatprep.mubr.f32.mxu0 %v14507_v12  ;;  %v18525_v44 = vpop.permute.xlu0 %18524  ;;  %v15064_v6 = vcombine.low %v14628_v11, %v14629_v26  ;;  %v14717_v27 = vrot.slane %v18897_v59, %v23530_v36  ;;  %v22246_v34 = vcombine.high %v14645_v1, %v14652_v61  ;;  %v14581_v57 = vcombine.high %v14573_v52, %v14573_v52 }
 0xcb1   :  { %18443 = vmatmul.mubr.f32.gmra.mxu0 %v14508_v28  ;;  %v18527_v42 = vunpack.i.h.bf16 %v18525_v44  ;;  %v18526_v3 = vunpack.i.l.bf16 %v18525_v44  ;;  %v14496_v5 = vsel %vm1042_vm1, %v23552_v23, %v18522_v21  ;;  %v14495_v40 = vsel %vm1042_vm1, %v23553_v43, %v18521_v29 }
 0xcb2   :  { %v14582_v24 = vcombine.high %v14580_v9, %v14580_v9  ;;  %v14597_v12 = vrot.slane %v18895_v4, %v23530_v36  ;;  %v14604_v28 = vrot.slane %v14590_v37, %v23530_v36  ;;  %v14677_v31 = vcombine.high %v14669_v48, %v14669_v48 }
 0xcb3   :  { %v14502_v33 = vsel %vm14497_vm6, %v14495_v40, %v18526_v3  ;;  %v14503_v50 = vsel %vm14497_vm6, %v14496_v5, %v18527_v42  ;;  %v14693_v44 = vrot.slane %v18896_v47, %v23530_v36  ;;  %v14700_v21 = vrot.slane %v14686_v62, %v23530_v36  ;;  %v22257_v40 = vld.sshfl [vmem:[%s23398_s26 + $0x2c] sm:$0x33 pattern:$0x75316420] }
 0xcb4   :  { %v15014_v29 = vcombine.low %v14534_v38, %v14556_v32  ;;  %v14678_v42 = vcombine.high %v14676_v54, %v14676_v54  ;;  %v14724_v3 = vrot.slane %v14710_v8, %v23530_v36  ;;  %v15065_v23 = vcombine.low %v14630_v10, %v14652_v61 }
 0xcb5   :  { %v14725_v5 = vcombine.high %v14717_v27, %v14717_v27  ;;  %v15016_v43 = vcombine.low %v14580_v9, %v14581_v57  ;;  %v22265_v2 = vcombine.low %v14676_v54, %v14677_v31  ;;  %v22267_v22 = vcombine.high %v14693_v44, %v14700_v21 }
 0xcb6   :  { %v18530_v16 = vpop.permute.xlu1 %18529  ;;  %v15113_v18 = vcombine.low %v14678_v42, %v14700_v21  ;;  %v14726_v53 = vcombine.high %v14724_v3, %v14724_v3  ;;  %v14782_v39 = vcombine.high %v22257_v40, %v22257_v40  ;;  %v15086_v47 = vrot.slane %v15064_v6, %v23530_v36 }
 0xcb7   :  { %v18532_v58 = vunpack.i.h.bf16 %v18530_v16  ;;  %v18531_v15 = vunpack.i.l.bf16 %v18530_v16  ;;  %v14734_v16 = vcombine.high %v18898_v46, %v18898_v46  ;;  %v22271_v41 = vcombine.low %v14724_v3, %v14725_v5 }
 0xcb8   :  { %v15093_v49 = vrot.slane %v15065_v23, %v23530_v36  ;;  %v15023_v32 = vrot.slane %v22233_v7, %v23530_v36  ;;  %v15030_v25 = vrot.slane %v15014_v29, %v23530_v36  ;;  %v15037_v59 = vrot.slane %v22236_v30, %v23530_v36 }
 0xcb9   :  { %v14509_v51 = vsel %vm14504_vm7, %v14502_v33, %v18531_v15  ;;  %v14510_v0 = vsel %vm14504_vm7, %v14503_v50, %v18532_v58  ;;  %v14758_v58 = vcombine.high %v18899_v20, %v18899_v20  ;;  %v14765_v15 = vrot.slane %v18899_v20, %v23530_v36  ;;  %v18901_v33 = vld.sshfl [vmem:[%s23398_s26 + $0x30] sm:$0x33 pattern:$0x75316420] }
 0xcba   :  { %18445 = vmatprep.mubr.f32.mxu0 %v14509_v51  ;;  %v18902_v50 = vld.sshfl [vmem:[%s23398_s26 + $0x38] sm:$0x33 pattern:$0x75316420]  ;;  %v15062_v51 = vcombine.low %v14582_v24, %v14604_v28  ;;  %v14748_v56 = vrot.slane %v14734_v16, %v23530_v36  ;;  %v14806_v60 = vcombine.high %v18901_v33, %v18901_v33  ;;  %v15044_v11 = vrot.slane %v15016_v43, %v23530_v36 }
 0xcbb   :  { %18446 = vmatmul.mubr.f32.gmra.mxu0 %v14510_v0  ;;  %v17155_v0 = vcombine.high %v14597_v12, %v14604_v28  ;;  %v14772_v17 = vrot.slane %v14758_v58, %v23530_v36  ;;  %v14773_v63 = vcombine.high %v14765_v15, %v14765_v15  ;;  %v14854_v14 = vcombine.high %v18902_v50, %v18902_v50 }
 0xcbc   :  { %15662 = vmatprep.mubr.f32.mxu0 %v23435_v45  ;;  %v15072_v19 = vrot.slane %v15062_v51, %v23530_v36  ;;  %v15161_v26 = vcombine.low %v14726_v53, %v14748_v56  ;;  %v17158_v1 = vcombine.high %v14741_v55, %v14748_v56  ;;  %v14830_v38 = vcombine.high %v18903_v13, %v18903_v13  ;;  %v17153_v51 = vld [vmem:[%s23286_s10] ss:$0 sm:$0xff] }
 0xcbd   :  { %v15079_v4 = vrot.slane %v17155_v0, %v23530_v36  ;;  %v14861_v61 = vrot.slane %v18902_v50, %v23530_v36  ;;  %v14774_v52 = vcombine.high %v14772_v17, %v14772_v17  ;;  %v14789_v9 = vrot.slane %v22257_v40, %v23530_v36 }
 0xcbe   :  { %v15163_v37 = vcombine.low %v14772_v17, %v14773_v63  ;;  %v14813_v48 = vrot.slane %v18901_v33, %v23530_v36  ;;  %v14868_v7 = vrot.slane %v14854_v14, %v23530_v36  ;;  %v14878_v62 = vcombine.high %v18904_v35, %v18904_v35 }
 0xcbf   :  { %v15094_v54 = vcombine.low %v15072_v19, %v15079_v4  ;;  %v15095_v8 = vcombine.low %v15086_v47, %v15093_v49  ;;  %v14796_v30 = vrot.slane %v14782_v39, %v23530_v36  ;;  %v14820_v46 = vrot.slane %v14806_v60, %v23530_v36 }
 0xcc0   :  { %v15045_v10 = vcombine.low %v15023_v32, %v15030_v25  ;;  %v15046_v6 = vcombine.low %v15037_v59, %v15044_v11  ;;  %v14837_v27 = vrot.slane %v18903_v13, %v23530_v36  ;;  %v14844_v20 = vrot.slane %v14830_v38, %v23530_v36 }
 0xcc1   :  { %v14869_v57 = vcombine.high %v14861_v61, %v14861_v61  ;;  %v14885_v24 = vrot.slane %v18904_v35, %v23530_v36  ;;  %v15121_v12 = vrot.slane %v22246_v34, %v23530_v36  ;;  %v15128_v28 = vrot.slane %v22265_v2, %v23530_v36 }
 0xcc2   :  { %v15135_v31 = vrot.slane %v15113_v18, %v23530_v36  ;;  %v15142_v44 = vrot.slane %v22267_v22, %v23530_v36  ;;  %v14870_v21 = vcombine.high %v14868_v7, %v14868_v7  ;;  %v14892_v29 = vrot.slane %v14878_v62, %v23530_v36 }
 0xcc3   :  { %v15102_v42 = vrot.slane %v15094_v54, %v23530_v36  ;;  %v15109_v3 = vrot.slane %v15095_v8, %v23530_v36  ;;  %v14821_v16 = vcombine.high %v14813_v48, %v14813_v48  ;;  %v14822_v23 = vcombine.high %v14820_v46, %v14820_v46 }
 0xcc4   :  { %v15053_v5 = vrot.slane %v15045_v10, %v23530_v36  ;;  %v15060_v34 = vrot.slane %v15046_v6, %v23530_v36  ;;  %v15170_v58 = vrot.slane %v22271_v41, %v23530_v36  ;;  %v15177_v15 = vrot.slane %v15161_v26, %v23530_v36 }
 0xcc5   :  { %v15184_v43 = vrot.slane %v17158_v1, %v23530_v36  ;;  %v15191_v40 = vrot.slane %v15163_v37, %v23530_v36  ;;  %v17160_v33 = vcombine.high %v14837_v27, %v14844_v20  ;;  %v15259_v50 = vcombine.low %v14868_v7, %v14869_v57 }
 0xcc6   :  { %v15143_v0 = vcombine.low %v15121_v12, %v15128_v28  ;;  %v15144_v2 = vcombine.low %v15135_v31, %v15142_v44  ;;  %v15260_v22 = vcombine.low %v14870_v21, %v14892_v29  ;;  %v17161_v18 = vcombine.high %v14885_v24, %v14892_v29 }
 0xcc7   :  { %v15110_v53 = vcombine.low %v15102_v42, %v15109_v3  ;;  %v15209_v55 = vcombine.low %v14774_v52, %v14796_v30  ;;  %v17159_v56 = vcombine.high %v14789_v9, %v14796_v30  ;;  %v15211_v41 = vcombine.low %v14820_v46, %v14821_v16 }
 0xcc8   :  { %v15212_v17 = vcombine.low %v14822_v23, %v14844_v20  ;;  %v15061_v39 = vcombine.low %v15053_v5, %v15060_v34  ;;  %v15192_v60 = vcombine.low %v15170_v58, %v15177_v15  ;;  %v15193_v14 = vcombine.low %v15184_v43, %v15191_v40  ;;  %v15472_v34 = vld [vmem:[%s23287_s13 + $0x1e8] sm:$0xff]  ;;  %v15474_v58 = vld [vmem:[%s23287_s13 + $0x1f8] sm:$0xff]  ;;  %v15471_v15 = vld [vmem:[%s23287_s13 + $0x1e0] sm:$0xff] }
 0xcc9   :  { %v15151_v19 = vrot.slane %v15143_v0, %v23530_v36  ;;  %v15158_v4 = vrot.slane %v15144_v2, %v23530_v36  ;;  %v15268_v47 = vrot.slane %v17160_v33, %v23530_v36  ;;  %v15275_v49 = vrot.slane %v15259_v50, %v23530_v36  ;;  %15497 = vmatprep.subr.mxu1 %v15472_v34  ;;  %v15473_v43 = vld [vmem:[%s23287_s13 + $0x1f0] sm:$0xff]  ;;  %v15468_v40 = vld [vmem:[%s23287_s13 + $0x1c8] sm:$0xff]  ;;  %v15470_v33 = vld [vmem:[%s23287_s13 + $0x1d8] sm:$0xff] }
 0xcca   :  { %v15282_v59 = vrot.slane %v15260_v22, %v23530_v36  ;;  %v15289_v11 = vrot.slane %v17161_v18, %v23530_v36  ;;  %v15219_v26 = vrot.slane %v15209_v55, %v23530_v36  ;;  %v15226_v38 = vrot.slane %v17159_v56, %v23530_v36  ;;  %15598 = vmatprep.subr.mxu0 %v15474_v58  ;;  %v15467_v50 = vld [vmem:[%s23287_s13 + $0x1c0] sm:$0xff]  ;;  %v15464_v0 = vld [vmem:[%s23287_s13 + $0x1a8] sm:$0xff]  ;;  %v15466_v2 = vld [vmem:[%s23287_s13 + $0x1b8] sm:$0xff] }
 0xccb   :  { %v15233_v61 = vrot.slane %v15211_v41, %v23530_v36  ;;  %v15240_v52 = vrot.slane %v15212_v17, %v23530_v36  ;;  %v15200_v37 = vrot.slane %v15192_v60, %v23530_v36  ;;  %v15207_v48 = vrot.slane %v15193_v14, %v23530_v36  ;;  %15498 = vmatpush1.msra.mxu1 %v15471_v15  ;;  %v15463_v22 = vld [vmem:[%s23287_s13 + $0x1a0] sm:$0xff]  ;;  %v15465_v18 = vld [vmem:[%s23287_s13 + $0x1b0] sm:$0xff]  ;;  %v15440_v34 = vld [vmem:[%s23287_s13 + $0xe8] sm:$0xff] }
 0xccc   :  { %v15159_v7 = vcombine.low %v15151_v19, %v15158_v4  ;;  %v15290_v62 = vcombine.low %v15268_v47, %v15275_v49  ;;  %v15291_v54 = vcombine.low %v15282_v59, %v15289_v11  ;;  %v15241_v46 = vcombine.low %v15219_v26, %v15226_v38  ;;  %15599 = vmatpush1.msra.mxu0 %v15473_v43  ;;  %v15460_v59 = vld [vmem:[%s23287_s13 + $0x188] sm:$0xff]  ;;  %v15462_v11 = vld [vmem:[%s23287_s13 + $0x198] sm:$0xff]  ;;  %v15439_v15 = vld [vmem:[%s23287_s13 + $0xe0] sm:$0xff] }
 0xccd   :  { %v15242_v10 = vcombine.low %v15233_v61, %v15240_v52  ;;  %v15208_v6 = vcombine.low %v15200_v37, %v15207_v48  ;;  %15499 = vmatprep.subr.mxu1 %v15468_v40  ;;  %15600 = vmatprep.subr.mxu0 %v15470_v33  ;;  %v15459_v61 = vld [vmem:[%s23287_s13 + $0x180] sm:$0xff]  ;;  %v15461_v52 = vld [vmem:[%s23287_s13 + $0x190] sm:$0xff]  ;;  %v15456_v37 = vld [vmem:[%s23287_s13 + $0x168] sm:$0xff] }
 0xcce   :  { %v15298_v57 = vrot.slane %v15290_v62, %v23530_v36  ;;  %v15305_v24 = vrot.slane %v15291_v54, %v23530_v36  ;;  %v15249_v12 = vrot.slane %v15241_v46, %v23530_v36  ;;  %15500 = vmatpush1.msra.mxu1 %v15467_v50  ;;  %v15458_v48 = vld [vmem:[%s23287_s13 + $0x178] sm:$0xff]  ;;  %v15455_v54 = vld [vmem:[%s23287_s13 + $0x160] sm:$0xff]  ;;  %v15441_v43 = vld [vmem:[%s23287_s13 + $0xf0] sm:$0xff] }
 0xccf   :  { %v15256_v28 = vrot.slane %v15242_v10, %v23530_v36  ;;  %15501 = vmatprep.subr.mxu1 %v15464_v0  ;;  %v15454_v46 = vld [vmem:[%s23287_s13 + $0x158] sm:$0xff]  ;;  %v15436_v40 = vld [vmem:[%s23287_s13 + $0xc8] sm:$0xff]  ;;  %v15435_v50 = vld [vmem:[%s23287_s13 + $0xc0] sm:$0xff] }
 0xcd0   :  { %v15306_v44 = vcombine.low %v15298_v57, %v15305_v24  ;;  %15502 = vmatpush1.msra.mxu1 %v15463_v22  ;;  %v15453_v57 = vld [vmem:[%s23287_s13 + $0x150] sm:$0xff]  ;;  %v15448_v24 = vld [vmem:[%s23287_s13 + $0x128] sm:$0xff]  ;;  %v15442_v58 = vld [vmem:[%s23287_s13 + $0xf8] sm:$0xff] }
 0xcd1   :  { %v15257_v42 = vcombine.low %v15249_v12, %v15256_v28  ;;  %15503 = vmatprep.subr.mxu1 %v15460_v59  ;;  %v15450_v12 = vld [vmem:[%s23287_s13 + $0x138] sm:$0xff]  ;;  %v15432_v0 = vld [vmem:[%s23287_s13 + $0xa8] sm:$0xff]  ;;  %v15431_v22 = vld [vmem:[%s23287_s13 + $0xa0] sm:$0xff] }
 0xcd2   :  { %15504 = vmatpush1.msra.mxu1 %v15459_v61  ;;  %v15438_v33 = vld [vmem:[%s23287_s13 + $0xd8] sm:$0xff]  ;;  %v15416_v59 = vld [vmem:[%s23287_s13 + $0x28] sm:$0xff] }
 0xcd3   :  { %15505 = vmatprep.subr.mxu1 %v15456_v37  ;;  %v15412_v61 = vld [vmem:[%s23287_s13 + $0x8] sm:$0xff]  ;;  %v15413_v37 = vld [vmem:[%s23287_s13 + $0x10] sm:$0xff] }
 0xcd4   :  { %15506 = vmatpush1.msra.mxu1 %v15455_v54 }
 0xd6b   :  { %v18441_v63 = vpop.f32.mrf.mxu0 }
 0xd6c   :  { %v14990_v13 = vadd.f32 %v18441_v63, %v17153_v51 }
 0xd6d   :  { %v14984_v35 = vpop.f32.mrf.mxu0 }
 0xd6e   :  { %v22326_v32 = vadd.f32 %v15110_v53, %v14990_v13  ;;  %v14985_v25 = vadd.f32 %v17153_v51, %v14984_v35 }
 0xd70   :  { %23554 = vst [vmem:[#allocation44_spill] sm:$0xff] %v22326_v32  ;;  %v22331_v1 = vadd.f32 %v15061_v39, %v14985_v25  ;;  %15323 = vadd.xlane.f32.xlu1 %v22326_v32 }
 0xd71   :  { %v18444_v9 = vpop.f32.mrf.mxu0 }
 0xd72   :  { %23555 = vst [vmem:[#allocation45_spill] sm:$0xff] %v22331_v1  ;;  %15321 = vadd.xlane.f32.xlu0 %v22331_v1  ;;  %v15000_v27 = vadd.f32 %v18444_v9, %v17153_v51 }
 0xd73   :  { %v14994_v8 = vpop.f32.mrf.mxu0 }
 0xd74   :  { %v14995_v30 = vadd.f32 %v17153_v51, %v14994_v8  ;;  %v22347_v31 = vadd.f32 %v15208_v6, %v15000_v27  ;;  %v15457_v8 = vld [vmem:[%s23287_s13 + $0x170] sm:$0xff]  ;;  %v15451_v27 = vld [vmem:[%s23287_s13 + $0x140] sm:$0xff] }
 0xd76   :  { %v22340_v20 = vadd.f32 %v15159_v7, %v14995_v30  ;;  %23557 = vst [vmem:[#allocation48_spill] sm:$0xff] %v22347_v31  ;;  %v15452_v30 = vld [vmem:[%s23287_s13 + $0x148] sm:$0xff] }
 0xd77   :  { %15507 = vmatprep.subr.mxu1 %v15452_v30 }
 0xd78   :  { %23556 = vst [vmem:[#allocation47_spill] sm:$0xff] %v22340_v20  ;;  %15325 = vadd.xlane.f32.xlu0 %v22340_v20  ;;  %15508 = vmatpush1.msra.mxu1 %v15451_v27 }
 0xd79   :  { %15509 = vmatprep.subr.mxu1 %v15448_v24 }
 0xd7b   :  { %v18447_v21 = vpop.f32.mrf.mxu0 }
 0xd7c   :  { %v15010_v29 = vadd.f32 %v18447_v21, %v17153_v51  ;;  %15327 = vadd.xlane.f32.xlu0 %v22347_v31  ;;  %v15449_v21 = vld [vmem:[%s23287_s13 + $0x130] sm:$0xff] }
 0xd7d   :  { %v15004_v3 = vpop.f32.mrf.mxu0 }
 0xd7e   :  { %v22350_v16 = vadd.f32 %v15306_v44, %v15010_v29  ;;  %v15005_v23 = vadd.f32 %v17153_v51, %v15004_v3  ;;  %v15469_v51 = vld [vmem:[%s23287_s13 + $0x1d0] sm:$0xff]  ;;  %v15447_v44 = vld [vmem:[%s23287_s13 + $0x120] sm:$0xff]  ;;  %v15444_v29 = vld [vmem:[%s23287_s13 + $0x108] sm:$0xff] }
 0xd7f   :  { %15601 = vmatpush1.msra.mxu0 %v15469_v51  ;;  %15510 = vmatpush1.msra.mxu1 %v15447_v44  ;;  %v15443_v3 = vld [vmem:[%s23287_s13 + $0x100] sm:$0xff]  ;;  %v15437_v51 = vld [vmem:[%s23287_s13 + $0xd0] sm:$0xff] }
 0xd80   :  { %23558 = vst [vmem:[#allocation46_spill] sm:$0xff] %v22350_v16  ;;  %v22352_v5 = vadd.f32 %v15257_v42, %v15005_v23  ;;  %15331 = vadd.xlane.f32.xlu0 %v22350_v16  ;;  %15602 = vmatprep.subr.mxu0 %v15466_v2  ;;  %v15446_v42 = vld [vmem:[%s23287_s13 + $0x118] sm:$0xff]  ;;  %v15445_v23 = vld [vmem:[%s23287_s13 + $0x110] sm:$0xff] }
 0xd81   :  { %15603 = vmatpush1.msra.mxu0 %v15465_v18  ;;  %15511 = vmatprep.subr.mxu1 %v15444_v29  ;;  %v15434_v2 = vld [vmem:[%s23287_s13 + $0xb8] sm:$0xff]  ;;  %v15433_v18 = vld [vmem:[%s23287_s13 + $0xb0] sm:$0xff] }
 0xd82   :  { %23559 = vst [vmem:[#allocation49_spill] sm:$0xff] %v22352_v5  ;;  %15329 = vadd.xlane.f32.xlu1 %v22352_v5  ;;  %15604 = vmatprep.subr.mxu0 %v15462_v11  ;;  %v15418_v11 = vld [vmem:[%s23287_s13 + $0x38] sm:$0xff] }
 0xd83   :  { %15605 = vmatpush1.msra.mxu0 %v15461_v52  ;;  %15512 = vmatpush1.msra.mxu1 %v15443_v3  ;;  %v15414_v52 = vld [vmem:[%s23287_s13 + $0x18] sm:$0xff] }
 0xd84   :  { %15606 = vmatprep.subr.mxu0 %v15458_v48  ;;  %15513 = vmatprep.subr.mxu1 %v15440_v34 }
 0xd85   :  { %15607 = vmatpush1.msra.mxu0 %v15457_v8  ;;  %15514 = vmatpush1.msra.mxu1 %v15439_v15 }
 0xd86   :  { %15608 = vmatprep.subr.mxu0 %v15454_v46  ;;  %15515 = vmatprep.subr.mxu1 %v15436_v40  ;;  %v17162_v40 = vld [vmem:[%s23288_s11] ss:$0 sm:$0xff] }
 0xd87   :  { %15609 = vmatpush1.msra.mxu0 %v15453_v57  ;;  %15516 = vmatpush1.msra.mxu1 %v15435_v50  ;;  %v17163_v50 = vld [vmem:[%s23289_s12] ss:$0 sm:$0xff] }
 0xd88   :  { %15610 = vmatprep.subr.mxu0 %v15450_v12  ;;  %15517 = vmatprep.subr.mxu1 %v15432_v0 }
 0xd89   :  { %15611 = vmatpush1.msra.mxu0 %v15449_v21  ;;  %15518 = vmatpush1.msra.mxu1 %v15431_v22 }
 0xd8a   :  { %15612 = vmatprep.subr.mxu0 %v15446_v42 }
 0xd8b   :  { %15613 = vmatpush1.msra.mxu0 %v15445_v23 }
 0xd8c   :  { %15614 = vmatprep.subr.mxu0 %v15442_v58 }
 0xd8d   :  { %15615 = vmatpush1.msra.mxu0 %v15441_v43 }
 0xd8e   :  { %15616 = vmatprep.subr.mxu0 %v15438_v33 }
 0xd8f   :  { %15617 = vmatpush1.msra.mxu0 %v15437_v51 }
 0xd90   :  { %15618 = vmatprep.subr.mxu0 %v15434_v2 }
 0xd91   :  { %15619 = vmatpush1.msra.mxu0 %v15433_v18 }
 0xdf9   :  { %v15324_v53 = vpop.xlane.xlu1 %15323 }
 0xdfa   :  { %v15334_v55 = vmul.f32 0.0078125, %v15324_v53  ;;  %v15428_v53 = vld [vmem:[%s23287_s13 + $0x88] sm:$0xff] }
 0xdfb   :  { %v15322_v56 = vpop.xlane.xlu0 %15321  ;;  %15519 = vmatprep.subr.mxu1 %v15428_v53 }
 0xdfc   :  { %v22393_v41 = vsub.f32 %v22326_v32, %v15334_v55  ;;  %v15333_v17 = vmul.f32 0.0078125, %v15322_v56  ;;  %v15430_v55 = vld [vmem:[%s23287_s13 + $0x98] sm:$0xff]  ;;  %v15427_v56 = vld [vmem:[%s23287_s13 + $0x80] sm:$0xff] }
 0xdfd   :  { %15620 = vmatprep.subr.mxu0 %v15430_v55  ;;  %15520 = vmatpush1.msra.mxu1 %v15427_v56 }
 0xdfe   :  { %v22396_v63 = vsub.f32 %v22331_v1, %v15333_v17  ;;  %v15346_v13 = vmul.f32 %v22393_v41, %v22393_v41  ;;  %v15429_v17 = vld [vmem:[%s23287_s13 + $0x90] sm:$0xff] }
 0xdff   :  { %15621 = vmatpush1.msra.mxu0 %v15429_v17 }
 0xe00   :  { %15353 = vadd.xlane.f32.xlu0 %v15346_v13  ;;  %v15345_v39 = vmul.f32 %v22396_v63, %v22396_v63  ;;  %v15424_v13 = vld [vmem:[%s23287_s13 + $0x68] sm:$0xff] }
 0xe01   :  { %v15326_v60 = vpop.xlane.xlu0 %15325  ;;  %15521 = vmatprep.subr.mxu1 %v15424_v13 }
 0xe02   :  { %15351 = vadd.xlane.f32.xlu1 %v15345_v39  ;;  %v15335_v14 = vmul.f32 0.0078125, %v15326_v60  ;;  %v15426_v39 = vld [vmem:[%s23287_s13 + $0x78] sm:$0xff]  ;;  %v15423_v60 = vld [vmem:[%s23287_s13 + $0x60] sm:$0xff] }
 0xe03   :  { %15622 = vmatprep.subr.mxu0 %v15426_v39  ;;  %15522 = vmatpush1.msra.mxu1 %v15423_v60 }
 0xe04   :  { %v22403_v35 = vsub.f32 %v22340_v20, %v15335_v14  ;;  %v15425_v14 = vld [vmem:[%s23287_s13 + $0x70] sm:$0xff] }
 0xe05   :  { %v15328_v19 = vpop.xlane.xlu0 %15327  ;;  %15623 = vmatpush1.msra.mxu0 %v15425_v14 }
 0xe06   :  { %v15336_v4 = vmul.f32 0.0078125, %v15328_v19  ;;  %v15347_v47 = vmul.f32 %v22403_v35, %v22403_v35  ;;  %v15420_v19 = vld [vmem:[%s23287_s13 + $0x48] sm:$0xff] }
 0xe07   :  { %15523 = vmatprep.subr.mxu1 %v15420_v19 }
 0xe08   :  { %v22408_v49 = vsub.f32 %v22347_v31, %v15336_v4  ;;  %15355 = vadd.xlane.f32.xlu1 %v15347_v47  ;;  %v15422_v4 = vld [vmem:[%s23287_s13 + $0x58] sm:$0xff]  ;;  %v15419_v47 = vld [vmem:[%s23287_s13 + $0x40] sm:$0xff] }
 0xe09   :  { %v15332_v25 = vpop.xlane.xlu0 %15331  ;;  %15624 = vmatprep.subr.mxu0 %v15422_v4  ;;  %15524 = vmatpush1.msra.mxu1 %v15419_v47  ;;  %v22609_v47 = vld [vmem:[%s23290_s15 + $0x1f8] sm:$0xff] }
 0xe0a   :  { %v15338_v26 = vmul.f32 0.0078125, %v15332_v25  ;;  %v15348_v38 = vmul.f32 %v22408_v49, %v22408_v49  ;;  %v15421_v25 = vld [vmem:[%s23287_s13 + $0x50] sm:$0xff]  ;;  %15525 = vmatprep.subr.mxu1 %v15416_v59 }
 0xe0b   :  { %v15330_v9 = vpop.xlane.xlu1 %15329  ;;  %15625 = vmatpush1.msra.mxu0 %v15421_v25  ;;  %v22618_v25 = vld [vmem:[%s23290_s15 + $0x178] sm:$0xff]  ;;  %v15929_v59 = vld [vmem:[%s23290_s15 + $0x70] sm:$0xff] }
 0xe0c   :  { %v22431_v7 = vsub.f32 %v22350_v16, %v15338_v26  ;;  %v15337_v62 = vmul.f32 0.0078125, %v15330_v9  ;;  %15357 = vadd.xlane.f32.xlu0 %v15348_v38  ;;  %v15415_v26 = vld [vmem:[%s23287_s13 + $0x20] sm:$0xff]  ;;  %v15417_v38 = vld [vmem:[%s23287_s13 + $0x30] sm:$0xff]  ;;  %15626 = vmatprep.subr.mxu0 %v15418_v11 }
 0xe0d   :  { %v15411_v9 = vld [vmem:[%s23287_s13] sm:$0xff]  ;;  %15526 = vmatpush1.msra.mxu1 %v15415_v26  ;;  %15627 = vmatpush1.msra.mxu0 %v15417_v38  ;;  %v22627_v11 = vld [vmem:[%s23290_s15 + $0x1f0] sm:$0xff]  ;;  %v15944_v26 = vld [vmem:[%s23290_s15 + $0xe8] sm:$0xff] }
 0xe0e   :  { %v22446_v10 = vsub.f32 %v22352_v5, %v15337_v62  ;;  %v15350_v6 = vmul.f32 %v22431_v7, %v22431_v7  ;;  %15527 = vmatprep.subr.mxu1 %v15412_v61  ;;  %15628 = vmatprep.subr.mxu0 %v15414_v52  ;;  %v22636_v38 = vld [vmem:[%s23290_s15 + $0x170] sm:$0xff]  ;;  %v15928_v61 = vld [vmem:[%s23290_s15 + $0x68] sm:$0xff] }
 0xe0f   :  { %15528 = vmatpush1.msra.mxu1 %v15411_v9  ;;  %15629 = vmatpush1.msra.mxu0 %v15413_v37  ;;  %v22645_v52 = vld [vmem:[%s23290_s15 + $0x1e8] sm:$0xff]  ;;  %v15943_v9 = vld [vmem:[%s23290_s15 + $0xe0] sm:$0xff] }
 0xe10   :  { %15361 = vadd.xlane.f32.xlu0 %v15350_v6  ;;  %v15349_v28 = vmul.f32 %v22446_v10, %v22446_v10  ;;  %17585 = vmatprep.subr.mxu0 %v22609_v47  ;;  %v22654_v37 = vld [vmem:[%s23290_s15 + $0x168] sm:$0xff] }
 0xe12   :  { %15359 = vadd.xlane.f32.xlu1 %v15349_v28 }
 0xe89   :  { %v15354_v48 = vpop.xlane.xlu0 %15353 }
 0xe8a   :  { %v15364_v62 = vmul.f32 0.0078125, %v15354_v48  ;;  %v15927_v48 = vld [vmem:[%s23290_s15 + $0x60] sm:$0xff] }
 0xe8b   :  { %v15352_v54 = vpop.xlane.xlu1 %15351 }
 0xe8c   :  { %v15370_v8 = vadd.f32 1e-05, %v15364_v62  ;;  %v15363_v30 = vmul.f32 0.0078125, %v15352_v54  ;;  %v22663_v62 = vld [vmem:[%s23290_s15 + $0x1e0] sm:$0xff]  ;;  %v15942_v54 = vld [vmem:[%s23290_s15 + $0xd8] sm:$0xff] }
 0xe8e   :  { %18813 = vrsqrt.f32 %v15370_v8  ;;  %v15369_v46 = vadd.f32 1e-05, %v15363_v30  ;;  %v22672_v8 = vld [vmem:[%s23290_s15 + $0x160] sm:$0xff]  ;;  %v15926_v30 = vld [vmem:[%s23290_s15 + $0x58] sm:$0xff] }
 0xe90   :  { %18815 = vrsqrt.f32 %v15369_v46  ;;  %v22681_v46 = vld [vmem:[%s23290_s15 + $0x1d8] sm:$0xff] }
 0xe91   :  { %v15356_v6 = vpop.xlane.xlu1 %15355 }
 0xe92   :  { %v15365_v27 = vmul.f32 0.0078125, %v15356_v6  ;;  %v15941_v6 = vld [vmem:[%s23290_s15 + $0xd0] sm:$0xff] }
 0xe94   :  { %v15371_v57 = vadd.f32 1e-05, %v15365_v27  ;;  %v22690_v27 = vld [vmem:[%s23290_s15 + $0x158] sm:$0xff] }
 0xe95   :  { %v15358_v24 = vpop.xlane.xlu0 %15357 }
 0xe96   :  { %18817 = vrsqrt.f32 %v15371_v57  ;;  %v15366_v12 = vmul.f32 0.0078125, %v15358_v24  ;;  %v15925_v57 = vld [vmem:[%s23290_s15 + $0x50] sm:$0xff] }
 0xe97   :  { %v22699_v24 = vld [vmem:[%s23290_s15 + $0x1d0] sm:$0xff] }
 0xe98   :  { %v15372_v28 = vadd.f32 1e-05, %v15366_v12  ;;  %v15940_v12 = vld [vmem:[%s23290_s15 + $0xc8] sm:$0xff] }
 0xe99   :  { %v15362_v44 = vpop.xlane.xlu0 %15361 }
 0xe9a   :  { %18819 = vrsqrt.f32 %v15372_v28  ;;  %v15368_v21 = vmul.f32 0.0078125, %v15362_v44  ;;  %v22708_v28 = vld [vmem:[%s23290_s15 + $0x150] sm:$0xff]  ;;  %v15924_v44 = vld [vmem:[%s23290_s15 + $0x48] sm:$0xff] }
 0xe9b   :  { %v18814_v29 = vpop.eup %18813  ;;  %v15360_v42 = vpop.xlane.xlu1 %15359 }
 0xe9c   :  { %v15374_v3 = vadd.f32 1e-05, %v15368_v21  ;;  %v15367_v23 = vmul.f32 0.0078125, %v15360_v42  ;;  %v15382_v43 = vmul.f32 %v18814_v29, %v22393_v41  ;;  %v22717_v21 = vld [vmem:[%s23290_s15 + $0x1c8] sm:$0xff]  ;;  %v15939_v29 = vld [vmem:[%s23290_s15 + $0xc0] sm:$0xff] }
 0xe9d   :  { %v18816_v34 = vpop.eup %18815  ;;  %23560 = vst [vmem:[#allocation10_spill] sm:$0xff] %v22717_v21  ;;  %v22726_v42 = vld [vmem:[%s23290_s15 + $0x148] sm:$0xff] }
 0xe9e   :  { %v15381_v58 = vmul.f32 %v18816_v34, %v22396_v63  ;;  %18821 = vrsqrt.f32 %v15374_v3  ;;  %v15373_v15 = vadd.f32 1e-05, %v15367_v23  ;;  %v15394_v0 = vmul.f32 %v17162_v40, %v15382_v43  ;;  %23561 = vst [vmem:[#allocation12_spill] sm:$0xff] %v22726_v42  ;;  %v15923_v3 = vld [vmem:[%s23290_s15 + $0x40] sm:$0xff]  ;;  %v15938_v34 = vld [vmem:[%s23290_s15 + $0xb8] sm:$0xff] }
 0xe9f   :  { %v22735_v23 = vld [vmem:[%s23290_s15 + $0x1c0] sm:$0xff]  ;;  %v22753_v43 = vld [vmem:[%s23290_s15 + $0x1b8] sm:$0xff] }
 0xea0   :  { %18823 = vrsqrt.f32 %v15373_v15  ;;  %v15393_v33 = vmul.f32 %v17162_v40, %v15381_v58  ;;  %v15406_v41 = vadd.f32 %v17163_v50, %v15394_v0  ;;  %23562 = vst [vmem:[#allocation11_spill] sm:$0xff] %v22735_v23  ;;  %v22744_v58 = vld [vmem:[%s23290_s15 + $0x140] sm:$0xff]  ;;  %v15922_v15 = vld [vmem:[%s23290_s15 + $0x38] sm:$0xff]  ;;  %23564 = vst [vmem:[#allocation27_spill] sm:$0xff] %v22753_v43 }
 0xea1   :  { %23563 = vst [vmem:[#allocation14_spill] sm:$0xff] %v22744_v58  ;;  %v15936_v0 = vld [vmem:[%s23290_s15 + $0xa8] sm:$0xff] }
 0xea2   :  { %v15405_v51 = vadd.f32 %v17163_v50, %v15393_v33  ;;  %v22762_v33 = vld [vmem:[%s23290_s15 + $0x138] sm:$0xff] }
 0xea3   :  { %v18818_v2 = vpop.eup %18817  ;;  %23565 = vst [vmem:[#allocation17_spill] sm:$0xff] %v22762_v33 }
 0xea4   :  { %15562 = vmatmul.mubr.f32.vlgmr.msra.gmra.mxu1 %v15405_v51  ;;  %15663 = vmatmul.mubr.f32.vlgmr.msra.gmra.mxu0 %v15405_v51  ;;  %v15383_v63 = vmul.f32 %v18818_v2, %v22403_v35  ;;  %v22771_v51 = vld [vmem:[%s23290_s15 + $0x1b0] sm:$0xff] }
 0xea5   :  { %15567 = vmatprep.mubr.f32.mxu1 %v23435_v45  ;;  %15668 = vmatprep.mubr.f32.mxu0 %v23435_v45  ;;  %23566 = vst [vmem:[#allocation19_spill] sm:$0xff] %v22771_v51  ;;  %v22780_v2 = vld [vmem:[%s23290_s15 + $0x130] sm:$0xff] }
 0xea6   :  { %v15395_v22 = vmul.f32 %v17162_v40, %v15383_v63  ;;  %17586 = vmatpush3.msra.mxu0 %v22618_v25  ;;  %23567 = vst [vmem:[#allocation16_spill] sm:$0xff] %v22780_v2  ;;  %v15920_v63 = vld [vmem:[%s23290_s15 + $0x28] sm:$0xff] }
 0xea7   :  { %v18820_v18 = vpop.eup %18819  ;;  %17587 = vmatprep.subr.mxu0 %v22627_v11 }
 0xea8   :  { %15568 = vmatmul.mubr.f32.gmra.mxu1 %v15406_v41  ;;  %15669 = vmatmul.mubr.f32.gmra.mxu0 %v15406_v41  ;;  %v15407_v53 = vadd.f32 %v17163_v50, %v15395_v22  ;;  %v15384_v55 = vmul.f32 %v18820_v18, %v22408_v49  ;;  %v22789_v41 = vld [vmem:[%s23290_s15 + $0x1a8] sm:$0xff]  ;;  %v15935_v22 = vld [vmem:[%s23290_s15 + $0xa0] sm:$0xff] }
 0xea9   :  { %15573 = vmatprep.mubr.f32.mxu1 %v23435_v45  ;;  %15674 = vmatprep.mubr.f32.mxu0 %v23435_v45  ;;  %23568 = vst [vmem:[#allocation30_spill] sm:$0xff] %v22789_v41  ;;  %v22798_v18 = vld [vmem:[%s23290_s15 + $0x128] sm:$0xff] }
 0xeaa   :  { %v15396_v56 = vmul.f32 %v17162_v40, %v15384_v55  ;;  %17588 = vmatpush3.msra.mxu0 %v22636_v38  ;;  %23569 = vst [vmem:[#allocation28_spill] sm:$0xff] %v22798_v18  ;;  %v22807_v55 = vld [vmem:[%s23290_s15 + $0x1a0] sm:$0xff] }
 0xeab   :  { %v18822_v17 = vpop.eup %18821  ;;  %17589 = vmatprep.subr.mxu0 %v22645_v52  ;;  %23570 = vst [vmem:[#allocation29_spill] sm:$0xff] %v22807_v55 }
 0xeac   :  { %15574 = vmatmul.mubr.f32.gmra.mxu1 %v15407_v53  ;;  %15675 = vmatmul.mubr.f32.gmra.mxu0 %v15407_v53  ;;  %v15408_v35 = vadd.f32 %v17163_v50, %v15396_v56  ;;  %v15386_v60 = vmul.f32 %v18822_v17, %v22431_v7  ;;  %v15946_v7 = vld [vmem:[%s23290_s15 + $0xf8] sm:$0xff]  ;;  %v15919_v53 = vld [vmem:[%s23290_s15 + $0x20] sm:$0xff] }
 0xead   :  { %v18824_v13 = vpop.eup %18823  ;;  %15579 = vmatprep.mubr.f32.mxu1 %v23435_v45  ;;  %15680 = vmatprep.mubr.f32.mxu0 %v23435_v45  ;;  %v15934_v56 = vld [vmem:[%s23290_s15 + $0x98] sm:$0xff]  ;;  %v22816_v17 = vld [vmem:[%s23290_s15 + $0x120] sm:$0xff] }
 0xeae   :  { %v15385_v39 = vmul.f32 %v18824_v13, %v22446_v10  ;;  %v15398_v19 = vmul.f32 %v17162_v40, %v15386_v60  ;;  %17535 = vmatprep.subr.mxu1 %v15946_v7  ;;  %v15930_v10 = vld [vmem:[%s23290_s15 + $0x78] sm:$0xff]  ;;  %17590 = vmatpush3.msra.mxu0 %v22654_v37  ;;  %23571 = vst [vmem:[#allocation24_spill] sm:$0xff] %v22816_v17  ;;  %v15916_v7 = vld [vmem:[%s23290_s15 + $0x8] sm:$0xff] }
 0xeaf   :  { %17536 = vmatpush3.msra.mxu1 %v15930_v10  ;;  %17591 = vmatprep.subr.mxu0 %v22663_v62  ;;  %v22825_v13 = vld [vmem:[%s23290_s15 + $0x198] sm:$0xff]  ;;  %v22861_v10 = vld [vmem:[%s23290_s15 + $0x188] sm:$0xff] }
 0xeb0   :  { %15580 = vmatmul.mubr.f32.gmra.mxu1 %v15408_v35  ;;  %15681 = vmatmul.mubr.f32.gmra.mxu0 %v15408_v35  ;;  %v15397_v49 = vmul.f32 %v17162_v40, %v15385_v39  ;;  %v15410_v4 = vadd.f32 %v17163_v50, %v15398_v19  ;;  %v15937_v40 = vld [vmem:[%s23290_s15 + $0xb0] sm:$0xff]  ;;  %v15918_v35 = vld [vmem:[%s23290_s15 + $0x18] sm:$0xff]  ;;  %23572 = vst [vmem:[#allocation5_spill] sm:$0xff] %v22825_v13  ;;  %v15932_v19 = vld [vmem:[%s23290_s15 + $0x88] sm:$0xff] }
 0xeb1   :  { %15585 = vmatprep.mubr.f32.mxu1 %v23435_v45  ;;  %15686 = vmatprep.mubr.f32.mxu0 %v23435_v45  ;;  %v15933_v39 = vld [vmem:[%s23290_s15 + $0x90] sm:$0xff]  ;;  %v22834_v60 = vld [vmem:[%s23290_s15 + $0x118] sm:$0xff]  ;;  %23576 = vst [vmem:[#allocation7_spill] sm:$0xff] %v22861_v10 }
 0xeb2   :  { %v15409_v14 = vadd.f32 %v17163_v50, %v15397_v49  ;;  %17592 = vmatpush3.msra.mxu0 %v22672_v8  ;;  %v15921_v50 = vld [vmem:[%s23290_s15 + $0x30] sm:$0xff]  ;;  %23573 = vst [vmem:[#allocation4_spill] sm:$0xff] %v22834_v60 }
 0xeb3   :  { %17593 = vmatprep.subr.mxu0 %v22681_v46  ;;  %v15917_v49 = vld [vmem:[%s23290_s15 + $0x10] sm:$0xff] }
 0xeb4   :  { %15586 = vmatmul.mubr.f32.gmra.mxu1 %v15409_v14  ;;  %15687 = vmatmul.mubr.f32.gmra.mxu0 %v15409_v14  ;;  %v22843_v14 = vld [vmem:[%s23290_s15 + $0x190] sm:$0xff] }
 0xeb5   :  { %15591 = vmatprep.mubr.f32.mxu1 %v23435_v45  ;;  %15692 = vmatprep.mubr.f32.mxu0 %v23435_v45  ;;  %v15945_v45 = vld [vmem:[%s23290_s15 + $0xf0] sm:$0xff]  ;;  %23574 = vst [vmem:[#allocation8_spill] sm:$0xff] %v22843_v14 }
 0xeb6   :  { %17537 = vmatprep.subr.mxu1 %v15945_v45  ;;  %17594 = vmatpush3.msra.mxu0 %v22690_v27  ;;  %v15931_v45 = vld [vmem:[%s23290_s15 + $0x80] sm:$0xff] }
 0xeb7   :  { %17538 = vmatpush3.msra.mxu1 %v15929_v59  ;;  %17595 = vmatprep.subr.mxu0 %v22699_v24  ;;  %v22870_v59 = vld [vmem:[%s23290_s15 + $0x108] sm:$0xff] }
 0xeb8   :  { %15592 = vmatmul.mubr.f32.gmra.mxu1 %v15410_v4  ;;  %15693 = vmatmul.mubr.f32.gmra.mxu0 %v15410_v4  ;;  %v22852_v4 = vld [vmem:[%s23290_s15 + $0x110] sm:$0xff]  ;;  %23577 = vst [vmem:[#allocation43_spill] sm:$0xff] %v22870_v59 }
 0xeb9   :  { %17539 = vmatprep.subr.mxu1 %v15944_v26  ;;  %17596 = vmatpush3.msra.mxu0 %v22708_v28  ;;  %23575 = vst [vmem:[#allocation3_spill] sm:$0xff] %v22852_v4  ;;  %v15915_v26 = vld [vmem:[%s23290_s15] sm:$0xff] }
 0xeba   :  { %17540 = vmatpush3.msra.mxu1 %v15928_v61  ;;  %17597 = vmatprep.subr.mxu0 %v22717_v21  ;;  %v22879_v61 = vld [vmem:[%s23290_s15 + $0x180] sm:$0xff] }
 0xebb   :  { %17541 = vmatprep.subr.mxu1 %v15943_v9  ;;  %17598 = vmatpush3.msra.mxu0 %v22726_v42  ;;  %23578 = vst [vmem:[#allocation42_spill] sm:$0xff] %v22879_v61  ;;  %v22886_v9 = vld [vmem:[%s23290_s15 + $0x100] sm:$0xff] }
 0xebc   :  { %17542 = vmatpush3.msra.mxu1 %v15927_v48  ;;  %17599 = vmatprep.subr.mxu0 %v22735_v23  ;;  %23579 = vst [vmem:[#allocation6_spill] sm:$0xff] %v22886_v9  ;;  %v23580_v48 = vld [vmem:[#allocation2_spill] sm:$0xff] }
 0xebd   :  { %17543 = vmatprep.subr.mxu1 %v15942_v54  ;;  %17600 = vmatpush3.msra.mxu0 %v22744_v58  ;;  %v15479_v54 = vsub.s32 0, %v23580_v48 }
 0xebe   :  { %17544 = vmatpush3.msra.mxu1 %v15926_v30  ;;  %17601 = vmatprep.subr.mxu0 %v22753_v43  ;;  %v15475_v30 = vld [vmem:[%s23291_s14] sm:$0xf] }
 0xebf   :  { %17545 = vmatprep.subr.mxu1 %v15941_v6  ;;  %17602 = vmatpush3.msra.mxu0 %v22762_v33  ;;  %v15487_v6 = vsub.s32 2, %v23580_v48 }
 0xec0   :  { %17546 = vmatpush3.msra.mxu1 %v15925_v57  ;;  %17603 = vmatprep.subr.mxu0 %v22771_v51  ;;  %v22894_v57 = vrot.slane %v15475_v30, %v15479_v54 }
 0xec1   :  { %17547 = vmatprep.subr.mxu1 %v15940_v12  ;;  %17604 = vmatpush3.msra.mxu0 %v22780_v2  ;;  %v22896_v12 = vrot.slane %v15475_v30, %v15487_v6 }
 0xec2   :  { %17548 = vmatpush3.msra.mxu1 %v15924_v44  ;;  %17605 = vmatprep.subr.mxu0 %v22789_v41 }
 0xec3   :  { %17549 = vmatprep.subr.mxu1 %v15939_v29  ;;  %17606 = vmatpush3.msra.mxu0 %v22798_v18 }
 0xec4   :  { %17550 = vmatpush3.msra.mxu1 %v15923_v3  ;;  %17607 = vmatprep.subr.mxu0 %v22807_v55 }
 0xec5   :  { %17551 = vmatprep.subr.mxu1 %v15938_v34  ;;  %17608 = vmatpush3.msra.mxu0 %v22816_v17 }
 0xec6   :  { %17552 = vmatpush3.msra.mxu1 %v15922_v15  ;;  %17609 = vmatprep.subr.mxu0 %v22825_v13 }
 0xec7   :  { %17553 = vmatprep.subr.mxu1 %v15937_v40  ;;  %17610 = vmatpush3.msra.mxu0 %v22834_v60  ;;  %v15483_v40 = vsub.s32 1, %v23580_v48 }
 0xec8   :  { %17554 = vmatpush3.msra.mxu1 %v15921_v50  ;;  %17611 = vmatprep.subr.mxu0 %v22843_v14 }
 0xec9   :  { %17555 = vmatprep.subr.mxu1 %v15936_v0  ;;  %17612 = vmatpush3.msra.mxu0 %v22852_v4 }
 0xeca   :  { %17556 = vmatpush3.msra.mxu1 %v15920_v63  ;;  %17613 = vmatprep.subr.mxu0 %v22861_v10 }
 0xecb   :  { %17557 = vmatprep.subr.mxu1 %v15935_v22  ;;  %17614 = vmatpush3.msra.mxu0 %v22870_v59  ;;  %v15491_v22 = vsub.s32 3, %v23580_v48 }
 0xecc   :  { %17558 = vmatpush3.msra.mxu1 %v15919_v53  ;;  %17615 = vmatprep.subr.mxu0 %v22879_v61 }
 0xecd   :  { %17559 = vmatprep.subr.mxu1 %v15934_v56  ;;  %17616 = vmatpush3.msra.mxu0 %v22886_v9 }
 0xece   :  { %17560 = vmatpush3.msra.mxu1 %v15918_v35 }
 0xecf   :  { %17561 = vmatprep.subr.mxu1 %v15933_v39  ;;  %v22902_v39 = vrot.slane %v15475_v30, %v15483_v40 }
 0xed0   :  { %17562 = vmatpush3.msra.mxu1 %v15917_v49 }
 0xed1   :  { %17563 = vmatprep.subr.mxu1 %v15932_v19 }
 0xed2   :  { %17564 = vmatpush3.msra.mxu1 %v15916_v7 }
 0xed3   :  { %17565 = vmatprep.subr.mxu1 %v15931_v45  ;;  %v22904_v45 = vrot.slane %v15475_v30, %v15491_v22 }
 0xed4   :  { %17566 = vmatpush3.msra.mxu1 %v15915_v26 }
 0xed5   :  { %18448 = vmatprep.subr.mxu1 %v22609_v47 }
 0xf64   :  { %v15563_v47 = vpop.f32.mrf.mxu1  ;;  %v15664_v44 = vpop.f32.mrf.mxu0 }
 0xf65   :  { %v15564_v29 = vadd.f32 %v15563_v47, %v22894_v57  ;;  %v15665_v15 = vadd.f32 %v15664_v44, %v22896_v12 }
 0xf66   :  { %v15565_v3 = vpop.f32.mrf.mxu1  ;;  %v15666_v34 = vpop.f32.mrf.mxu0 }
 0xf67   :  { %v15723_v63 = vmul.f32 0.044715, %v15564_v29  ;;  %v15725_v35 = vmul.f32 0.044715, %v15665_v15  ;;  %v22913_v48 = vadd.f32 %v15565_v3, %v22902_v39  ;;  %v22927_v20 = vmul.f32 0.5, %v15564_v29 }
 0xf68   :  { %v15569_v50 = vpop.f32.mrf.mxu1  ;;  %v15670_v0 = vpop.f32.mrf.mxu0  ;;  %v22934_v36 = vmul.f32 0.5, %v15665_v15 }
 0xf69   :  { %v15747_v7 = vmul.f32 %v15723_v63, %v15564_v29  ;;  %v22907_v26 = vadd.f32 %v15569_v50, %v22894_v57  ;;  %v22910_v54 = vadd.f32 %v15670_v0, %v22896_v12  ;;  %v15749_v47 = vmul.f32 %v15725_v35, %v15665_v15 }
 0xf6a   :  { %v15571_v53 = vpop.f32.mrf.mxu1  ;;  %v15672_v56 = vpop.f32.mrf.mxu0  ;;  %v22922_v50 = vadd.f32 %v15666_v34, %v22904_v45  ;;  %v15724_v3 = vmul.f32 0.044715, %v22913_v48  ;;  %v22946_v59 = vmul.f32 0.5, %v22913_v48 }
 0xf6b   :  { %v15771_v63 = vmul.f32 %v15747_v7, %v15564_v29  ;;  %v15727_v0 = vmul.f32 0.044715, %v22907_v26  ;;  %v15729_v22 = vmul.f32 0.044715, %v22910_v54  ;;  %v15773_v5 = vmul.f32 %v15749_v47, %v15665_v15 }
 0xf6c   :  { %v15575_v49 = vpop.f32.mrf.mxu1  ;;  %v15676_v19 = vpop.f32.mrf.mxu0  ;;  %v22937_v1 = vadd.f32 %v15672_v56, %v22904_v45  ;;  %v15726_v9 = vmul.f32 0.044715, %v22922_v50  ;;  %v22953_v4 = vmul.f32 0.5, %v22922_v50 }
 0xf6d   :  { %v22916_v40 = vadd.f32 %v15575_v49, %v22894_v57  ;;  %v22919_v16 = vadd.f32 %v15676_v19, %v22896_v12  ;;  %v22930_v49 = vadd.f32 %v15571_v53, %v22902_v39  ;;  %v15795_v32 = vadd.f32 %v15771_v63, %v15564_v29 }
 0xf6e   :  { %v15577_v6 = vpop.f32.mrf.mxu1  ;;  %v15678_v44 = vpop.f32.mrf.mxu0  ;;  %v15751_v61 = vmul.f32 %v15727_v0, %v22907_v26  ;;  %v15753_v53 = vmul.f32 %v15729_v22, %v22910_v54  ;;  %v15797_v10 = vadd.f32 %v15773_v5, %v15665_v15  ;;  %v15748_v29 = vmul.f32 %v15724_v3, %v22913_v48 }
 0xf6f   :  { %v15731_v19 = vmul.f32 0.044715, %v22916_v40  ;;  %v15733_v7 = vmul.f32 0.044715, %v22919_v16  ;;  %v22950_v63 = vadd.f32 %v15577_v6, %v22902_v39  ;;  %v22959_v22 = vadd.f32 %v15678_v44, %v22904_v45 }
 0xf70   :  { %v15581_v30 = vpop.f32.mrf.mxu1  ;;  %v15682_v31 = vpop.f32.mrf.mxu0  ;;  %v15819_v5 = vmul.f32 0.7978846, %v15795_v32  ;;  %v15730_v15 = vmul.f32 0.044715, %v22937_v1  ;;  %v15750_v13 = vmul.f32 %v15726_v9, %v22922_v50  ;;  %v15775_v17 = vmul.f32 %v15751_v61, %v22907_v26 }
 0xf71   :  { %v22940_v47 = vadd.f32 %v15581_v30, %v22894_v57  ;;  %v15728_v30 = vmul.f32 0.044715, %v22930_v49  ;;  %v15755_v14 = vmul.f32 %v15731_v19, %v22916_v40  ;;  %v15757_v0 = vmul.f32 %v15733_v7, %v22919_v16 }
 0xf72   :  { %v15583_v35 = vpop.f32.mrf.mxu1  ;;  %v15684_v56 = vpop.f32.mrf.mxu0  ;;  %v22964_v3 = vadd.f32 %v15682_v31, %v22896_v12  ;;  %v15777_v19 = vmul.f32 %v15753_v53, %v22910_v54  ;;  %v15821_v44 = vmul.f32 0.7978846, %v15797_v10  ;;  %v15732_v55 = vmul.f32 0.044715, %v22950_v63 }
 0xf73   :  { %v15735_v6 = vmul.f32 0.044715, %v22940_v47  ;;  %v22970_v7 = vadd.f32 %v15583_v35, %v22902_v39  ;;  %v22974_v32 = vadd.f32 %v15684_v56, %v22904_v45  ;;  %v15752_v41 = vmul.f32 %v15728_v30, %v22930_v49 }
 0xf74   :  { %v15587_v34 = vpop.f32.mrf.mxu1  ;;  %v15688_v31 = vpop.f32.mrf.mxu0  ;;  %v15779_v9 = vmul.f32 %v15755_v14, %v22916_v40  ;;  %v15781_v61 = vmul.f32 %v15757_v0, %v22919_v16  ;;  %v15734_v53 = vmul.f32 0.044715, %v22959_v22  ;;  %18825 = vtanh.f32 %v15819_v5 }
 0xf75   :  { %v22977_v18 = vadd.f32 %v15587_v34, %v22894_v57  ;;  %v15754_v10 = vmul.f32 %v15730_v15, %v22937_v1  ;;  %v15759_v2 = vmul.f32 %v15735_v6, %v22940_v47  ;;  %v15737_v56 = vmul.f32 0.044715, %v22964_v3 }
 0xf76   :  { %v15589_v60 = vpop.f32.mrf.mxu1  ;;  %v15799_v34 = vadd.f32 %v15775_v17, %v22907_v26  ;;  %v15801_v51 = vadd.f32 %v15777_v19, %v22910_v54  ;;  %v15736_v30 = vmul.f32 0.044715, %v22970_v7  ;;  %v15772_v14 = vmul.f32 %v15748_v29, %v22913_v48  ;;  %v15690_v15 = vpop.f32.mrf.mxu0 }
 0xf77   :  { %18827 = vtanh.f32 %v15821_v44  ;;  %v15756_v0 = vmul.f32 %v15732_v55, %v22950_v63  ;;  %v15738_v33 = vmul.f32 0.044715, %v22974_v32  ;;  %v15739_v5 = vmul.f32 0.044715, %v22977_v18 }
 0xf78   :  { %v15593_v35 = vpop.f32.mrf.mxu1  ;;  %v15803_v6 = vadd.f32 %v15779_v9, %v22916_v40  ;;  %v15805_v43 = vadd.f32 %v15781_v61, %v22919_v16  ;;  %v15758_v17 = vmul.f32 %v15734_v53, %v22959_v22  ;;  %v22997_v19 = vadd.f32 %v15589_v60, %v22902_v39 }
 0xf79   :  { %v15783_v29 = vmul.f32 %v15759_v2, %v22940_v47  ;;  %v15761_v44 = vmul.f32 %v15737_v56, %v22964_v3  ;;  %v23002_v55 = vadd.f32 %v15593_v35, %v22894_v57  ;;  %v15796_v23 = vadd.f32 %v15772_v14, %v22913_v48 }
 0xf7a   :  { %v15595_v58 = vpop.f32.mrf.mxu1  ;;  %v15760_v42 = vmul.f32 %v15736_v30, %v22970_v7  ;;  %v23007_v9 = vadd.f32 %v15688_v31, %v22896_v12  ;;  %v23010_v61 = vadd.f32 %v15690_v15, %v22904_v45  ;;  %v15774_v60 = vmul.f32 %v15750_v13, %v22922_v50 }
 0xf7b   :  { %v23014_v53 = vmul.f32 %v15738_v33, %v22974_v32  ;;  %v15763_v2 = vmul.f32 %v15739_v5, %v22977_v18  ;;  %v23018_v57 = vadd.f32 %v15595_v58, %v22902_v39  ;;  %v15820_v35 = vmul.f32 0.7978846, %v15796_v23 }
 0xf7c   :  { %v15740_v48 = vmul.f32 0.044715, %v22997_v19  ;;  %v15798_v56 = vadd.f32 %v15774_v60, %v22922_v50  ;;  %v15776_v31 = vmul.f32 %v15752_v41, %v22930_v49  ;;  %v15778_v30 = vmul.f32 %v15754_v10, %v22937_v1  ;;  %v15694_v10 = vpop.f32.mrf.mxu0 }
 0xf7d   :  { %v15807_v14 = vadd.f32 %v15783_v29, %v22940_v47  ;;  %v15743_v13 = vmul.f32 0.044715, %v23002_v55  ;;  %18829 = vtanh.f32 %v15820_v35  ;;  %v15823_v33 = vmul.f32 0.7978846, %v15799_v34 }
 0xf7e   :  { %v15822_v15 = vmul.f32 0.7978846, %v15798_v56  ;;  %v15800_v5 = vadd.f32 %v15776_v31, %v22930_v49  ;;  %v15802_v58 = vadd.f32 %v15778_v30, %v22937_v1  ;;  %v15825_v23 = vmul.f32 0.7978846, %v15801_v51 }
 0xf7f   :  { %v15787_v39 = vmul.f32 %v15763_v2, %v22977_v18  ;;  %v15744_v50 = vmul.f32 0.044715, %v23018_v57  ;;  %18831 = vtanh.f32 %v15823_v33  ;;  %v15780_v41 = vmul.f32 %v15756_v0, %v22950_v63 }
 0xf80   :  { %18833 = vtanh.f32 %v15822_v15  ;;  %v15824_v29 = vmul.f32 0.7978846, %v15800_v5  ;;  %v15826_v60 = vmul.f32 0.7978846, %v15802_v58  ;;  %v15782_v35 = vmul.f32 %v15758_v17, %v22959_v22  ;;  %v15696_v58 = vpop.f32.mrf.mxu0 }
 0xf81   :  { %v15767_v34 = vmul.f32 %v15743_v13, %v23002_v55  ;;  %18835 = vtanh.f32 %v15825_v23  ;;  %v15804_v56 = vadd.f32 %v15780_v41, %v22950_v63  ;;  %v15827_v31 = vmul.f32 0.7978846, %v15803_v6  ;;  %v18826_v51 = vpop.eup %18825 }
 0xf82   :  { %v15741_v2 = vmul.f32 0.044715, %v23007_v9  ;;  %v15764_v30 = vmul.f32 %v15740_v48, %v22997_v19  ;;  %18837 = vtanh.f32 %v15824_v29  ;;  %v15806_v0 = vadd.f32 %v15782_v35, %v22959_v22 }
 0xf83   :  { %18839 = vtanh.f32 %v15826_v60  ;;  %v15828_v33 = vmul.f32 0.7978846, %v15804_v56  ;;  %v15829_v15 = vmul.f32 0.7978846, %v15805_v43  ;;  %v15784_v5 = vmul.f32 %v15760_v42, %v22970_v7 }
 0xf84   :  { %v18828_v17 = vpop.eup %18827  ;;  %v15768_v13 = vmul.f32 %v15744_v50, %v23018_v57  ;;  %v15830_v23 = vmul.f32 0.7978846, %v15806_v0  ;;  %18841 = vtanh.f32 %v15827_v31  ;;  %v15831_v6 = vmul.f32 0.7978846, %v15807_v14 }
 0xf85   :  { %v15811_v41 = vadd.f32 %v15787_v39, %v22977_v18  ;;  %v15791_v21 = vmul.f32 %v15767_v34, %v23002_v55  ;;  %18843 = vtanh.f32 %v15828_v33  ;;  %v15808_v48 = vadd.f32 %v15784_v5, %v22970_v7 }
 0xf86   :  { %v15785_v29 = vmul.f32 %v15761_v44, %v22964_v3  ;;  %v15742_v43 = vmul.f32 0.044715, %v23010_v61  ;;  %18845 = vtanh.f32 %v15830_v23  ;;  %v15788_v42 = vmul.f32 %v15764_v30, %v22997_v19 }
 0xf87   :  { %v23046_v50 = vadd.f32 %v15694_v10, %v22896_v12  ;;  %v23049_v60 = vadd.f32 %v15696_v58, %v22904_v45  ;;  %18847 = vtanh.f32 %v15829_v15  ;;  %v15832_v14 = vmul.f32 0.7978846, %v15808_v48 }
 0xf88   :  { %v15765_v39 = vmul.f32 %v15741_v2, %v23007_v9  ;;  %18849 = vtanh.f32 %v15831_v6  ;;  %v15812_v35 = vadd.f32 %v15788_v42, %v22997_v19  ;;  %v15792_v44 = vmul.f32 %v15768_v13, %v23018_v57 }
 0xf89   :  { %v15815_v34 = vadd.f32 %v15791_v21, %v23002_v55  ;;  %18851 = vtanh.f32 %v15832_v14  ;;  %v15835_v56 = vmul.f32 0.7978846, %v15811_v41  ;;  %v15786_v12 = vmul.f32 %v23014_v53, %v22974_v32 }
 0xf8a   :  { %v18830_v10 = vpop.eup %18829  ;;  %v15867_v31 = vadd.f32 1.0, %v18826_v51  ;;  %v23058_v45 = vadd.f32 %v15785_v29, %v22964_v3  ;;  %v15836_v30 = vmul.f32 0.7978846, %v15812_v35  ;;  %v15816_v2 = vadd.f32 %v15792_v44, %v23018_v57 }
 0xf8b   :  { %v15869_v0 = vadd.f32 1.0, %v18828_v17  ;;  %v15746_v33 = vmul.f32 0.044715, %v23049_v60  ;;  %v15868_v15 = vadd.f32 1.0, %v18830_v10  ;;  %v15810_v5 = vadd.f32 %v15786_v12, %v22974_v32 }
 0xf8c   :  { %v18832_v21 = vpop.eup %18831  ;;  %v15766_v13 = vmul.f32 %v15742_v43, %v23010_v61  ;;  %v15745_v58 = vmul.f32 0.044715, %v23046_v50  ;;  %18853 = vtanh.f32 %v15836_v30  ;;  %v15840_v53 = vmul.f32 0.7978846, %v15816_v2 }
 0xf8d   :  { %v18834_v51 = vpop.eup %18833  ;;  %v15789_v23 = vmul.f32 %v15765_v39, %v23007_v9  ;;  %v15892_v6 = vmul.f32 %v15868_v15, %v22946_v59  ;;  %18855 = vtanh.f32 %v15835_v56  ;;  %v15839_v41 = vmul.f32 0.7978846, %v15815_v34 }
 0xf8e   :  { %v18836_v17 = vpop.eup %18835  ;;  %v15891_v48 = vmul.f32 %v15867_v31, %v22927_v20  ;;  %v15870_v29 = vadd.f32 1.0, %v18834_v51  ;;  %18857 = vtanh.f32 %v15840_v53  ;;  %v15834_v42 = vmul.f32 0.7978846, %v15810_v5 }
 0xf8f   :  { %v18838_v14 = vpop.eup %18837  ;;  %v15893_v43 = vmul.f32 %v15869_v0, %v22934_v36  ;;  %v15770_v35 = vmul.f32 %v15746_v33, %v23049_v60  ;;  %16043 = vmatprep.mubr.f32.mxu1 %v15892_v6  ;;  %v15704_v44 = vmul.f32 0.5, %v22930_v49  ;;  %v15871_v12 = vadd.f32 1.0, %v18832_v21 }
 0xf90   :  { %v18840_v39 = vpop.eup %18839  ;;  %v15894_v59 = vmul.f32 %v15870_v29, %v22953_v4  ;;  %16044 = vmatmul.mubr.f32.vlgmr.msra.gmra.mxu1 %v15891_v48  ;;  %v15872_v34 = vadd.f32 1.0, %v18838_v14  ;;  %v15706_v56 = vmul.f32 0.5, %v22937_v1  ;;  %v15790_v20 = vmul.f32 %v15766_v13, %v23010_v61 }
 0xf91   :  { %v18842_v10 = vpop.eup %18841  ;;  %18464 = vmatpush3.msra.mxu1 %v22618_v25  ;;  %v15874_v31 = vadd.f32 1.0, %v18840_v39  ;;  %v15703_v36 = vmul.f32 0.5, %v22907_v26  ;;  %v15873_v30 = vadd.f32 1.0, %v18836_v17  ;;  %18859 = vtanh.f32 %v15839_v41 }
 0xf92   :  { %v18844_v2 = vpop.eup %18843  ;;  %v15769_v49 = vmul.f32 %v15745_v58, %v23046_v50  ;;  %16138 = vmatprep.mubr.f32.mxu0 %v15894_v59  ;;  %18449 = vmatprep.subr.mxu1 %v22627_v11  ;;  %v15896_v4 = vmul.f32 %v15872_v34, %v15704_v44  ;;  %v15705_v0 = vmul.f32 0.5, %v22910_v54  ;;  %18861 = vtanh.f32 %v15834_v42 }
 0xf93   :  { %v18846_v1 = vpop.eup %18845  ;;  %16139 = vmatmul.mubr.f32.vlgmr.msra.gmra.mxu0 %v15893_v43  ;;  %18465 = vmatpush3.msra.mxu1 %v22636_v38  ;;  %v15898_v25 = vmul.f32 %v15874_v31, %v15706_v56  ;;  %v15895_v33 = vmul.f32 %v15871_v12, %v15703_v36  ;;  %v15708_v26 = vmul.f32 0.5, %v22950_v63  ;;  %v15876_v15 = vadd.f32 1.0, %v18844_v2  ;;  %v23581_v56 = vld [vmem:[#allocation10_spill] sm:$0xff]  ;;  %v23582_v31 = vld [vmem:[#allocation12_spill] sm:$0xff] }
 0xf94   :  { %v18848_v5 = vpop.eup %18847  ;;  %16048 = vmatprep.mubr.f32.mxu1 %v15896_v4  ;;  %18450 = vmatprep.subr.mxu1 %v22645_v52  ;;  %v15710_v21 = vmul.f32 0.5, %v22959_v22  ;;  %v15878_v11 = vadd.f32 1.0, %v18846_v1  ;;  %v15814_v13 = vadd.f32 %v15790_v20, %v23010_v61  ;;  %v15794_v54 = vmul.f32 %v15770_v35, %v23049_v60  ;;  %v23584_v2 = vld [vmem:[#allocation14_spill] sm:$0xff]  ;;  %v23585_v4 = vld [vmem:[#allocation27_spill] sm:$0xff] }
 0xf95   :  { %v18850_v58 = vpop.eup %18849  ;;  %16143 = vmatprep.mubr.f32.mxu0 %v15898_v25  ;;  %16049 = vmatmul.mubr.f32.gmra.mxu1 %v15895_v33  ;;  %v15897_v38 = vmul.f32 %v15873_v30, %v15705_v0  ;;  %v15900_v53 = vmul.f32 %v15876_v15, %v15708_v26  ;;  %v15875_v51 = vadd.f32 1.0, %v18842_v10  ;;  %v15833_v63 = vmul.f32 0.7978846, %v23058_v45  ;;  %v23586_v25 = vld [vmem:[#allocation17_spill] sm:$0xff]  ;;  %v23587_v33 = vld [vmem:[#allocation19_spill] sm:$0xff] }
 0xf96   :  { %v18852_v6 = vpop.eup %18851  ;;  %v15813_v41 = vadd.f32 %v15789_v23, %v23007_v9  ;;  %18466 = vmatpush3.msra.mxu1 %v22654_v37  ;;  %v15902_v52 = vmul.f32 %v15878_v11, %v15710_v21  ;;  %v15877_v22 = vadd.f32 1.0, %v18848_v5  ;;  %v15793_v17 = vmul.f32 %v15769_v49, %v23046_v50  ;;  %v23589_v5 = vld [vmem:[#allocation30_spill] sm:$0xff]  ;;  %v23590_v11 = vld [vmem:[#allocation28_spill] sm:$0xff] }
 0xf97   :  { %16144 = vmatmul.mubr.f32.gmra.mxu0 %v15897_v38  ;;  %18451 = vmatprep.subr.mxu1 %v22663_v62  ;;  %v15707_v48 = vmul.f32 0.5, %v22916_v40  ;;  %v15712_v29 = vmul.f32 0.5, %v22970_v7  ;;  %v15880_v42 = vadd.f32 1.0, %v18852_v6  ;;  %v15709_v45 = vmul.f32 0.5, %v22919_v16  ;;  %v23592_v38 = vld [vmem:[#allocation24_spill] sm:$0xff] }
 0xf98   :  { %18467 = vmatpush3.msra.mxu1 %v22672_v8  ;;  %16053 = vmatprep.mubr.f32.mxu1 %v15900_v53  ;;  %v15838_v23 = vmul.f32 0.7978846, %v15814_v13  ;;  %v15818_v37 = vadd.f32 %v15794_v54, %v23049_v60  ;;  %v15879_v62 = vadd.f32 1.0, %v18850_v58  ;;  %v15716_v7 = vmul.f32 0.5, %v22997_v19  ;;  %v23591_v54 = vld [vmem:[#allocation29_spill] sm:$0xff] }
 0xf99   :  { %v18854_v14 = vpop.eup %18853  ;;  %18452 = vmatprep.subr.mxu1 %v22681_v46  ;;  %16148 = vmatprep.mubr.f32.mxu0 %v15902_v52  ;;  %v15899_v43 = vmul.f32 %v15875_v51, %v15707_v48  ;;  %v15904_v35 = vmul.f32 %v15880_v42, %v15712_v29  ;;  %v15901_v40 = vmul.f32 %v15877_v22, %v15709_v45  ;;  %18863 = vtanh.f32 %v15833_v63  ;;  %v23593_v53 = vld [vmem:[#allocation5_spill] sm:$0xff]  ;;  %v23594_v51 = vld [vmem:[#allocation4_spill] sm:$0xff]  ;;  %v23597_v48 = vld [vmem:[#allocation7_spill] sm:$0xff] }
 0xf9a   :  { %v18856_v44 = vpop.eup %18855  ;;  %18468 = vmatpush3.msra.mxu1 %v22690_v27  ;;  %v15884_v8 = vadd.f32 1.0, %v18854_v14  ;;  %v15817_v16 = vadd.f32 %v15793_v17, %v23046_v50  ;;  %v15711_v46 = vmul.f32 0.5, %v22940_v47  ;;  %v15837_v39 = vmul.f32 0.7978846, %v15813_v41  ;;  %v23583_v47 = vld [vmem:[#allocation11_spill] sm:$0xff] }
 0xf9b   :  { %v18858_v12 = vpop.eup %18857  ;;  %18453 = vmatprep.subr.mxu1 %v22699_v24  ;;  %16054 = vmatmul.mubr.f32.gmra.mxu1 %v15899_v43  ;;  %18865 = vtanh.f32 %v15838_v23  ;;  %v15842_v27 = vmul.f32 0.7978846, %v15818_v37  ;;  %v15883_v20 = vadd.f32 1.0, %v18856_v44  ;;  %v15720_v24 = vmul.f32 0.5, %v23018_v57  ;;  %v23596_v41 = vld [vmem:[#allocation3_spill] sm:$0xff]  ;;  %v23599_v23 = vld [vmem:[#allocation42_spill] sm:$0xff] }
 0xf9c   :  { %18469 = vmatpush3.msra.mxu1 %v22708_v28  ;;  %16149 = vmatmul.mubr.f32.gmra.mxu0 %v15901_v40  ;;  %v15908_v59 = vmul.f32 %v15884_v8, %v15716_v7  ;;  %v15888_v34 = vadd.f32 1.0, %v18858_v12  ;;  %v15903_v19 = vmul.f32 %v15879_v62, %v15711_v46  ;;  %v15715_v28 = vmul.f32 0.5, %v22977_v18  ;;  %v23588_v18 = vld [vmem:[#allocation16_spill] sm:$0xff]  ;;  %v23598_v29 = vld [vmem:[#allocation43_spill] sm:$0xff]  ;;  %v23600_v43 = vld [vmem:[#allocation6_spill] sm:$0xff] }
 0xf9d   :  { %18454 = vmatprep.subr.mxu1 %v23581_v56  ;;  %16058 = vmatprep.mubr.f32.mxu1 %v15904_v35  ;;  %18867 = vtanh.f32 %v15837_v39  ;;  %v15841_v30 = vmul.f32 0.7978846, %v15817_v16  ;;  %v15719_v26 = vmul.f32 0.5, %v23002_v55  ;;  %v15714_v15 = vmul.f32 0.5, %v22974_v32  ;;  %v23595_v32 = vld [vmem:[#allocation8_spill] sm:$0xff] }
 0xf9e   :  { %v18860_v10 = vpop.eup %18859  ;;  %18470 = vmatpush3.msra.mxu1 %v23582_v31  ;;  %v15912_v49 = vmul.f32 %v15888_v34, %v15720_v24  ;;  %18869 = vtanh.f32 %v15842_v27  ;;  %v15907_v0 = vmul.f32 %v15883_v20, %v15715_v28  ;;  %v15713_v17 = vmul.f32 0.5, %v22964_v3  ;;  %v23601_v31 = vld [vmem:[#allocation45_spill] sm:$0xff] }
 0xf9f   :  { %v18862_v36 = vpop.eup %18861  ;;  %18455 = vmatprep.subr.mxu1 %v23583_v47  ;;  %16059 = vmatmul.mubr.f32.gmra.mxu1 %v15903_v19  ;;  %v15887_v1 = vadd.f32 1.0, %v18860_v10  ;;  %18871 = vtanh.f32 %v15841_v30  ;;  %v15718_v42 = vmul.f32 0.5, %v23010_v61  ;;  %v15717_v44 = vmul.f32 0.5, %v23007_v9  ;;  %v23134_v10 = vld [vmem:[%s23292_s16] ss:$0 sm:$0xff] }
 0xfa0   :  { %18471 = vmatpush3.msra.mxu1 %v23584_v2  ;;  %16063 = vmatprep.mubr.f32.mxu1 %v15908_v59  ;;  %v15882_v57 = vadd.f32 1.0, %v18862_v36  ;;  %v15722_v3 = vmul.f32 0.5, %v23049_v60  ;;  %v15721_v61 = vmul.f32 0.5, %v23046_v50 }
 0xfa1   :  { %18456 = vmatprep.subr.mxu1 %v23585_v4  ;;  %v15911_v21 = vmul.f32 %v15887_v1, %v15719_v26 }
 0xfa2   :  { %18472 = vmatpush3.msra.mxu1 %v23586_v25  ;;  %v15906_v13 = vmul.f32 %v15882_v57, %v15714_v15  ;;  %v23603_v25 = vld [vmem:[#allocation44_spill] sm:$0xff] }
 0xfa3   :  { %18457 = vmatprep.subr.mxu1 %v23587_v33  ;;  %16064 = vmatmul.mubr.f32.gmra.mxu1 %v15907_v0  ;;  %v23602_v0 = vld [vmem:[#allocation35_spill] sm:$0xff] }
 0xfa4   :  { %18473 = vmatpush3.msra.mxu1 %v23588_v18  ;;  %16068 = vmatprep.mubr.f32.mxu1 %v15912_v49 }
 0xfa5   :  { %18458 = vmatprep.subr.mxu1 %v23589_v5 }
 0xfa6   :  { %18474 = vmatpush3.msra.mxu1 %v23590_v11  ;;  %v18864_v58 = vpop.eup %18863 }
 0xfa7   :  { %18459 = vmatprep.subr.mxu1 %v23591_v54  ;;  %16069 = vmatmul.mubr.f32.gmra.mxu1 %v15911_v21  ;;  %v15881_v6 = vadd.f32 1.0, %v18864_v58 }
 0xfa8   :  { %18475 = vmatpush3.msra.mxu1 %v23592_v38  ;;  %16153 = vmatprep.mubr.f32.mxu1 %v15906_v13  ;;  %v18866_v55 = vpop.eup %18865 }
 0xfa9   :  { %18460 = vmatprep.subr.mxu1 %v23593_v53  ;;  %v15886_v52 = vadd.f32 1.0, %v18866_v55  ;;  %v15905_v45 = vmul.f32 %v15881_v6, %v15713_v17 }
 0xfaa   :  { %18476 = vmatpush3.msra.mxu1 %v23594_v51  ;;  %v18868_v63 = vpop.eup %18867 }
 0xfab   :  { %18461 = vmatprep.subr.mxu1 %v23595_v32  ;;  %v18870_v22 = vpop.eup %18869  ;;  %v15885_v37 = vadd.f32 1.0, %v18868_v63  ;;  %v15910_v35 = vmul.f32 %v15886_v52, %v15718_v42  ;;  %v23604_v63 = vld [vmem:[#allocation47_spill] sm:$0xff] }
 0xfac   :  { %18477 = vmatpush3.msra.mxu1 %v23596_v41  ;;  %v18872_v14 = vpop.eup %18871  ;;  %v15890_v62 = vadd.f32 1.0, %v18870_v22 }
 0xfad   :  { %18462 = vmatprep.subr.mxu1 %v23597_v48  ;;  %v15909_v40 = vmul.f32 %v15885_v37, %v15717_v44  ;;  %v15889_v7 = vadd.f32 1.0, %v18872_v14 }
 0xfae   :  { %18478 = vmatpush3.msra.mxu1 %v23598_v29  ;;  %v15914_v8 = vmul.f32 %v15890_v62, %v15722_v3 }
 0xfaf   :  { %18463 = vmatprep.subr.mxu1 %v23599_v23  ;;  %v15913_v12 = vmul.f32 %v15889_v7, %v15721_v61 }
 0xfb0   :  { %18479 = vmatpush3.msra.mxu1 %v23600_v43 }
 0xfb1   :  { %16154 = vmatmul.mubr.f32.vlgmr.msra.gmra.mxu1 %v15905_v45 }
 0xfb2   :  { %16158 = vmatprep.mubr.f32.mxu1 %v15910_v35 }
 0xfb5   :  { %16159 = vmatmul.mubr.f32.gmra.mxu1 %v15909_v40 }
 0xfb6   :  { %16163 = vmatprep.mubr.f32.mxu1 %v15914_v8 }
 0xfb9   :  { %16164 = vmatmul.mubr.f32.gmra.mxu1 %v15913_v12 }
0x1050   :  { %v17567_v16 = vpop.f32.mrf.mxu1 }
0x1052   :  { %v17568_v46 = vpop.f32.mrf.mxu1 }
0x1053   :  { %v17617_v39 = vpop.f32.mrf.mxu0  ;;  %v17569_v59 = vadd.f32 %v17568_v46, %v17567_v16 }
0x1055   :  { %v17618_v34 = vpop.f32.mrf.mxu0  ;;  %v17570_v27 = vpop.f32.mrf.mxu1 }
0x1056   :  { %v17619_v56 = vadd.f32 %v17618_v34, %v17617_v39 }
0x1057   :  { %v17620_v9 = vpop.f32.mrf.mxu0  ;;  %v17571_v19 = vpop.f32.mrf.mxu1 }
0x1058   :  { %v16141_v20 = vadd.f32 %v17619_v56, %v17569_v59  ;;  %v17572_v60 = vadd.f32 %v17571_v19, %v17570_v27 }
0x1059   :  { %v17621_v50 = vpop.f32.mrf.mxu0 }
0x105a   :  { %v16169_v24 = vadd.f32 %v16141_v20, %v23601_v31  ;;  %v17622_v36 = vadd.f32 %v17621_v50, %v17620_v9 }
0x105b   :  { %v17573_v47 = vpop.f32.mrf.mxu1 }
0x105c   :  { %v16182_v28 = vadd.f32 %v23134_v10, %v16169_v24  ;;  %v16146_v30 = vadd.f32 %v17622_v36, %v17572_v60  ;;  %v17623_v2 = vpop.f32.mrf.mxu0 }
0x105d   :  { %v17574_v49 = vpop.f32.mrf.mxu1 }
0x105e   :  { %v16194_v4 = vcombine.high %v16182_v28, %v16182_v28  ;;  %v16201_v1 = vrot.slane %v16182_v28, %v23602_v0  ;;  %v16170_v57 = vadd.f32 %v16146_v30, %v23603_v25  ;;  %v17575_v33 = vadd.f32 %v17574_v49, %v17573_v47  ;;  %v17624_v26 = vpop.f32.mrf.mxu0 }
0x105f   :  { %v17625_v18 = vadd.f32 %v17624_v26, %v17623_v2  ;;  %v23140_v15 = vpop.f32.mrf.mxu1 }
0x1060   :  { %v16208_v5 = vrot.slane %v16194_v4, %v23602_v0  ;;  %v16209_v21 = vcombine.high %v16201_v1, %v16201_v1  ;;  %v16217_v11 = vrot.slane %v16201_v1, %v23602_v0  ;;  %v16183_v13 = vadd.f32 %v23134_v10, %v16170_v57 }
0x1061   :  { %v16151_v54 = vadd.f32 %v17625_v18, %v17575_v33  ;;  %v23145_v58 = vpop.f32.mrf.mxu1 }
0x1062   :  { %v16210_v38 = vcombine.high %v16208_v5, %v16208_v5  ;;  %v16231_v55 = vrot.slane %v16209_v21, %v23602_v0  ;;  %v16239_v53 = vcombine.high %v16217_v11, %v16217_v11  ;;  %v16224_v51 = vrot.slane %v16208_v5, %v23602_v0 }
0x1063   :  { %v16243_v6 = vcombine.high %v16183_v13, %v16183_v13  ;;  %v16250_v32 = vrot.slane %v16183_v13, %v23602_v0  ;;  %v16171_v41 = vadd.f32 %v16151_v54, %v23604_v63  ;;  %v23151_v52 = vpop.f32.mrf.mxu1 }
0x1064   :  { %v16238_v22 = vrot.slane %v16210_v38, %v23602_v0  ;;  %v16241_v17 = vcombine.high %v16231_v55, %v16231_v55  ;;  %v16488_v48 = vcombine.low %v16217_v11, %v16231_v55  ;;  %v16502_v29 = vrot.slane %v16239_v53, %v23602_v0 }
0x1065   :  { %v16257_v42 = vrot.slane %v16243_v6, %v23602_v0  ;;  %v16258_v45 = vcombine.high %v16250_v32, %v16250_v32  ;;  %v16266_v23 = vrot.slane %v16250_v32, %v23602_v0  ;;  %v16184_v37 = vadd.f32 %v23134_v10, %v16171_v41  ;;  %v23158_v14 = vpop.f32.mrf.mxu1 }
0x1066   :  { %v16495_v43 = vrot.slane %v16488_v48, %v23602_v0  ;;  %v16511_v35 = vcombine.low %v16241_v17, %v16224_v51  ;;  %v16525_v62 = vrot.slane %v16238_v22, %v23602_v0  ;;  %v17165_v44 = vcombine.high %v16224_v51, %v16238_v22 }
0x1067   :  { %v16259_v3 = vcombine.high %v16257_v42, %v16257_v42  ;;  %v16273_v40 = vrot.slane %v16257_v42, %v23602_v0  ;;  %v16280_v7 = vrot.slane %v16258_v45, %v23602_v0  ;;  %v16288_v8 = vcombine.high %v16266_v23, %v16266_v23  ;;  %v17582_v56 = vpop.f32.mrf.mxu1 }
0x1068   :  { %v16503_v61 = vcombine.low %v16495_v43, %v16502_v29  ;;  %v16518_v12 = vrot.slane %v16511_v35, %v23602_v0  ;;  %v16541_v16 = vrot.slane %v17165_v44, %v23602_v0  ;;  %v16548_v46 = vrot.slane %v16266_v23, %v23602_v0  ;;  %v23605_v35 = vld [vmem:[#allocation48_spill] sm:$0xff] }
0x1069   :  { %v16287_v39 = vrot.slane %v16259_v3, %v23602_v0  ;;  %v16289_v59 = vcombine.high %v16273_v40, %v16273_v40  ;;  %v16290_v34 = vcombine.high %v16280_v7, %v16280_v7  ;;  %v16557_v27 = vcombine.low %v16280_v7, %v16288_v8  ;;  %v17583_v1 = vpop.f32.mrf.mxu1 }
0x106a   :  { %v16526_v9 = vcombine.low %v16518_v12, %v16525_v62  ;;  %17169 = vst.sshfl [vmem:[%s23293_s17] sm:$0x15 pattern:$0x73625140] %v16503_v61  ;;  %v16549_v19 = vcombine.low %v16541_v16, %v16548_v46  ;;  %v16292_v20 = vcombine.high %v16184_v37, %v16184_v37  ;;  %v16299_v60 = vrot.slane %v16184_v37, %v23602_v0  ;;  %v23606_v61 = vld [vmem:[#allocation49_spill] sm:$0xff] }
0x106b   :  { %v16564_v50 = vrot.slane %v16557_v27, %v23602_v0  ;;  %v16571_v31 = vrot.slane %v16290_v34, %v23602_v0  ;;  %v16580_v24 = vcombine.low %v16273_v40, %v16287_v39  ;;  %v16291_v36 = vcombine.high %v16287_v39, %v16287_v39 }
0x106c   :  { %17170 = vst.sshfl [vmem:[%s23293_s17 + $0x4] sm:$0x15 pattern:$0x73625140] %v16526_v9  ;;  %v16306_v47 = vrot.slane %v16292_v20, %v23602_v0  ;;  %v16307_v28 = vcombine.high %v16299_v60, %v16299_v60  ;;  %v16315_v30 = vrot.slane %v16299_v60, %v23602_v0  ;;  %v16594_v4 = vrot.slane %v16289_v59, %v23602_v0 }
0x106d   :  { %17171 = vst.sshfl [vmem:[%s23293_s17 + $0x8] sm:$0x15 pattern:$0x73625140] %v16549_v19  ;;  %v16572_v2 = vcombine.low %v16564_v50, %v16571_v31  ;;  %v16587_v49 = vrot.slane %v16580_v24, %v23602_v0  ;;  %v17578_v17 = vadd.f32 %v23145_v58, %v23140_v15  ;;  %v17581_v43 = vadd.f32 %v23158_v14, %v23151_v52  ;;  %v23607_v31 = vld [vmem:[#allocation46_spill] sm:$0xff] }
0x106e   :  { %v16308_v25 = vcombine.high %v16306_v47, %v16306_v47  ;;  %v16322_v57 = vrot.slane %v16306_v47, %v23602_v0  ;;  %v16329_v33 = vrot.slane %v16307_v28, %v23602_v0  ;;  %v16603_v26 = vcombine.low %v16291_v36, %v16315_v30 }
0x106f   :  { %v16595_v18 = vcombine.low %v16587_v49, %v16594_v4  ;;  %17172 = vst.sshfl [vmem:[%s23293_s17 + $0xc] sm:$0x15 pattern:$0x73625140] %v16572_v2  ;;  %v17584_v46 = vadd.f32 %v17583_v1, %v17582_v56 }
0x1070   :  { %v16336_v5 = vrot.slane %v16308_v25, %v23602_v0  ;;  %v16338_v21 = vcombine.high %v16322_v57, %v16322_v57  ;;  %v16610_v11 = vrot.slane %v16603_v26, %v23602_v0  ;;  %v16617_v13 = vrot.slane %v16329_v33, %v23602_v0 }
0x1071   :  { %17173 = vst.sshfl [vmem:[%s23293_s17 + $0x10] sm:$0x15 pattern:$0x73625140] %v16595_v18  ;;  %v17166_v54 = vcombine.high %v16315_v30, %v16329_v33  ;;  %v17626_v38 = vpop.f32.mrf.mxu1  ;;  %v16640_v32 = vrot.slane %v16322_v57, %v23602_v0 }
0x1072   :  { %v16340_v55 = vcombine.high %v16336_v5, %v16336_v5  ;;  %v16618_v53 = vcombine.low %v16610_v11, %v16617_v13  ;;  %v16649_v51 = vcombine.low %v16336_v5, %v16338_v21 }
0x1073   :  { %v16633_v6 = vrot.slane %v17166_v54, %v23602_v0  ;;  %v17627_v63 = vpop.f32.mrf.mxu1 }
0x1074   :  { %v16656_v41 = vrot.slane %v16649_v51, %v23602_v0  ;;  %v16663_v22 = vrot.slane %v16340_v55, %v23602_v0  ;;  %17174 = vst.sshfl [vmem:[%s23293_s17 + $0x14] sm:$0x15 pattern:$0x73625140] %v16618_v53  ;;  %v17628_v48 = vadd.f32 %v17627_v63, %v17626_v38 }
0x1075   :  { %v16641_v29 = vcombine.low %v16633_v6, %v16640_v32  ;;  %v17629_v42 = vpop.f32.mrf.mxu1 }
0x1076   :  { %v16664_v45 = vcombine.low %v16656_v41, %v16663_v22  ;;  %v16156_v23 = vadd.f32 %v17628_v48, %v17578_v17 }
0x1077   :  { %17175 = vst.sshfl [vmem:[%s23293_s17 + $0x18] sm:$0x15 pattern:$0x73625140] %v16641_v29  ;;  %v17630_v37 = vpop.f32.mrf.mxu1 }
0x1078   :  { %17176 = vst.sshfl [vmem:[%s23293_s17 + $0x1c] sm:$0x15 pattern:$0x73625140] %v16664_v45  ;;  %v16172_v62 = vadd.f32 %v16156_v23, %v23605_v35  ;;  %v17631_v15 = vadd.f32 %v17630_v37, %v17629_v42 }
0x1079   :  { %v17632_v58 = vpop.f32.mrf.mxu1 }
0x107a   :  { %v16185_v44 = vadd.f32 %v23134_v10, %v16172_v62  ;;  %v16161_v3 = vadd.f32 %v17631_v15, %v17581_v43 }
0x107b   :  { %v17633_v40 = vpop.f32.mrf.mxu1 }
0x107c   :  { %v16341_v7 = vcombine.high %v16185_v44, %v16185_v44  ;;  %v16348_v8 = vrot.slane %v16185_v44, %v23602_v0  ;;  %v16173_v12 = vadd.f32 %v16161_v3, %v23606_v61  ;;  %v17634_v16 = vadd.f32 %v17633_v40, %v17632_v58 }
0x107e   :  { %v16355_v39 = vrot.slane %v16341_v7, %v23602_v0  ;;  %v16356_v59 = vcombine.high %v16348_v8, %v16348_v8  ;;  %v16364_v52 = vrot.slane %v16348_v8, %v23602_v0  ;;  %v16186_v14 = vadd.f32 %v23134_v10, %v16173_v12 }
0x107f   :  { %v16166_v34 = vadd.f32 %v17634_v16, %v17584_v46 }
0x1080   :  { %v16357_v27 = vcombine.high %v16355_v39, %v16355_v39  ;;  %v16378_v9 = vrot.slane %v16356_v59, %v23602_v0  ;;  %v16386_v19 = vcombine.high %v16364_v52, %v16364_v52  ;;  %v16371_v20 = vrot.slane %v16355_v39, %v23602_v0 }
0x1081   :  { %v16390_v60 = vcombine.high %v16186_v14, %v16186_v14  ;;  %v16397_v50 = vrot.slane %v16186_v14, %v23602_v0  ;;  %v16174_v24 = vadd.f32 %v16166_v34, %v23607_v31 }
0x1082   :  { %v16385_v56 = vrot.slane %v16357_v27, %v23602_v0  ;;  %v16388_v36 = vcombine.high %v16378_v9, %v16378_v9  ;;  %v16672_v47 = vcombine.low %v16364_v52, %v16378_v9  ;;  %v16686_v28 = vrot.slane %v16386_v19, %v23602_v0 }
0x1083   :  { %v16404_v30 = vrot.slane %v16390_v60, %v23602_v0  ;;  %v16405_v2 = vcombine.high %v16397_v50, %v16397_v50  ;;  %v16413_v49 = vrot.slane %v16397_v50, %v23602_v0  ;;  %v16187_v4 = vadd.f32 %v23134_v10, %v16174_v24 }
0x1084   :  { %v16679_v1 = vrot.slane %v16672_v47, %v23602_v0  ;;  %v16695_v25 = vcombine.low %v16388_v36, %v16371_v20  ;;  %v16709_v57 = vrot.slane %v16385_v56, %v23602_v0  ;;  %v17167_v33 = vcombine.high %v16371_v20, %v16385_v56 }
0x1085   :  { %v16406_v26 = vcombine.high %v16404_v30, %v16404_v30  ;;  %v16420_v18 = vrot.slane %v16404_v30, %v23602_v0  ;;  %v16427_v5 = vrot.slane %v16405_v2, %v23602_v0  ;;  %v16435_v21 = vcombine.high %v16413_v49, %v16413_v49 }
0x1086   :  { %v16687_v11 = vcombine.low %v16679_v1, %v16686_v28  ;;  %v16702_v13 = vrot.slane %v16695_v25, %v23602_v0  ;;  %v16725_v54 = vrot.slane %v17167_v33, %v23602_v0  ;;  %v16732_v38 = vrot.slane %v16413_v49, %v23602_v0 }
0x1087   :  { %v16434_v10 = vrot.slane %v16406_v26, %v23602_v0  ;;  %v16436_v55 = vcombine.high %v16420_v18, %v16420_v18  ;;  %v16437_v53 = vcombine.high %v16427_v5, %v16427_v5  ;;  %v16741_v51 = vcombine.low %v16427_v5, %v16435_v21 }
0x1088   :  { %v16710_v6 = vcombine.low %v16702_v13, %v16709_v57  ;;  %17177 = vst.sshfl [vmem:[%s23293_s17 + $0x20] sm:$0x15 pattern:$0x73625140] %v16687_v11  ;;  %v16733_v32 = vcombine.low %v16725_v54, %v16732_v38  ;;  %v16439_v63 = vcombine.high %v16187_v4, %v16187_v4  ;;  %v16446_v41 = vrot.slane %v16187_v4, %v23602_v0 }
0x1089   :  { %v16748_v22 = vrot.slane %v16741_v51, %v23602_v0  ;;  %v16755_v17 = vrot.slane %v16437_v53, %v23602_v0  ;;  %v16764_v48 = vcombine.low %v16420_v18, %v16434_v10  ;;  %v16438_v29 = vcombine.high %v16434_v10, %v16434_v10 }
0x108a   :  { %17178 = vst.sshfl [vmem:[%s23293_s17 + $0x24] sm:$0x15 pattern:$0x73625140] %v16710_v6  ;;  %v16453_v42 = vrot.slane %v16439_v63, %v23602_v0  ;;  %v16454_v45 = vcombine.high %v16446_v41, %v16446_v41  ;;  %v16462_v23 = vrot.slane %v16446_v41, %v23602_v0  ;;  %v16778_v35 = vrot.slane %v16436_v55, %v23602_v0 }
0x108b   :  { %17179 = vst.sshfl [vmem:[%s23293_s17 + $0x28] sm:$0x15 pattern:$0x73625140] %v16733_v32  ;;  %v16756_v37 = vcombine.low %v16748_v22, %v16755_v17  ;;  %v16771_v43 = vrot.slane %v16764_v48, %v23602_v0 }
0x108c   :  { %v16455_v62 = vcombine.high %v16453_v42, %v16453_v42  ;;  %v16469_v15 = vrot.slane %v16453_v42, %v23602_v0  ;;  %v16476_v58 = vrot.slane %v16454_v45, %v23602_v0  ;;  %v16787_v44 = vcombine.low %v16438_v29, %v16462_v23 }
0x108d   :  { %v16779_v3 = vcombine.low %v16771_v43, %v16778_v35  ;;  %17180 = vst.sshfl [vmem:[%s23293_s17 + $0x2c] sm:$0x15 pattern:$0x73625140] %v16756_v37 }
0x108e   :  { %v16483_v40 = vrot.slane %v16455_v62, %v23602_v0  ;;  %v16485_v7 = vcombine.high %v16469_v15, %v16469_v15  ;;  %v16794_v8 = vrot.slane %v16787_v44, %v23602_v0  ;;  %v16801_v61 = vrot.slane %v16476_v58, %v23602_v0 }
0x108f   :  { %17181 = vst.sshfl [vmem:[%s23293_s17 + $0x30] sm:$0x15 pattern:$0x73625140] %v16779_v3  ;;  %v17168_v12 = vcombine.high %v16462_v23, %v16476_v58  ;;  %v16824_v52 = vrot.slane %v16469_v15, %v23602_v0 }
0x1090   :  { %v16487_v16 = vcombine.high %v16483_v40, %v16483_v40  ;;  %v16802_v46 = vcombine.low %v16794_v8, %v16801_v61  ;;  %v16833_v39 = vcombine.low %v16483_v40, %v16485_v7 }
0x1091   :  { %v16817_v59 = vrot.slane %v17168_v12, %v23602_v0 }
0x1092   :  { %v16840_v14 = vrot.slane %v16833_v39, %v23602_v0  ;;  %v16847_v34 = vrot.slane %v16487_v16, %v23602_v0  ;;  %17182 = vst.sshfl [vmem:[%s23293_s17 + $0x34] sm:$0x15 pattern:$0x73625140] %v16802_v46 }
0x1093   :  { %v16825_v27 = vcombine.low %v16817_v59, %v16824_v52 }
0x1094   :  { %v16848_v9 = vcombine.low %v16840_v14, %v16847_v34 }
0x1095   :  { %17183 = vst.sshfl [vmem:[%s23293_s17 + $0x38] sm:$0x15 pattern:$0x73625140] %v16825_v27 }
0x1096   :  { %17184 = vst.sshfl [vmem:[%s23293_s17 + $0x3c] sm:$0x15 pattern:$0x73625140] %v16848_v9 }

</bundles_post_ra>
